<compile_context>
chip_gen: v6e
topology: v6e:2x2x1
jax: 0.10.0
libtpu: 0.0.40
codegen_flags: <defaults>
</compile_context>

<pallas_src>
import functools

import jax
import jax.numpy as jnp
from jax import lax
from jax.experimental import pallas as pl
from jax.experimental.pallas import tpu as pltpu

K = 3      # 3x3 conv, stride 1, padding 1
LPAD = 8   # left pad columns (multiple of 8 -> aligned interior offsets)
TPAD = 1   # top pad rows
BPAD = 2   # bottom pad rows (extra row lets every ky slab be one contiguous slice)


def _residual_block_kernel(mask_ref, xp_ref, w1_ref, b1_ref, w2_ref, b2_ref,
                           o_ref, lhs_ref, t_ref, y1_ref, *, wq):
    """relu(conv2(relu(conv1(x)+b1)) + b2 + x) for one image, fully in VMEM.

    Layout: NHWC with C (=128) on the lane axis; spatial dims flattened as
    row * wq + col (wq = padded width, multiple of 8).

    mask_ref: (hw, 1)   f32   1.0 on real columns (col < W), 0.0 on junk cols
    xp_ref  : (p*wq, C) f32   zero-padded input, rows flattened as ph*wq + pw
    w*_ref  : (3C, 3F)  bf16  [ky*C + c, kx*F + f]  (ky in K, kx packed in N)
    b*_ref  : (1, F)    f32
    o_ref   : (hw, F)   f32   rows flattened as oh*wq + ow (cols >= W are junk)
    lhs_ref : VMEM (m_rows, 3C) bf16   ky-concatenated matmul LHS (both convs)
    t_ref   : VMEM (m_rows, 3F) f32    matmul result (kx taps along N)
    y1_ref  : VMEM (p*wq, C)    f32    padded intermediate activation
    """
    hw = o_ref.shape[0]
    m_rows = lhs_ref.shape[0]
    c = xp_ref.shape[-1]
    f = b1_ref.shape[-1]
    base = LPAD - 1                 # output-row shift of the matmul result
    istart = TPAD * wq + LPAD       # flat offset of interior pixel (0, 0)

    # ------------- conv1: one (m_rows, 3C) @ (3C, 3F) bf16 MXU matmul --------
    for ky in range(K):             # aligned slab copies: ky*wq % 8 == 0
        lhs_ref[:, ky * c:(ky + 1) * c] = (
            xp_ref[ky * wq:ky * wq + m_rows, :].astype(jnp.bfloat16))
    t_ref[...] = jnp.dot(lhs_ref[...], w1_ref[...],
                         preferred_element_type=jnp.float32)
    # Fused kx taps: three shifted in-register slices, a single accumulate.
    s = (t_ref[base + 0:base + 0 + hw, 0 * f:1 * f]
         + t_ref[base + 1:base + 1 + hw, 1 * f:2 * f]
         + t_ref[base + 2:base + 2 + hw, 2 * f:3 * f])
    # Bias + ReLU + junk-column mask folded into the single interior store; the
    # mask keeps y1's padding ring exactly zero (= conv2's implicit padding=1).
    y1_ref[istart:istart + hw, :] = (
        jnp.maximum(s + b1_ref[...], 0.0) * mask_ref[...])
    # Zero only the small ring rows conv2 actually reads (no full-buffer init).
    y1_ref[0:istart, :] = jnp.zeros((istart, c), jnp.float32)
    tail = istart + hw
    y1_ref[tail:, :] = jnp.zeros((y1_ref.shape[0] - tail, c), jnp.float32)

    # ------------- conv2 + bias + residual + ReLU ----------------------------
    for ky in range(K):
        lhs_ref[:, ky * c:(ky + 1) * c] = (
            y1_ref[ky * wq:ky * wq + m_rows, :].astype(jnp.bfloat16))
    t_ref[...] = jnp.dot(lhs_ref[...], w2_ref[...],
                         preferred_element_type=jnp.float32)
    s2 = (t_ref[base + 0:base + 0 + hw, 0 * f:1 * f]
          + t_ref[base + 1:base + 1 + hw, 1 * f:2 * f]
          + t_ref[base + 2:base + 2 + hw, 2 * f:3 * f])
    residual = xp_ref[istart:istart + hw, :]          # f32 residual path
    o_ref[...] = jnp.maximum(s2 + b2_ref[...] + residual, 0.0).astype(o_ref.dtype)


@jax.jit
def residual_block(x, w1, b1, w2, b2):
    """x: (B, C, H, W) NCHW; w1/w2: PyTorch Conv2d weights (C, C, 3, 3); b: (C,)."""
    n, c, h, w = x.shape
    f = w1.shape[0]
    assert f == c, "ResidualBlock requires in_channels == out_channels"

    wq = ((w + LPAD + 7) // 8) * 8      # padded width: 8 left + data (+ right), %8==0
    p = h + TPAD + BPAD                 # padded rows: 1 top + 2 bottom
    hw = h * wq
    m_rows = hw + 2 * LPAD              # matmul M (covers base + kx + m), %8==0

    # NCHW -> NHWC, zero-pad, flatten (ph, pw) -> ph*wq + pw (channels on lanes).
    x_nhwc = jnp.transpose(x, (0, 2, 3, 1))
    xp = jnp.pad(x_nhwc, ((0, 0), (TPAD, BPAD), (LPAD, wq - LPAD - w), (0, 0)))
    xp_flat = xp.reshape(n, p * wq, c)                       # f32 (residual path)

    # Conv weights (F, C, 3, 3) -> (3C, 3F): ky packed into the contraction,
    # kx packed along N. bf16 operands, f32 accumulation on the MXU.
    def prep(wt):
        return jnp.transpose(wt, (2, 1, 3, 0)).reshape(K * c, K * f).astype(jnp.bfloat16)

    w1p, w2p = prep(w1), prep(w2)
    b1p = b1.reshape(1, f).astype(jnp.float32)
    b2p = b2.reshape(1, f).astype(jnp.float32)

    # 1.0 on real output columns, 0.0 on the junk (padded-width) columns.
    mask = (jnp.arange(hw) % wq < w).astype(jnp.float32).reshape(hw, 1)

    # Right-sized VMEM budget: double-buffered ins/outs + scratch, +50% headroom.
    vmem_bytes = (2 * (p * wq * c * 4) + 2 * (hw * 4) + 2 * (hw * f * 4)
                  + 2 * 2 * (K * c * K * f * 2) + 2 * 2 * (f * 4)
                  + m_rows * K * c * 2 + m_rows * K * f * 4 + p * wq * c * 4)
    vmem_limit = min(96 * 1024 * 1024, int(vmem_bytes * 1.5) + (2 << 20))

    out_flat = pl.pallas_call(
        functools.partial(_residual_block_kernel, wq=wq),
        out_shape=jax.ShapeDtypeStruct((n, hw, f), jnp.float32),
        grid_spec=pltpu.PrefetchScalarGridSpec(
            num_scalar_prefetch=0,
            grid=(n,),
            in_specs=[
                pl.BlockSpec((hw, 1), lambda i: (0, 0)),                # mask
                pl.BlockSpec((None, p * wq, c), lambda i: (i, 0, 0)),   # x (padded)
                pl.BlockSpec((K * c, K * f), lambda i: (0, 0)),         # w1 packed
                pl.BlockSpec((1, f), lambda i: (0, 0)),                 # b1
                pl.BlockSpec((K * c, K * f), lambda i: (0, 0)),         # w2 packed
                pl.BlockSpec((1, f), lambda i: (0, 0)),                 # b2
            ],
            out_specs=pl.BlockSpec((None, hw, f), lambda i: (i, 0, 0)),
            scratch_shapes=[
                pltpu.VMEM((m_rows, K * c), jnp.bfloat16),   # ky-concat LHS
                pltpu.VMEM((m_rows, K * f), jnp.float32),    # matmul result
                pltpu.VMEM((p * wq, c), jnp.float32),        # padded intermediate
            ],
        ),
        compiler_params=pltpu.CompilerParams(
            dimension_semantics=("parallel",),   # batch shards across TCs (v7x)
            vmem_limit_bytes=vmem_limit,
        ),
    )(mask, xp_flat, w1p, b1p, w2p, b2p)

    # (B, H*Wq, C) -> drop junk padded columns -> NCHW to match PyTorch.
    out = out_flat.reshape(n, h, wq, f)[:, :, :w, :]
    return jnp.transpose(out, (0, 3, 1, 2))


def _reference(x, w1, b1, w2, b2, *, emulate_bf16=False):
    """Pure-JAX reference matching the PyTorch ResidualBlock forward.

    With emulate_bf16=True it reproduces the kernel's bf16 operand quantization
    (f32 accumulation, f32 bias / residual) for a tight numerical check.
    """
    dn = ("NCHW", "OIHW", "NCHW")
    hp = lax.Precision.HIGHEST
    cast = ((lambda a: a.astype(jnp.bfloat16).astype(jnp.float32))
            if emulate_bf16 else (lambda a: a))
    y = lax.conv_general_dilated(cast(x), cast(w1), (1, 1), ((1, 1), (1, 1)),
                                 dimension_numbers=dn, precision=hp)
    y = jnp.maximum(y + b1.reshape(1, -1, 1, 1), 0.0)
    y = lax.conv_general_dilated(cast(y), cast(w2), (1, 1), ((1, 1), (1, 1)),
                                 dimension_numbers=dn, precision=hp)
    return jnp.maximum(y + b2.reshape(1, -1, 1, 1) + x, 0.0)


if __name__ == "__main__":
    key = jax.random.PRNGKey(0)
    k_x, k_w1, k_b1, k_w2, k_b2 = jax.random.split(key, 5)

    B, FILTERS, H, W = 2, 128, 16, 16   # filters=128 is the module default

    x = jax.random.normal(k_x, (B, FILTERS, H, W), dtype=jnp.float32)
    fan = FILTERS * K * K
    bound = 1.0 / (fan ** 0.5)
    w1 = jax.random.uniform(k_w1, (FILTERS, FILTERS, K, K),
                            minval=-bound, maxval=bound, dtype=jnp.float32)
    b1 = jax.random.uniform(k_b1, (FILTERS,), minval=-bound, maxval=bound,
                            dtype=jnp.float32)
    w2 = jax.random.uniform(k_w2, (FILTERS, FILTERS, K, K),
                            minval=-bound, maxval=bound, dtype=jnp.float32)
    b2 = jax.random.uniform(k_b2, (FILTERS,), minval=-bound, maxval=bound,
                            dtype=jnp.float32)

    out = jax.block_until_ready(residual_block(x, w1, b1, w2, b2))
    assert out.shape == (B, FILTERS, H, W), out.shape

    # Tight check vs a reference that emulates the kernel's bf16 operand cast.
    ref_q = _reference(x, w1, b1, w2, b2, emulate_bf16=True)
    err_q = float(jnp.max(jnp.abs(out - ref_q)))
    assert jnp.allclose(out, ref_q, atol=2e-3, rtol=2e-3), err_q

    # Loose sanity check vs the exact f32 reference (bf16 quantization noise).
    ref = _reference(x, w1, b1, w2, b2)
    err = float(jnp.max(jnp.abs(out - ref)))
    assert err < 1e-1, err

    print("KERNEL_OK")
</pallas_src>

<mosaic_0001>
module attributes {stable_mosaic.version = 11 : i64} {
  func.func @_residual_block_kernel(%arg0: i32, %arg1: memref<384x1xf32, #tpu.memory_space<vmem>>, %arg2: memref<1x456x128xf32, #tpu.memory_space<vmem>>, %arg3: memref<384x384xbf16, #tpu.memory_space<vmem>>, %arg4: memref<1x128xf32, #tpu.memory_space<vmem>>, %arg5: memref<384x384xbf16, #tpu.memory_space<vmem>>, %arg6: memref<1x128xf32, #tpu.memory_space<vmem>>, %arg7: memref<1x384x128xf32, #tpu.memory_space<vmem>>, %arg8: memref<400x384xbf16, #tpu.memory_space<vmem>>, %arg9: memref<400x384xf32, #tpu.memory_space<vmem>>, %arg10: memref<456x128xf32, #tpu.memory_space<vmem>>) attributes {dimension_semantics = [#tpu.dimension_semantics<parallel>], iteration_bounds = array<i64: 2>, scalar_prefetch = 0 : i64, scratch_operands = 3 : i64, tpu.core_type = #tpu.core_type<tc>, window_params = [{pipeline_mode = #tpu.pipeline_mode<synchronous>, transform_indices = @transform_0, window_bounds = array<i64: 384, 1>}, {transform_indices = @transform_1, window_bounds = array<i64: 1, 456, 128>}, {pipeline_mode = #tpu.pipeline_mode<synchronous>, transform_indices = @transform_2, window_bounds = array<i64: 384, 384>}, {pipeline_mode = #tpu.pipeline_mode<synchronous>, transform_indices = @transform_3, window_bounds = array<i64: 1, 128>}, {pipeline_mode = #tpu.pipeline_mode<synchronous>, transform_indices = @transform_4, window_bounds = array<i64: 384, 384>}, {pipeline_mode = #tpu.pipeline_mode<synchronous>, transform_indices = @transform_5, window_bounds = array<i64: 1, 128>}, {transform_indices = @transform_6, window_bounds = array<i64: 1, 384, 128>}]} {
    %c0 = arith.constant 0 : index
    %c0_0 = arith.constant 0 : index
    %c0_1 = arith.constant 0 : index
    %0 = vector.load %arg2[%c0, %c0_0, %c0_1] : memref<1x456x128xf32, #tpu.memory_space<vmem>>, vector<1x400x128xf32>
    %1 = vector.shape_cast %0 : vector<1x400x128xf32> to vector<400x128xf32>
    %2 = arith.truncf %1 : vector<400x128xf32> to vector<400x128xbf16>
    %c0_2 = arith.constant 0 : index
    %c0_3 = arith.constant 0 : index
    %3 = vector.load %arg8[%c0_2, %c0_3] : memref<400x384xbf16, #tpu.memory_space<vmem>>, vector<400x128xbf16>
    tpu.vector_store %arg8[%c0_2, %c0_3], %2 {strides = array<i32>} : memref<400x384xbf16, #tpu.memory_space<vmem>>, vector<400x128xbf16>,
    %c0_4 = arith.constant 0 : index
    %c24 = arith.constant 24 : index
    %c0_5 = arith.constant 0 : index
    %4 = vector.load %arg2[%c0_4, %c24, %c0_5] : memref<1x456x128xf32, #tpu.memory_space<vmem>>, vector<1x400x128xf32>
    %5 = vector.shape_cast %4 : vector<1x400x128xf32> to vector<400x128xf32>
    %6 = arith.truncf %5 : vector<400x128xf32> to vector<400x128xbf16>
    %c0_6 = arith.constant 0 : index
    %c128 = arith.constant 128 : index
    %7 = vector.load %arg8[%c0_6, %c128] : memref<400x384xbf16, #tpu.memory_space<vmem>>, vector<400x128xbf16>
    tpu.vector_store %arg8[%c0_6, %c128], %6 {strides = array<i32>} : memref<400x384xbf16, #tpu.memory_space<vmem>>, vector<400x128xbf16>,
    %c0_7 = arith.constant 0 : index
    %c48 = arith.constant 48 : index
    %c0_8 = arith.constant 0 : index
    %8 = vector.load %arg2[%c0_7, %c48, %c0_8] : memref<1x456x128xf32, #tpu.memory_space<vmem>>, vector<1x400x128xf32>
    %9 = vector.shape_cast %8 : vector<1x400x128xf32> to vector<400x128xf32>
    %10 = arith.truncf %9 : vector<400x128xf32> to vector<400x128xbf16>
    %c0_9 = arith.constant 0 : index
    %c256 = arith.constant 256 : index
    %11 = vector.load %arg8[%c0_9, %c256] : memref<400x384xbf16, #tpu.memory_space<vmem>>, vector<400x128xbf16>
    tpu.vector_store %arg8[%c0_9, %c256], %10 {strides = array<i32>} : memref<400x384xbf16, #tpu.memory_space<vmem>>, vector<400x128xbf16>,
    %c0_10 = arith.constant 0 : index
    %c0_11 = arith.constant 0 : index
    %12 = vector.load %arg8[%c0_10, %c0_11] : memref<400x384xbf16, #tpu.memory_space<vmem>>, vector<400x384xbf16>
    %c0_12 = arith.constant 0 : index
    %c0_13 = arith.constant 0 : index
    %13 = vector.load %arg3[%c0_12, %c0_13] : memref<384x384xbf16, #tpu.memory_space<vmem>>, vector<384x384xbf16>
    %cst = arith.constant dense<0.000000e+00> : vector<400x384xf32>
    %14 = tpu.matmul %12, %13, %cst {dimension_numbers = #tpu.dot_dimension_numbers<[1], [0], [0], [1], [0, 0, 1, 1], [], []>} : vector<400x384xbf16>, vector<384x384xbf16>, vector<400x384xf32> -> vector<400x384xf32>
    %c0_14 = arith.constant 0 : index
    %c0_15 = arith.constant 0 : index
    %15 = vector.load %arg9[%c0_14, %c0_15] : memref<400x384xf32, #tpu.memory_space<vmem>>, vector<400x384xf32>
    tpu.vector_store %arg9[%c0_14, %c0_15], %14 {strides = array<i32>} : memref<400x384xf32, #tpu.memory_space<vmem>>, vector<400x384xf32>,
    %c7 = arith.constant 7 : index
    %c0_16 = arith.constant 0 : index
    %16 = vector.load %arg9[%c7, %c0_16] : memref<400x384xf32, #tpu.memory_space<vmem>>, vector<384x128xf32>
    %c8 = arith.constant 8 : index
    %c128_17 = arith.constant 128 : index
    %17 = vector.load %arg9[%c8, %c128_17] : memref<400x384xf32, #tpu.memory_space<vmem>>, vector<384x128xf32>
    %18 = arith.addf %16, %17 : vector<384x128xf32>
    %c9 = arith.constant 9 : index
    %c256_18 = arith.constant 256 : index
    %19 = vector.load %arg9[%c9, %c256_18] : memref<400x384xf32, #tpu.memory_space<vmem>>, vector<384x128xf32>
    %20 = arith.addf %18, %19 : vector<384x128xf32>
    %c0_19 = arith.constant 0 : index
    %c0_20 = arith.constant 0 : index
    %21 = vector.load %arg4[%c0_19, %c0_20] : memref<1x128xf32, #tpu.memory_space<vmem>>, vector<1x128xf32>
    %22 = vector.broadcast %21 : vector<1x128xf32> to vector<384x128xf32>
    %23 = arith.addf %20, %22 : vector<384x128xf32>
    %cst_21 = arith.constant 0.000000e+00 : f32
    %24 = vector.broadcast %cst_21 : f32 to vector<384x128xf32>
    %25 = arith.maximumf %23, %24 : vector<384x128xf32>
    %c0_22 = arith.constant 0 : index
    %c0_23 = arith.constant 0 : index
    %26 = vector.load %arg1[%c0_22, %c0_23] : memref<384x1xf32, #tpu.memory_space<vmem>>, vector<384x1xf32>
    %27 = vector.broadcast %26 : vector<384x1xf32> to vector<384x128xf32>
    %28 = arith.mulf %25, %27 : vector<384x128xf32>
    %c32 = arith.constant 32 : index
    %c0_24 = arith.constant 0 : index
    %29 = vector.load %arg10[%c32, %c0_24] : memref<456x128xf32, #tpu.memory_space<vmem>>, vector<384x128xf32>
    tpu.vector_store %arg10[%c32, %c0_24], %28 {strides = array<i32>} : memref<456x128xf32, #tpu.memory_space<vmem>>, vector<384x128xf32>,
    %cst_25 = arith.constant 0.000000e+00 : f32
    %30 = vector.broadcast %cst_25 : f32 to vector<32x128xf32>
    %c0_26 = arith.constant 0 : index
    %c0_27 = arith.constant 0 : index
    %31 = vector.load %arg10[%c0_26, %c0_27] : memref<456x128xf32, #tpu.memory_space<vmem>>, vector<32x128xf32>
    tpu.vector_store %arg10[%c0_26, %c0_27], %30 {strides = array<i32>} : memref<456x128xf32, #tpu.memory_space<vmem>>, vector<32x128xf32>,
    %cst_28 = arith.constant 0.000000e+00 : f32
    %32 = vector.broadcast %cst_28 : f32 to vector<40x128xf32>
    %c416 = arith.constant 416 : index
    %c0_29 = arith.constant 0 : index
    %33 = vector.load %arg10[%c416, %c0_29] : memref<456x128xf32, #tpu.memory_space<vmem>>, vector<40x128xf32>
    tpu.vector_store %arg10[%c416, %c0_29], %32 {strides = array<i32>} : memref<456x128xf32, #tpu.memory_space<vmem>>, vector<40x128xf32>,
    %c0_30 = arith.constant 0 : index
    %c0_31 = arith.constant 0 : index
    %34 = vector.load %arg10[%c0_30, %c0_31] : memref<456x128xf32, #tpu.memory_space<vmem>>, vector<400x128xf32>
    %35 = arith.truncf %34 : vector<400x128xf32> to vector<400x128xbf16>
    %c0_32 = arith.constant 0 : index
    %c0_33 = arith.constant 0 : index
    %36 = vector.load %arg8[%c0_32, %c0_33] : memref<400x384xbf16, #tpu.memory_space<vmem>>, vector<400x128xbf16>
    tpu.vector_store %arg8[%c0_32, %c0_33], %35 {strides = array<i32>} : memref<400x384xbf16, #tpu.memory_space<vmem>>, vector<400x128xbf16>,
    %c24_34 = arith.constant 24 : index
    %c0_35 = arith.constant 0 : index
    %37 = vector.load %arg10[%c24_34, %c0_35] : memref<456x128xf32, #tpu.memory_space<vmem>>, vector<400x128xf32>
    %38 = arith.truncf %37 : vector<400x128xf32> to vector<400x128xbf16>
    %c0_36 = arith.constant 0 : index
    %c128_37 = arith.constant 128 : index
    %39 = vector.load %arg8[%c0_36, %c128_37] : memref<400x384xbf16, #tpu.memory_space<vmem>>, vector<400x128xbf16>
    tpu.vector_store %arg8[%c0_36, %c128_37], %38 {strides = array<i32>} : memref<400x384xbf16, #tpu.memory_space<vmem>>, vector<400x128xbf16>,
    %c48_38 = arith.constant 48 : index
    %c0_39 = arith.constant 0 : index
    %40 = vector.load %arg10[%c48_38, %c0_39] : memref<456x128xf32, #tpu.memory_space<vmem>>, vector<400x128xf32>
    %41 = arith.truncf %40 : vector<400x128xf32> to vector<400x128xbf16>
    %c0_40 = arith.constant 0 : index
    %c256_41 = arith.constant 256 : index
    %42 = vector.load %arg8[%c0_40, %c256_41] : memref<400x384xbf16, #tpu.memory_space<vmem>>, vector<400x128xbf16>
    tpu.vector_store %arg8[%c0_40, %c256_41], %41 {strides = array<i32>} : memref<400x384xbf16, #tpu.memory_space<vmem>>, vector<400x128xbf16>,
    %c0_42 = arith.constant 0 : index
    %c0_43 = arith.constant 0 : index
    %43 = vector.load %arg8[%c0_42, %c0_43] : memref<400x384xbf16, #tpu.memory_space<vmem>>, vector<400x384xbf16>
    %c0_44 = arith.constant 0 : index
    %c0_45 = arith.constant 0 : index
    %44 = vector.load %arg5[%c0_44, %c0_45] : memref<384x384xbf16, #tpu.memory_space<vmem>>, vector<384x384xbf16>
    %cst_46 = arith.constant dense<0.000000e+00> : vector<400x384xf32>
    %45 = tpu.matmul %43, %44, %cst_46 {dimension_numbers = #tpu.dot_dimension_numbers<[1], [0], [0], [1], [0, 0, 1, 1], [], []>} : vector<400x384xbf16>, vector<384x384xbf16>, vector<400x384xf32> -> vector<400x384xf32>
    %c0_47 = arith.constant 0 : index
    %c0_48 = arith.constant 0 : index
    %46 = vector.load %arg9[%c0_47, %c0_48] : memref<400x384xf32, #tpu.memory_space<vmem>>, vector<400x384xf32>
    tpu.vector_store %arg9[%c0_47, %c0_48], %45 {strides = array<i32>} : memref<400x384xf32, #tpu.memory_space<vmem>>, vector<400x384xf32>,
    %c7_49 = arith.constant 7 : index
    %c0_50 = arith.constant 0 : index
    %47 = vector.load %arg9[%c7_49, %c0_50] : memref<400x384xf32, #tpu.memory_space<vmem>>, vector<384x128xf32>
    %c8_51 = arith.constant 8 : index
    %c128_52 = arith.constant 128 : index
    %48 = vector.load %arg9[%c8_51, %c128_52] : memref<400x384xf32, #tpu.memory_space<vmem>>, vector<384x128xf32>
    %49 = arith.addf %47, %48 : vector<384x128xf32>
    %c9_53 = arith.constant 9 : index
    %c256_54 = arith.constant 256 : index
    %50 = vector.load %arg9[%c9_53, %c256_54] : memref<400x384xf32, #tpu.memory_space<vmem>>, vector<384x128xf32>
    %51 = arith.addf %49, %50 : vector<384x128xf32>
    %c0_55 = arith.constant 0 : index
    %c32_56 = arith.constant 32 : index
    %c0_57 = arith.constant 0 : index
    %52 = vector.load %arg2[%c0_55, %c32_56, %c0_57] : memref<1x456x128xf32, #tpu.memory_space<vmem>>, vector<1x384x128xf32>
    %53 = vector.shape_cast %52 : vector<1x384x128xf32> to vector<384x128xf32>
    %c0_58 = arith.constant 0 : index
    %c0_59 = arith.constant 0 : index
    %54 = vector.load %arg6[%c0_58, %c0_59] : memref<1x128xf32, #tpu.memory_space<vmem>>, vector<1x128xf32>
    %55 = vector.broadcast %54 : vector<1x128xf32> to vector<384x128xf32>
    %56 = arith.addf %51, %55 : vector<384x128xf32>
    %57 = arith.addf %56, %53 : vector<384x128xf32>
    %cst_60 = arith.constant 0.000000e+00 : f32
    %58 = vector.broadcast %cst_60 : f32 to vector<384x128xf32>
    %59 = arith.maximumf %57, %58 : vector<384x128xf32>
    %c0_61 = arith.constant 0 : index
    %c0_62 = arith.constant 0 : index
    %c0_63 = arith.constant 0 : index
    %60 = vector.load %arg7[%c0_61, %c0_62, %c0_63] : memref<1x384x128xf32, #tpu.memory_space<vmem>>, vector<1x384x128xf32>
    %61 = vector.shape_cast %60 : vector<1x384x128xf32> to vector<384x128xf32>
    %62 = vector.shape_cast %59 : vector<384x128xf32> to vector<1x384x128xf32>
    tpu.vector_store %arg7[%c0_61, %c0_62, %c0_63], %62 {strides = array<i32>} : memref<1x384x128xf32, #tpu.memory_space<vmem>>, vector<1x384x128xf32>,
    return
  }
  func.func @transform_0(%arg0: i32) -> (i32, i32) {
    %c0_i32 = arith.constant 0 : i32
    %c0_i32_0 = arith.constant 0 : i32
    %c0_i32_1 = arith.constant 0 : i32
    return %c0_i32, %c0_i32_0 : i32, i32
  }
  func.func @transform_1(%arg0: i32) -> (i32, i32, i32) {
    %c0_i32 = arith.constant 0 : i32
    %c0_i32_0 = arith.constant 0 : i32
    %c0_i32_1 = arith.constant 0 : i32
    return %arg0, %c0_i32, %c0_i32_0 : i32, i32, i32
  }
  func.func @transform_2(%arg0: i32) -> (i32, i32) {
    %c0_i32 = arith.constant 0 : i32
    %c0_i32_0 = arith.constant 0 : i32
    %c0_i32_1 = arith.constant 0 : i32
    return %c0_i32, %c0_i32_0 : i32, i32
  }
  func.func @transform_3(%arg0: i32) -> (i32, i32) {
    %c0_i32 = arith.constant 0 : i32
    %c0_i32_0 = arith.constant 0 : i32
    %c0_i32_1 = arith.constant 0 : i32
    return %c0_i32, %c0_i32_0 : i32, i32
  }
  func.func @transform_4(%arg0: i32) -> (i32, i32) {
    %c0_i32 = arith.constant 0 : i32
    %c0_i32_0 = arith.constant 0 : i32
    %c0_i32_1 = arith.constant 0 : i32
    return %c0_i32, %c0_i32_0 : i32, i32
  }
  func.func @transform_5(%arg0: i32) -> (i32, i32) {
    %c0_i32 = arith.constant 0 : i32
    %c0_i32_0 = arith.constant 0 : i32
    %c0_i32_1 = arith.constant 0 : i32
    return %c0_i32, %c0_i32_0 : i32, i32
  }
  func.func @transform_6(%arg0: i32) -> (i32, i32, i32) {
    %c0_i32 = arith.constant 0 : i32
    %c0_i32_0 = arith.constant 0 : i32
    %c0_i32_1 = arith.constant 0 : i32
    return %arg0, %c0_i32, %c0_i32_0 : i32, i32, i32
  }
}

</mosaic_0001>

<bundles_post_ra>
// kernel: residual_block.1
= control target key start
LH: loop header
LB: loop body
LE: loop exit
PB: predicated region body
PF: predicated region fallthrough
CT: control target
= control target key end

     0   :  { %s10551_s21 = smov 0   ;;  %s13020_s0 = inlined_call_operand.vmem [shape: f32[384,1], index: 0, kind: input, shape index: {}]   ;;  %s13021_s1 = inlined_call_operand.vmem [shape: f32[2,456,128], index: 1, kind: input, shape index: {}]   ;;  %s13022_s2 = inlined_call_operand.vmem [shape: bf16[384,384], index: 2, kind: input, shape index: {}]   ;;  %s13023_s3 = inlined_call_operand.vmem [shape: f32[1,128], index: 3, kind: input, shape index: {}]   ;;  %s13024_s4 = inlined_call_operand.vmem [shape: bf16[384,384], index: 4, kind: input, shape index: {}]   ;;  %s13025_s5 = inlined_call_operand.vmem [shape: f32[1,128], index: 5, kind: input, shape index: {}]   ;;  %s13026_s6 = inlined_call_operand.vmem [shape: f32[2,384,128], index: 6, kind: output, shape index: {}]  }
   0x1 LB: > { %s8735_s22 = sadd.s32 4294967295, %s10510_s21   ;;  %p8739_p0 = scmp.ge.s32.totalorder %s10510_s21, 1  ;;  %s10510_s21 = sphi %s10551_s21, %s16_s21  }
   0x2   : > { %p212_p1 = scmp.lt.s32.totalorder %s10510_s21, 3 }
   0x4   : > { %p213_p2 = pnand %p8739_p0, %p212_p1 }
   0x6   : > { %216 = sbr.rel (%p213_p2) target bundleno = 1141 (0x475), region = 44 }
   0xb   : > { %v9969_v0 = vld [vmem:[%s13022_s2 + $0xac] ss:$12 sps:$4 sm:$0xff]   ;;  %v9971_v1 = vld [vmem:[%s13022_s2 + $0xa8] ss:$12 sps:$4 sm:$0xff]   ;;  %v13028_v2 = vmov 0   ;;  %v10513_v4 = vmov 0.0  }
   0xc   : > { %2448 = vmatprep.mubr.bf16.mxu1 %v13028_v2  ;;  %9968 = vset.pattern.permute.xlu1 %v13028_v2  ;;  %v9972_v3 = vld [vmem:[%s13022_s2 + $0x94] ss:$12 sps:$4 sm:$0xff]   ;;  %4535 = vst [vmem:[#allocation4] sm:$0xff] %v10513_v4  ;;  %v9974_v5 = vld [vmem:[%s13022_s2 + $0x90] ss:$12 sps:$4 sm:$0xff]   ;;  %p242_p3 = scmp.lt.s32.totalorder %s8735_s22, 1 }
   0xd   : > { %2133 = vmatprep.subr.bf16.mxu0 %v9969_v0  ;;  %9967 = vset.pattern.permute.xlu0 %v13028_v2  ;;  %v9975_v6 = vld [vmem:[%s13022_s2 + $0x7c] ss:$12 sps:$4 sm:$0xff]   ;;  %v9977_v7 = vld [vmem:[%s13022_s2 + $0x78] ss:$12 sps:$4 sm:$0xff]   ;;  %v9980_v10 = vld [vmem:[%s13022_s2 + $0x60] ss:$12 sps:$4 sm:$0xff]  }
   0xe   : > { %2134 = vmatpush1.bf16.msra.mxu0 %v9971_v1  ;;  %v9978_v8 = vld [vmem:[%s13022_s2 + $0x64] ss:$12 sps:$4 sm:$0xff]   ;;  %v9990_v9 = vld [vmem:[%s13022_s2 + $0x22c] ss:$12 sps:$4 sm:$0xff]   ;;  %v9994_v12 = vld [vmem:[%s13022_s2 + $0x228] ss:$12 sps:$4 sm:$0xff]  }
   0xf   : > { %2135 = vmatprep.subr.bf16.mxu0 %v9972_v3  ;;  %v9981_v11 = vld [vmem:[%s13022_s2 + $0x4c] ss:$12 sps:$4 sm:$0xff]   ;;  %2416 = vmatprep.subr.bf16.mxu1 %v9990_v9  ;;  %v9996_v13 = vld [vmem:[%s13022_s2 + $0x214] ss:$12 sps:$4 sm:$0xff]   ;;  %v10000_v15 = vld [vmem:[%s13022_s2 + $0x210] ss:$12 sps:$4 sm:$0xff]  }
  0x10   : > { %2417 = vmatpush1.bf16.msra.mxu1 %v9994_v12  ;;  %v9983_v14 = vld [vmem:[%s13022_s2 + $0x48] ss:$12 sps:$4 sm:$0xff]   ;;  %v10006_v18 = vld [vmem:[%s13022_s2 + $0x1f8] ss:$12 sps:$4 sm:$0xff]   ;;  %v9986_v20 = vld [vmem:[%s13022_s2 + $0x30] ss:$12 sps:$4 sm:$0xff]  }
  0x11   : > { %2418 = vmatprep.subr.bf16.mxu1 %v9996_v13  ;;  %v10002_v16 = vld [vmem:[%s13022_s2 + $0x1fc] ss:$12 sps:$4 sm:$0xff]   ;;  %v9984_v17 = vld [vmem:[%s13022_s2 + $0x34] ss:$12 sps:$4 sm:$0xff]   ;;  %v10008_v19 = vld [vmem:[%s13022_s2 + $0x1e4] ss:$12 sps:$4 sm:$0xff]  }
  0x12   : > { %2136 = vmatpush1.bf16.msra.mxu0 %v9974_v5  ;;  %s13099_s22 = smov (!%p242_p3, %s8735_s22), 1  ;;  %v9987_v21 = vld [vmem:[%s13022_s2 + $0x1c] ss:$12 sps:$4 sm:$0xff]   ;;  %v10012_v22 = vld [vmem:[%s13022_s2 + $0x1e0] ss:$12 sps:$4 sm:$0xff]   ;;  %vm10515_vm0 = vmmov 0  }
  0x13   : > { %2137 = vmatprep.subr.bf16.mxu0 %v9975_v6  ;;  %v10014_v23 = vld [vmem:[%s13022_s2 + $0x1cc] ss:$12 sps:$4 sm:$0xff]   ;;  %s9954_s25 = smul.u32 456, %s13099_s22  ;;  %v9992_v25 = vld [vmem:[%s13022_s2 + $0x4] ss:$12 sps:$4 sm:$0xff]   ;;  %vm3460_vm1 = vcmask 1046528  }
  0x14   : > { %2419 = vmatpush1.bf16.msra.mxu1 %v10000_v15  ;;  %v9989_v24 = vld [vmem:[%s13022_s2 + $0x18] ss:$12 sps:$4 sm:$0xff]   ;;  %v10018_v26 = vld [vmem:[%s13022_s2 + $0x1c8] ss:$12 sps:$4 sm:$0xff]   ;;  %v9995_v28 = vld [vmem:[%s13022_s2] ss:$12 sps:$4 sm:$0xff]  }
  0x15   : > { %2420 = vmatprep.subr.bf16.mxu1 %v10002_v16  ;;  %v10020_v27 = vld [vmem:[%s13022_s2 + $0x1b4] ss:$12 sps:$4 sm:$0xff]   ;;  %s10654_s12 = scalar_lea.vmem %s13021_s1, %s9954_s25  ;;  %v9998_v29 = vld [vmem:[%s13022_s2 + $0x16c] ss:$12 sps:$4 sm:$0xff]   ;;  %v10024_v30 = vld [vmem:[%s13022_s2 + $0x1b0] ss:$12 sps:$4 sm:$0xff]  }
  0x16   : > { %2138 = vmatpush1.bf16.msra.mxu0 %v9977_v7  ;;  %v10001_v31 = vld [vmem:[%s13022_s2 + $0x168] ss:$12 sps:$4 sm:$0xff]   ;;  %v854_v34 = vld [vmem:[%s10654_s12 + $0x38] sm:$0xff]  ;;  %v253_v39 = vld [vmem:[%s10654_s12] sm:$0xff]  ;;  %vm3752_vm2 = vcmask 1045504   ;;  %s9955_s9 = smul.u32 384, %s13099_s22 }
  0x17   : > { %2139 = vmatprep.subr.bf16.mxu0 %v9978_v8  ;;  %v10026_v32 = vld [vmem:[%s13022_s2 + $0x19c] ss:$12 sps:$4 sm:$0xff]   ;;  %v853_v33 = vld [vmem:[%s10654_s12 + $0x30] sm:$0xff]  ;;  %v10030_v37 = vld [vmem:[%s13022_s2 + $0x198] ss:$12 sps:$4 sm:$0xff]   ;;  %v9441_v38 = vpack.c.bf16 %v854_v34, %v854_v34  ;;  %v9340_v42 = vpack.c.bf16 %v253_v39, %v253_v39 }
  0x18   : > { %2421 = vmatpush1.bf16.msra.mxu1 %v10006_v18  ;;  %v9440_v35 = vpack.c.bf16 %v853_v33, %v853_v33  ;;  %v10004_v36 = vld [vmem:[%s13022_s2 + $0x154] ss:$12 sps:$4 sm:$0xff]   ;;  %v10007_v40 = vld [vmem:[%s13022_s2 + $0x150] ss:$12 sps:$4 sm:$0xff]   ;;  %v254_v41 = vld [vmem:[%s10654_s12 + $0x8] sm:$0xff]  ;;  %s12623_s11 = scalar_lea.vmem %s13026_s6, %s9955_s9 }
  0x19   : > { %2422 = vmatprep.subr.bf16.mxu1 %v10008_v19  ;;  %v553_v43 = vld [vmem:[%s10654_s12 + $0x18] sm:$0xff]  ;;  %v554_v44 = vld [vmem:[%s10654_s12 + $0x20] sm:$0xff]  ;;  %1104 = vst [vmem:[#allocation2 + $0x14] sm:$0xf] %v9441_v38  ;;  %v9341_v47 = vpack.c.bf16 %v254_v41, %v254_v41  ;;  %807 = vst [vmem:[#allocation2 + $0x34] sm:$0xf] %v9441_v38 }
  0x1a   : > { %2140 = vmatpush1.bf16.msra.mxu0 %v9980_v10  ;;  %1103 = vst [vmem:[#allocation2 + $0x8] sm:$0xf] %v9440_v35  ;;  %806 = vst [vmem:[#allocation2 + $0x28] sm:$0xf] %v9440_v35  ;;  %v10010_v45 = vld [vmem:[%s13022_s2 + $0x13c] ss:$12 sps:$4 sm:$0xff]   ;;  %v9390_v48 = vpack.c.bf16 %v553_v43, %v553_v43  ;;  %v9391_v49 = vpack.c.bf16 %v554_v44, %v554_v44 }
  0x1b   : > { %2141 = vmatprep.subr.bf16.mxu0 %v9981_v11  ;;  %509 = vst [vmem:[#allocation2 + $0x48] sm:$0xf] %v9440_v35  ;;  %v10032_v46 = vld [vmem:[%s13022_s2 + $0x184] ss:$12 sps:$4 sm:$0xff]   ;;  %510 = vst [vmem:[#allocation2 + $0x54] sm:$0xf] %v9441_v38 }
  0x1c   : > { %2423 = vmatpush1.bf16.msra.mxu1 %v10012_v22  ;;  %v10036_v50 = vld [vmem:[%s13022_s2 + $0x180] ss:$12 sps:$4 sm:$0xff]   ;;  %503 = vst [vmem:[#allocation2] sm:$0xf] %v9340_v42  ;;  %504 = vst [vmem:[#allocation2 + $0xc] sm:$0xf] %v9341_v47 }
  0x1d   : > { %2424 = vmatprep.subr.bf16.mxu1 %v10014_v23  ;;  %803 = vst [vmem:[#allocation2 + $0x4] sm:$0xf] %v9390_v48  ;;  %804 = vst [vmem:[#allocation2 + $0x10] sm:$0xf] %v9391_v49  ;;  %v855_v51 = vld [vmem:[%s10654_s12 + $0x40] sm:$0xff]  ;;  %v856_v52 = vld [vmem:[%s10654_s12 + $0x48] sm:$0xff] }
  0x1e   : > { %2142 = vmatpush1.bf16.msra.mxu0 %v9983_v14  ;;  %v255_v53 = vld [vmem:[%s10654_s12 + $0x10] sm:$0xff]  ;;  %506 = vst [vmem:[#allocation2 + $0x24] sm:$0xf] %v9390_v48  ;;  %507 = vst [vmem:[#allocation2 + $0x30] sm:$0xf] %v9391_v49  ;;  %v9442_v55 = vpack.c.bf16 %v855_v51, %v855_v51  ;;  %v9443_v56 = vpack.c.bf16 %v856_v52, %v856_v52  ;;  %v555_v58 = vld [vmem:[%s10654_s12 + $0x28] sm:$0xff] }
  0x1f   : > { %2143 = vmatprep.subr.bf16.mxu0 %v9984_v17  ;;  %v10013_v54 = vld [vmem:[%s13022_s2 + $0x138] ss:$12 sps:$4 sm:$0xff]   ;;  %v9342_v57 = vpack.c.bf16 %v255_v53, %v255_v53  ;;  %v857_v59 = vld [vmem:[%s10654_s12 + $0x50] sm:$0xff]  ;;  %v9392_v62 = vpack.c.bf16 %v555_v58, %v555_v58  ;;  %v860_v3 = vld [vmem:[%s10654_s12 + $0x68] sm:$0xff]  ;;  %v10514_v14 = vmov 0.0|0.0  }
  0x20   : > { %2425 = vmatpush1.bf16.msra.mxu1 %v10018_v26  ;;  %v858_v60 = vld [vmem:[%s10654_s12 + $0x58] sm:$0xff]  ;;  %v10016_v61 = vld [vmem:[%s13022_s2 + $0x124] ss:$12 sps:$4 sm:$0xff]   ;;  %v9444_v63 = vpack.c.bf16 %v857_v59, %v857_v59  ;;  %1105 = vst [vmem:[#allocation2 + $0x20] sm:$0xf] %v9442_v55  ;;  %v9447_v7 = vpack.c.bf16 %v860_v3, %v860_v3  ;;  %v864_v19 = vld [vmem:[%s10654_s12 + $0x88] sm:$0xff] }
  0x21   : > { %2426 = vmatprep.subr.bf16.mxu1 %v10020_v27  ;;  %v9445_v0 = vpack.c.bf16 %v858_v60, %v858_v60  ;;  %1106 = vst [vmem:[#allocation2 + $0x2c] sm:$0xf] %v9443_v56  ;;  %505 = vst [vmem:[#allocation2 + $0x18] sm:$0xf] %v9342_v57  ;;  %v859_v1 = vld [vmem:[%s10654_s12 + $0x60] sm:$0xff]  ;;  %v861_v9 = vld [vmem:[%s10654_s12 + $0x70] sm:$0xff]  ;;  %v9451_v22 = vpack.c.bf16 %v864_v19, %v864_v19 }
  0x22   : > { %2144 = vmatpush1.bf16.msra.mxu0 %v9986_v20  ;;  %808 = vst [vmem:[#allocation2 + $0x40] sm:$0xf] %v9442_v55  ;;  %809 = vst [vmem:[#allocation2 + $0x4c] sm:$0xf] %v9443_v56  ;;  %v10044_v5 = vld [vmem:[%s13022_s2 + $0xb0] ss:$12 sps:$4 sm:$0xff]   ;;  %v9446_v6 = vpack.c.bf16 %v859_v1, %v859_v1  ;;  %v9448_v13 = vpack.c.bf16 %v861_v9, %v861_v9 }
  0x23   : > { %2145 = vmatprep.subr.bf16.mxu0 %v9987_v21  ;;  %511 = vst [vmem:[#allocation2 + $0x60] sm:$0xf] %v9442_v55  ;;  %512 = vst [vmem:[#allocation2 + $0x6c] sm:$0xf] %v9443_v56  ;;  %v10038_v8 = vld [vmem:[#allocation2 + $0x8] ss:$12 sps:$4 sm:$0xff]  }
  0x24   : > { %2427 = vmatpush1.bf16.msra.mxu1 %v10024_v30  ;;  %805 = vst [vmem:[#allocation2 + $0x1c] sm:$0xf] %v9392_v62  ;;  %1107 = vst [vmem:[#allocation2 + $0x38] sm:$0xf] %v9444_v63  ;;  %v10019_v10 = vld [vmem:[%s13022_s2 + $0x120] ss:$12 sps:$4 sm:$0xff]  }
  0x25   : > { %2428 = vmatprep.subr.bf16.mxu1 %v10026_v32  ;;  %1108 = vst [vmem:[#allocation2 + $0x44] sm:$0xf] %v9445_v0  ;;  %508 = vst [vmem:[#allocation2 + $0x3c] sm:$0xf] %v9392_v62  ;;  %v10022_v11 = vld [vmem:[%s13022_s2 + $0x10c] ss:$12 sps:$4 sm:$0xff]  }
  0x26   : > { %2146 = vmatpush1.bf16.msra.mxu0 %v9989_v24  ;;  %810 = vst [vmem:[#allocation2 + $0x58] sm:$0xf] %v9444_v63  ;;  %811 = vst [vmem:[#allocation2 + $0x64] sm:$0xf] %v9445_v0  ;;  %v10717_v12 = vld [vmem:[#allocation2 + $0x4] ss:$12 sps:$4 sm:$0xff]  }
  0x27   : > { %2147 = vmatprep.subr.bf16.mxu0 %v9992_v25  ;;  %513 = vst [vmem:[#allocation2 + $0x78] sm:$0xf] %v9444_v63  ;;  %514 = vst [vmem:[#allocation2 + $0x84] sm:$0xf] %v9445_v0  ;;  %v10050_v15 = vld [vmem:[%s13022_s2 + $0x98] ss:$12 sps:$4 sm:$0xff]   ;;  %2165 = vmatprep.mubr.bf16.mxu0 %v10717_v12 }
  0x28   : > { %2429 = vmatpush1.bf16.msra.mxu1 %v10030_v37  ;;  %1109 = vst [vmem:[#allocation2 + $0x50] sm:$0xf] %v9446_v6  ;;  %1110 = vst [vmem:[#allocation2 + $0x5c] sm:$0xf] %v9447_v7  ;;  %v862_v16 = vld [vmem:[%s10654_s12 + $0x78] sm:$0xff]  ;;  %v863_v18 = vld [vmem:[%s10654_s12 + $0x80] sm:$0xff] }
  0x29   : > { %2430 = vmatprep.subr.bf16.mxu1 %v10032_v46  ;;  %812 = vst [vmem:[#allocation2 + $0x70] sm:$0xf] %v9446_v6  ;;  %813 = vst [vmem:[#allocation2 + $0x7c] sm:$0xf] %v9447_v7  ;;  %v9449_v17 = vpack.c.bf16 %v862_v16, %v862_v16  ;;  %v10025_v20 = vld [vmem:[%s13022_s2 + $0x108] ss:$12 sps:$4 sm:$0xff]   ;;  %v9450_v21 = vpack.c.bf16 %v863_v18, %v863_v18 }
  0x2a   : > { %2148 = vmatpush1.bf16.msra.mxu0 %v9995_v28  ;;  %515 = vst [vmem:[#allocation2 + $0x90] sm:$0xf] %v9446_v6  ;;  %516 = vst [vmem:[#allocation2 + $0x9c] sm:$0xf] %v9447_v7  ;;  %v10028_v23 = vld [vmem:[%s13022_s2 + $0xf4] ss:$12 sps:$4 sm:$0xff]  }
  0x2b   : > { %2149 = vmatprep.subr.bf16.mxu0 %v9998_v29  ;;  %4794 = vst [vmem:[#allocation2] sm:$0xf] %v10514_v14  ;;  %4795 = vst [vmem:[#allocation2 + $0xc] sm:$0xf] %v10514_v14  ;;  %v10734_v24 = vld [vmem:[#allocation2 + $0x1c] ss:$12 sps:$4 sm:$0xff]  }
  0x2c   : > { %2431 = vmatpush1.bf16.msra.mxu1 %v10036_v50  ;;  %5094 = vst [vmem:[#allocation2 + $0x4] sm:$0xf] %v10514_v14  ;;  %1111 = vst [vmem:[#allocation2 + $0x68] sm:$0xf] %v9448_v13  ;;  %v10046_v25 = vld [vmem:[#allocation2 + $0x20] ss:$12 sps:$4 sm:$0xff]  }
  0x2d   : > { %2699 = vmatprep.subr.bf16.mxu1 %v13028_v2  ;;  %814 = vst [vmem:[#allocation2 + $0x88] sm:$0xf] %v9448_v13  ;;  %517 = vst [vmem:[#allocation2 + $0xa8] sm:$0xf] %v9448_v13  ;;  %v10058_v26 = vld [vmem:[%s13022_s2 + $0x80] ss:$12 sps:$4 sm:$0xff]  }
  0x2e   : > { %2150 = vmatpush2.bf16.msra.mxu0 %v10001_v31  ;;  %1112 = vst [vmem:[#allocation2 + $0x74] sm:$0xf] %v9449_v17  ;;  %815 = vst [vmem:[#allocation2 + $0x94] sm:$0xf] %v9449_v17  ;;  %v10031_v27 = vld [vmem:[%s13022_s2 + $0xf0] ss:$12 sps:$4 sm:$0xff]  }
  0x2f   : > { %2151 = vmatprep.subr.bf16.mxu0 %v10004_v36  ;;  %2449 = vmatmul.mubr.bf16.vlgmr.msra.gmra.mxu1 %v10038_v8  ;;  %518 = vst [vmem:[#allocation2 + $0xb4] sm:$0xf] %v9449_v17  ;;  %4796 = vst [vmem:[#allocation2 + $0x18] sm:$0xf] %v10514_v14  ;;  %v10034_v28 = vld [vmem:[%s13022_s2 + $0xdc] ss:$12 sps:$4 sm:$0xff]  }
  0x30   : > { %2700 = vmatpush1.bf16.msra.mxu1 %v10044_v5  ;;  %2458 = vmatprep.mubr.bf16.mxu1 %v13028_v2  ;;  %4797 = vst [vmem:[#allocation2 + $0x24] sm:$0xf] %v10514_v14  ;;  %1113 = vst [vmem:[#allocation2 + $0x80] sm:$0xf] %v9450_v21  ;;  %v10037_v29 = vld [vmem:[%s13022_s2 + $0xd8] ss:$12 sps:$4 sm:$0xff]  }
  0x31   : > { %2701 = vmatprep.subr.bf16.mxu1 %v13028_v2  ;;  %1114 = vst [vmem:[#allocation2 + $0x8c] sm:$0xf] %v9451_v22  ;;  %816 = vst [vmem:[#allocation2 + $0xa0] sm:$0xf] %v9450_v21  ;;  %v10039_v30 = vld [vmem:[%s13022_s2 + $0xc4] ss:$12 sps:$4 sm:$0xff]  }
  0x32   : > { %2152 = vmatpush2.bf16.msra.mxu0 %v10007_v40  ;;  %817 = vst [vmem:[#allocation2 + $0xac] sm:$0xf] %v9451_v22  ;;  %519 = vst [vmem:[#allocation2 + $0xc0] sm:$0xf] %v9450_v21  ;;  %v10049_v31 = vld [vmem:[#allocation2 + $0x38] ss:$12 sps:$4 sm:$0xff]  }
  0x33   : > { %2153 = vmatprep.subr.bf16.mxu0 %v10010_v45  ;;  %520 = vst [vmem:[#allocation2 + $0xcc] sm:$0xf] %v9451_v22  ;;  %v10067_v32 = vld [vmem:[%s13022_s2 + $0x68] ss:$12 sps:$4 sm:$0xff]   ;;  %v10041_v33 = vld [vmem:[%s13022_s2 + $0xc0] ss:$12 sps:$4 sm:$0xff]  }
  0x34   : > { %2702 = vmatpush1.bf16.msra.mxu1 %v10050_v15  ;;  %v865_v34 = vld [vmem:[%s10654_s12 + $0x90] sm:$0xff]  ;;  %v866_v35 = vld [vmem:[%s10654_s12 + $0x98] sm:$0xff]  ;;  %v1153_v36 = vld [vmem:[#allocation2] sm:$0xff] }
  0x35   : > { %2703 = vmatprep.subr.bf16.mxu1 %v13028_v2  ;;  %v9452_v37 = vpack.c.bf16 %v865_v34, %v865_v34  ;;  %v9453_v38 = vpack.c.bf16 %v866_v35, %v866_v35  ;;  %v1155_v39 = vld [vmem:[#allocation2 + $0xc] sm:$0xff]  ;;  %v867_v40 = vld [vmem:[%s10654_s12 + $0xa0] sm:$0xff]  ;;  %v870_v49 = vld [vmem:[%s10654_s12 + $0xb8] sm:$0xff] }
  0x36   : > { %2154 = vmatpush2.bf16.msra.mxu0 %v10013_v54  ;;  %v868_v41 = vld [vmem:[%s10654_s12 + $0xa8] sm:$0xff]  ;;  %v9454_v42 = vpack.c.bf16 %v867_v40, %v867_v40  ;;  %v10074_v44 = vld [vmem:[%s13022_s2 + $0x50] ss:$12 sps:$4 sm:$0xff]   ;;  %v10772_v46 = vcombine.low %v1153_v36, %v1155_v39  ;;  %v9457_v51 = vpack.c.bf16 %v870_v49, %v870_v49  ;;  %v10083_v52 = vld [vmem:[%s13022_s2 + $0x38] ss:$12 sps:$4 sm:$0xff]  }
  0x37   : > { %2155 = vmatprep.subr.bf16.mxu0 %v10016_v61  ;;  %2459 = vmatmul.mubr.bf16.gmra.mxu1 %v10046_v25  ;;  %1115 = vst [vmem:[#allocation2 + $0x98] sm:$0xf] %v9452_v37  ;;  %1116 = vst [vmem:[#allocation2 + $0xa4] sm:$0xf] %v9453_v38  ;;  %v9455_v43 = vpack.c.bf16 %v868_v41, %v868_v41  ;;  %v10045_v45 = vld [vmem:[%s13022_s2 + $0x230] ss:$12 sps:$4 sm:$0xff]  }
  0x38   : > { %2468 = vmatprep.mubr.bf16.mxu1 %v13028_v2  ;;  %2704 = vmatpush1.bf16.msra.mxu1 %v10058_v26  ;;  %818 = vst [vmem:[#allocation2 + $0xb8] sm:$0xf] %v9452_v37  ;;  %819 = vst [vmem:[#allocation2 + $0xc4] sm:$0xf] %v9453_v38  ;;  %v10054_v47 = vld [vmem:[#allocation2 + $0x50] ss:$12 sps:$4 sm:$0xff]  }
  0x39   : > { %2705 = vmatprep.subr.bf16.mxu1 %v13028_v2  ;;  %521 = vst [vmem:[#allocation2 + $0xd8] sm:$0xf] %v9452_v37  ;;  %522 = vst [vmem:[#allocation2 + $0xe4] sm:$0xf] %v9453_v38  ;;  %v869_v48 = vld [vmem:[%s10654_s12 + $0xb0] sm:$0xff]  ;;  %v871_v53 = vld [vmem:[%s10654_s12 + $0xc0] sm:$0xff] }
  0x3a   : > { %2156 = vmatpush2.bf16.msra.mxu0 %v10019_v10  ;;  %1117 = vst [vmem:[#allocation2 + $0xb0] sm:$0xf] %v9454_v42  ;;  %1118 = vst [vmem:[#allocation2 + $0xbc] sm:$0xf] %v9455_v43  ;;  %v9456_v50 = vpack.c.bf16 %v869_v48, %v869_v48  ;;  %v872_v54 = vld [vmem:[%s10654_s12 + $0xc8] sm:$0xff]  ;;  %v873_v55 = vld [vmem:[%s10654_s12 + $0xd0] sm:$0xff]  ;;  %v9458_v58 = vpack.c.bf16 %v871_v53, %v871_v53 }
  0x3b   : > { %2157 = vmatprep.subr.bf16.mxu0 %v10022_v11  ;;  %820 = vst [vmem:[#allocation2 + $0xd0] sm:$0xf] %v9454_v42  ;;  %821 = vst [vmem:[#allocation2 + $0xdc] sm:$0xf] %v9455_v43  ;;  %v1159_v56 = vld [vmem:[#allocation2 + $0x24] sm:$0xff]  ;;  %v9459_v59 = vpack.c.bf16 %v872_v54, %v872_v54  ;;  %v874_v60 = vld [vmem:[%s10654_s12 + $0xd8] sm:$0xff]  ;;  %v9460_v61 = vpack.c.bf16 %v873_v55, %v873_v55 }
  0x3c   : > { %2706 = vmatpush1.bf16.msra.mxu1 %v10067_v32  ;;  %523 = vst [vmem:[#allocation2 + $0xf0] sm:$0xf] %v9454_v42  ;;  %524 = vst [vmem:[#allocation2 + $0xfc] sm:$0xf] %v9455_v43  ;;  %v10059_v57 = vld [vmem:[%s13022_s2 + $0x218] ss:$12 sps:$4 sm:$0xff]   ;;  %v9461_v62 = vpack.c.bf16 %v874_v60, %v874_v60 }
  0x3d   : > { %2707 = vmatprep.subr.bf16.mxu1 %v13028_v2  ;;  %1119 = vst [vmem:[#allocation2 + $0xc8] sm:$0xf] %v9456_v50  ;;  %1120 = vst [vmem:[#allocation2 + $0xd4] sm:$0xf] %v9457_v51  ;;  %v10089_v63 = vld [vmem:[%s13022_s2 + $0x20] ss:$12 sps:$4 sm:$0xff]  }
  0x3e   : > { %2158 = vmatpush2.bf16.msra.mxu0 %v10025_v20  ;;  %822 = vst [vmem:[#allocation2 + $0xe8] sm:$0xf] %v9456_v50  ;;  %823 = vst [vmem:[#allocation2 + $0xf4] sm:$0xf] %v9457_v51  ;;  %v1157_v0 = vld [vmem:[#allocation2 + $0x18] sm:$0xff]  ;;  %v875_v9 = vld [vmem:[%s10654_s12 + $0xe0] sm:$0xff] }
  0x3f   : > { %2159 = vmatprep.subr.bf16.mxu0 %v10028_v23  ;;  %2469 = vmatmul.mubr.bf16.gmra.mxu1 %v10049_v31  ;;  %525 = vst [vmem:[#allocation2 + $0x108] sm:$0xf] %v9456_v50  ;;  %526 = vst [vmem:[#allocation2 + $0x114] sm:$0xf] %v9457_v51  ;;  %v10796_v1 = vcombine.low %v1157_v0, %v1159_v56  ;;  %v10051_v3 = vld [vmem:[#allocation2 + $0x34] ss:$12 sps:$4 sm:$0xff]   ;;  %v9462_v13 = vpack.c.bf16 %v875_v9, %v875_v9 }
  0x40   : > { %2478 = vmatprep.mubr.bf16.mxu1 %v13028_v2  ;;  %2708 = vmatpush1.bf16.msra.mxu1 %v10074_v44  ;;  %1121 = vst [vmem:[#allocation2 + $0xe0] sm:$0xf] %v9458_v58  ;;  %1122 = vst [vmem:[#allocation2 + $0xec] sm:$0xf] %v9459_v59  ;;  %v10075_v5 = vld [vmem:[%s13022_s2 + $0x200] ss:$12 sps:$4 sm:$0xff]  }
  0x41   : > { %2709 = vmatprep.subr.bf16.mxu1 %v13028_v2  ;;  %1123 = vst [vmem:[#allocation2 + $0xf8] sm:$0xf] %v9460_v61  ;;  %824 = vst [vmem:[#allocation2 + $0x100] sm:$0xf] %v9458_v58  ;;  %v10060_v6 = vld [vmem:[#allocation2 + $0x68] ss:$12 sps:$4 sm:$0xff]  }
  0x42   : > { %2160 = vmatpush2.bf16.msra.mxu0 %v10031_v27  ;;  %825 = vst [vmem:[#allocation2 + $0x10c] sm:$0xf] %v9459_v59  ;;  %826 = vst [vmem:[#allocation2 + $0x118] sm:$0xf] %v9460_v61  ;;  %v10090_v7 = vld [vmem:[%s13022_s2 + $0x1e8] ss:$12 sps:$4 sm:$0xff]  }
  0x43   : > { %2161 = vmatprep.subr.bf16.mxu0 %v10034_v28  ;;  %527 = vst [vmem:[#allocation2 + $0x120] sm:$0xf] %v9458_v58  ;;  %528 = vst [vmem:[#allocation2 + $0x12c] sm:$0xf] %v9459_v59  ;;  %v10053_v8 = vld [vmem:[#allocation2 + $0x30] ss:$12 sps:$4 sm:$0xff]  }
  0x44   : > { %2710 = vmatpush1.bf16.msra.mxu1 %v10083_v52  ;;  %529 = vst [vmem:[#allocation2 + $0x138] sm:$0xf] %v9460_v61  ;;  %1124 = vst [vmem:[#allocation2 + $0x104] sm:$0xf] %v9461_v62  ;;  %v876_v10 = vld [vmem:[%s10654_s12 + $0xe8] sm:$0xff]  ;;  %v877_v17 = vld [vmem:[%s10654_s12 + $0xf0] sm:$0xff] }
  0x45   : > { %827 = vst [vmem:[#allocation2 + $0x124] sm:$0xf] %v9461_v62  ;;  %530 = vst [vmem:[#allocation2 + $0x144] sm:$0xf] %v9461_v62  ;;  %2711 = vmatprep.subr.bf16.mxu1 %v13028_v2  ;;  %v10055_v11 = vld [vmem:[#allocation2 + $0x4c] ss:$12 sps:$4 sm:$0xff]   ;;  %v9463_v14 = vpack.c.bf16 %v876_v10, %v876_v10  ;;  %v9464_v19 = vpack.c.bf16 %v877_v17, %v877_v17 }
  0x46   : > { %2162 = vmatpush2.bf16.msra.mxu0 %v10037_v29  ;;  %v10064_v15 = vld [vmem:[#allocation2 + $0x80] ss:$12 sps:$4 sm:$0xff]   ;;  %1125 = vst [vmem:[#allocation2 + $0x110] sm:$0xf] %v9462_v13  ;;  %v10098_v16 = vld [vmem:[%s13022_s2 + $0x8] ss:$12 sps:$4 sm:$0xff]  }
  0x47   : > { %2163 = vmatprep.subr.bf16.mxu0 %v10039_v30  ;;  %2479 = vmatmul.mubr.bf16.gmra.mxu1 %v10054_v47  ;;  %1126 = vst [vmem:[#allocation2 + $0x11c] sm:$0xf] %v9463_v14  ;;  %v878_v18 = vld [vmem:[%s10654_s12 + $0xf8] sm:$0xff]  ;;  %828 = vst [vmem:[#allocation2 + $0x130] sm:$0xf] %v9462_v13  ;;  %v879_v21 = vld [vmem:[%s10654_s12 + $0x100] sm:$0xff] }
  0x48   : > { %2488 = vmatprep.mubr.bf16.mxu1 %v13028_v2  ;;  %2712 = vmatpush1.bf16.msra.mxu1 %v10089_v63  ;;  %829 = vst [vmem:[#allocation2 + $0x13c] sm:$0xf] %v9463_v14  ;;  %531 = vst [vmem:[#allocation2 + $0x150] sm:$0xf] %v9462_v13  ;;  %v9465_v20 = vpack.c.bf16 %v878_v18, %v878_v18  ;;  %v880_v22 = vld [vmem:[%s10654_s12 + $0x108] sm:$0xff]  ;;  %v9466_v23 = vpack.c.bf16 %v879_v21, %v879_v21  ;;  %v881_v29 = vld [vmem:[%s10654_s12 + $0x110] sm:$0xff] }
  0x49   : > { %2713 = vmatprep.subr.bf16.mxu1 %v13028_v2  ;;  %532 = vst [vmem:[#allocation2 + $0x15c] sm:$0xf] %v9463_v14  ;;  %v9467_v25 = vpack.c.bf16 %v880_v22, %v880_v22  ;;  %v10104_v26 = vld [vmem:[%s13022_s2 + $0x170] ss:$12 sps:$4 sm:$0xff]   ;;  %1127 = vst [vmem:[#allocation2 + $0x128] sm:$0xf] %v9464_v19  ;;  %v9468_v31 = vpack.c.bf16 %v881_v29, %v881_v29 }
  0x4a   : > { %2164 = vmatpush2.bf16.msra.mxu0 %v10041_v33  ;;  %1128 = vst [vmem:[#allocation2 + $0x134] sm:$0xf] %v9465_v20  ;;  %v10105_v27 = vld [vmem:[%s13022_s2 + $0x1d0] ss:$12 sps:$4 sm:$0xff]   ;;  %830 = vst [vmem:[#allocation2 + $0x148] sm:$0xf] %v9464_v19 }
  0x4b   : > { %9706 = vmatprep.subr.bf16.mxu0 %v10513_v4  ;;  %831 = vst [vmem:[#allocation2 + $0x154] sm:$0xf] %v9465_v20  ;;  %533 = vst [vmem:[#allocation2 + $0x168] sm:$0xf] %v9464_v19  ;;  %v10057_v28 = vld [vmem:[#allocation2 + $0x48] ss:$12 sps:$4 sm:$0xff]  }
  0x4c   : > { %2714 = vmatpush1.bf16.msra.mxu1 %v10098_v16  ;;  %534 = vst [vmem:[#allocation2 + $0x174] sm:$0xf] %v9465_v20  ;;  %1129 = vst [vmem:[#allocation2 + $0x140] sm:$0xf] %v9466_v23  ;;  %v882_v30 = vld [vmem:[%s10654_s12 + $0x118] sm:$0xff]  ;;  %v883_v34 = vld [vmem:[%s10654_s12 + $0x120] sm:$0xff] }
  0x4d   : > { %2166 = vmatmul.mubr.bf16.vlgmr.msra.gmra.mxu0 %v10772_v46  ;;  %2715 = vmatprep.subr.bf16.mxu1 %v13028_v2  ;;  %1130 = vst [vmem:[#allocation2 + $0x14c] sm:$0xf] %v9467_v25  ;;  %832 = vst [vmem:[#allocation2 + $0x160] sm:$0xf] %v9466_v23  ;;  %v9469_v32 = vpack.c.bf16 %v882_v30, %v882_v30  ;;  %v10113_v33 = vld [vmem:[%s13022_s2 + $0x158] ss:$12 sps:$4 sm:$0xff]   ;;  %v9470_v36 = vpack.c.bf16 %v883_v34, %v883_v34 }
  0x4e   : > { %9707 = vmatpush3.bf16.msra.mxu0 %v10045_v45  ;;  %2175 = vmatprep.mubr.bf16.mxu0 %v10734_v24  ;;  %833 = vst [vmem:[#allocation2 + $0x16c] sm:$0xf] %v9467_v25  ;;  %535 = vst [vmem:[#allocation2 + $0x180] sm:$0xf] %v9466_v23  ;;  %v884_v35 = vld [vmem:[%s10654_s12 + $0x128] sm:$0xff]  ;;  %v885_v37 = vld [vmem:[%s10654_s12 + $0x130] sm:$0xff] }
  0x4f   : > { %9708 = vmatprep.subr.bf16.mxu0 %v10513_v4  ;;  %2489 = vmatmul.mubr.bf16.gmra.mxu1 %v10060_v6  ;;  %536 = vst [vmem:[#allocation2 + $0x18c] sm:$0xf] %v9467_v25  ;;  %v886_v38 = vld [vmem:[%s10654_s12 + $0x138] sm:$0xff]  ;;  %v10061_v39 = vld [vmem:[#allocation2 + $0x64] ss:$12 sps:$4 sm:$0xff]   ;;  %v9471_v40 = vpack.c.bf16 %v884_v35, %v884_v35  ;;  %v9472_v41 = vpack.c.bf16 %v885_v37, %v885_v37  ;;  %v888_v51 = vld [vmem:[%s10654_s12 + $0x148] sm:$0xff] }
  0x50   : > { %2498 = vmatprep.mubr.bf16.mxu1 %v13028_v2  ;;  %2716 = vmatpush2.bf16.msra.mxu1 %v10104_v26  ;;  %1131 = vst [vmem:[#allocation2 + $0x158] sm:$0xf] %v9468_v31  ;;  %1132 = vst [vmem:[#allocation2 + $0x164] sm:$0xf] %v9469_v32  ;;  %v9473_v42 = vpack.c.bf16 %v886_v38, %v886_v38  ;;  %v10069_v43 = vld [vmem:[#allocation2 + $0x98] ss:$12 sps:$4 sm:$0xff]   ;;  %v9475_v54 = vpack.c.bf16 %v888_v51, %v888_v51 }
  0x51   : > { %2717 = vmatprep.subr.bf16.mxu1 %v13028_v2  ;;  %834 = vst [vmem:[#allocation2 + $0x178] sm:$0xf] %v9468_v31  ;;  %835 = vst [vmem:[#allocation2 + $0x184] sm:$0xf] %v9469_v32  ;;  %v10065_v44 = vld [vmem:[#allocation2 + $0x7c] ss:$12 sps:$4 sm:$0xff]  }
  0x52   : > { %9709 = vmatpush3.bf16.msra.mxu0 %v10059_v57  ;;  %537 = vst [vmem:[#allocation2 + $0x198] sm:$0xf] %v9468_v31  ;;  %538 = vst [vmem:[#allocation2 + $0x1a4] sm:$0xf] %v9469_v32  ;;  %v10073_v45 = vld [vmem:[#allocation2 + $0xb0] ss:$12 sps:$4 sm:$0xff]  }
  0x53   : > { %9710 = vmatprep.subr.bf16.mxu0 %v10513_v4  ;;  %1133 = vst [vmem:[#allocation2 + $0x170] sm:$0xf] %v9470_v36  ;;  %836 = vst [vmem:[#allocation2 + $0x190] sm:$0xf] %v9470_v36  ;;  %v10119_v47 = vld [vmem:[%s13022_s2 + $0x140] ss:$12 sps:$4 sm:$0xff]  }
  0x54   : > { %539 = vst [vmem:[#allocation2 + $0x1b0] sm:$0xf] %v9470_v36  ;;  %1134 = vst [vmem:[#allocation2 + $0x17c] sm:$0xf] %v9471_v40  ;;  %2718 = vmatpush2.bf16.msra.mxu1 %v10113_v33  ;;  %v10120_v48 = vld [vmem:[%s13022_s2 + $0x1b8] ss:$12 sps:$4 sm:$0xff]  }
  0x55   : > { %2176 = vmatmul.mubr.bf16.gmra.mxu0 %v10796_v1  ;;  %1135 = vst [vmem:[#allocation2 + $0x188] sm:$0xf] %v9472_v41  ;;  %1136 = vst [vmem:[#allocation2 + $0x194] sm:$0xf] %v9473_v42  ;;  %2719 = vmatprep.subr.bf16.mxu1 %v13028_v2  ;;  %v10068_v49 = vld [vmem:[#allocation2 + $0x78] ss:$12 sps:$4 sm:$0xff]  }
  0x56   : > { %2185 = vmatprep.mubr.bf16.mxu0 %v10051_v3  ;;  %9711 = vmatpush3.bf16.msra.mxu0 %v10075_v5  ;;  %837 = vst [vmem:[#allocation2 + $0x19c] sm:$0xf] %v9471_v40  ;;  %838 = vst [vmem:[#allocation2 + $0x1a8] sm:$0xf] %v9472_v41  ;;  %v887_v50 = vld [vmem:[%s10654_s12 + $0x140] sm:$0xff]  ;;  %v889_v56 = vld [vmem:[%s10654_s12 + $0x150] sm:$0xff] }
  0x57   : > { %9712 = vmatprep.subr.bf16.mxu0 %v10513_v4  ;;  %2499 = vmatmul.mubr.bf16.gmra.mxu1 %v10064_v15  ;;  %540 = vst [vmem:[#allocation2 + $0x1bc] sm:$0xf] %v9471_v40  ;;  %839 = vst [vmem:[#allocation2 + $0x1b4] sm:$0xf] %v9473_v42  ;;  %v10070_v52 = vld [vmem:[#allocation2 + $0x94] ss:$12 sps:$4 sm:$0xff]   ;;  %v9474_v53 = vpack.c.bf16 %v887_v50, %v887_v50  ;;  %v9476_v59 = vpack.c.bf16 %v889_v56, %v889_v56 }
  0x58   : > { %2508 = vmatprep.mubr.bf16.mxu1 %v13028_v2  ;;  %541 = vst [vmem:[#allocation2 + $0x1c8] sm:$0xf] %v9472_v41  ;;  %542 = vst [vmem:[#allocation2 + $0x1d4] sm:$0xf] %v9473_v42  ;;  %2720 = vmatpush2.bf16.msra.mxu1 %v10119_v47  ;;  %v10079_v55 = vld [vmem:[#allocation2 + $0xc8] ss:$12 sps:$4 sm:$0xff]  }
  0x59   : > { %2721 = vmatprep.subr.bf16.mxu1 %v13028_v2  ;;  %v890_v57 = vld [vmem:[%s10654_s12 + $0x158] sm:$0xff]  ;;  %v10852_v58 = vld [vmem:[#allocation4] sm:$0xff]  ;;  %1137 = vst [vmem:[#allocation2 + $0x1a0] sm:$0xf] %v9474_v53  ;;  %1138 = vst [vmem:[#allocation2 + $0x1ac] sm:$0xf] %v9475_v54 }
  0x5a   : > { %9713 = vmatpush3.bf16.msra.mxu0 %v10090_v7  ;;  %v9477_v60 = vpack.c.bf16 %v890_v57, %v890_v57  ;;  %v10129_v61 = vld [vmem:[%s13022_s2 + $0x128] ss:$12 sps:$4 sm:$0xff]   ;;  %840 = vst [vmem:[#allocation2 + $0x1c0] sm:$0xf] %v9474_v53  ;;  %841 = vst [vmem:[#allocation2 + $0x1cc] sm:$0xf] %v9475_v54 }
  0x5b   : > { %9714 = vmatprep.subr.bf16.mxu0 %v10513_v4  ;;  %543 = vst [vmem:[#allocation2 + $0x1e0] sm:$0xf] %v9474_v53  ;;  %544 = vst [vmem:[#allocation2 + $0x1ec] sm:$0xf] %v9475_v54  ;;  %v891_v62 = vld [vmem:[%s10654_s12 + $0x160] sm:$0xff]  ;;  %v892_v63 = vld [vmem:[%s10654_s12 + $0x168] sm:$0xff] }
  0x5c   : > { %1139 = vst [vmem:[#allocation2 + $0x1b8] sm:$0xf] %v9476_v59  ;;  %1140 = vst [vmem:[#allocation2 + $0x1c4] sm:$0xf] %v9477_v60  ;;  %2722 = vmatpush2.bf16.msra.mxu1 %v10129_v61  ;;  %v9478_v0 = vpack.c.bf16 %v891_v62, %v891_v62  ;;  %v9479_v3 = vpack.c.bf16 %v892_v63, %v892_v63  ;;  %v10136_v5 = vld [vmem:[%s13022_s2 + $0x110] ss:$12 sps:$4 sm:$0xff]  }
  0x5d   : > { %2186 = vmatmul.mubr.bf16.gmra.mxu0 %v10053_v8  ;;  %842 = vst [vmem:[#allocation2 + $0x1d8] sm:$0xf] %v9476_v59  ;;  %843 = vst [vmem:[#allocation2 + $0x1e4] sm:$0xf] %v9477_v60  ;;  %2723 = vmatprep.subr.bf16.mxu1 %v13028_v2  ;;  %v10137_v6 = vld [vmem:[%s13022_s2 + $0x1a0] ss:$12 sps:$4 sm:$0xff]  }
  0x5e   : > { %2195 = vmatprep.mubr.bf16.mxu0 %v10055_v11  ;;  %9715 = vmatpush3.bf16.msra.mxu0 %v10105_v27  ;;  %545 = vst [vmem:[#allocation2 + $0x1f8] sm:$0xf] %v9476_v59  ;;  %546 = vst [vmem:[#allocation2 + $0x204] sm:$0xf] %v9477_v60  ;;  %v10072_v7 = vld [vmem:[#allocation2 + $0x90] ss:$12 sps:$4 sm:$0xff]  }
  0x5f   : > { %9716 = vmatprep.subr.bf16.mxu0 %v10513_v4  ;;  %2509 = vmatmul.mubr.bf16.gmra.mxu1 %v10069_v43  ;;  %v10063_v4 = vld [vmem:[#allocation2 + $0x60] ss:$12 sps:$4 sm:$0xff]   ;;  %1141 = vst [vmem:[#allocation2 + $0x1d0] sm:$0xf] %v9478_v0  ;;  %1142 = vst [vmem:[#allocation2 + $0x1dc] sm:$0xf] %v9479_v3 }
  0x60   : > { %2518 = vmatprep.mubr.bf16.mxu1 %v13028_v2  ;;  %v893_v8 = vld [vmem:[%s10654_s12 + $0x170] sm:$0xff]  ;;  %v894_v9 = vld [vmem:[%s10654_s12 + $0x178] sm:$0xff]  ;;  %844 = vst [vmem:[#allocation2 + $0x1f0] sm:$0xf] %v9478_v0  ;;  %v895_v10 = vld [vmem:[%s10654_s12 + $0x180] sm:$0xff]  ;;  %2724 = vmatpush2.bf16.msra.mxu1 %v10136_v5 }
  0x61   : > { %845 = vst [vmem:[#allocation2 + $0x1fc] sm:$0xf] %v9479_v3  ;;  %547 = vst [vmem:[#allocation2 + $0x210] sm:$0xf] %v9478_v0  ;;  %v9480_v11 = vpack.c.bf16 %v893_v8, %v893_v8  ;;  %v9481_v13 = vpack.c.bf16 %v894_v9, %v894_v9  ;;  %v896_v14 = vld [vmem:[%s10654_s12 + $0x188] sm:$0xff]  ;;  %v9482_v15 = vpack.c.bf16 %v895_v10, %v895_v10  ;;  %v897_v18 = vld [vmem:[%s10654_s12 + $0x190] sm:$0xff]  ;;  %2725 = vmatprep.subr.bf16.mxu1 %v13028_v2 }
  0x62   : > { %9717 = vmatpush3.bf16.msra.mxu0 %v10120_v48  ;;  %548 = vst [vmem:[#allocation2 + $0x21c] sm:$0xf] %v9479_v3  ;;  %v9483_v16 = vpack.c.bf16 %v896_v14, %v896_v14  ;;  %v10144_v17 = vld [vmem:[%s13022_s2 + $0xf8] ss:$12 sps:$4 sm:$0xff]   ;;  %v9484_v21 = vpack.c.bf16 %v897_v18, %v897_v18  ;;  %v10084_v23 = vld [vmem:[#allocation2 + $0xe0] ss:$12 sps:$4 sm:$0xff]  }
  0x63   : > { %9718 = vmatprep.subr.bf16.mxu0 %v10852_v58  ;;  %v898_v19 = vld [vmem:[%s10654_s12 + $0x198] sm:$0xff]  ;;  %1143 = vst [vmem:[#allocation2 + $0x1e8] sm:$0xf] %v9480_v11  ;;  %1144 = vst [vmem:[#allocation2 + $0x1f4] sm:$0xf] %v9481_v13  ;;  %v899_v31 = vld [vmem:[%s10654_s12 + $0x1a0] sm:$0xff] }
  0x64   : > { %v10076_v20 = vld [vmem:[#allocation2 + $0xac] ss:$12 sps:$4 sm:$0xff]   ;;  %1145 = vst [vmem:[#allocation2 + $0x200] sm:$0xf] %v9482_v15  ;;  %846 = vst [vmem:[#allocation2 + $0x208] sm:$0xf] %v9480_v11  ;;  %v9485_v22 = vpack.c.bf16 %v898_v19, %v898_v19  ;;  %2726 = vmatpush2.bf16.msra.mxu1 %v10144_v17  ;;  %v9486_v34 = vpack.c.bf16 %v899_v31, %v899_v31 }
  0x65   : > { %2196 = vmatmul.mubr.bf16.gmra.mxu0 %v10057_v28  ;;  %847 = vst [vmem:[#allocation2 + $0x214] sm:$0xf] %v9481_v13  ;;  %848 = vst [vmem:[#allocation2 + $0x220] sm:$0xf] %v9482_v15  ;;  %2727 = vmatprep.subr.bf16.mxu1 %v13028_v2  ;;  %v10078_v25 = vld [vmem:[#allocation2 + $0xa8] ss:$12 sps:$4 sm:$0xff]  }
  0x66   : > { %2205 = vmatprep.mubr.bf16.mxu0 %v10061_v39  ;;  %9719 = vmatpush3.bf16.msra.mxu0 %v10137_v6  ;;  %549 = vst [vmem:[#allocation2 + $0x228] sm:$0xf] %v9480_v11  ;;  %550 = vst [vmem:[#allocation2 + $0x234] sm:$0xf] %v9481_v13  ;;  %v10080_v26 = vld [vmem:[#allocation2 + $0xc4] ss:$12 sps:$4 sm:$0xff]  }
  0x67   : > { %2519 = vmatmul.mubr.bf16.gmra.mxu1 %v10073_v45  ;;  %9720 = vmatprep.subr.bf16.mxu0 %v10852_v58  ;;  %551 = vst [vmem:[#allocation2 + $0x240] sm:$0xf] %v9482_v15  ;;  %1146 = vst [vmem:[#allocation2 + $0x20c] sm:$0xf] %v9483_v16  ;;  %v10088_v27 = vld [vmem:[#allocation2 + $0xf8] ss:$12 sps:$4 sm:$0xff]   ;;  %v9636_v45 = vpack.c.bf16 %v10852_v58, %v10852_v58 }
  0x68   : > { %2528 = vmatprep.mubr.bf16.mxu1 %v13028_v2  ;;  %849 = vst [vmem:[#allocation2 + $0x22c] sm:$0xf] %v9483_v16  ;;  %552 = vst [vmem:[#allocation2 + $0x24c] sm:$0xf] %v9483_v16  ;;  %v10082_v28 = vld [vmem:[#allocation2 + $0xc0] ss:$12 sps:$4 sm:$0xff]  }
  0x69   : > { %1147 = vst [vmem:[#allocation2 + $0x218] sm:$0xf] %v9484_v21  ;;  %1148 = vst [vmem:[#allocation2 + $0x224] sm:$0xf] %v9485_v22  ;;  %v10152_v29 = vld [vmem:[%s13022_s2 + $0xe0] ss:$12 sps:$4 sm:$0xff]  }
  0x6a   : > { %850 = vst [vmem:[#allocation2 + $0x238] sm:$0xf] %v9484_v21  ;;  %851 = vst [vmem:[#allocation2 + $0x244] sm:$0xf] %v9485_v22  ;;  %v10153_v30 = vld [vmem:[%s13022_s2 + $0x188] ss:$12 sps:$4 sm:$0xff]   ;;  %2728 = vmatpush2.bf16.msra.mxu1 %v10152_v29 }
  0x6b   : > { %v900_v32 = vld [vmem:[%s10654_s12 + $0x1a8] sm:$0xff]  ;;  %v10094_v36 = vld [vmem:[#allocation2 + $0x110] ss:$12 sps:$4 sm:$0xff]   ;;  %9721 = vmatpush3.bf16.msra.mxu0 %v10153_v30  ;;  %2729 = vmatprep.subr.bf16.mxu1 %v13028_v2  ;;  %1149 = vst [vmem:[#allocation2 + $0x230] sm:$0xf] %v9486_v34  ;;  %v4053_v43 = vld [vmem:[%s13020_s0] sm:$0xff] }
  0x6c   : > { %v10085_v33 = vld [vmem:[#allocation2 + $0xdc] ss:$12 sps:$4 sm:$0xff]   ;;  %v9487_v35 = vpack.c.bf16 %v900_v32, %v900_v32  ;;  %v901_v37 = vld [vmem:[%s10654_s12 + $0x1b0] sm:$0xff]  ;;  %852 = vst [vmem:[#allocation2 + $0x250] sm:$0xf] %v9486_v34  ;;  %4103 = vperm.xlu0 %9967, %v4053_v43   ;;  %v4057_v54 = vld [vmem:[%s13020_s0 + $0x20] sm:$0xff] }
  0x6d   : > { %2206 = vmatmul.mubr.bf16.gmra.mxu0 %v10063_v4  ;;  %v902_v38 = vld [vmem:[%s10654_s12 + $0x1b8] sm:$0xff]  ;;  %v9488_v39 = vpack.c.bf16 %v901_v37, %v901_v37  ;;  %v10159_v41 = vld [vmem:[%s13022_s2 + $0xc8] ss:$12 sps:$4 sm:$0xff]   ;;  %v10103_v57 = vld [vmem:[#allocation2 + $0x140] ss:$12 sps:$4 sm:$0xff]  }
  0x6e   : > { %2215 = vmatprep.mubr.bf16.mxu0 %v10065_v44  ;;  %1150 = vst [vmem:[#allocation2 + $0x23c] sm:$0xf] %v9487_v35  ;;  %v9489_v40 = vpack.c.bf16 %v902_v38, %v902_v38  ;;  %2730 = vmatpush2.bf16.msra.mxu1 %v10159_v41  ;;  %v4055_v42 = vld [vmem:[%s13020_s0 + $0x10] sm:$0xff]  ;;  %v10087_v4 = vld [vmem:[#allocation2 + $0xd8] ss:$12 sps:$4 sm:$0xff]   ;;  %v4054_v48 = vld [vmem:[%s13020_s0 + $0x8] sm:$0xff] }
  0x6f   : > { %2529 = vmatmul.mubr.bf16.gmra.mxu1 %v10079_v55  ;;  %1151 = vst [vmem:[#allocation2 + $0x248] sm:$0xf] %v9488_v39  ;;  %4111 = vperm.xlu1 %9968, %v4055_v42   ;;  %v10091_v44 = vld [vmem:[#allocation2 + $0xf4] ss:$12 sps:$4 sm:$0xff]   ;;  %v4056_v47 = vld [vmem:[%s13020_s0 + $0x18] sm:$0xff]  ;;  %v4058_v53 = vld [vmem:[%s13020_s0 + $0x28] sm:$0xff] }
  0x70   : > { %2538 = vmatprep.mubr.bf16.mxu1 %v13028_v2  ;;  %1152 = vst [vmem:[#allocation2 + $0x254] sm:$0xf] %v9489_v40  ;;  %v10099_v50 = vld [vmem:[#allocation2 + $0x128] ss:$12 sps:$4 sm:$0xff]   ;;  %4107 = vperm.xlu0 %9967, %v4054_v48   ;;  %v10093_v55 = vld [vmem:[#allocation2 + $0xf0] ss:$12 sps:$4 sm:$0xff]  }
  0x71   : > { %v10095_v56 = vld [vmem:[#allocation2 + $0x10c] ss:$12 sps:$4 sm:$0xff]   ;;  %v4059_v60 = vld [vmem:[%s13020_s0 + $0x30] sm:$0xff]  ;;  %v4061_v62 = vld [vmem:[%s13020_s0 + $0x40] sm:$0xff] }
  0x72   : > { %v4060_v59 = vld [vmem:[%s13020_s0 + $0x38] sm:$0xff]  ;;  %v4062_v61 = vld [vmem:[%s13020_s0 + $0x48] sm:$0xff]  ;;  %v10938_v0 = vld [vmem:[#allocation2 + $0x124] ss:$12 sps:$4 sm:$0xff]  }
  0x73   : > { %4115 = vperm.xlu1 %9968, %v4056_v47   ;;  %v10913_v51 = vld [vmem:[#allocation2 + $0x244] ss:$12 sps:$4 sm:$0xff]   ;;  %v10936_v63 = vld [vmem:[#allocation2 + $0x108] ss:$12 sps:$4 sm:$0xff]   ;;  %v4064_v5 = vld [vmem:[%s13020_s0 + $0x58] sm:$0xff] }
  0x74   : > { %5143 = vst [vmem:[#allocation2 + $0x250] sm:$0xf] %v9636_v45  ;;  %4119 = vperm.xlu0 %9967, %v4057_v54   ;;  %v10109_v3 = vld [vmem:[#allocation2 + $0x158] ss:$12 sps:$4 sm:$0xff]   ;;  %v4063_v6 = vld [vmem:[%s13020_s0 + $0x50] sm:$0xff]  ;;  %v4070_v15 = vld [vmem:[%s13020_s0 + $0x88] sm:$0xff] }
  0x75   : > { %2216 = vmatmul.mubr.bf16.gmra.mxu0 %v10068_v49  ;;  %v10911_v49 = vld [vmem:[#allocation2 + $0x230] ss:$12 sps:$4 sm:$0xff]   ;;  %v4065_v8 = vld [vmem:[%s13020_s0 + $0x60] sm:$0xff]  ;;  %v10118_v19 = vld [vmem:[#allocation2 + $0x188] ss:$12 sps:$4 sm:$0xff]  }
  0x76   : > { %2225 = vmatprep.mubr.bf16.mxu0 %v10070_v52  ;;  %5440 = vst [vmem:[#allocation2 + $0x230] sm:$0xf] %v9636_v45  ;;  %5441 = vst [vmem:[#allocation2 + $0x23c] sm:$0xf] %v9636_v45  ;;  %v10955_v9 = vld [vmem:[#allocation2 + $0x120] ss:$12 sps:$4 sm:$0xff]  }
  0x77   : > { %2539 = vmatmul.mubr.bf16.gmra.mxu1 %v10084_v23  ;;  %v10915_v52 = vld [vmem:[#allocation2 + $0x248] ss:$12 sps:$4 sm:$0xff]   ;;  %4123 = vperm.xlu1 %9968, %v4058_v53   ;;  %v10114_v11 = vld [vmem:[#allocation2 + $0x170] ss:$12 sps:$4 sm:$0xff]   ;;  %v4069_v16 = vld [vmem:[%s13020_s0 + $0x80] sm:$0xff] }
  0x78   : > { %2548 = vmatprep.mubr.bf16.mxu1 %v13028_v2  ;;  %5442 = vst [vmem:[#allocation2 + $0x248] sm:$0xf] %v9636_v45  ;;  %5443 = vst [vmem:[#allocation2 + $0x254] sm:$0xf] %v9636_v45  ;;  %4127 = vperm.xlu0 %9967, %v4059_v60   ;;  %v10957_v10 = vld [vmem:[#allocation2 + $0x13c] ss:$12 sps:$4 sm:$0xff]  }
  0x79   : > { %v4068_v13 = vld [vmem:[%s13020_s0 + $0x78] sm:$0xff]  ;;  %v4067_v14 = vld [vmem:[%s13020_s0 + $0x70] sm:$0xff]  ;;  %v4074_v22 = vld [vmem:[%s13020_s0 + $0xa8] sm:$0xff] }
  0x7a   : > { %v10974_v17 = vld [vmem:[#allocation2 + $0x138] ss:$12 sps:$4 sm:$0xff]   ;;  %v10976_v18 = vld [vmem:[#allocation2 + $0x154] ss:$12 sps:$4 sm:$0xff]   ;;  %v4078_v30 = vld [vmem:[%s13020_s0 + $0xc8] sm:$0xff] }
  0x7b   : > { %4131 = vperm.xlu1 %9968, %v4060_v59   ;;  %v4071_v21 = vld [vmem:[%s13020_s0 + $0x90] sm:$0xff]  ;;  %v4073_v23 = vld [vmem:[%s13020_s0 + $0xa0] sm:$0xff]  ;;  %v10164_v37 = vld [vmem:[%s13024_s4 + $0xac] ss:$12 sps:$4 sm:$0xff]  }
  0x7c   : > { %4135 = vperm.xlu0 %9967, %v4061_v62   ;;  %v10124_v29 = vld [vmem:[#allocation2 + $0x1a0] ss:$12 sps:$4 sm:$0xff]   ;;  %v11013_v32 = vld [vmem:[#allocation2 + $0x168] ss:$12 sps:$4 sm:$0xff]   ;;  %v11021_v35 = vld [vmem:[#allocation2 + $0x184] ss:$12 sps:$4 sm:$0xff]   ;;  %6424 = vmatprep.subr.bf16.mxu1 %v10164_v37 }
  0x7d   : > { %2226 = vmatmul.mubr.bf16.gmra.mxu0 %v10072_v7  ;;  %v4066_v7 = vld [vmem:[%s13020_s0 + $0x68] sm:$0xff]  ;;  %v4077_v31 = vld [vmem:[%s13020_s0 + $0xc0] sm:$0xff]  ;;  %v4079_v34 = vld [vmem:[%s13020_s0 + $0xd0] sm:$0xff] }
  0x7e   : > { %2235 = vmatprep.mubr.bf16.mxu0 %v10076_v20  ;;  %v4072_v20 = vld [vmem:[%s13020_s0 + $0x98] sm:$0xff]  ;;  %v4082_v38 = vld [vmem:[%s13020_s0 + $0xe8] sm:$0xff]  ;;  %v4081_v39 = vld [vmem:[%s13020_s0 + $0xe0] sm:$0xff] }
  0x7f   : > { %2549 = vmatmul.mubr.bf16.gmra.mxu1 %v10088_v27  ;;  %4139 = vperm.xlu1 %9968, %v4062_v61   ;;  %v4075_v27 = vld [vmem:[%s13020_s0 + $0xb0] sm:$0xff]  ;;  %v11035_v40 = vld [vmem:[#allocation2 + $0x180] ss:$12 sps:$4 sm:$0xff]   ;;  %v4084_v41 = vld [vmem:[%s13020_s0 + $0xf8] sm:$0xff] }
  0x80   : > { %2558 = vmatprep.mubr.bf16.mxu1 %v13028_v2  ;;  %4143 = vperm.xlu0 %9967, %v4063_v6   ;;  %v4083_v42 = vld [vmem:[%s13020_s0 + $0xf0] sm:$0xff]  ;;  %v11043_v43 = vld [vmem:[#allocation2 + $0x19c] ss:$12 sps:$4 sm:$0xff]   ;;  %v4085_v45 = vld [vmem:[%s13020_s0 + $0x100] sm:$0xff] }
  0x81   : > { %v11054_v47 = vld [vmem:[#allocation2 + $0x198] ss:$12 sps:$4 sm:$0xff]   ;;  %v4087_v53 = vld [vmem:[%s13020_s0 + $0x110] sm:$0xff]  ;;  %v10143_v62 = vld [vmem:[#allocation2 + $0x200] ss:$12 sps:$4 sm:$0xff]  }
  0x82   : > { %v4088_v48 = vld [vmem:[%s13020_s0 + $0x118] sm:$0xff]  ;;  %v10139_v54 = vld [vmem:[#allocation2 + $0x1e8] ss:$12 sps:$4 sm:$0xff]  }
  0x83   : > { %4147 = vperm.xlu1 %9968, %v4064_v5   ;;  %v4092_v59 = vld [vmem:[%s13020_s0 + $0x138] sm:$0xff]  ;;  %v4091_v60 = vld [vmem:[%s13020_s0 + $0x130] sm:$0xff]  ;;  %v4093_v5 = vld [vmem:[%s13020_s0 + $0x140] sm:$0xff] }
  0x84   : > { %4151 = vperm.xlu0 %9967, %v4065_v8   ;;  %v10134_v61 = vld [vmem:[#allocation2 + $0x1cc] ss:$12 sps:$4 sm:$0xff]   ;;  %v10138_v6 = vld [vmem:[#allocation2 + $0x1c8] ss:$12 sps:$4 sm:$0xff]  }
  0x85   : > { %2236 = vmatmul.mubr.bf16.gmra.mxu0 %v10078_v25  ;;  %v10994_v25 = vld [vmem:[#allocation2 + $0x150] ss:$12 sps:$4 sm:$0xff]   ;;  %v10167_v37 = vld [vmem:[%s13024_s4 + $0x94] ss:$12 sps:$4 sm:$0xff]  }
  0x86   : > { %2245 = vmatprep.mubr.bf16.mxu0 %v10080_v26  ;;  %v4076_v26 = vld [vmem:[%s13020_s0 + $0xb8] sm:$0xff]  ;;  %v4095_v8 = vld [vmem:[%s13020_s0 + $0x150] sm:$0xff] }
  0x87   : > { %2559 = vmatmul.mubr.bf16.gmra.mxu1 %v10094_v36  ;;  %4155 = vperm.xlu1 %9968, %v4066_v7   ;;  %v10128_v36 = vld [vmem:[#allocation2 + $0x1b8] ss:$12 sps:$4 sm:$0xff]  }
  0x88   : > { %2568 = vmatprep.mubr.bf16.mxu1 %v13028_v2  ;;  %4159 = vperm.xlu0 %9967, %v4067_v14   ;;  %v4096_v7 = vld [vmem:[%s13020_s0 + $0x158] sm:$0xff] }
  0x89   : > { %v10173_v14 = vld [vmem:[%s13024_s4 + $0x22c] ss:$12 sps:$4 sm:$0xff]  }
  0x8a   : > { %6707 = vmatprep.subr.bf16.mxu0 %v10173_v14 }
  0x8b   : > { %4163 = vperm.xlu1 %9968, %v4068_v13   ;;  %v10148_v13 = vld [vmem:[#allocation2 + $0x218] ss:$12 sps:$4 sm:$0xff]  }
  0x8c   : > { %4167 = vperm.xlu0 %9967, %v4069_v16   ;;  %v4097_v16 = vld [vmem:[%s13020_s0 + $0x160] sm:$0xff] }
  0x8d   : > { %2246 = vmatmul.mubr.bf16.gmra.mxu0 %v10082_v28  ;;  %v11002_v28 = vld [vmem:[#allocation2 + $0x16c] ss:$12 sps:$4 sm:$0xff]  }
  0x8e   : > { %2255 = vmatprep.mubr.bf16.mxu0 %v10085_v33  ;;  %v4080_v33 = vld [vmem:[%s13020_s0 + $0xd8] sm:$0xff] }
  0x8f   : > { %2569 = vmatmul.mubr.bf16.gmra.mxu1 %v10099_v50  ;;  %4171 = vperm.xlu1 %9968, %v4070_v15   ;;  %v10130_v50 = vld [vmem:[#allocation2 + $0x1b4] ss:$12 sps:$4 sm:$0xff]   ;;  %v4098_v15 = vld [vmem:[%s13020_s0 + $0x168] sm:$0xff] }
  0x90   : > { %2578 = vmatprep.mubr.bf16.mxu1 %v13028_v2  ;;  %4175 = vperm.xlu0 %9967, %v4071_v21   ;;  %v10145_v21 = vld [vmem:[#allocation2 + $0x1fc] ss:$12 sps:$4 sm:$0xff]  }
  0x93   : > { %4179 = vperm.xlu1 %9968, %v4072_v20   ;;  %v4100_v20 = vld [vmem:[%s13020_s0 + $0x178] sm:$0xff] }
  0x94   : > { %4183 = vperm.xlu0 %9967, %v4073_v23   ;;  %v10147_v23 = vld [vmem:[#allocation2 + $0x1f8] ss:$12 sps:$4 sm:$0xff]  }
  0x95   : > { %2256 = vmatmul.mubr.bf16.gmra.mxu0 %v10087_v4  ;;  %v10133_v4 = vld [vmem:[#allocation2 + $0x1d0] ss:$12 sps:$4 sm:$0xff]  }
  0x96   : > { %2265 = vmatprep.mubr.bf16.mxu0 %v10091_v44  ;;  %v4086_v44 = vld [vmem:[%s13020_s0 + $0x108] sm:$0xff] }
  0x97   : > { %2579 = vmatmul.mubr.bf16.gmra.mxu1 %v10103_v57  ;;  %4187 = vperm.xlu1 %9968, %v4074_v22   ;;  %v10132_v57 = vld [vmem:[#allocation2 + $0x1b0] ss:$12 sps:$4 sm:$0xff]  }
  0x98   : > { %2588 = vmatprep.mubr.bf16.mxu1 %v13028_v2  ;;  %4191 = vperm.xlu0 %9967, %v4075_v27   ;;  %v4099_v22 = vld [vmem:[%s13020_s0 + $0x170] sm:$0xff] }
  0x9b   : > { %4195 = vperm.xlu1 %9968, %v4076_v26   ;;  %v10149_v26 = vld [vmem:[#allocation2 + $0x214] ss:$12 sps:$4 sm:$0xff]  }
  0x9c   : > { %4199 = vperm.xlu0 %9967, %v4077_v31   ;;  %v10155_v31 = vld [vmem:[#allocation2 + $0x22c] ss:$12 sps:$4 sm:$0xff]  }
  0x9d   : > { %2266 = vmatmul.mubr.bf16.gmra.mxu0 %v10093_v55  ;;  %v4090_v55 = vld [vmem:[%s13020_s0 + $0x128] sm:$0xff] }
  0x9e   : > { %2275 = vmatprep.mubr.bf16.mxu0 %v10095_v56  ;;  %v4089_v56 = vld [vmem:[%s13020_s0 + $0x120] sm:$0xff] }
  0x9f   : > { %2589 = vmatmul.mubr.bf16.gmra.mxu1 %v10109_v3  ;;  %4203 = vperm.xlu1 %9968, %v4078_v30   ;;  %v4094_v3 = vld [vmem:[%s13020_s0 + $0x148] sm:$0xff] }
  0xa0   : > { %2598 = vmatprep.mubr.bf16.mxu1 %v13028_v2  ;;  %4207 = vperm.xlu0 %9967, %v4079_v34   ;;  %v10162_v34 = vld [vmem:[%s13024_s4 + $0xa8] ss:$12 sps:$4 sm:$0xff]  }
  0xa3   : > { %4211 = vperm.xlu1 %9968, %v4080_v33  }
  0xa4   : > { %4215 = vperm.xlu0 %9967, %v4081_v39   ;;  %v10157_v39 = vld [vmem:[#allocation2 + $0x228] ss:$12 sps:$4 sm:$0xff]  }
  0xa5   : > { %2276 = vmatmul.mubr.bf16.gmra.mxu0 %v10936_v63 }
  0xa6   : > { %2285 = vmatprep.mubr.bf16.mxu0 %v10938_v0 }
  0xa7   : > { %2599 = vmatmul.mubr.bf16.gmra.mxu1 %v10114_v11  ;;  %4219 = vperm.xlu1 %9968, %v4082_v38   ;;  %v10140_v11 = vld [vmem:[#allocation2 + $0x1e4] ss:$12 sps:$4 sm:$0xff]  }
  0xa8   : > { %2608 = vmatprep.mubr.bf16.mxu1 %v13028_v2  ;;  %4223 = vperm.xlu0 %9967, %v4083_v42   ;;  %v10170_v42 = vld [vmem:[%s13024_s4 + $0x7c] ss:$12 sps:$4 sm:$0xff]  }
  0xab   : > { %4227 = vperm.xlu1 %9968, %v4084_v41  }
  0xac   : > { %4231 = vperm.xlu0 %9967, %v4085_v45   ;;  %v1249_v45 = vld [vmem:[#allocation2 + $0x240] sm:$0xff] }
  0xad   : > { %2286 = vmatmul.mubr.bf16.gmra.mxu0 %v10955_v9 }
  0xae   : > { %2295 = vmatprep.mubr.bf16.mxu0 %v10957_v10 }
  0xaf   : > { %2609 = vmatmul.mubr.bf16.gmra.mxu1 %v10118_v19  ;;  %4235 = vperm.xlu1 %9968, %v4086_v44   ;;  %v10142_v19 = vld [vmem:[#allocation2 + $0x1e0] ss:$12 sps:$4 sm:$0xff]   ;;  %v10176_v44 = vld [vmem:[%s13024_s4 + $0x64] ss:$12 sps:$4 sm:$0xff]  }
  0xb0   : > { %2618 = vmatprep.mubr.bf16.mxu1 %v13028_v2  ;;  %4239 = vperm.xlu0 %9967, %v4087_v53   ;;  %v10359_v53 = vld [vmem:[#allocation2 + $0x34] ss:$12 sps:$4 sm:$0xff]  }
  0xb3   : > { %4243 = vperm.xlu1 %9968, %v4088_v48   ;;  %v1251_v48 = vld [vmem:[#allocation2 + $0x24c] sm:$0xff] }
  0xb4   : > { %4247 = vperm.xlu0 %9967, %v4089_v56  }
  0xb5   : > { %2296 = vmatmul.mubr.bf16.gmra.mxu0 %v10974_v17 }
  0xb6   : > { %2305 = vmatprep.mubr.bf16.mxu0 %v10976_v18 }
  0xb7   : > { %2619 = vmatmul.mubr.bf16.gmra.mxu1 %v10124_v29  ;;  %4251 = vperm.xlu1 %9968, %v4090_v55   ;;  %v10151_v29 = vld [vmem:[#allocation2 + $0x210] ss:$12 sps:$4 sm:$0xff]   ;;  %v11144_v55 = vcombine.low %v1249_v45, %v1251_v48 }
  0xb8   : > { %2628 = vmatprep.mubr.bf16.mxu1 %v13028_v2  ;;  %4255 = vperm.xlu0 %9967, %v4091_v60  }
  0xbb   : > { %4259 = vperm.xlu1 %9968, %v4092_v59  }
  0xbc   : > { %4263 = vperm.xlu0 %9967, %v4093_v5  }
  0xbd   : > { %2306 = vmatmul.mubr.bf16.gmra.mxu0 %v10994_v25 }
  0xbe   : > { %2315 = vmatprep.mubr.bf16.mxu0 %v11002_v28 }
  0xbf   : > { %2629 = vmatmul.mubr.bf16.gmra.mxu1 %v10128_v36  ;;  %4267 = vperm.xlu1 %9968, %v4094_v3  }
  0xc0   : > { %2638 = vmatprep.mubr.bf16.mxu1 %v13028_v2  ;;  %4271 = vperm.xlu0 %9967, %v4095_v8   ;;  %v10361_v8 = vld [vmem:[#allocation2 + $0x4c] ss:$12 sps:$4 sm:$0xff]  }
  0xc3   : > { %4275 = vperm.xlu1 %9968, %v4096_v7   ;;  %v10360_v7 = vld [vmem:[#allocation2 + $0x30] ss:$12 sps:$4 sm:$0xff]  }
  0xc4   : > { %4279 = vperm.xlu0 %9967, %v4097_v16   ;;  %v10171_v16 = vld [vmem:[%s13024_s4 + $0x228] ss:$12 sps:$4 sm:$0xff]  }
  0xc5   : > { %2316 = vmatmul.mubr.bf16.gmra.mxu0 %v11013_v32 }
  0xc6   : > { %2325 = vmatprep.mubr.bf16.mxu0 %v11021_v35 }
  0xc7   : > { %2639 = vmatmul.mubr.bf16.gmra.mxu1 %v10133_v4  ;;  %4283 = vperm.xlu1 %9968, %v4098_v15  }
  0xc8   : > { %2648 = vmatprep.mubr.bf16.mxu1 %v13028_v2  ;;  %4287 = vperm.xlu0 %9967, %v4099_v22  }
  0xcb   : > { %4291 = vperm.xlu1 %9968, %v4100_v20  }
  0xcd   : > { %2326 = vmatmul.mubr.bf16.gmra.mxu0 %v11035_v40 }
  0xce   : > { %2335 = vmatprep.mubr.bf16.mxu0 %v11043_v43 }
  0xcf   : > { %2649 = vmatmul.mubr.bf16.gmra.mxu1 %v10139_v54  ;;  %v10174_v54 = vld [vmem:[%s13024_s4 + $0x60] ss:$12 sps:$4 sm:$0xff]  }
  0xd0   : > { %2658 = vmatprep.mubr.bf16.mxu1 %v13028_v2 }
  0xd5   : > { %2336 = vmatmul.mubr.bf16.gmra.mxu0 %v11054_v47 }
  0xd6   : > { %2345 = vmatprep.mubr.bf16.mxu0 %v10130_v50 }
  0xd7   : > { %2659 = vmatmul.mubr.bf16.gmra.mxu1 %v10143_v62  ;;  %v10185_v62 = vld [vmem:[%s13024_s4 + $0x34] ss:$12 sps:$4 sm:$0xff]  }
  0xd8   : > { %2668 = vmatprep.mubr.bf16.mxu1 %v13028_v2 }
  0xdd   : > { %2346 = vmatmul.mubr.bf16.gmra.mxu0 %v10132_v57  ;;  %v10179_v57 = vld [vmem:[%s13024_s4 + $0x4c] ss:$12 sps:$4 sm:$0xff]  }
  0xde   : > { %2355 = vmatprep.mubr.bf16.mxu0 %v10134_v61 }
  0xdf   : > { %2669 = vmatmul.mubr.bf16.gmra.mxu1 %v10148_v13 }
  0xe0   : > { %2678 = vmatprep.mubr.bf16.mxu1 %v13028_v2 }
  0xe5   : > { %2356 = vmatmul.mubr.bf16.gmra.mxu0 %v10138_v6 }
  0xe6   : > { %2365 = vmatprep.mubr.bf16.mxu0 %v10140_v11  ;;  %v10183_v11 = vld [vmem:[%s13024_s4 + $0x30] ss:$12 sps:$4 sm:$0xff]  }
  0xe7   : > { %2679 = vmatmul.mubr.bf16.gmra.mxu1 %v10911_v49 }
  0xe8   : > { %2688 = vmatprep.mubr.bf16.mxu1 %v13028_v2 }
  0xed   : > { %2366 = vmatmul.mubr.bf16.gmra.mxu0 %v10142_v19 }
  0xee   : > { %2375 = vmatprep.mubr.bf16.mxu0 %v10145_v21  ;;  %v10182_v21 = vld [vmem:[%s13024_s4 + $0x214] ss:$12 sps:$4 sm:$0xff]  }
  0xef   : > { %v2450_v27 = vpop.f32.mrf.mxu1  ;;  %2689 = vmatmul.mubr.bf16.gmra.mxu1 %v10915_v52 }
  0xf0   : > { %2731 = vmatprep.mubr.bf16.mxu1 %v10717_v12  ;;  %v10165_v12 = vld [vmem:[%s13024_s4 + $0x90] ss:$12 sps:$4 sm:$0xff]  }
  0xf1   : > { %v2452_v30 = vpop.f32.mrf.mxu1 }
  0xf3   : > { %v2454_v33 = vpop.f32.mrf.mxu1 }
  0xf5   : > { %2376 = vmatmul.mubr.bf16.gmra.mxu0 %v10147_v23  ;;  %v2456_v36 = vpop.f32.mrf.mxu1  ;;  %v10186_v23 = vld [vmem:[%s13024_s4 + $0x18] ss:$12 sps:$4 sm:$0xff]  }
  0xf6   : > { %2385 = vmatprep.mubr.bf16.mxu0 %v10149_v26 }
  0xf7   : > { %v11115_v38 = vpop.f32.mrf.mxu1  ;;  %2732 = vmatmul.mubr.bf16.vlgmr.msra.gmra.mxu1 %v10772_v46 }
  0xf8   : > { %2739 = vmatprep.mubr.bf16.mxu1 %v10734_v24  ;;  %6425 = vmatpush1.bf16.msra.mxu1 %v10162_v34  ;;  %v10168_v24 = vld [vmem:[%s13024_s4 + $0x78] ss:$12 sps:$4 sm:$0xff]  }
  0xf9   : > { %v11122_v41 = vpop.f32.mrf.mxu1  ;;  %6426 = vmatprep.subr.bf16.mxu1 %v10167_v37  ;;  %v10364_v37 = vld [vmem:[#allocation2 + $0x48] ss:$12 sps:$4 sm:$0xff]  }
  0xfb   : > { %v11127_v4 = vpop.f32.mrf.mxu1 }
  0xfc   : > { %6427 = vmatpush1.bf16.msra.mxu1 %v10165_v12 }
  0xfd   : > { %2386 = vmatmul.mubr.bf16.gmra.mxu0 %v10151_v29  ;;  %v11132_v46 = vpop.f32.mrf.mxu1  ;;  %6428 = vmatprep.subr.bf16.mxu1 %v10170_v42 }
  0xfe   : > { %2395 = vmatprep.mubr.bf16.mxu0 %v10155_v31  ;;  %v11190_v31 = vld [vmem:[#allocation4] sm:$0xff] }
  0xff   : > { %v11138_v50 = vpop.f32.mrf.mxu1  ;;  %2740 = vmatmul.mubr.bf16.gmra.mxu1 %v10796_v1  ;;  %v10177_v1 = vld [vmem:[%s13024_s4 + $0x48] ss:$12 sps:$4 sm:$0xff]  }
 0x100   : > { %2747 = vmatprep.mubr.bf16.mxu1 %v10359_v53  ;;  %6429 = vmatpush1.bf16.msra.mxu1 %v10168_v24  ;;  %v10189_v53 = vld [vmem:[%s13024_s4 + $0x1f8] ss:$12 sps:$4 sm:$0xff]  }
 0x101   : > { %v11146_v56 = vpop.f32.mrf.mxu1  ;;  %6430 = vmatprep.subr.bf16.mxu1 %v10176_v44 }
 0x103   : > { %v11151_v59 = vpop.f32.mrf.mxu1 }
 0x104   : > { %6431 = vmatpush1.bf16.msra.mxu1 %v10174_v54 }
 0x105   : > { %2396 = vmatmul.mubr.bf16.gmra.mxu0 %v10157_v39  ;;  %v11157_v61 = vpop.f32.mrf.mxu1  ;;  %6432 = vmatprep.subr.bf16.mxu1 %v10179_v57  ;;  %v10365_v39 = vld [vmem:[#allocation2 + $0x64] ss:$12 sps:$4 sm:$0xff]  }
 0x106   : > { %2405 = vmatprep.mubr.bf16.mxu0 %v10913_v51 }
 0x107   : > { %v11164_v6 = vpop.f32.mrf.mxu1  ;;  %2748 = vmatmul.mubr.bf16.gmra.mxu1 %v10360_v7  ;;  %v10194_v7 = vld [vmem:[%s13024_s4 + $0x4] ss:$12 sps:$4 sm:$0xff]  }
 0x108   : > { %2755 = vmatprep.mubr.bf16.mxu1 %v10361_v8  ;;  %6433 = vmatpush1.bf16.msra.mxu1 %v10177_v1 }
 0x109   : > { %v11169_v14 = vpop.f32.mrf.mxu1  ;;  %6434 = vmatprep.subr.bf16.mxu1 %v10185_v62 }
 0x10b   : > { %v11177_v20 = vpop.f32.mrf.mxu1 }
 0x10c   : > { %6435 = vmatpush1.bf16.msra.mxu1 %v10183_v11 }
 0x10d   : > { %v2167_v60 = vpop.f32.mrf.mxu0  ;;  %2406 = vmatmul.mubr.bf16.gmra.mxu0 %v11144_v55  ;;  %v11187_v29 = vpop.f32.mrf.mxu1 }
 0x10e   : > { %v2451_v3 = vadd.f32 %v2450_v27, %v2167_v60  ;;  %9722 = vmatprep.mubr.msk.bf16.mxu0 %vm10515_vm0, %v10852_v58  ;;  %v10188_v58 = vld [vmem:[%s13024_s4 + $0x1c] ss:$12 sps:$4 sm:$0xff]  }
 0x10f   : > { %v2169_v5 = vpop.f32.mrf.mxu0  ;;  %v10362_v27 = vld [vmem:[#allocation2 + $0x8] ss:$12 sps:$4 sm:$0xff]   ;;  %6436 = vmatprep.subr.bf16.mxu1 %v10188_v58  ;;  %2756 = vmatmul.mubr.bf16.gmra.mxu1 %v10364_v37  ;;  %v10367_v58 = vld [vmem:[#allocation2 + $0x60] ss:$12 sps:$4 sm:$0xff]  }
 0x110   : > { %3165 = vst [vmem:[#allocation3 + $0x2b0] sm:$0xff] %v2451_v3  ;;  %2763 = vmatprep.mubr.bf16.mxu1 %v10365_v39  ;;  %6437 = vmatpush1.bf16.msra.mxu1 %v10186_v23  ;;  %v10366_v3 = vld [vmem:[#allocation2 + $0x20] ss:$12 sps:$4 sm:$0xff]   ;;  %v10369_v39 = vld [vmem:[#allocation2 + $0x38] ss:$12 sps:$4 sm:$0xff]  }
 0x111   : > { %v2171_v13 = vpop.f32.mrf.mxu0  ;;  %v10192_v5 = vld [vmem:[%s13024_s4] ss:$12 sps:$4 sm:$0xff]   ;;  %6438 = vmatprep.subr.bf16.mxu1 %v10194_v7 }
 0x112   : > { %v2455_v15 = vadd.f32 %v2454_v33, %v2171_v13  ;;  %v10180_v33 = vld [vmem:[%s13024_s4 + $0x210] ss:$12 sps:$4 sm:$0xff]  }
 0x113   : > { %v2173_v19 = vpop.f32.mrf.mxu0 }
 0x114   : > { %v11182_v22 = vadd.f32 %v2456_v36, %v2173_v19  ;;  %v11197_v36 = vpop.f32.mrf.mxu1  ;;  %v10368_v19 = vld [vmem:[#allocation2 + $0x7c] ss:$12 sps:$4 sm:$0xff]   ;;  %6439 = vmatpush1.bf16.msra.mxu1 %v10192_v5  ;;  %v10197_v5 = vld [vmem:[%s13024_s4 + $0x16c] ss:$12 sps:$4 sm:$0xff]  }
 0x115   : > { %v2177_v26 = vpop.f32.mrf.mxu0  ;;  %9723 = vmatmul.mubr.bf16.vlgmr.msra.gmra.mxu0 %v10362_v27  ;;  %6440 = vmatprep.subr.bf16.mxu1 %v10197_v5 }
 0x116   : > { %v2461_v30 = vadd.f32 %v11115_v38, %v2177_v26  ;;  %9726 = vmatprep.mubr.msk.bf16.mxu0 %vm10515_vm0, %v11190_v31  ;;  %6708 = vmatpush1.bf16.msra.mxu0 %v10171_v16  ;;  %v10191_v38 = vld [vmem:[%s13024_s4 + $0x1fc] ss:$12 sps:$4 sm:$0xff]   ;;  %v11203_v24 = vpop.f32.mrf.mxu1  ;;  %v13027_v44 = vrot.slane %v11182_v22, 1 }
 0x117   : > { %v2179_v34 = vpop.f32.mrf.mxu0  ;;  %6709 = vmatprep.subr.bf16.mxu0 %v10182_v21  ;;  %2764 = vmatmul.mubr.bf16.gmra.mxu1 %v10367_v58 }
 0x118   : > { %v2463_v12 = vadd.f32 %v11122_v41, %v2179_v34  ;;  %v11210_v57 = vpop.f32.mrf.mxu1  ;;  %2771 = vmatprep.mubr.bf16.mxu1 %v10368_v19  ;;  %v10372_v19 = vld [vmem:[#allocation2 + $0x50] ss:$12 sps:$4 sm:$0xff]  }
 0x119   : > { %v2181_v42 = vpop.f32.mrf.mxu0 }
 0x11a   : > { %v3462_v45 = vrot.slane %v2463_v12, 1  ;;  %v2465_v48 = vadd.f32 %v11127_v4, %v2181_v42  ;;  %6710 = vmatpush1.bf16.msra.mxu0 %v10180_v33  ;;  %v11218_v4 = vpop.f32.mrf.mxu1 }
 0x11b   : > { %v2183_v54 = vpop.f32.mrf.mxu0  ;;  %6711 = vmatprep.subr.bf16.mxu0 %v10191_v38 }
 0x11c   : > { %v3463_v41 = vsel %vm3460_vm1, %v13027_v44, %v3462_v45  ;;  %v2467_v1 = vadd.f32 %v11132_v46, %v2183_v54  ;;  %v11229_v13 = vpop.f32.mrf.mxu1  ;;  %v10370_v54 = vld [vmem:[#allocation2 + $0x78] ss:$12 sps:$4 sm:$0xff]  }
 0x11d   : > { %v11216_v60 = vadd.f32 %v3463_v41, %v2455_v15  ;;  %v2187_v62 = vpop.f32.mrf.mxu0  ;;  %9727 = vmatmul.mubr.bf16.gmra.mxu0 %v10366_v3  ;;  %v10371_v41 = vld [vmem:[#allocation2 + $0x94] ss:$12 sps:$4 sm:$0xff]  }
 0x11e   : > { %v3464_v8 = vrot.slane %v2467_v1, 1  ;;  %v2471_v11 = vadd.f32 %v11138_v50, %v2187_v62  ;;  %9730 = vmatprep.mubr.msk.bf16.mxu0 %vm10515_vm0, %v11190_v31  ;;  %6712 = vmatpush1.bf16.msra.mxu0 %v10189_v53  ;;  %v11235_v23 = vpop.f32.mrf.mxu1 }
 0x11f   : > { %v2189_v46 = vpop.f32.mrf.mxu0  ;;  %2772 = vmatmul.mubr.bf16.gmra.mxu1 %v10370_v54  ;;  %v10200_v54 = vld [vmem:[%s13024_s4 + $0x1e4] ss:$12 sps:$4 sm:$0xff]  }
 0x120   : > { %v3465_v15 = vsel %vm3460_vm1, %v3462_v45, %v3464_v8  ;;  %v2473_v16 = vadd.f32 %v11146_v56, %v2189_v46  ;;  %v11238_v34 = vpop.f32.mrf.mxu1  ;;  %2779 = vmatprep.mubr.bf16.mxu1 %v10371_v41  ;;  %6713 = vmatprep.subr.bf16.mxu0 %v10200_v54 }
 0x121   : > { %v11233_v21 = vadd.f32 %v3465_v15, %v2461_v30  ;;  %v2191_v50 = vpop.f32.mrf.mxu0 }
 0x122   : > { %v3466_v26 = vrot.slane %v2473_v16, 1  ;;  %v2475_v27 = vadd.f32 %v11151_v59, %v2191_v50  ;;  %v11244_v30 = vpop.f32.mrf.mxu1 }
 0x123   : > { %v2193_v33 = vpop.f32.mrf.mxu0 }
 0x124   : > { %v3467_v37 = vsel %vm3460_vm1, %v3464_v8, %v3466_v26  ;;  %v2477_v38 = vadd.f32 %v11157_v61, %v2193_v33  ;;  %v11249_v53 = vpop.f32.mrf.mxu1 }
 0x125   : > { %v11242_v12 = vadd.f32 %v3467_v37, %v2465_v48  ;;  %v2197_v56 = vpop.f32.mrf.mxu0  ;;  %9731 = vmatmul.mubr.bf16.gmra.mxu0 %v10369_v39 }
 0x126   : > { %v3468_v42 = vrot.slane %v2477_v38, 1  ;;  %v2481_v45 = vadd.f32 %v11164_v6, %v2197_v56  ;;  %9734 = vmatprep.mubr.msk.bf16.mxu0 %vm10515_vm0, %v11190_v31  ;;  %v11255_v3 = vpop.f32.mrf.mxu1  ;;  %v10195_v6 = vld [vmem:[%s13024_s4 + $0x168] ss:$12 sps:$4 sm:$0xff]   ;;  %v10373_v38 = vld [vmem:[#allocation2 + $0x90] ss:$12 sps:$4 sm:$0xff]  }
 0x127   : > { %v2199_v59 = vpop.f32.mrf.mxu0  ;;  %6441 = vmatpush2.bf16.msra.mxu1 %v10195_v6  ;;  %v10374_v56 = vld [vmem:[#allocation2 + $0xac] ss:$12 sps:$4 sm:$0xff]  }
 0x128   : > { %v3469_v61 = vsel %vm3460_vm1, %v3466_v26, %v3468_v42  ;;  %v2483_v48 = vadd.f32 %v11169_v14, %v2199_v59  ;;  %v11264_v14 = vpop.f32.mrf.mxu1  ;;  %2780 = vmatmul.mubr.bf16.gmra.mxu1 %v10373_v38  ;;  %v10377_v38 = vld [vmem:[#allocation2 + $0xc4] ss:$12 sps:$4 sm:$0xff]  }
 0x129   : > { %v11253_v1 = vadd.f32 %v3469_v61, %v2471_v11  ;;  %v2201_v62 = vpop.f32.mrf.mxu0  ;;  %2787 = vmatprep.mubr.bf16.mxu1 %v10374_v56 }
 0x12a   : > { %v3470_v7 = vrot.slane %v2483_v48, 1  ;;  %v2485_v8 = vadd.f32 %v11177_v20, %v2201_v62  ;;  %v11270_v50 = vpop.f32.mrf.mxu1 }
 0x12b   : > { %v2203_v46 = vpop.f32.mrf.mxu0 }
 0x12c   : > { %v3471_v11 = vsel %vm3460_vm1, %v3468_v42, %v3470_v7  ;;  %v2487_v58 = vadd.f32 %v11187_v29, %v2203_v46  ;;  %v11275_v37 = vpop.f32.mrf.mxu1 }
 0x12d   : > { %v11268_v15 = vadd.f32 %v3471_v11, %v2475_v27  ;;  %v2207_v16 = vpop.f32.mrf.mxu0  ;;  %9735 = vmatmul.mubr.bf16.gmra.mxu0 %v10372_v19  ;;  %v10203_v11 = vld [vmem:[%s13024_s4 + $0x154] ss:$12 sps:$4 sm:$0xff]  }
 0x12e   : > { %v3472_v26 = vrot.slane %v2487_v58, 1  ;;  %v2491_v33 = vadd.f32 %v11197_v36, %v2207_v16  ;;  %9738 = vmatprep.mubr.msk.bf16.mxu0 %vm10515_vm0, %v11190_v31  ;;  %v11281_v59 = vpop.f32.mrf.mxu1  ;;  %v10198_v36 = vld [vmem:[%s13024_s4 + $0x1e0] ss:$12 sps:$4 sm:$0xff]   ;;  %v10376_v19 = vld [vmem:[#allocation2 + $0xa8] ss:$12 sps:$4 sm:$0xff]   ;;  %6442 = vmatprep.subr.bf16.mxu1 %v10203_v11 }
 0x12f   : > { %v2209_v20 = vpop.f32.mrf.mxu0  ;;  %6714 = vmatpush1.bf16.msra.mxu0 %v10198_v36  ;;  %v10379_v11 = vld [vmem:[#allocation2 + $0xc0] ss:$12 sps:$4 sm:$0xff]  }
 0x130   : > { %v3473_v29 = vsel %vm3460_vm1, %v3470_v7, %v3472_v26  ;;  %v2493_v27 = vadd.f32 %v11203_v24, %v2209_v20  ;;  %v11290_v24 = vpop.f32.mrf.mxu1  ;;  %v10375_v7 = vld [vmem:[#allocation2 + $0x68] ss:$12 sps:$4 sm:$0xff]   ;;  %2788 = vmatmul.mubr.bf16.gmra.mxu1 %v10376_v19 }
 0x131   : > { %v11279_v39 = vadd.f32 %v3473_v29, %v2481_v45  ;;  %v2211_v42 = vpop.f32.mrf.mxu0  ;;  %2795 = vmatprep.mubr.bf16.mxu1 %v10377_v38 }
 0x132   : > { %v3474_v61 = vrot.slane %v2493_v27, 1  ;;  %v2495_v48 = vadd.f32 %v11210_v57, %v2211_v42  ;;  %v11296_v46 = vpop.f32.mrf.mxu1  ;;  %v10201_v57 = vld [vmem:[%s13024_s4 + $0x150] ss:$12 sps:$4 sm:$0xff]  }
 0x133   : > { %v2213_v41 = vpop.f32.mrf.mxu0  ;;  %6443 = vmatpush2.bf16.msra.mxu1 %v10201_v57 }
 0x134   : > { %v3475_v45 = vsel %vm3460_vm1, %v3472_v26, %v3474_v61  ;;  %v2497_v62 = vadd.f32 %v11218_v4, %v2213_v41 }
 0x135   : > { %v11294_v6 = vadd.f32 %v3475_v45, %v2485_v8  ;;  %v2217_v5 = vpop.f32.mrf.mxu0  ;;  %9739 = vmatmul.mubr.bf16.gmra.mxu0 %v10375_v7  ;;  %v11307_v8 = vpop.f32.mrf.mxu1 }
 0x136   : > { %v3476_v58 = vrot.slane %v2497_v62, 1  ;;  %v2501_v16 = vadd.f32 %v11229_v13, %v2217_v5  ;;  %9742 = vmatprep.mubr.msk.bf16.mxu0 %vm10515_vm0, %v11190_v31  ;;  %v10378_v62 = vld [vmem:[#allocation2 + $0x80] ss:$12 sps:$4 sm:$0xff]  }
 0x137   : > { %v2219_v4 = vpop.f32.mrf.mxu0  ;;  %v11313_v13 = vpop.f32.mrf.mxu1 }
 0x138   : > { %v3477_v26 = vsel %vm3460_vm1, %v3474_v61, %v3476_v58  ;;  %v2503_v20 = vadd.f32 %v11235_v23, %v2219_v4  ;;  %2796 = vmatmul.mubr.bf16.gmra.mxu1 %v10379_v11 }
 0x139   : > { %v11311_v29 = vadd.f32 %v3477_v26, %v2491_v33  ;;  %v2221_v27 = vpop.f32.mrf.mxu0  ;;  %v11316_v54 = vpop.f32.mrf.mxu1 }
 0x13a   : > { %v3478_v56 = vrot.slane %v2503_v20, 1  ;;  %v2505_v42 = vadd.f32 %v11238_v34, %v2221_v27  ;;  %v10206_v20 = vld [vmem:[%s13024_s4 + $0x13c] ss:$12 sps:$4 sm:$0xff]  }
 0x13b   : > { %v2223_v36 = vpop.f32.mrf.mxu0  ;;  %v11322_v33 = vpop.f32.mrf.mxu1  ;;  %6444 = vmatprep.subr.bf16.mxu1 %v10206_v20  ;;  %v10209_v20 = vld [vmem:[%s13024_s4 + $0x1cc] ss:$12 sps:$4 sm:$0xff]  }
 0x13c   : > { %v3479_v41 = vsel %vm3460_vm1, %v3476_v58, %v3478_v56  ;;  %v2507_v61 = vadd.f32 %v11244_v30, %v2223_v36  ;;  %v10380_v58 = vld [vmem:[#allocation2 + $0xdc] ss:$12 sps:$4 sm:$0xff]   ;;  %6715 = vmatprep.subr.bf16.mxu0 %v10209_v20  ;;  %v10386_v20 = vld [vmem:[#allocation2 + $0x10c] ss:$12 sps:$4 sm:$0xff]  }
 0x13d   : > { %v11320_v45 = vadd.f32 %v3479_v41, %v2495_v48  ;;  %v2227_v23 = vpop.f32.mrf.mxu0  ;;  %9743 = vmatmul.mubr.bf16.gmra.mxu0 %v10378_v62  ;;  %v11327_v57 = vpop.f32.mrf.mxu1  ;;  %2803 = vmatprep.mubr.bf16.mxu1 %v10380_v58 }
 0x13e   : > { %v3480_v5 = vrot.slane %v2507_v61, 1  ;;  %v2511_v7 = vadd.f32 %v11249_v53, %v2227_v23  ;;  %9746 = vmatprep.mubr.msk.bf16.mxu0 %vm10515_vm0, %v11190_v31  ;;  %v10204_v53 = vld [vmem:[%s13024_s4 + $0x138] ss:$12 sps:$4 sm:$0xff]  }
 0x13f   : > { %v2229_v34 = vpop.f32.mrf.mxu0  ;;  %v11333_v26 = vpop.f32.mrf.mxu1  ;;  %6445 = vmatpush2.bf16.msra.mxu1 %v10204_v53  ;;  %v10381_v23 = vld [vmem:[#allocation2 + $0x98] ss:$12 sps:$4 sm:$0xff]  }
 0x140   : > { %v3481_v30 = vsel %vm3460_vm1, %v3478_v56, %v3480_v5  ;;  %v2513_v48 = vadd.f32 %v11255_v3, %v2229_v34 }
 0x141   : > { %v11331_v4 = vadd.f32 %v3481_v30, %v2501_v16  ;;  %v2231_v19 = vpop.f32.mrf.mxu0  ;;  %v11342_v3 = vpop.f32.mrf.mxu1 }
 0x142   : > { %v3482_v38 = vrot.slane %v2513_v48, 1  ;;  %v2515_v27 = vadd.f32 %v11264_v14, %v2231_v19  ;;  %v10383_v48 = vld [vmem:[#allocation2 + $0xf4] ss:$12 sps:$4 sm:$0xff]  }
 0x143   : > { %v2233_v56 = vpop.f32.mrf.mxu0  ;;  %v11348_v62 = vpop.f32.mrf.mxu1 }
 0x144   : > { %v3483_v16 = vsel %vm3460_vm1, %v3480_v5, %v3482_v38  ;;  %v2517_v36 = vadd.f32 %v11270_v50, %v2233_v56  ;;  %v10382_v5 = vld [vmem:[#allocation2 + $0xd8] ss:$12 sps:$4 sm:$0xff]  }
 0x145   : > { %v11346_v41 = vadd.f32 %v3483_v16, %v2505_v42  ;;  %v2237_v61 = vpop.f32.mrf.mxu0  ;;  %9747 = vmatmul.mubr.bf16.gmra.mxu0 %v10381_v23  ;;  %v11353_v30 = vpop.f32.mrf.mxu1  ;;  %2804 = vmatmul.mubr.bf16.gmra.mxu1 %v10382_v5 }
 0x146   : > { %v3484_v34 = vrot.slane %v2517_v36, 1  ;;  %v2521_v11 = vadd.f32 %v11275_v37, %v2237_v61  ;;  %9750 = vmatprep.mubr.msk.bf16.mxu0 %vm10515_vm0, %v11190_v31  ;;  %2811 = vmatprep.mubr.bf16.mxu1 %v10383_v48  ;;  %v10207_v37 = vld [vmem:[%s13024_s4 + $0x1c8] ss:$12 sps:$4 sm:$0xff]   ;;  %v10385_v48 = vld [vmem:[#allocation2 + $0xf0] ss:$12 sps:$4 sm:$0xff]  }
 0x147   : > { %v2239_v14 = vpop.f32.mrf.mxu0  ;;  %v11359_v53 = vpop.f32.mrf.mxu1  ;;  %6716 = vmatpush1.bf16.msra.mxu0 %v10207_v37 }
 0x148   : > { %v3485_v50 = vsel %vm3460_vm1, %v3482_v38, %v3484_v34  ;;  %v2523_v42 = vadd.f32 %v11281_v59, %v2239_v14  ;;  %v10384_v14 = vld [vmem:[#allocation2 + $0xb0] ss:$12 sps:$4 sm:$0xff]  }
 0x149   : > { %v11357_v58 = vadd.f32 %v3485_v50, %v2511_v7  ;;  %v2241_v19 = vpop.f32.mrf.mxu0  ;;  %v11368_v59 = vpop.f32.mrf.mxu1  ;;  %v10212_v50 = vld [vmem:[%s13024_s4 + $0x124] ss:$12 sps:$4 sm:$0xff]  }
 0x14a   : > { %v3486_v56 = vrot.slane %v2523_v42, 1  ;;  %v2525_v38 = vadd.f32 %v11290_v24, %v2241_v19  ;;  %v10210_v24 = vld [vmem:[%s13024_s4 + $0x120] ss:$12 sps:$4 sm:$0xff]   ;;  %6446 = vmatprep.subr.bf16.mxu1 %v10212_v50 }
 0x14b   : > { %v2243_v16 = vpop.f32.mrf.mxu0  ;;  %v11374_v5 = vpop.f32.mrf.mxu1  ;;  %6447 = vmatpush2.bf16.msra.mxu1 %v10210_v24 }
 0x14c   : > { %v3487_v7 = vsel %vm3460_vm1, %v3484_v34, %v3486_v56  ;;  %v2527_v36 = vadd.f32 %v11296_v46, %v2243_v16 }
 0x14d   : > { %v11372_v61 = vadd.f32 %v3487_v7, %v2515_v27  ;;  %v2247_v23 = vpop.f32.mrf.mxu0  ;;  %9751 = vmatmul.mubr.bf16.gmra.mxu0 %v10384_v14  ;;  %v11385_v27 = vpop.f32.mrf.mxu1  ;;  %2812 = vmatmul.mubr.bf16.gmra.mxu1 %v10385_v48 }
 0x14e   : > { %v3488_v42 = vrot.slane %v2527_v36, 1  ;;  %v2531_v34 = vadd.f32 %v11307_v8, %v2247_v23  ;;  %9754 = vmatprep.mubr.msk.bf16.mxu0 %vm10515_vm0, %v11190_v31  ;;  %2819 = vmatprep.mubr.bf16.mxu1 %v10386_v20 }
 0x14f   : > { %v2249_v46 = vpop.f32.mrf.mxu0  ;;  %v11391_v8 = vpop.f32.mrf.mxu1 }
 0x150   : > { %v3489_v19 = vsel %vm3460_vm1, %v3486_v56, %v3488_v42  ;;  %v2533_v37 = vadd.f32 %v11313_v13, %v2249_v46  ;;  %v10387_v46 = vld [vmem:[#allocation2 + $0xc8] ss:$12 sps:$4 sm:$0xff]  }
 0x151   : > { %v11389_v16 = vadd.f32 %v3489_v19, %v2521_v11  ;;  %v2251_v7 = vpop.f32.mrf.mxu0  ;;  %v11394_v44 = vpop.f32.mrf.mxu1 }
 0x152   : > { %v3490_v36 = vrot.slane %v2533_v37, 1  ;;  %v2535_v23 = vadd.f32 %v11316_v54, %v2251_v7 }
 0x153   : > { %v2253_v14 = vpop.f32.mrf.mxu0  ;;  %v11400_v11 = vpop.f32.mrf.mxu1 }
 0x154   : > { %v3491_v50 = vsel %vm3460_vm1, %v3488_v42, %v3490_v36  ;;  %v2537_v56 = vadd.f32 %v11322_v33, %v2253_v14  ;;  %v10213_v42 = vld [vmem:[%s13024_s4 + $0x108] ss:$12 sps:$4 sm:$0xff]  }
 0x155   : > { %v11398_v48 = vadd.f32 %v3491_v50, %v2525_v38  ;;  %v2257_v13 = vpop.f32.mrf.mxu0  ;;  %9755 = vmatmul.mubr.bf16.gmra.mxu0 %v10387_v46  ;;  %v11405_v37 = vpop.f32.mrf.mxu1  ;;  %2820 = vmatmul.mubr.bf16.gmra.mxu1 %v10936_v63 }
 0x156   : > { %v3492_v24 = vrot.slane %v2537_v56, 1  ;;  %v2541_v19 = vadd.f32 %v11327_v57, %v2257_v13  ;;  %9758 = vmatprep.mubr.msk.bf16.mxu0 %vm10515_vm0, %v11190_v31  ;;  %2827 = vmatprep.mubr.bf16.mxu1 %v10938_v0  ;;  %v10215_v57 = vld [vmem:[%s13024_s4 + $0x10c] ss:$12 sps:$4 sm:$0xff]  }
 0x157   : > { %v2259_v54 = vpop.f32.mrf.mxu0  ;;  %v11419_v14 = vpop.f32.mrf.mxu1  ;;  %6448 = vmatprep.subr.bf16.mxu1 %v10215_v57 }
 0x158   : > { %v3493_v33 = vsel %vm3460_vm1, %v3490_v36, %v3492_v24  ;;  %v2543_v38 = vadd.f32 %v11333_v26, %v2259_v54  ;;  %6449 = vmatpush2.bf16.msra.mxu1 %v10213_v42 }
 0x159   : > { %v11417_v20 = vadd.f32 %v3493_v33, %v2531_v34  ;;  %v2261_v7 = vpop.f32.mrf.mxu0  ;;  %v11422_v50 = vpop.f32.mrf.mxu1  ;;  %v10388_v34 = vld [vmem:[#allocation2 + $0xe0] ss:$12 sps:$4 sm:$0xff]  }
 0x15a   : > { %v3494_v63 = vrot.slane %v2543_v38, 1  ;;  %v2545_v36 = vadd.f32 %v11342_v3, %v2261_v7 }
 0x15b   : > { %v2263_v26 = vpop.f32.mrf.mxu0  ;;  %v11428_v54 = vpop.f32.mrf.mxu1 }
 0x15c   : > { %v3495_v0 = vsel %vm3460_vm1, %v3492_v24, %v3494_v63  ;;  %v2547_v56 = vadd.f32 %v11348_v62, %v2263_v26 }
 0x15d   : > { %v11426_v13 = vadd.f32 %v3495_v0, %v2535_v23  ;;  %v2267_v46 = vpop.f32.mrf.mxu0  ;;  %9759 = vmatmul.mubr.bf16.gmra.mxu0 %v10388_v34  ;;  %v11433_v57 = vpop.f32.mrf.mxu1  ;;  %2828 = vmatmul.mubr.bf16.gmra.mxu1 %v10955_v9  ;;  %v10389_v34 = vld [vmem:[#allocation2 + $0xf8] ss:$12 sps:$4 sm:$0xff]  }
 0x15e   : > { %v3496_v33 = vrot.slane %v2547_v56, 1  ;;  %v2551_v38 = vadd.f32 %v11353_v30, %v2267_v46  ;;  %9762 = vmatprep.mubr.msk.bf16.mxu0 %vm10515_vm0, %v11190_v31  ;;  %2835 = vmatprep.mubr.bf16.mxu1 %v10957_v10 }
 0x15f   : > { %v2269_v3 = vpop.f32.mrf.mxu0  ;;  %v11441_v7 = vpop.f32.mrf.mxu1 }
 0x160   : > { %v3497_v62 = vsel %vm3460_vm1, %v3494_v63, %v3496_v33  ;;  %v2553_v23 = vadd.f32 %v11359_v53, %v2269_v3 }
 0x161   : > { %v11439_v24 = vadd.f32 %v3497_v62, %v2541_v19  ;;  %v2271_v42 = vpop.f32.mrf.mxu0  ;;  %v11444_v56 = vpop.f32.mrf.mxu1 }
 0x162   : > { %v3498_v30 = vrot.slane %v2553_v23, 1  ;;  %v2555_v26 = vadd.f32 %v11368_v59, %v2271_v42 }
 0x163   : > { %v2273_v0 = vpop.f32.mrf.mxu0  ;;  %v11450_v10 = vpop.f32.mrf.mxu1 }
 0x164   : > { %v3499_v46 = vsel %vm3460_vm1, %v3496_v33, %v3498_v30  ;;  %v2557_v9 = vadd.f32 %v11374_v5, %v2273_v0 }
 0x165   : > { %v11448_v63 = vadd.f32 %v3499_v46, %v2545_v36  ;;  %v2277_v53 = vpop.f32.mrf.mxu0  ;;  %9763 = vmatmul.mubr.bf16.gmra.mxu0 %v10389_v34  ;;  %v11455_v62 = vpop.f32.mrf.mxu1  ;;  %2836 = vmatmul.mubr.bf16.gmra.mxu1 %v10974_v17  ;;  %v10390_v34 = vld [vmem:[#allocation2 + $0x110] ss:$12 sps:$4 sm:$0xff]  }
 0x166   : > { %v3500_v19 = vrot.slane %v2557_v9, 1  ;;  %v2561_v3 = vadd.f32 %v11385_v27, %v2277_v53  ;;  %9766 = vmatprep.mubr.msk.bf16.mxu0 %vm10515_vm0, %v11190_v31  ;;  %2843 = vmatprep.mubr.bf16.mxu1 %v10976_v18 }
 0x167   : > { %v2279_v59 = vpop.f32.mrf.mxu0  ;;  %v11463_v42 = vpop.f32.mrf.mxu1 }
 0x168   : > { %v3501_v5 = vsel %vm3460_vm1, %v3498_v30, %v3500_v19  ;;  %v2563_v36 = vadd.f32 %v11391_v8, %v2279_v59 }
 0x169   : > { %v11461_v33 = vadd.f32 %v3501_v5, %v2551_v38  ;;  %v2281_v23 = vpop.f32.mrf.mxu0  ;;  %v11466_v9 = vpop.f32.mrf.mxu1 }
 0x16a   : > { %v3502_v27 = vrot.slane %v2563_v36, 1  ;;  %v2565_v0 = vadd.f32 %v11394_v44, %v2281_v23 }
 0x16b   : > { %v2283_v46 = vpop.f32.mrf.mxu0  ;;  %v11472_v18 = vpop.f32.mrf.mxu1 }
 0x16c   : > { %v3503_v53 = vsel %vm3460_vm1, %v3500_v19, %v3502_v27  ;;  %v2567_v17 = vadd.f32 %v11400_v11, %v2283_v46  ;;  %v10216_v11 = vld [vmem:[%s13024_s4 + $0x1b0] ss:$12 sps:$4 sm:$0xff]  }
 0x16d   : > { %v11470_v30 = vadd.f32 %v3503_v53, %v2555_v26  ;;  %v2287_v8 = vpop.f32.mrf.mxu0  ;;  %9767 = vmatmul.mubr.bf16.gmra.mxu0 %v10390_v34  ;;  %v11477_v5 = vpop.f32.mrf.mxu1  ;;  %2844 = vmatmul.mubr.bf16.gmra.mxu1 %v10994_v25  ;;  %v10218_v26 = vld [vmem:[%s13024_s4 + $0x1b4] ss:$12 sps:$4 sm:$0xff]  }
 0x16e   : > { %v3504_v38 = vrot.slane %v2567_v17, 1  ;;  %v2571_v59 = vadd.f32 %v11405_v37, %v2287_v8  ;;  %9770 = vmatprep.mubr.msk.bf16.mxu0 %vm10515_vm0, %v11190_v31  ;;  %v10219_v37 = vld [vmem:[%s13024_s4 + $0xf0] ss:$12 sps:$4 sm:$0xff]   ;;  %2851 = vmatprep.mubr.bf16.mxu1 %v11002_v28  ;;  %v10221_v25 = vld [vmem:[%s13024_s4 + $0xf4] ss:$12 sps:$4 sm:$0xff]  }
 0x16f   : > { %v2289_v44 = vpop.f32.mrf.mxu0  ;;  %v11497_v53 = vpop.f32.mrf.mxu1  ;;  %6717 = vmatprep.subr.bf16.mxu0 %v10218_v26  ;;  %6450 = vmatprep.subr.bf16.mxu1 %v10221_v25 }
 0x170   : > { %v3505_v19 = vsel %vm3460_vm1, %v3502_v27, %v3504_v38  ;;  %v2573_v36 = vadd.f32 %v11419_v14, %v2289_v44  ;;  %6718 = vmatpush1.bf16.msra.mxu0 %v10216_v11  ;;  %6451 = vmatpush2.bf16.msra.mxu1 %v10219_v37 }
 0x171   : > { %v11495_v23 = vadd.f32 %v3505_v19, %v2561_v3  ;;  %v2291_v46 = vpop.f32.mrf.mxu0  ;;  %v11500_v34 = vpop.f32.mrf.mxu1  ;;  %v10391_v19 = vld [vmem:[#allocation2 + $0x128] ss:$12 sps:$4 sm:$0xff]  }
 0x172   : > { %v3506_v17 = vrot.slane %v2573_v36, 1  ;;  %v2575_v8 = vadd.f32 %v11422_v50, %v2291_v46 }
 0x173   : > { %v2293_v27 = vpop.f32.mrf.mxu0  ;;  %v11506_v2 = vpop.f32.mrf.mxu1 }
 0x174   : > { %v3507_v28 = vsel %vm3460_vm1, %v3504_v38, %v3506_v17  ;;  %v2577_v14 = vadd.f32 %v11428_v54, %v2293_v27 }
 0x175   : > { %v11504_v44 = vadd.f32 %v3507_v28, %v2565_v0  ;;  %v2297_v3 = vpop.f32.mrf.mxu0  ;;  %9771 = vmatmul.mubr.bf16.gmra.mxu0 %v10391_v19  ;;  %v11511_v36 = vpop.f32.mrf.mxu1  ;;  %2852 = vmatmul.mubr.bf16.gmra.mxu1 %v11013_v32  ;;  %v10222_v32 = vld [vmem:[%s13024_s4 + $0xd8] ss:$12 sps:$4 sm:$0xff]  }
 0x176   : > { %v3508_v26 = vrot.slane %v2577_v14, 1  ;;  %v2581_v50 = vadd.f32 %v11433_v57, %v2297_v3  ;;  %9774 = vmatprep.mubr.msk.bf16.mxu0 %vm10515_vm0, %v11190_v31  ;;  %2859 = vmatprep.mubr.bf16.mxu1 %v11021_v35  ;;  %v10224_v57 = vld [vmem:[%s13024_s4 + $0xdc] ss:$12 sps:$4 sm:$0xff]   ;;  %v10392_v3 = vld [vmem:[#allocation2 + $0x140] ss:$12 sps:$4 sm:$0xff]  }
 0x177   : > { %v2299_v11 = vpop.f32.mrf.mxu0  ;;  %v11519_v25 = vpop.f32.mrf.mxu1  ;;  %6452 = vmatprep.subr.bf16.mxu1 %v10224_v57 }
 0x178   : > { %v3509_v54 = vsel %vm3460_vm1, %v3506_v17, %v3508_v26  ;;  %v2583_v0 = vadd.f32 %v11441_v7, %v2299_v11  ;;  %6453 = vmatpush2.bf16.msra.mxu1 %v10222_v32 }
 0x179   : > { %v11517_v38 = vadd.f32 %v3509_v54, %v2571_v59  ;;  %v2301_v37 = vpop.f32.mrf.mxu0  ;;  %v11528_v7 = vpop.f32.mrf.mxu1 }
 0x17a   : > { %v3510_v46 = vrot.slane %v2583_v0, 1  ;;  %v2585_v27 = vadd.f32 %v11444_v56, %v2301_v37  ;;  %v10230_v56 = vld [vmem:[%s13024_s4 + $0xc4] ss:$12 sps:$4 sm:$0xff]  }
 0x17b   : > { %v2303_v17 = vpop.f32.mrf.mxu0  ;;  %v11534_v19 = vpop.f32.mrf.mxu1  ;;  %6454 = vmatprep.subr.bf16.mxu1 %v10230_v56 }
 0x17c   : > { %v3511_v35 = vsel %vm3460_vm1, %v3508_v26, %v3510_v46  ;;  %v2587_v59 = vadd.f32 %v11450_v10, %v2303_v17  ;;  %v10228_v10 = vld [vmem:[%s13024_s4 + $0xc0] ss:$12 sps:$4 sm:$0xff]  }
 0x17d   : > { %v11532_v28 = vadd.f32 %v3511_v35, %v2575_v8  ;;  %v2307_v14 = vpop.f32.mrf.mxu0  ;;  %9775 = vmatmul.mubr.bf16.gmra.mxu0 %v10392_v3  ;;  %v11545_v26 = vpop.f32.mrf.mxu1  ;;  %2860 = vmatmul.mubr.bf16.gmra.mxu1 %v11035_v40  ;;  %v10225_v40 = vld [vmem:[%s13024_s4 + $0x198] ss:$12 sps:$4 sm:$0xff]   ;;  %v13035_v35 = vmov 0  }
 0x17e   : > { %v3512_v11 = vrot.slane %v2587_v59, 1  ;;  %v2591_v54 = vadd.f32 %v11455_v62, %v2307_v14  ;;  %9778 = vmatprep.mubr.msk.bf16.mxu0 %vm10515_vm0, %v11190_v31  ;;  %2867 = vmatprep.mubr.bf16.mxu1 %v11043_v43  ;;  %v10227_v62 = vld [vmem:[%s13024_s4 + $0x19c] ss:$12 sps:$4 sm:$0xff]  }
 0x17f   : > { %v2309_v8 = vpop.f32.mrf.mxu0  ;;  %6455 = vmatpush2.bf16.msra.mxu1 %v10228_v10  ;;  %v11556_v17 = vpop.f32.mrf.mxu1  ;;  %6719 = vmatprep.subr.bf16.mxu0 %v10227_v62  ;;  %v10393_v10 = vld [vmem:[#allocation2 + $0x158] ss:$12 sps:$4 sm:$0xff]  }
 0x180   : > { %v3513_v0 = vsel %vm3460_vm1, %v3510_v46, %v3512_v11  ;;  %v2593_v37 = vadd.f32 %v11463_v42, %v2309_v8  ;;  %6990 = vmatprep.subr.bf16.mxu1 %v13035_v35  ;;  %6720 = vmatpush1.bf16.msra.mxu0 %v10225_v40  ;;  %v10394_v40 = vld [vmem:[#allocation2 + $0x1b4] ss:$12 sps:$4 sm:$0xff]  }
 0x181   : > { %v11554_v57 = vadd.f32 %v3513_v0, %v2581_v50  ;;  %v2311_v32 = vpop.f32.mrf.mxu0  ;;  %v11563_v59 = vpop.f32.mrf.mxu1 }
 0x182   : > { %v3514_v46 = vrot.slane %v2593_v37, 1  ;;  %v2595_v42 = vadd.f32 %v11466_v9, %v2311_v32  ;;  %v10240_v9 = vld [vmem:[%s13024_s4 + $0x184] ss:$12 sps:$4 sm:$0xff]  }
 0x183   : > { %v2313_v43 = vpop.f32.mrf.mxu0  ;;  %v11569_v8 = vpop.f32.mrf.mxu1  ;;  %6721 = vmatprep.subr.bf16.mxu0 %v10240_v9 }
 0x184   : > { %v3515_v50 = vsel %vm3460_vm1, %v3512_v11, %v3514_v46  ;;  %v2597_v14 = vadd.f32 %v11472_v18, %v2313_v43  ;;  %v10238_v18 = vld [vmem:[%s13024_s4 + $0x180] ss:$12 sps:$4 sm:$0xff]  }
 0x185   : > { %v11567_v3 = vadd.f32 %v3515_v50, %v2585_v27  ;;  %v2317_v56 = vpop.f32.mrf.mxu0  ;;  %9779 = vmatmul.mubr.bf16.gmra.mxu0 %v10393_v10  ;;  %v11580_v11 = vpop.f32.mrf.mxu1  ;;  %2868 = vmatmul.mubr.bf16.gmra.mxu1 %v11054_v47 }
 0x186   : > { %v3516_v0 = vrot.slane %v2597_v14, 1  ;;  %v2601_v37 = vadd.f32 %v11477_v5, %v2317_v56  ;;  %9782 = vmatprep.mubr.msk.bf16.mxu0 %vm10515_vm0, %v11190_v31  ;;  %2875 = vmatprep.mubr.bf16.mxu1 %v10394_v40 }
 0x187   : > { %v2319_v27 = vpop.f32.mrf.mxu0  ;;  %6722 = vmatpush1.bf16.msra.mxu0 %v10238_v18  ;;  %v11587_v50 = vpop.f32.mrf.mxu1 }
 0x188   : > { %v3517_v62 = vsel %vm3460_vm1, %v3514_v46, %v3516_v0  ;;  %v2603_v32 = vadd.f32 %v11497_v53, %v2319_v27  ;;  %9822 = vmatprep.subr.bf16.mxu0 %v11190_v31 }
 0x189   : > { %v11585_v5 = vadd.f32 %v3517_v62, %v2591_v54  ;;  %v2321_v43 = vpop.f32.mrf.mxu0  ;;  %v11591_v47 = vpop.f32.mrf.mxu1  ;;  %v10395_v54 = vld [vmem:[#allocation2 + $0x170] ss:$12 sps:$4 sm:$0xff]  }
 0x18a   : > { %v3518_v14 = vrot.slane %v2603_v32, 1  ;;  %v2605_v56 = vadd.f32 %v11500_v34, %v2321_v43  ;;  %v10396_v43 = vld [vmem:[#allocation2 + $0x1b0] ss:$12 sps:$4 sm:$0xff]  }
 0x18b   : > { %13036 = vst [vmem:[#allocation5_spill] sm:$0xff] %v11585_v5  ;;  %v2323_v10 = vpop.f32.mrf.mxu0  ;;  %v11597_v27 = vpop.f32.mrf.mxu1 }
 0x18c   : > { %v3519_v46 = vsel %vm3460_vm1, %v3516_v0, %v3518_v14  ;;  %v2607_v53 = vadd.f32 %v11506_v2, %v2323_v10  ;;  %v10397_v0 = vld [vmem:[#allocation2 + $0x1cc] ss:$12 sps:$4 sm:$0xff]  }
 0x18d   : > { %v11595_v9 = vadd.f32 %v3519_v46, %v2595_v42  ;;  %v2327_v18 = vpop.f32.mrf.mxu0  ;;  %9783 = vmatmul.mubr.bf16.gmra.mxu0 %v10395_v54  ;;  %v11602_v32 = vpop.f32.mrf.mxu1  ;;  %2876 = vmatmul.mubr.bf16.gmra.mxu1 %v10396_v43 }
 0x18e   : > { %v3520_v62 = vrot.slane %v2607_v53, 1  ;;  %v2611_v40 = vadd.f32 %v11511_v36, %v2327_v18  ;;  %9786 = vmatprep.mubr.msk.bf16.mxu0 %vm10515_vm0, %v11190_v31  ;;  %2883 = vmatprep.mubr.bf16.mxu1 %v10397_v0 }
 0x18f   : > { %13037 = vst [vmem:[#allocation6_spill] sm:$0xff] %v11595_v9  ;;  %v2329_v34 = vpop.f32.mrf.mxu0  ;;  %v11608_v53 = vpop.f32.mrf.mxu1 }
 0x190   : > { %v3521_v2 = vsel %vm3460_vm1, %v3518_v14, %v3520_v62  ;;  %v2613_v42 = vadd.f32 %v11519_v25, %v2329_v34  ;;  %v10398_v34 = vld [vmem:[#allocation2 + $0x188] ss:$12 sps:$4 sm:$0xff]  }
 0x191   : > { %v11606_v10 = vadd.f32 %v3521_v2, %v2601_v37  ;;  %v2331_v46 = vpop.f32.mrf.mxu0  ;;  %v11611_v9 = vpop.f32.mrf.mxu1 }
 0x192   : > { %v3522_v36 = vrot.slane %v2613_v42, 1  ;;  %v2615_v18 = vadd.f32 %v11528_v7, %v2331_v46  ;;  %v10399_v46 = vld [vmem:[#allocation2 + $0x1c8] ss:$12 sps:$4 sm:$0xff]  }
 0x193   : > { %13038 = vst [vmem:[#allocation7_spill] sm:$0xff] %v11606_v10  ;;  %v2333_v54 = vpop.f32.mrf.mxu0  ;;  %v11617_v37 = vpop.f32.mrf.mxu1 }
 0x194   : > { %v3523_v5 = vsel %vm3460_vm1, %v3520_v62, %v3522_v36  ;;  %v2617_v43 = vadd.f32 %v11534_v19, %v2333_v54 }
 0x195   : > { %v11615_v14 = vadd.f32 %v3523_v5, %v2605_v56  ;;  %v2337_v25 = vpop.f32.mrf.mxu0  ;;  %9787 = vmatmul.mubr.bf16.gmra.mxu0 %v10398_v34  ;;  %v11622_v42 = vpop.f32.mrf.mxu1  ;;  %2884 = vmatmul.mubr.bf16.gmra.mxu1 %v10399_v46  ;;  %v10400_v56 = vld [vmem:[#allocation2 + $0x1e4] ss:$12 sps:$4 sm:$0xff]  }
 0x196   : > { %v3524_v2 = vrot.slane %v2617_v43, 1  ;;  %v2621_v0 = vadd.f32 %v11545_v26, %v2337_v25  ;;  %9790 = vmatprep.mubr.msk.bf16.mxu0 %vm10515_vm0, %v11190_v31  ;;  %2891 = vmatprep.mubr.bf16.mxu1 %v10400_v56 }
 0x197   : > { %13039 = vst [vmem:[#allocation8_spill] sm:$0xff] %v11615_v14  ;;  %v2339_v7 = vpop.f32.mrf.mxu0  ;;  %v11628_v43 = vpop.f32.mrf.mxu1 }
 0x198   : > { %v3525_v19 = vsel %vm3460_vm1, %v3522_v36, %v3524_v2  ;;  %v2623_v5 = vadd.f32 %v11556_v17, %v2339_v7  ;;  %v10401_v7 = vld [vmem:[#allocation2 + $0x1a0] ss:$12 sps:$4 sm:$0xff]  }
 0x199   : > { %v11626_v62 = vadd.f32 %v3525_v19, %v2611_v40  ;;  %v2341_v54 = vpop.f32.mrf.mxu0  ;;  %v11631_v14 = vpop.f32.mrf.mxu1 }
 0x19a   : > { %v3526_v26 = vrot.slane %v2623_v5, 1  ;;  %v2625_v25 = vadd.f32 %v11563_v59, %v2341_v54  ;;  %v10402_v54 = vld [vmem:[#allocation2 + $0x1e0] ss:$12 sps:$4 sm:$0xff]  }
 0x19b   : > { %13040 = vst [vmem:[#allocation9_spill] sm:$0xff] %v11626_v62  ;;  %v2343_v34 = vpop.f32.mrf.mxu0  ;;  %v11637_v40 = vpop.f32.mrf.mxu1 }
 0x19c   : > { %v3527_v10 = vsel %vm3460_vm1, %v3524_v2, %v3526_v26  ;;  %v2627_v46 = vadd.f32 %v11569_v8, %v2343_v34 }
 0x19d   : > { %v11635_v36 = vadd.f32 %v3527_v10, %v2615_v18  ;;  %v2347_v17 = vpop.f32.mrf.mxu0  ;;  %9791 = vmatmul.mubr.bf16.gmra.mxu0 %v10401_v7  ;;  %v11642_v5 = vpop.f32.mrf.mxu1  ;;  %2892 = vmatmul.mubr.bf16.gmra.mxu1 %v10402_v54  ;;  %v10403_v18 = vld [vmem:[#allocation2 + $0x1fc] ss:$12 sps:$4 sm:$0xff]  }
 0x19e   : > { %v3528_v19 = vrot.slane %v2627_v46, 1  ;;  %v2631_v56 = vadd.f32 %v11580_v11, %v2347_v17  ;;  %9794 = vmatprep.mubr.msk.bf16.mxu0 %vm10515_vm0, %v11190_v31  ;;  %2899 = vmatprep.mubr.bf16.mxu1 %v10403_v18 }
 0x19f   : > { %13041 = vst [vmem:[#allocation10_spill] sm:$0xff] %v11635_v36  ;;  %v2349_v59 = vpop.f32.mrf.mxu0  ;;  %v11648_v46 = vpop.f32.mrf.mxu1 }
 0x1a0   : > { %v3529_v8 = vsel %vm3460_vm1, %v3526_v26, %v3528_v19  ;;  %v2633_v10 = vadd.f32 %v11587_v50, %v2349_v59  ;;  %v10404_v59 = vld [vmem:[#allocation2 + $0x1b8] ss:$12 sps:$4 sm:$0xff]  }
 0x1a1   : > { %v11646_v2 = vadd.f32 %v3529_v8, %v2621_v0  ;;  %v2351_v34 = vpop.f32.mrf.mxu0  ;;  %v11651_v36 = vpop.f32.mrf.mxu1 }
 0x1a2   : > { %v3530_v11 = vrot.slane %v2633_v10, 1  ;;  %v2635_v17 = vadd.f32 %v11591_v47, %v2351_v34  ;;  %v10405_v34 = vld [vmem:[#allocation2 + $0x1f8] ss:$12 sps:$4 sm:$0xff]  }
 0x1a3   : > { %13042 = vst [vmem:[#allocation11_spill] sm:$0xff] %v11646_v2  ;;  %v2353_v7 = vpop.f32.mrf.mxu0  ;;  %v11657_v0 = vpop.f32.mrf.mxu1 }
 0x1a4   : > { %v3531_v62 = vsel %vm3460_vm1, %v3528_v19, %v3530_v11  ;;  %v2637_v54 = vadd.f32 %v11597_v27, %v2353_v7 }
 0x1a5   : > { %v11655_v26 = vadd.f32 %v3531_v62, %v2625_v25  ;;  %v2357_v50 = vpop.f32.mrf.mxu0  ;;  %9795 = vmatmul.mubr.bf16.gmra.mxu0 %v10404_v59  ;;  %v11662_v10 = vpop.f32.mrf.mxu1  ;;  %2900 = vmatmul.mubr.bf16.gmra.mxu1 %v10405_v34  ;;  %v10406_v25 = vld [vmem:[#allocation2 + $0x214] ss:$12 sps:$4 sm:$0xff]  }
 0x1a6   : > { %v3532_v8 = vrot.slane %v2637_v54, 1  ;;  %v2641_v18 = vadd.f32 %v11602_v32, %v2357_v50  ;;  %9798 = vmatprep.mubr.msk.bf16.mxu0 %vm10515_vm0, %v11190_v31  ;;  %2907 = vmatprep.mubr.bf16.mxu1 %v10406_v25 }
 0x1a7   : > { %13043 = vst [vmem:[#allocation12_spill] sm:$0xff] %v11655_v26  ;;  %v2359_v47 = vpop.f32.mrf.mxu0  ;;  %v11668_v54 = vpop.f32.mrf.mxu1 }
 0x1a8   : > { %v3533_v27 = vsel %vm3460_vm1, %v3530_v11, %v3532_v8  ;;  %v2643_v62 = vadd.f32 %v11608_v53, %v2359_v47  ;;  %v10407_v47 = vld [vmem:[#allocation2 + $0x1d0] ss:$12 sps:$4 sm:$0xff]  }
 0x1a9   : > { %v11666_v19 = vadd.f32 %v3533_v27, %v2631_v56  ;;  %v2361_v7 = vpop.f32.mrf.mxu0  ;;  %v11671_v26 = vpop.f32.mrf.mxu1 }
 0x1aa   : > { %v3534_v32 = vrot.slane %v2643_v62, 1  ;;  %v2645_v50 = vadd.f32 %v11611_v9, %v2361_v7  ;;  %v10408_v7 = vld [vmem:[#allocation2 + $0x210] ss:$12 sps:$4 sm:$0xff]  }
 0x1ab   : > { %13044 = vst [vmem:[#allocation13_spill] sm:$0xff] %v11666_v19  ;;  %v2363_v59 = vpop.f32.mrf.mxu0  ;;  %v11677_v56 = vpop.f32.mrf.mxu1 }
 0x1ac   : > { %v3535_v2 = vsel %vm3460_vm1, %v3532_v8, %v3534_v32  ;;  %v2647_v34 = vadd.f32 %v11617_v37, %v2363_v59 }
 0x1ad   : > { %v11675_v11 = vadd.f32 %v3535_v2, %v2635_v17  ;;  %v2367_v53 = vpop.f32.mrf.mxu0  ;;  %9799 = vmatmul.mubr.bf16.gmra.mxu0 %v10407_v47  ;;  %v11682_v62 = vpop.f32.mrf.mxu1  ;;  %2908 = vmatmul.mubr.bf16.gmra.mxu1 %v10408_v7  ;;  %v10409_v17 = vld [vmem:[#allocation2 + $0x22c] ss:$12 sps:$4 sm:$0xff]  }
 0x1ae   : > { %v3536_v27 = vrot.slane %v2647_v34, 1  ;;  %v2651_v25 = vadd.f32 %v11622_v42, %v2367_v53  ;;  %9802 = vmatprep.mubr.msk.bf16.mxu0 %vm10515_vm0, %v11190_v31  ;;  %2915 = vmatprep.mubr.bf16.mxu1 %v10409_v17 }
 0x1af   : > { %13045 = vst [vmem:[#allocation14_spill] sm:$0xff] %v11675_v11  ;;  %v2369_v9 = vpop.f32.mrf.mxu0  ;;  %v11688_v34 = vpop.f32.mrf.mxu1 }
 0x1b0   : > { %v3537_v37 = vsel %vm3460_vm1, %v3534_v32, %v3536_v27  ;;  %v2653_v2 = vadd.f32 %v11628_v43, %v2369_v9  ;;  %v10410_v9 = vld [vmem:[#allocation2 + $0x1e8] ss:$12 sps:$4 sm:$0xff]  }
 0x1b1   : > { %v11686_v8 = vadd.f32 %v3537_v37, %v2641_v18  ;;  %v2371_v59 = vpop.f32.mrf.mxu0  ;;  %v11691_v11 = vpop.f32.mrf.mxu1 }
 0x1b2   : > { %v3538_v42 = vrot.slane %v2653_v2, 1  ;;  %v2655_v53 = vadd.f32 %v11631_v14, %v2371_v59  ;;  %v10411_v59 = vld [vmem:[#allocation2 + $0x228] ss:$12 sps:$4 sm:$0xff]  }
 0x1b3   : > { %13046 = vst [vmem:[#allocation15_spill] sm:$0xff] %v11686_v8  ;;  %v2373_v47 = vpop.f32.mrf.mxu0  ;;  %v11697_v18 = vpop.f32.mrf.mxu1  ;;  %v10412_v8 = vld [vmem:[#allocation2 + $0x200] ss:$12 sps:$4 sm:$0xff]  }
 0x1b4   : > { %v3539_v19 = vsel %vm3460_vm1, %v3536_v27, %v3538_v42  ;;  %v2657_v7 = vadd.f32 %v11637_v40, %v2373_v47 }
 0x1b5   : > { %v11695_v32 = vadd.f32 %v3539_v19, %v2645_v50  ;;  %v2377_v43 = vpop.f32.mrf.mxu0  ;;  %9803 = vmatmul.mubr.bf16.gmra.mxu0 %v10410_v9  ;;  %v11702_v2 = vpop.f32.mrf.mxu1  ;;  %2916 = vmatmul.mubr.bf16.gmra.mxu1 %v10411_v59 }
 0x1b6   : > { %v3540_v37 = vrot.slane %v2657_v7, 1  ;;  %v2661_v17 = vadd.f32 %v11642_v5, %v2377_v43  ;;  %9806 = vmatprep.mubr.msk.bf16.mxu0 %vm10515_vm0, %v11190_v31  ;;  %2923 = vmatprep.mubr.bf16.mxu1 %v10913_v51 }
 0x1b7   : > { %13047 = vst [vmem:[#allocation16_spill] sm:$0xff] %v11695_v32  ;;  %v2379_v14 = vpop.f32.mrf.mxu0  ;;  %v2692_v47 = vpop.f32.mrf.mxu1 }
 0x1b8   : > { %v3541_v40 = vsel %vm3460_vm1, %v3538_v42, %v3540_v37  ;;  %v2663_v19 = vadd.f32 %v11648_v46, %v2379_v14  ;;  %v11715_v14 = vld [vmem:[#allocation4] sm:$0xff] }
 0x1b9   : > { %v11707_v50 = vadd.f32 %v3541_v40, %v2651_v25  ;;  %v2381_v27 = vpop.f32.mrf.mxu0  ;;  %v2694_v31 = vpop.f32.mrf.mxu1 }
 0x1ba   : > { %v3542_v7 = vrot.slane %v2663_v19, 1  ;;  %v2665_v5 = vadd.f32 %v11651_v36, %v2381_v27 }
 0x1bb   : > { %v2383_v43 = vpop.f32.mrf.mxu0  ;;  %v2696_v46 = vpop.f32.mrf.mxu1 }
 0x1bc   : > { %v3543_v9 = vsel %vm3460_vm1, %v3540_v37, %v3542_v7  ;;  %v2667_v32 = vadd.f32 %v11657_v0, %v2383_v43  ;;  %v10414_v46 = vld [vmem:[#allocation2 + $0x218] ss:$12 sps:$4 sm:$0xff]  }
 0x1bd   : > { %v11712_v59 = vadd.f32 %v3543_v9, %v2655_v53  ;;  %v2387_v42 = vpop.f32.mrf.mxu0  ;;  %9807 = vmatmul.mubr.bf16.gmra.mxu0 %v10412_v8  ;;  %v2733_v40 = vpop.f32.mrf.mxu1  ;;  %2924 = vmatmul.mubr.bf16.gmra.mxu1 %v11144_v55 }
 0x1be   : > { %v3544_v51 = vrot.slane %v2667_v32, 1  ;;  %v2671_v25 = vadd.f32 %v11662_v10, %v2387_v42  ;;  %9810 = vmatprep.mubr.msk.bf16.mxu0 %vm10515_vm0, %v11715_v14 }
 0x1bf   : > { %v2389_v36 = vpop.f32.mrf.mxu0  ;;  %v2735_v19 = vpop.f32.mrf.mxu1 }
 0x1c0   : > { %v3545_v0 = vsel %vm3460_vm1, %v3542_v7, %v3544_v51  ;;  %v2673_v53 = vadd.f32 %v11668_v54, %v2389_v36 }
 0x1c1   : > { %v11722_v37 = vadd.f32 %v3545_v0, %v2661_v17  ;;  %v2391_v8 = vpop.f32.mrf.mxu0  ;;  %v2736_v43 = vpop.f32.mrf.mxu1 }
 0x1c2   : > { %v3546_v32 = vrot.slane %v2673_v53, 1  ;;  %v2675_v10 = vadd.f32 %v11671_v26, %v2391_v8 }
 0x1c3   : > { %v2393_v27 = vpop.f32.mrf.mxu0  ;;  %v2738_v7 = vpop.f32.mrf.mxu1 }
 0x1c4   : > { %v3547_v31 = vsel %vm3460_vm1, %v3544_v51, %v3546_v32  ;;  %v2677_v9 = vadd.f32 %v11677_v56, %v2393_v27 }
 0x1c5   : > { %v11727_v42 = vadd.f32 %v3547_v31, %v2665_v5  ;;  %v2397_v55 = vpop.f32.mrf.mxu0  ;;  %9811 = vmatmul.mubr.bf16.gmra.mxu0 %v10414_v46  ;;  %v2741_v26 = vpop.f32.mrf.mxu1 }
 0x1c6   : > { %v3548_v54 = vrot.slane %v2677_v9, 1  ;;  %v2681_v17 = vadd.f32 %v11682_v62, %v2397_v55  ;;  %9814 = vmatprep.mubr.msk.bf16.mxu0 %vm10515_vm0, %v11715_v14 }
 0x1c7   : > { %v2399_v36 = vpop.f32.mrf.mxu0  ;;  %v2743_v5 = vpop.f32.mrf.mxu1 }
 0x1c8   : > { %v3549_v40 = vsel %vm3460_vm1, %v3546_v32, %v3548_v54  ;;  %v2683_v51 = vadd.f32 %v11688_v34, %v2399_v36 }
 0x1c9   : > { %v11734_v0 = vadd.f32 %v3549_v40, %v2671_v25  ;;  %v2401_v56 = vpop.f32.mrf.mxu0  ;;  %v2744_v27 = vpop.f32.mrf.mxu1 }
 0x1ca   : > { %v3550_v53 = vrot.slane %v2683_v51, 1  ;;  %v2685_v8 = vadd.f32 %v11691_v11, %v2401_v56 }
 0x1cb   : > { %v2403_v19 = vpop.f32.mrf.mxu0  ;;  %v2746_v32 = vpop.f32.mrf.mxu1 }
 0x1cc   : > { %v3551_v62 = vsel %vm3460_vm1, %v3548_v54, %v3550_v53  ;;  %v2687_v31 = vadd.f32 %v11697_v18, %v2403_v19 }
 0x1cd   : > { %v11739_v9 = vadd.f32 %v3551_v62, %v2675_v10  ;;  %v2407_v55 = vpop.f32.mrf.mxu0  ;;  %9815 = vmatmul.mubr.bf16.gmra.mxu0 %v10911_v49  ;;  %v2749_v11 = vpop.f32.mrf.mxu1 }
 0x1ce   : > { %v3552_v34 = vrot.slane %v2687_v31, 1  ;;  %v2691_v25 = vadd.f32 %v11702_v2, %v2407_v55  ;;  %9818 = vmatprep.mubr.msk.bf16.mxu0 %vm10515_vm0, %v11715_v14 }
 0x1cf   : > { %13048 = vst [vmem:[#allocation17_spill] sm:$0xff] %v11739_v9  ;;  %v2409_v46 = vpop.f32.mrf.mxu0  ;;  %v2751_v36 = vpop.f32.mrf.mxu1 }
 0x1d0   : > { %v3553_v7 = vsel %vm3460_vm1, %v3550_v53, %v3552_v34  ;;  %3309 = vst [vmem:[#allocation3 + $0x380] sm:$0xff] %v2691_v25  ;;  %v11746_v54 = vadd.f32 %v2692_v47, %v2409_v46 }
 0x1d1   : > { %v11748_v18 = vadd.f32 %v3553_v7, %v2681_v17  ;;  %v2411_v10 = vpop.f32.mrf.mxu0  ;;  %v2752_v51 = vpop.f32.mrf.mxu1 }
 0x1d2   : > { %13049 = vst [vmem:[#allocation18_spill] sm:$0xff] %v11746_v54  ;;  %v13030_v49 = vrot.slane %v11746_v54, 1  ;;  %v4104_v7 = vpop.permute.xlu0 %4103  ;;  %v3315_v10 = vld [vmem:[#allocation3 + $0x2b0] sm:$0x80] }
 0x1d3   : > { %13050 = vst [vmem:[#allocation19_spill] sm:$0xff] %v11748_v18  ;;  %v2413_v40 = vpop.f32.mrf.mxu0  ;;  %v2754_v53 = vpop.f32.mrf.mxu1 }
 0x1d4   : > { %v3555_v2 = vsel %vm3460_vm1, %v3552_v34, %v13030_v49 }
 0x1d5   : > { %v11754_v56 = vadd.f32 %v3555_v2, %v2685_v8  ;;  %v2966_v5 = vpop.f32.mrf.mxu0  ;;  %9819 = vmatmul.mubr.bf16.gmra.mxu0 %v10915_v52  ;;  %v11758_v17 = vpop.f32.mrf.mxu1 }
 0x1d6   : > { %6739 = vmatprep.mubr.bf16.mxu0 %v13035_v35 }
 0x1d7   : > { %13051 = vst [vmem:[#allocation20_spill] sm:$0xff] %v11754_v56  ;;  %v9724_v47 = vpop.f32.mrf.mxu0  ;;  %v2759_v62 = vpop.f32.mrf.mxu1 }
 0x1d8   : > { %v4112_v62 = vpop.permute.xlu1 %4111 }
 0x1d9   : > { %v2969_v19 = vpop.f32.mrf.mxu0  ;;  %v11760_v32 = vpop.f32.mrf.mxu1 }
 0x1da   : > { %v2970_v31 = vadd.f32 %v2969_v19, %v2736_v43  ;;  %v13052_v43 = vrot.slane %v11182_v22, 1  ;;  %v4296_v22 = vrot.slane %v4112_v62, 1 }
 0x1db   : > { %v9725_v55 = vpop.f32.mrf.mxu0  ;;  %v2762_v34 = vpop.f32.mrf.mxu1 }
 0x1dc   : > { %3170 = vst [vmem:[#allocation3 + $0x438] sm:$0xff] %v2970_v31  ;;  %v3605_v19 = vadd.f32 %v13052_v43, %v3315_v10  ;;  %v4293_v43 = vrot.slane %v4104_v7, 1 }
 0x1dd   : > { %v2974_v25 = vpop.f32.mrf.mxu0  ;;  %v11762_v46 = vpop.f32.mrf.mxu1 }
 0x1de   : > { %v2975_v52 = vadd.f32 %v2974_v25, %v2741_v26  ;;  %v11771_v26 = vld [vmem:[%s13023_s3] ss:$0 sm:$0xff] }
 0x1df   : > { %v9728_v8 = vpop.f32.mrf.mxu0  ;;  %v2767_v40 = vpop.f32.mrf.mxu1 }
 0x1e0   : > { %v3754_v55 = vrot.slane %v2975_v52, 2 }
 0x1e1   : > { %v2977_v36 = vpop.f32.mrf.mxu0  ;;  %v11764_v47 = vpop.f32.mrf.mxu1 }
 0x1e2   : > { %v2978_v2 = vadd.f32 %v2977_v36, %v2744_v27  ;;  %v4108_v27 = vpop.permute.xlu0 %4107 }
 0x1e3   : > { %v3654_v5 = vld [vmem:[#allocation3 + $0x438] sm:$0xfe]  ;;  %v9729_v53 = vpop.f32.mrf.mxu0  ;;  %v2770_v8 = vpop.f32.mrf.mxu1  ;;  %v4294_v54 = vrot.slane %v4108_v27, 1 }
 0x1e4   : > { %v3753_v31 = vrot.slane %v3654_v5, 2  ;;  %v3756_v34 = vrot.slane %v2978_v2, 2 }
 0x1e5   : > { %v2982_v25 = vpop.f32.mrf.mxu0  ;;  %v11777_v5 = vpop.f32.mrf.mxu1 }
 0x1e6   : > { %v3899_v36 = vadd.f32 %v3753_v31, %v3605_v19  ;;  %v3755_v40 = vsel %vm3752_vm2, %v3753_v31, %v3754_v55  ;;  %v3757_v53 = vsel %vm3752_vm2, %v3754_v55, %v3756_v34  ;;  %v2983_v49 = vadd.f32 %v2982_v25, %v2749_v11  ;;  %v4116_v11 = vpop.permute.xlu1 %4115 }
 0x1e7   : > { %v3900_v10 = vadd.f32 %v3755_v40, %v11216_v60  ;;  %v3901_v52 = vadd.f32 %v3757_v53, %v11233_v21  ;;  %v9732_v2 = vpop.f32.mrf.mxu0  ;;  %v2775_v55 = vpop.f32.mrf.mxu1  ;;  %v4298_v21 = vrot.slane %v4116_v11, 1 }
 0x1e8   : > { %v3955_v56 = vadd.f32 %v11771_v26, %v3899_v36  ;;  %v3758_v8 = vrot.slane %v2983_v49, 2  ;;  %v4295_v49 = vsel %vm3460_vm1, %v4293_v43, %v4294_v54  ;;  %v4297_v36 = vsel %vm3460_vm1, %v4294_v54, %v4296_v22 }
 0x1e9   : > { %v3956_v19 = vadd.f32 %v11771_v26, %v3900_v10  ;;  %v3957_v31 = vadd.f32 %v11771_v26, %v3901_v52  ;;  %v2985_v18 = vpop.f32.mrf.mxu0  ;;  %v11784_v2 = vpop.f32.mrf.mxu1 }
 0x1ea   : > { %v4004_v62 = vmax.f32 %v3955_v56, 0.0  ;;  %v3759_v60 = vsel %vm3752_vm2, %v3756_v34, %v3758_v8  ;;  %v2986_v25 = vadd.f32 %v2985_v18, %v2752_v51  ;;  %v4299_v51 = vsel %vm3460_vm1, %v4296_v22, %v4298_v21 }
 0x1eb   : > { %v4005_v40 = vmax.f32 %v3956_v19, 0.0  ;;  %v4006_v53 = vmax.f32 %v3957_v31, 0.0  ;;  %v3902_v7 = vadd.f32 %v3759_v60, %v11242_v12  ;;  %v9733_v27 = vpop.f32.mrf.mxu0  ;;  %v2778_v18 = vpop.f32.mrf.mxu1 }
 0x1ec   : > { %v4437_v10 = vmul.f32 %v4293_v43, %v4004_v62  ;;  %v3760_v52 = vrot.slane %v2986_v25, 2  ;;  %v4120_v19 = vpop.permute.xlu0 %4119  ;;  %v4124_v27 = vpop.permute.xlu1 %4123 }
 0x1ed   : > { %v4438_v55 = vmul.f32 %v4295_v49, %v4005_v40  ;;  %v4439_v9 = vmul.f32 %v4297_v36, %v4006_v53  ;;  %v3958_v56 = vadd.f32 %v11771_v26, %v3902_v7  ;;  %v2990_v34 = vpop.f32.mrf.mxu0  ;;  %v11793_v62 = vpop.f32.mrf.mxu1  ;;  %v4300_v60 = vrot.slane %v4120_v19, 1 }
 0x1ee   : > { %4486 = vst [vmem:[#allocation4 + $0x19] sm:$0x80] %v4437_v10  ;;  %v3761_v12 = vsel %vm3752_vm2, %v3758_v8, %v3760_v52  ;;  %v2991_v31 = vadd.f32 %v2990_v34, %v11758_v17  ;;  %v4302_v10 = vrot.slane %v4124_v27, 1 }
 0x1ef   : > { %4487 = vst [vmem:[#allocation4 + $0x21] sm:$0xff] %v4438_v55  ;;  %4488 = vst [vmem:[#allocation4 + $0x29] sm:$0xff] %v4439_v9  ;;  %v4007_v11 = vmax.f32 %v3958_v56, 0.0  ;;  %v3903_v54 = vadd.f32 %v3761_v12, %v11253_v1  ;;  %v9736_v43 = vpop.f32.mrf.mxu0  ;;  %v2783_v7 = vpop.f32.mrf.mxu1  ;;  %v4301_v55 = vsel %vm3460_vm1, %v4298_v21, %v4300_v60 }
 0x1f0   : > { %v3762_v25 = vrot.slane %v2991_v31, 2  ;;  %v4128_v12 = vpop.permute.xlu0 %4127 }
 0x1f1   : > { %v4440_v40 = vmul.f32 %v4299_v51, %v4007_v11  ;;  %v3959_v53 = vadd.f32 %v11771_v26, %v3903_v54  ;;  %v2993_v22 = vpop.f32.mrf.mxu0  ;;  %v11799_v36 = vpop.f32.mrf.mxu1  ;;  %v4304_v7 = vrot.slane %v4128_v12, 1 }
 0x1f2   : > { %v3763_v8 = vsel %vm3752_vm2, %v3760_v52, %v3762_v25  ;;  %v2994_v17 = vadd.f32 %v2993_v22, %v11760_v32  ;;  %v4303_v22 = vsel %vm3460_vm1, %v4300_v60, %v4302_v10 }
 0x1f3   : > { %4489 = vst [vmem:[#allocation4 + $0x31] sm:$0xff] %v4440_v40  ;;  %v4008_v9 = vmax.f32 %v3959_v53, 0.0  ;;  %v3904_v49 = vadd.f32 %v3763_v8, %v11268_v15  ;;  %v9737_v1 = vpop.f32.mrf.mxu0  ;;  %v2786_v19 = vpop.f32.mrf.mxu1  ;;  %v4305_v12 = vsel %vm3460_vm1, %v4302_v10, %v4304_v7 }
 0x1f4   : > { %v3764_v56 = vrot.slane %v2994_v17, 2 }
 0x1f5   : > { %v4441_v34 = vmul.f32 %v4301_v55, %v4008_v9  ;;  %v3960_v18 = vadd.f32 %v11771_v26, %v3904_v49  ;;  %v2998_v51 = vpop.f32.mrf.mxu0  ;;  %v11806_v21 = vpop.f32.mrf.mxu1 }
 0x1f6   : > { %v3765_v52 = vsel %vm3752_vm2, %v3762_v25, %v3764_v56  ;;  %v2999_v32 = vadd.f32 %v2998_v51, %v11762_v46  ;;  %v4845_v31 = vld [vmem:[#allocation4 + $0x20] sm:$0xff]  ;;  %v4846_v11 = vld [vmem:[#allocation4 + $0x28] sm:$0xff]  ;;  %v4132_v9 = vpop.permute.xlu1 %4131 }
 0x1f7   : > { %4490 = vst [vmem:[#allocation4 + $0x39] sm:$0xff] %v4441_v34  ;;  %v4009_v15 = vmax.f32 %v3960_v18, 0.0  ;;  %v3905_v54 = vadd.f32 %v3765_v52, %v11279_v39  ;;  %v9740_v43 = vpop.f32.mrf.mxu0  ;;  %v9541_v40 = vpack.c.bf16 %v4845_v31, %v4845_v31  ;;  %v9542_v53 = vpack.c.bf16 %v4846_v11, %v4846_v11  ;;  %v2791_v46 = vpop.f32.mrf.mxu1 }
 0x1f8   : > { %v3766_v27 = vrot.slane %v2999_v32, 2  ;;  %v4306_v19 = vrot.slane %v4132_v9, 1  ;;  %v10231_v46 = vld [vmem:[#allocation2] ss:$12 sps:$4 sm:$0xff]  }
 0x1f9   : > { %v4442_v8 = vmul.f32 %v4303_v22, %v4009_v15  ;;  %v3961_v25 = vadd.f32 %v11771_v26, %v3905_v54  ;;  %v3001_v17 = vpop.f32.mrf.mxu0  ;;  %5095 = vst [vmem:[#allocation2 + $0x10] sm:$0xf] %v9541_v40  ;;  %5096 = vst [vmem:[#allocation2 + $0x1c] sm:$0xf] %v9542_v53  ;;  %v11813_v18 = vpop.f32.mrf.mxu1  ;;  %v10234_v22 = vld [vmem:[%s13024_s4 + $0xb0] ss:$12 sps:$4 sm:$0xff]  }
 0x1fa   : > { %4798 = vst [vmem:[#allocation2 + $0x30] sm:$0xf] %v9541_v40  ;;  %4799 = vst [vmem:[#allocation2 + $0x3c] sm:$0xf] %v9542_v53  ;;  %v3767_v39 = vsel %vm3752_vm2, %v3764_v56, %v3766_v27  ;;  %v3002_v49 = vadd.f32 %v3001_v17, %v11764_v47  ;;  %v4847_v1 = vld [vmem:[#allocation4 + $0x30] sm:$0xff]  ;;  %v11817_v47 = vpop.permute.xlu0 %4135  ;;  %v4307_v17 = vsel %vm3460_vm1, %v4304_v7, %v4306_v19 }
 0x1fb   : > { %4491 = vst [vmem:[#allocation4 + $0x41] sm:$0xff] %v4442_v8  ;;  %v4010_v55 = vmax.f32 %v3961_v25, 0.0  ;;  %v3906_v60 = vadd.f32 %v3767_v39, %v11294_v6  ;;  %v9741_v34 = vpop.f32.mrf.mxu0  ;;  %v9543_v51 = vpack.c.bf16 %v4847_v1, %v4847_v1  ;;  %v2794_v56 = vpop.f32.mrf.mxu1  ;;  %v4308_v43 = vrot.slane %v11817_v47, 1 }
 0x1fc   : > { %v3768_v52 = vrot.slane %v3002_v49, 2 }
 0x1fd   : > { %v4443_v32 = vmul.f32 %v4305_v12, %v4010_v55  ;;  %v3962_v31 = vadd.f32 %v11771_v26, %v3906_v60  ;;  %v3006_v11 = vpop.f32.mrf.mxu0  ;;  %5097 = vst [vmem:[#allocation2 + $0x28] sm:$0xf] %v9543_v51  ;;  %5394 = vst [vmem:[#allocation2 + $0x8] sm:$0xf] %v9543_v51  ;;  %v11826_v8 = vpop.f32.mrf.mxu1  ;;  %v4309_v56 = vsel %vm3460_vm1, %v4306_v19, %v4308_v43 }
 0x1fe   : > { %4800 = vst [vmem:[#allocation2 + $0x48] sm:$0xf] %v9543_v51  ;;  %v3769_v6 = vsel %vm3752_vm2, %v3766_v27, %v3768_v52  ;;  %v3007_v15 = vadd.f32 %v3006_v11, %v11777_v5  ;;  %v5145_v54 = vld [vmem:[#allocation4 + $0x38] sm:$0xff] }
 0x1ff   : > { %4492 = vst [vmem:[#allocation4 + $0x49] sm:$0xff] %v4443_v32  ;;  %v4011_v10 = vmax.f32 %v3962_v31, 0.0  ;;  %v3907_v40 = vadd.f32 %v3769_v6, %v11311_v29  ;;  %v9744_v53 = vpop.f32.mrf.mxu0  ;;  %v9591_v25 = vpack.c.bf16 %v5145_v54, %v5145_v54  ;;  %v2799_v1 = vpop.f32.mrf.mxu1 }
 0x200   : > { %v3770_v27 = vrot.slane %v3007_v15, 2  ;;  %v10233_v5 = vld [vmem:[#allocation2 + $0x4] ss:$12 sps:$4 sm:$0xff]   ;;  %v11830_v29 = vpop.permute.xlu1 %4139 }
 0x201   : > { %v4444_v9 = vmul.f32 %v4307_v17, %v4011_v10  ;;  %v3963_v39 = vadd.f32 %v11771_v26, %v3907_v40  ;;  %v3009_v49 = vpop.f32.mrf.mxu0  ;;  %5395 = vst [vmem:[#allocation2 + $0x14] sm:$0xf] %v9591_v25  ;;  %5098 = vst [vmem:[#allocation2 + $0x34] sm:$0xf] %v9591_v25  ;;  %6456 = vmatprep.mubr.bf16.mxu1 %v10233_v5  ;;  %v4310_v7 = vrot.slane %v11830_v29, 1  ;;  %v11836_v31 = vpop.f32.mrf.mxu1 }
 0x202   : > { %4801 = vst [vmem:[#allocation2 + $0x54] sm:$0xf] %v9591_v25  ;;  %v3771_v55 = vsel %vm3752_vm2, %v3768_v52, %v3770_v27  ;;  %v3010_v60 = vadd.f32 %v3009_v49, %v11784_v2  ;;  %v4849_v34 = vld [vmem:[#allocation4 + $0x40] sm:$0xff]  ;;  %6457 = vmatmul.mubr.bf16.vlgmr.msra.gmra.mxu1 %v10231_v46  ;;  %v10242_v2 = vld [vmem:[%s13024_s4 + $0x98] ss:$12 sps:$4 sm:$0xff]   ;;  %v11844_v10 = vpop.permute.xlu0 %4143 }
 0x203   : > { %4493 = vst [vmem:[#allocation4 + $0x51] sm:$0xff] %v4444_v9  ;;  %v4012_v51 = vmax.f32 %v3963_v39, 0.0  ;;  %v3908_v12 = vadd.f32 %v3771_v55, %v11320_v45  ;;  %v9745_v32 = vpop.f32.mrf.mxu0  ;;  %v9545_v11 = vpack.c.bf16 %v4849_v34, %v4849_v34  ;;  %6991 = vmatpush1.bf16.msra.mxu1 %v10234_v22  ;;  %v2802_v45 = vpop.f32.mrf.mxu1  ;;  %v4312_v22 = vrot.slane %v11844_v10, 1  ;;  %v10250_v39 = vld [vmem:[%s13024_s4 + $0x80] ss:$12 sps:$4 sm:$0xff]  }
 0x204   : > { %v3772_v47 = vrot.slane %v3010_v60, 2  ;;  %v10237_v52 = vld [vmem:[#allocation2 + $0x1c] ss:$12 sps:$4 sm:$0xff]   ;;  %6992 = vmatprep.subr.bf16.mxu1 %v13035_v35  ;;  %v10235_v34 = vld [vmem:[#allocation2 + $0x18] ss:$12 sps:$4 sm:$0xff]  }
 0x205   : > { %v4445_v6 = vmul.f32 %v4309_v56, %v4012_v51  ;;  %v3964_v15 = vadd.f32 %v11771_v26, %v3908_v12  ;;  %v3014_v54 = vpop.f32.mrf.mxu0  ;;  %5099 = vst [vmem:[#allocation2 + $0x40] sm:$0xf] %v9545_v11  ;;  %5396 = vst [vmem:[#allocation2 + $0x20] sm:$0xf] %v9545_v11  ;;  %6466 = vmatprep.mubr.bf16.mxu1 %v10237_v52  ;;  %v11850_v5 = vpop.f32.mrf.mxu1 }
 0x206   : > { %4802 = vst [vmem:[#allocation2 + $0x60] sm:$0xf] %v9545_v11  ;;  %v3773_v19 = vsel %vm3752_vm2, %v3770_v27, %v3772_v47  ;;  %v3015_v40 = vadd.f32 %v3014_v54, %v11793_v62  ;;  %v5147_v53 = vld [vmem:[#allocation4 + $0x48] sm:$0xff]  ;;  %v4311_v27 = vsel %vm3460_vm1, %v4308_v43, %v4310_v7  ;;  %v11863_v12 = vpop.permute.xlu1 %4147  ;;  %v11886_v29 = vpop.permute.xlu0 %4151 }
 0x207   : > { %4494 = vst [vmem:[#allocation4 + $0x59] sm:$0xff] %v4445_v6  ;;  %v4013_v25 = vmax.f32 %v3964_v15, 0.0  ;;  %v3909_v17 = vadd.f32 %v3773_v19, %v11331_v4  ;;  %v9748_v46 = vpop.f32.mrf.mxu0  ;;  %v9593_v9 = vpack.c.bf16 %v5147_v53, %v5147_v53  ;;  %v10255_v62 = vld [vmem:[%s13024_s4 + $0x230] ss:$12 sps:$4 sm:$0xff]   ;;  %6993 = vmatpush1.bf16.msra.mxu1 %v10242_v2  ;;  %v2807_v51 = vpop.f32.mrf.mxu1  ;;  %v4314_v56 = vrot.slane %v11863_v12, 1 }
 0x208   : > { %v3774_v49 = vrot.slane %v3015_v40, 2  ;;  %v10241_v1 = vld [vmem:[#allocation2 + $0x8] ss:$12 sps:$4 sm:$0xff]   ;;  %6994 = vmatprep.subr.bf16.mxu1 %v13035_v35 }
 0x209   : > { %v4446_v4 = vmul.f32 %v4311_v27, %v4013_v25  ;;  %v3965_v55 = vadd.f32 %v11771_v26, %v3909_v17  ;;  %v3017_v60 = vpop.f32.mrf.mxu0  ;;  %5397 = vst [vmem:[#allocation2 + $0x2c] sm:$0xf] %v9593_v9  ;;  %5100 = vst [vmem:[#allocation2 + $0x4c] sm:$0xf] %v9593_v9  ;;  %6740 = vmatmul.mubr.bf16.vlgmr.msra.gmra.mxu0 %v10241_v1  ;;  %v11870_v15 = vpop.f32.mrf.mxu1 }
 0x20a   : > { %4803 = vst [vmem:[#allocation2 + $0x6c] sm:$0xf] %v9593_v9  ;;  %v3775_v32 = vsel %vm3752_vm2, %v3772_v47, %v3774_v49  ;;  %v3018_v43 = vadd.f32 %v3017_v60, %v11799_v36  ;;  %v4851_v11 = vld [vmem:[#allocation4 + $0x50] sm:$0xff]  ;;  %6467 = vmatmul.mubr.bf16.gmra.mxu1 %v10235_v34  ;;  %6749 = vmatprep.mubr.bf16.mxu0 %v13035_v35  ;;  %v10260_v47 = vld [vmem:[%s13024_s4 + $0x68] ss:$12 sps:$4 sm:$0xff]   ;;  %v11908_v10 = vpop.permute.xlu1 %4155  ;;  %v11931_v12 = vpop.permute.xlu0 %4159 }
 0x20b   : > { %4495 = vst [vmem:[#allocation4 + $0x61] sm:$0xff] %v4446_v4  ;;  %v4014_v52 = vmax.f32 %v3965_v55, 0.0  ;;  %v3910_v2 = vadd.f32 %v3775_v32, %v11346_v41  ;;  %v9749_v6 = vpop.f32.mrf.mxu0  ;;  %v9547_v54 = vpack.c.bf16 %v4851_v11, %v4851_v11  ;;  %v4313_v36 = vsel %vm3460_vm1, %v4310_v7, %v4312_v22  ;;  %6995 = vmatpush1.bf16.msra.mxu1 %v10250_v39  ;;  %v10270_v41 = vld [vmem:[%s13024_s4 + $0x218] ss:$12 sps:$4 sm:$0xff]   ;;  %v2810_v17 = vpop.f32.mrf.mxu1  ;;  %v10266_v60 = vld [vmem:[%s13024_s4 + $0x50] ss:$12 sps:$4 sm:$0xff]  }
 0x20c   : > { %v3776_v45 = vrot.slane %v3018_v43, 2  ;;  %v10245_v19 = vld [vmem:[#allocation2 + $0x34] ss:$12 sps:$4 sm:$0xff]   ;;  %9823 = vmatpush3.bf16.msra.mxu0 %v10255_v62  ;;  %6996 = vmatprep.subr.bf16.mxu1 %v13035_v35  ;;  %v4316_v39 = vrot.slane %v11886_v29, 1  ;;  %v10243_v11 = vld [vmem:[#allocation2 + $0x30] ss:$12 sps:$4 sm:$0xff]  }
 0x20d   : > { %v4447_v40 = vmul.f32 %v4313_v36, %v4014_v52  ;;  %v3966_v53 = vadd.f32 %v11771_v26, %v3910_v2  ;;  %v3022_v25 = vpop.f32.mrf.mxu0  ;;  %5101 = vst [vmem:[#allocation2 + $0x58] sm:$0xf] %v9547_v54  ;;  %5398 = vst [vmem:[#allocation2 + $0x38] sm:$0xf] %v9547_v54  ;;  %9824 = vmatprep.subr.bf16.mxu0 %v11715_v14  ;;  %6476 = vmatprep.mubr.bf16.mxu1 %v10245_v19  ;;  %v11892_v4 = vpop.f32.mrf.mxu1 }
 0x20e   : > { %4804 = vst [vmem:[#allocation2 + $0x78] sm:$0xf] %v9547_v54  ;;  %v3777_v7 = vsel %vm3752_vm2, %v3774_v49, %v3776_v45  ;;  %v3023_v46 = vadd.f32 %v3022_v25, %v11806_v21  ;;  %v5149_v9 = vld [vmem:[#allocation4 + $0x58] sm:$0xff]  ;;  %v4315_v49 = vsel %vm3460_vm1, %v4312_v22, %v4314_v56  ;;  %v4318_v54 = vrot.slane %v11908_v10, 1  ;;  %v11950_v29 = vpop.permute.xlu1 %4163  ;;  %v11972_v10 = vpop.permute.xlu0 %4167 }
 0x20f   : > { %4496 = vst [vmem:[#allocation4 + $0x69] sm:$0xff] %v4447_v40  ;;  %v4015_v62 = vmax.f32 %v3966_v53, 0.0  ;;  %v3911_v27 = vadd.f32 %v3777_v7, %v11357_v58  ;;  %v9752_v1 = vpop.f32.mrf.mxu0  ;;  %v9595_v55 = vpack.c.bf16 %v5149_v9, %v5149_v9  ;;  %v10286_v21 = vld [vmem:[%s13024_s4 + $0x200] ss:$12 sps:$4 sm:$0xff]   ;;  %6997 = vmatpush1.bf16.msra.mxu1 %v10260_v47  ;;  %v2815_v52 = vpop.f32.mrf.mxu1 }
 0x210   : > { %v3778_v34 = vrot.slane %v3023_v46, 2  ;;  %v10246_v58 = vld [vmem:[#allocation2 + $0x20] ss:$12 sps:$4 sm:$0xff]   ;;  %9825 = vmatpush3.bf16.msra.mxu0 %v10270_v41  ;;  %6998 = vmatprep.subr.bf16.mxu1 %v13035_v35  ;;  %v4320_v1 = vrot.slane %v11931_v12, 1  ;;  %v10247_v52 = vld [vmem:[#allocation2 + $0x48] ss:$12 sps:$4 sm:$0xff]  }
 0x211   : > { %v4448_v51 = vmul.f32 %v4315_v49, %v4015_v62  ;;  %v3967_v32 = vadd.f32 %v11771_v26, %v3911_v27  ;;  %v3025_v43 = vpop.f32.mrf.mxu0  ;;  %5399 = vst [vmem:[#allocation2 + $0x44] sm:$0xf] %v9595_v55  ;;  %5102 = vst [vmem:[#allocation2 + $0x64] sm:$0xf] %v9595_v55  ;;  %9826 = vmatprep.subr.bf16.mxu0 %v11715_v14  ;;  %6750 = vmatmul.mubr.bf16.gmra.mxu0 %v10246_v58  ;;  %v11915_v41 = vpop.f32.mrf.mxu1 }
 0x212   : > { %4805 = vst [vmem:[#allocation2 + $0x84] sm:$0xf] %v9595_v55  ;;  %v3779_v22 = vsel %vm3752_vm2, %v3776_v45, %v3778_v34  ;;  %v3026_v2 = vadd.f32 %v3025_v43, %v11813_v18  ;;  %v4853_v6 = vld [vmem:[#allocation4 + $0x60] sm:$0xff]  ;;  %6477 = vmatmul.mubr.bf16.gmra.mxu1 %v10243_v11  ;;  %6759 = vmatprep.mubr.bf16.mxu0 %v13035_v35  ;;  %v10275_v45 = vld [vmem:[%s13024_s4 + $0x38] ss:$12 sps:$4 sm:$0xff]  }
 0x213   : > { %4497 = vst [vmem:[#allocation4 + $0x71] sm:$0xff] %v4448_v51  ;;  %v4016_v47 = vmax.f32 %v3967_v32, 0.0  ;;  %v3912_v36 = vadd.f32 %v3779_v22, %v11372_v61  ;;  %v9753_v19 = vpop.f32.mrf.mxu0  ;;  %v9549_v40 = vpack.c.bf16 %v4853_v6, %v4853_v6  ;;  %v4317_v18 = vsel %vm3460_vm1, %v4314_v56, %v4316_v39  ;;  %6999 = vmatpush1.bf16.msra.mxu1 %v10266_v60  ;;  %v10301_v61 = vld [vmem:[%s13024_s4 + $0x1e8] ss:$12 sps:$4 sm:$0xff]   ;;  %v2818_v9 = vpop.f32.mrf.mxu1  ;;  %v10281_v51 = vld [vmem:[%s13024_s4 + $0x20] ss:$12 sps:$4 sm:$0xff]  }
 0x214   : > { %v3780_v53 = vrot.slane %v3026_v2, 2  ;;  %v10249_v25 = vld [vmem:[#allocation2 + $0x4c] ss:$12 sps:$4 sm:$0xff]   ;;  %9827 = vmatpush3.bf16.msra.mxu0 %v10286_v21  ;;  %7000 = vmatprep.subr.bf16.mxu1 %v13035_v35 }
 0x215   : > { %v4449_v17 = vmul.f32 %v4317_v18, %v4016_v47  ;;  %v3968_v7 = vadd.f32 %v11771_v26, %v3912_v36  ;;  %v3030_v46 = vpop.f32.mrf.mxu0  ;;  %5103 = vst [vmem:[#allocation2 + $0x70] sm:$0xf] %v9549_v40  ;;  %5400 = vst [vmem:[#allocation2 + $0x50] sm:$0xf] %v9549_v40  ;;  %9828 = vmatprep.subr.bf16.mxu0 %v11715_v14  ;;  %6486 = vmatprep.mubr.bf16.mxu1 %v10249_v25  ;;  %v11937_v49 = vpop.f32.mrf.mxu1  ;;  %v4322_v47 = vrot.slane %v11950_v29, 1 }
 0x216   : > { %4806 = vst [vmem:[#allocation2 + $0x90] sm:$0xf] %v9549_v40  ;;  %v3781_v56 = vsel %vm3752_vm2, %v3778_v34, %v3780_v53  ;;  %v3031_v62 = vadd.f32 %v3030_v46, %v11826_v8  ;;  %v5151_v27 = vld [vmem:[#allocation4 + $0x68] sm:$0xff]  ;;  %v4319_v8 = vsel %vm3460_vm1, %v4316_v39, %v4318_v54  ;;  %v12008_v29 = vpop.permute.xlu0 %4175 }
 0x217   : > { %4498 = vst [vmem:[#allocation4 + $0x79] sm:$0xff] %v4449_v17  ;;  %v4017_v55 = vmax.f32 %v3968_v7, 0.0  ;;  %v3913_v60 = vadd.f32 %v3781_v56, %v11389_v16  ;;  %v9756_v21 = vpop.f32.mrf.mxu0  ;;  %v9597_v58 = vpack.c.bf16 %v5151_v27, %v5151_v27  ;;  %7001 = vmatpush1.bf16.msra.mxu1 %v10275_v45  ;;  %v2823_v22 = vpop.f32.mrf.mxu1  ;;  %v4324_v27 = vrot.slane %v11972_v10, 1 }
 0x218   : > { %v3782_v34 = vrot.slane %v3031_v62, 2  ;;  %v10251_v32 = vld [vmem:[#allocation2 + $0x38] ss:$12 sps:$4 sm:$0xff]   ;;  %9829 = vmatpush3.bf16.msra.mxu0 %v10301_v61  ;;  %7002 = vmatprep.subr.bf16.mxu1 %v13035_v35 }
 0x219   : > { %v4450_v43 = vmul.f32 %v4319_v8, %v4017_v55  ;;  %v3969_v16 = vadd.f32 %v11771_v26, %v3913_v60  ;;  %v3033_v11 = vpop.f32.mrf.mxu0  ;;  %5401 = vst [vmem:[#allocation2 + $0x5c] sm:$0xf] %v9597_v58  ;;  %5104 = vst [vmem:[#allocation2 + $0x7c] sm:$0xf] %v9597_v58  ;;  %9830 = vmatprep.subr.bf16.mxu0 %v11715_v14  ;;  %6760 = vmatmul.mubr.bf16.gmra.mxu0 %v10251_v32  ;;  %v11957_v45 = vpop.f32.mrf.mxu1  ;;  %v10296_v8 = vld [vmem:[%s13024_s4 + $0x170] ss:$12 sps:$4 sm:$0xff]  }
 0x21a   : > { %4807 = vst [vmem:[#allocation2 + $0x9c] sm:$0xf] %v9597_v58  ;;  %v3783_v39 = vsel %vm3752_vm2, %v3780_v53, %v3782_v34  ;;  %v3034_v2 = vadd.f32 %v3033_v11, %v11836_v31  ;;  %v4855_v6 = vld [vmem:[#allocation4 + $0x70] sm:$0xff]  ;;  %6487 = vmatmul.mubr.bf16.gmra.mxu1 %v10247_v52  ;;  %6769 = vmatprep.mubr.bf16.mxu0 %v13035_v35  ;;  %v11991_v52 = vpop.permute.xlu1 %4171 }
 0x21b   : > { %4499 = vst [vmem:[#allocation4 + $0x81] sm:$0xff] %v4450_v43  ;;  %v4018_v36 = vmax.f32 %v3969_v16, 0.0  ;;  %v3914_v19 = vadd.f32 %v3783_v39, %v11398_v48  ;;  %v9757_v40 = vpop.f32.mrf.mxu0  ;;  %v9551_v18 = vpack.c.bf16 %v4855_v6, %v4855_v6  ;;  %v10316_v53 = vld [vmem:[%s13024_s4 + $0x1d0] ss:$12 sps:$4 sm:$0xff]   ;;  %v4321_v31 = vsel %vm3460_vm1, %v4318_v54, %v4320_v1  ;;  %7003 = vmatpush1.bf16.msra.mxu1 %v10281_v51  ;;  %v10290_v48 = vld [vmem:[%s13024_s4 + $0x8] ss:$12 sps:$4 sm:$0xff]   ;;  %v2826_v9 = vpop.f32.mrf.mxu1 }
 0x21c   : > { %v3784_v25 = vrot.slane %v3034_v2, 2  ;;  %v10254_v61 = vld [vmem:[#allocation2 + $0x64] ss:$12 sps:$4 sm:$0xff]   ;;  %7004 = vmatprep.subr.bf16.mxu1 %v13035_v35  ;;  %9831 = vmatpush3.bf16.msra.mxu0 %v10316_v53  ;;  %v10252_v16 = vld [vmem:[#allocation2 + $0x60] ss:$12 sps:$4 sm:$0xff]   ;;  %v4326_v39 = vrot.slane %v11991_v52, 1  ;;  %v12043_v52 = vpop.permute.xlu0 %4183 }
 0x21d   : > { %v4451_v17 = vmul.f32 %v4321_v31, %v4018_v36  ;;  %v3970_v7 = vadd.f32 %v11771_v26, %v3914_v19  ;;  %v3038_v46 = vpop.f32.mrf.mxu0  ;;  %5105 = vst [vmem:[#allocation2 + $0x88] sm:$0xf] %v9551_v18  ;;  %5402 = vst [vmem:[#allocation2 + $0x68] sm:$0xf] %v9551_v18  ;;  %6496 = vmatprep.mubr.bf16.mxu1 %v10254_v61  ;;  %9832 = vmatprep.subr.bf16.mxu0 %v11715_v14  ;;  %v11979_v58 = vpop.f32.mrf.mxu1  ;;  %v10305_v31 = vld [vmem:[%s13024_s4 + $0x158] ss:$12 sps:$4 sm:$0xff]  }
 0x21e   : > { %4808 = vst [vmem:[#allocation2 + $0xa8] sm:$0xf] %v9551_v18  ;;  %v3785_v54 = vsel %vm3752_vm2, %v3782_v34, %v3784_v25  ;;  %v3039_v56 = vadd.f32 %v3038_v46, %v11850_v5  ;;  %v5153_v62 = vld [vmem:[#allocation4 + $0x78] sm:$0xff]  ;;  %v4323_v14 = vsel %vm3460_vm1, %v4320_v1, %v4322_v47  ;;  %v4325_v18 = vsel %vm3460_vm1, %v4322_v47, %v4324_v27 }
 0x21f   : > { %4500 = vst [vmem:[#allocation4 + $0x89] sm:$0xff] %v4451_v17  ;;  %v4019_v55 = vmax.f32 %v3970_v7, 0.0  ;;  %v3915_v60 = vadd.f32 %v3785_v54, %v11417_v20  ;;  %v9760_v21 = vpop.f32.mrf.mxu0  ;;  %v9599_v51 = vpack.c.bf16 %v5153_v62, %v5153_v62  ;;  %7005 = vmatpush1.bf16.msra.mxu1 %v10290_v48  ;;  %v2831_v11 = vpop.f32.mrf.mxu1  ;;  %v4328_v46 = vrot.slane %v12008_v29, 1 }
 0x220   : > { %v3786_v5 = vrot.slane %v3039_v56, 2  ;;  %v10256_v34 = vld [vmem:[#allocation2 + $0x50] ss:$12 sps:$4 sm:$0xff]   ;;  %7006 = vmatprep.subr.bf16.mxu1 %v13035_v35 }
 0x221   : > { %v4452_v32 = vmul.f32 %v4323_v14, %v4019_v55  ;;  %v3971_v20 = vadd.f32 %v11771_v26, %v3915_v60  ;;  %v3041_v43 = vpop.f32.mrf.mxu0  ;;  %5403 = vst [vmem:[#allocation2 + $0x74] sm:$0xf] %v9599_v51  ;;  %5106 = vst [vmem:[#allocation2 + $0x94] sm:$0xf] %v9599_v51  ;;  %6770 = vmatmul.mubr.bf16.gmra.mxu0 %v10256_v34  ;;  %v11998_v19 = vpop.f32.mrf.mxu1  ;;  %v10311_v55 = vld [vmem:[%s13024_s4 + $0x140] ss:$12 sps:$4 sm:$0xff]  }
 0x222   : > { %4809 = vst [vmem:[#allocation2 + $0xb4] sm:$0xf] %v9599_v51  ;;  %v3787_v12 = vsel %vm3752_vm2, %v3784_v25, %v3786_v5  ;;  %v3042_v1 = vadd.f32 %v3041_v43, %v11870_v15  ;;  %v4857_v22 = vld [vmem:[#allocation4 + $0x80] sm:$0xff]  ;;  %6497 = vmatmul.mubr.bf16.gmra.mxu1 %v10252_v16  ;;  %6779 = vmatprep.mubr.bf16.mxu0 %v13035_v35  ;;  %v12024_v34 = vpop.permute.xlu1 %4179 }
 0x223   : > { %4501 = vst [vmem:[#allocation4 + $0x91] sm:$0xff] %v4452_v32  ;;  %v4020_v2 = vmax.f32 %v3971_v20, 0.0  ;;  %v3916_v6 = vadd.f32 %v3787_v12, %v11426_v13  ;;  %v9761_v36 = vpop.f32.mrf.mxu0  ;;  %v9553_v40 = vpack.c.bf16 %v4857_v22, %v4857_v22  ;;  %7007 = vmatpush2.bf16.msra.mxu1 %v10296_v8  ;;  %v2834_v48 = vpop.f32.mrf.mxu1  ;;  %v4330_v43 = vrot.slane %v12024_v34, 1 }
 0x224   : > { %v3788_v15 = vrot.slane %v3042_v1, 2  ;;  %v10259_v53 = vld [vmem:[#allocation2 + $0x7c] ss:$12 sps:$4 sm:$0xff]   ;;  %7008 = vmatprep.subr.bf16.mxu1 %v13035_v35  ;;  %v12091_v34 = vpop.permute.xlu0 %4191 }
 0x225   : > { %v4453_v25 = vmul.f32 %v4325_v18, %v4020_v2  ;;  %v3972_v13 = vadd.f32 %v11771_v26, %v3916_v6  ;;  %v3046_v61 = vpop.f32.mrf.mxu0  ;;  %5107 = vst [vmem:[#allocation2 + $0xa0] sm:$0xf] %v9553_v40  ;;  %5404 = vst [vmem:[#allocation2 + $0x80] sm:$0xf] %v9553_v40  ;;  %6506 = vmatprep.mubr.bf16.mxu1 %v10259_v53  ;;  %v12014_v56 = vpop.f32.mrf.mxu1 }
 0x226   : > { %4810 = vst [vmem:[#allocation2 + $0xc0] sm:$0xf] %v9553_v40  ;;  %v3789_v47 = vsel %vm3752_vm2, %v3786_v5, %v3788_v15  ;;  %v3047_v17 = vadd.f32 %v3046_v61, %v11892_v4  ;;  %v5155_v7 = vld [vmem:[#allocation4 + $0x88] sm:$0xff]  ;;  %v4327_v4 = vsel %vm3460_vm1, %v4324_v27, %v4326_v39 }
 0x227   : > { %4502 = vst [vmem:[#allocation4 + $0x99] sm:$0xff] %v4453_v25  ;;  %v4021_v9 = vmax.f32 %v3972_v13, 0.0  ;;  %v3917_v10 = vadd.f32 %v3789_v47, %v11439_v24  ;;  %v9764_v54 = vpop.f32.mrf.mxu0  ;;  %v9601_v62 = vpack.c.bf16 %v5155_v7, %v5155_v7  ;;  %7009 = vmatpush2.bf16.msra.mxu1 %v10305_v31  ;;  %v10257_v24 = vld [vmem:[#allocation2 + $0x78] ss:$12 sps:$4 sm:$0xff]   ;;  %v2839_v5 = vpop.f32.mrf.mxu1  ;;  %v4332_v25 = vrot.slane %v12043_v52, 1 }
 0x228   : > { %v3790_v60 = vrot.slane %v3047_v17, 2  ;;  %v10261_v21 = vld [vmem:[#allocation2 + $0x68] ss:$12 sps:$4 sm:$0xff]   ;;  %7010 = vmatprep.subr.bf16.mxu1 %v13035_v35  ;;  %v10329_v7 = vld [vmem:[%s13024_s4 + $0x110] ss:$12 sps:$4 sm:$0xff]  }
 0x229   : > { %v4454_v51 = vmul.f32 %v4327_v4, %v4021_v9  ;;  %v3973_v8 = vadd.f32 %v11771_v26, %v3917_v10  ;;  %v3049_v14 = vpop.f32.mrf.mxu0  ;;  %5405 = vst [vmem:[#allocation2 + $0x8c] sm:$0xf] %v9601_v62  ;;  %5108 = vst [vmem:[#allocation2 + $0xac] sm:$0xf] %v9601_v62  ;;  %6780 = vmatmul.mubr.bf16.gmra.mxu0 %v10261_v21  ;;  %v12031_v1 = vpop.f32.mrf.mxu1  ;;  %v4331_v9 = vsel %vm3460_vm1, %v4328_v46, %v4330_v43  ;;  %v10262_v4 = vld [vmem:[#allocation2 + $0x90] ss:$12 sps:$4 sm:$0xff]  }
 0x22a   : > { %4811 = vst [vmem:[#allocation2 + $0xcc] sm:$0xf] %v9601_v62  ;;  %v3791_v32 = vsel %vm3752_vm2, %v3788_v15, %v3790_v60  ;;  %v3050_v27 = vadd.f32 %v3049_v14, %v11915_v41  ;;  %v4859_v20 = vld [vmem:[#allocation4 + $0x90] sm:$0xff]  ;;  %6507 = vmatmul.mubr.bf16.gmra.mxu1 %v10257_v24  ;;  %6789 = vmatprep.mubr.bf16.mxu0 %v13035_v35  ;;  %v12064_v21 = vpop.permute.xlu1 %4187 }
 0x22b   : > { %4503 = vst [vmem:[#allocation4 + $0xa1] sm:$0xff] %v4454_v51  ;;  %v4022_v16 = vmax.f32 %v3973_v8, 0.0  ;;  %v3918_v11 = vadd.f32 %v3791_v32, %v11448_v63  ;;  %v9765_v12 = vpop.f32.mrf.mxu0  ;;  %v9555_v22 = vpack.c.bf16 %v4859_v20, %v4859_v20  ;;  %v4329_v41 = vsel %vm3460_vm1, %v4326_v39, %v4328_v46  ;;  %7011 = vmatpush2.bf16.msra.mxu1 %v10311_v55  ;;  %v10321_v63 = vld [vmem:[%s13024_s4 + $0x128] ss:$12 sps:$4 sm:$0xff]   ;;  %v2842_v15 = vpop.f32.mrf.mxu1 }
 0x22c   : > { %v3792_v2 = vrot.slane %v3050_v27, 2  ;;  %v10264_v6 = vld [vmem:[#allocation2 + $0x94] ss:$12 sps:$4 sm:$0xff]   ;;  %7012 = vmatprep.subr.bf16.mxu1 %v13035_v35  ;;  %v12068_v8 = vld [vmem:[#allocation4] sm:$0xff] }
 0x22d   : > { %v4455_v36 = vmul.f32 %v4329_v41, %v4022_v16  ;;  %v3974_v40 = vadd.f32 %v11771_v26, %v3918_v11  ;;  %v3054_v18 = vpop.f32.mrf.mxu0  ;;  %5109 = vst [vmem:[#allocation2 + $0xb8] sm:$0xf] %v9555_v22  ;;  %5406 = vst [vmem:[#allocation2 + $0x98] sm:$0xf] %v9555_v22  ;;  %6516 = vmatprep.mubr.bf16.mxu1 %v10264_v6  ;;  %v12049_v47 = vpop.f32.mrf.mxu1  ;;  %v12087_v12 = vld [vmem:[%s13023_s3] ss:$0 sm:$0xff] }
 0x22e   : > { %4812 = vst [vmem:[#allocation2 + $0xd8] sm:$0xf] %v9555_v22  ;;  %v3793_v39 = vsel %vm3752_vm2, %v3790_v60, %v3792_v2  ;;  %v3055_v53 = vadd.f32 %v3054_v18, %v11937_v49  ;;  %v5157_v31 = vld [vmem:[#allocation4 + $0x98] sm:$0xff]  ;;  %v12113_v52 = vpop.permute.xlu1 %4195 }
 0x22f   : > { %4504 = vst [vmem:[#allocation4 + $0xa9] sm:$0xff] %v4455_v36  ;;  %v4023_v13 = vmax.f32 %v3974_v40, 0.0  ;;  %v3919_v61 = vadd.f32 %v3793_v39, %v11461_v33  ;;  %v9768_v48 = vpop.f32.mrf.mxu0  ;;  %v9603_v17 = vpack.c.bf16 %v5157_v31, %v5157_v31  ;;  %v10331_v49 = vld [vmem:[%s13024_s4 + $0x1b8] ss:$12 sps:$4 sm:$0xff]   ;;  %7013 = vmatpush2.bf16.msra.mxu1 %v10321_v63  ;;  %v2847_v60 = vpop.f32.mrf.mxu1  ;;  %v10349_v36 = vld [vmem:[%s13024_s4 + $0x1a0] ss:$12 sps:$4 sm:$0xff]  }
 0x230   : > { %v3794_v10 = vrot.slane %v3055_v53, 2  ;;  %v10265_v33 = vld [vmem:[#allocation2 + $0x80] ss:$12 sps:$4 sm:$0xff]   ;;  %7014 = vmatprep.subr.bf16.mxu1 %v13035_v35  ;;  %9833 = vmatpush3.bf16.msra.mxu0 %v10331_v49  ;;  %v4336_v40 = vrot.slane %v12091_v34, 1  ;;  %v10267_v49 = vld [vmem:[#allocation2 + $0xa8] ss:$12 sps:$4 sm:$0xff]  }
 0x231   : > { %v4456_v54 = vmul.f32 %v4331_v9, %v4023_v13  ;;  %v3975_v62 = vadd.f32 %v11771_v26, %v3919_v61  ;;  %v3057_v55 = vpop.f32.mrf.mxu0  ;;  %5407 = vst [vmem:[#allocation2 + $0xa4] sm:$0xf] %v9603_v17  ;;  %5110 = vst [vmem:[#allocation2 + $0xc4] sm:$0xf] %v9603_v17  ;;  %6790 = vmatmul.mubr.bf16.gmra.mxu0 %v10265_v33  ;;  %9834 = vmatprep.subr.bf16.mxu0 %v12068_v8  ;;  %v4334_v26 = vrot.slane %v12064_v21, 1  ;;  %v12074_v32 = vpop.f32.mrf.mxu1 }
 0x232   : > { %4813 = vst [vmem:[#allocation2 + $0xe4] sm:$0xf] %v9603_v17  ;;  %v3795_v29 = vsel %vm3752_vm2, %v3792_v2, %v3794_v10  ;;  %v3058_v46 = vadd.f32 %v3057_v55, %v11957_v45  ;;  %v4861_v51 = vld [vmem:[#allocation4 + $0xa0] sm:$0xff]  ;;  %6517 = vmatmul.mubr.bf16.gmra.mxu1 %v10262_v4  ;;  %6799 = vmatprep.mubr.bf16.mxu0 %v13035_v35 }
 0x233   : > { %4505 = vst [vmem:[#allocation4 + $0xb1] sm:$0xff] %v4456_v54  ;;  %v4024_v14 = vmax.f32 %v3975_v62, 0.0  ;;  %v3920_v24 = vadd.f32 %v3795_v29, %v11470_v30  ;;  %v9769_v5 = vpop.f32.mrf.mxu0  ;;  %v9557_v27 = vpack.c.bf16 %v4861_v51, %v4861_v51  ;;  %v4333_v45 = vsel %vm3460_vm1, %v4330_v43, %v4332_v25  ;;  %7015 = vmatpush2.bf16.msra.mxu1 %v10329_v7  ;;  %v10336_v30 = vld [vmem:[%s13024_s4 + $0xf8] ss:$12 sps:$4 sm:$0xff]   ;;  %v2850_v2 = vpop.f32.mrf.mxu1 }
 0x234   : > { %v3796_v20 = vrot.slane %v3058_v46, 2  ;;  %v10269_v16 = vld [vmem:[#allocation2 + $0xac] ss:$12 sps:$4 sm:$0xff]   ;;  %7016 = vmatprep.subr.bf16.mxu1 %v13035_v35  ;;  %v4335_v13 = vsel %vm3460_vm1, %v4332_v25, %v4334_v26  ;;  %9835 = vmatpush3.bf16.msra.mxu0 %v10349_v36  ;;  %v4338_v29 = vrot.slane %v12113_v52, 1  ;;  %v4337_v46 = vsel %vm3460_vm1, %v4334_v26, %v4336_v40 }
 0x235   : > { %v4457_v11 = vmul.f32 %v4333_v45, %v4024_v14  ;;  %v3976_v22 = vadd.f32 %v12087_v12, %v3920_v24  ;;  %v3062_v41 = vpop.f32.mrf.mxu0  ;;  %5111 = vst [vmem:[#allocation2 + $0xd0] sm:$0xf] %v9557_v27  ;;  %5408 = vst [vmem:[#allocation2 + $0xb0] sm:$0xf] %v9557_v27  ;;  %6526 = vmatprep.mubr.bf16.mxu1 %v10269_v16  ;;  %v12100_v53 = vpop.f32.mrf.mxu1  ;;  %9836 = vmatprep.subr.bf16.mxu0 %v12068_v8  ;;  %v10272_v36 = vld [vmem:[#allocation2 + $0xc0] ss:$12 sps:$4 sm:$0xff]  }
 0x236   : > { %4814 = vst [vmem:[#allocation2 + $0xf0] sm:$0xf] %v9557_v27  ;;  %v3797_v43 = vsel %vm3752_vm2, %v3794_v10, %v3796_v20  ;;  %v3063_v6 = vadd.f32 %v3062_v41, %v11979_v58  ;;  %v5159_v63 = vld [vmem:[#allocation4 + $0xa8] sm:$0xff]  ;;  %v10344_v58 = vld [vmem:[%s13024_s4 + $0xe0] ss:$12 sps:$4 sm:$0xff]   ;;  %v12127_v27 = vpop.permute.xlu0 %4199  ;;  %v4339_v2 = vsel %vm3460_vm1, %v4336_v40, %v4338_v29 }
 0x237   : > { %4506 = vst [vmem:[#allocation4 + $0xb9] sm:$0xff] %v4457_v11  ;;  %v4025_v18 = vmax.f32 %v3976_v22, 0.0  ;;  %v3921_v15 = vadd.f32 %v3797_v43, %v11495_v23  ;;  %v9772_v39 = vpop.f32.mrf.mxu0  ;;  %v9605_v31 = vpack.c.bf16 %v5159_v63, %v5159_v63  ;;  %7017 = vmatpush2.bf16.msra.mxu1 %v10336_v30  ;;  %v2855_v9 = vpop.f32.mrf.mxu1 }
 0x238   : > { %v3798_v61 = vrot.slane %v3063_v6, 2  ;;  %v10271_v48 = vld [vmem:[#allocation2 + $0x98] ss:$12 sps:$4 sm:$0xff]   ;;  %7018 = vmatprep.subr.bf16.mxu1 %v13035_v35 }
 0x239   : > { %v4458_v17 = vmul.f32 %v4335_v13, %v4025_v18  ;;  %v3977_v23 = vadd.f32 %v12087_v12, %v3921_v15  ;;  %v3065_v7 = vpop.f32.mrf.mxu0  ;;  %5409 = vst [vmem:[#allocation2 + $0xbc] sm:$0xf] %v9605_v31  ;;  %5112 = vst [vmem:[#allocation2 + $0xdc] sm:$0xf] %v9605_v31  ;;  %6800 = vmatmul.mubr.bf16.gmra.mxu0 %v10271_v48  ;;  %v12119_v4 = vpop.f32.mrf.mxu1 }
 0x23a   : > { %4815 = vst [vmem:[#allocation2 + $0xfc] sm:$0xf] %v9605_v31  ;;  %v3799_v25 = vsel %vm3752_vm2, %v3796_v20, %v3798_v61  ;;  %v3066_v10 = vadd.f32 %v3065_v7, %v11998_v19  ;;  %v4863_v33 = vld [vmem:[#allocation4 + $0xb0] sm:$0xff]  ;;  %6527 = vmatmul.mubr.bf16.gmra.mxu1 %v10267_v49  ;;  %6809 = vmatprep.mubr.bf16.mxu0 %v13035_v35  ;;  %v4340_v20 = vrot.slane %v12127_v27, 1  ;;  %v12137_v15 = vpop.permute.xlu1 %4203 }
 0x23b   : > { %4507 = vst [vmem:[#allocation4 + $0xc1] sm:$0xff] %v4458_v17  ;;  %v4026_v54 = vmax.f32 %v3977_v23, 0.0  ;;  %v3922_v62 = vadd.f32 %v3799_v25, %v11504_v44  ;;  %v9773_v55 = vpop.f32.mrf.mxu0  ;;  %v9559_v60 = vpack.c.bf16 %v4863_v33, %v4863_v33  ;;  %7019 = vmatpush2.bf16.msra.mxu1 %v10344_v58  ;;  %v2858_v5 = vpop.f32.mrf.mxu1  ;;  %v10354_v17 = vld [vmem:[%s13024_s4 + $0xc8] ss:$12 sps:$4 sm:$0xff]   ;;  %v4342_v23 = vrot.slane %v12137_v15, 1 }
 0x23c   : > { %v3800_v19 = vrot.slane %v3066_v10, 2  ;;  %v10274_v51 = vld [vmem:[#allocation2 + $0xc4] ss:$12 sps:$4 sm:$0xff]   ;;  %7020 = vmatprep.subr.bf16.mxu1 %v13035_v35  ;;  %v4208_v10 = vpop.permute.xlu0 %4207 }
 0x23d   : > { %v4459_v14 = vmul.f32 %v4337_v46, %v4026_v54  ;;  %v3978_v24 = vadd.f32 %v12087_v12, %v3922_v62  ;;  %v3070_v44 = vpop.f32.mrf.mxu0  ;;  %5113 = vst [vmem:[#allocation2 + $0xe8] sm:$0xf] %v9559_v60  ;;  %5410 = vst [vmem:[#allocation2 + $0xc8] sm:$0xf] %v9559_v60  ;;  %6536 = vmatprep.mubr.bf16.mxu1 %v10274_v51  ;;  %v12133_v22 = vpop.f32.mrf.mxu1  ;;  %v4344_v55 = vrot.slane %v4208_v10, 1 }
 0x23e   : > { %4816 = vst [vmem:[#allocation2 + $0x108] sm:$0xf] %v9559_v60  ;;  %v3801_v45 = vsel %vm3752_vm2, %v3798_v61, %v3800_v19  ;;  %v3071_v21 = vadd.f32 %v3070_v44, %v12014_v56  ;;  %v5161_v26 = vld [vmem:[#allocation4 + $0xb8] sm:$0xff] }
 0x23f   : > { %4508 = vst [vmem:[#allocation4 + $0xc9] sm:$0xff] %v4459_v14  ;;  %v4027_v16 = vmax.f32 %v3978_v24, 0.0  ;;  %v3923_v30 = vadd.f32 %v3801_v45, %v11517_v38  ;;  %v9776_v11 = vpop.f32.mrf.mxu0  ;;  %v9607_v41 = vpack.c.bf16 %v5161_v26, %v5161_v26  ;;  %v2863_v18 = vpop.f32.mrf.mxu1  ;;  %7021 = vmatpush2.bf16.msra.mxu1 %v10354_v17  ;;  %v4343_v14 = vsel %vm3460_vm1, %v4340_v20, %v4342_v23  ;;  %v10277_v45 = vld [vmem:[#allocation2 + $0xd8] ss:$12 sps:$4 sm:$0xff]  }
 0x240   : > { %v3802_v34 = vrot.slane %v3071_v21, 2  ;;  %v10276_v43 = vld [vmem:[#allocation2 + $0xb0] ss:$12 sps:$4 sm:$0xff]   ;;  %9938 = vmatprep.subr.bf16.mxu1 %v12068_v8  ;;  %v12159_v8 = vpop.permute.xlu1 %4211 }
 0x241   : > { %v4460_v6 = vmul.f32 %v4339_v2, %v4027_v16  ;;  %v3979_v63 = vadd.f32 %v12087_v12, %v3923_v30  ;;  %v3073_v56 = vpop.f32.mrf.mxu0  ;;  %5411 = vst [vmem:[#allocation2 + $0xd4] sm:$0xf] %v9607_v41  ;;  %5114 = vst [vmem:[#allocation2 + $0xf4] sm:$0xf] %v9607_v41  ;;  %6810 = vmatmul.mubr.bf16.gmra.mxu0 %v10276_v43  ;;  %v12143_v61 = vpop.f32.mrf.mxu1  ;;  %v4345_v43 = vsel %vm3460_vm1, %v4342_v23, %v4344_v55 }
 0x242   : > { %4817 = vst [vmem:[#allocation2 + $0x114] sm:$0xf] %v9607_v41  ;;  %v3803_v38 = vsel %vm3752_vm2, %v3800_v19, %v3802_v34  ;;  %v3074_v39 = vadd.f32 %v3073_v56, %v12031_v1  ;;  %v4865_v31 = vld [vmem:[#allocation4 + $0xc0] sm:$0xff]  ;;  %6537 = vmatmul.mubr.bf16.gmra.mxu1 %v10272_v36  ;;  %6819 = vmatprep.mubr.bf16.mxu0 %v13035_v35 }
 0x243   : > { %4509 = vst [vmem:[#allocation4 + $0xd1] sm:$0xff] %v4460_v6  ;;  %v4028_v40 = vmax.f32 %v3979_v63, 0.0  ;;  %v3924_v58 = vadd.f32 %v3803_v38, %v11532_v28  ;;  %v9777_v13 = vpop.f32.mrf.mxu0  ;;  %v9561_v48 = vpack.c.bf16 %v4865_v31, %v4865_v31  ;;  %v4341_v1 = vsel %vm3460_vm1, %v4338_v29, %v4340_v20  ;;  %v2866_v25 = vpop.f32.mrf.mxu1 }
 0x244   : > { %v3804_v7 = vrot.slane %v3074_v39, 2  ;;  %v10279_v49 = vld [vmem:[#allocation2 + $0xdc] ss:$12 sps:$4 sm:$0xff]   ;;  %v12180_v10 = vpop.permute.xlu1 %4219 }
 0x245   : > { %v4461_v9 = vmul.f32 %v4341_v1, %v4028_v40  ;;  %v3980_v28 = vadd.f32 %v12087_v12, %v3924_v58  ;;  %v3078_v52 = vpop.f32.mrf.mxu0  ;;  %5115 = vst [vmem:[#allocation2 + $0x100] sm:$0xf] %v9561_v48  ;;  %5412 = vst [vmem:[#allocation2 + $0xe0] sm:$0xf] %v9561_v48  ;;  %6546 = vmatprep.mubr.bf16.mxu1 %v10279_v49  ;;  %v12155_v19 = vpop.f32.mrf.mxu1  ;;  %v13053_v58 = vld [vmem:[#allocation5_spill] sm:$0xff] }
 0x246   : > { %4818 = vst [vmem:[#allocation2 + $0x120] sm:$0xf] %v9561_v48  ;;  %v3805_v33 = vsel %vm3752_vm2, %v3802_v34, %v3804_v7  ;;  %v3079_v54 = vadd.f32 %v3078_v52, %v12049_v47  ;;  %v5163_v62 = vld [vmem:[#allocation4 + $0xc8] sm:$0xff]  ;;  %v4346_v34 = vrot.slane %v12159_v8, 1 }
 0x247   : > { %4510 = vst [vmem:[#allocation4 + $0xd9] sm:$0xff] %v4461_v9  ;;  %v4029_v60 = vmax.f32 %v3980_v28, 0.0  ;;  %v3925_v29 = vadd.f32 %v3805_v33, %v11554_v57  ;;  %v9780_v46 = vpop.f32.mrf.mxu0  ;;  %v9609_v51 = vpack.c.bf16 %v5163_v62, %v5163_v62  ;;  %v2871_v21 = vpop.f32.mrf.mxu1  ;;  %v10282_v52 = vld [vmem:[#allocation2 + $0xf0] ss:$12 sps:$4 sm:$0xff]   ;;  %v10357_v8 = vld [vmem:[%s13024_s4 + $0x188] ss:$12 sps:$4 sm:$0xff]  }
 0x248   : > { %v3806_v24 = vrot.slane %v3079_v54, 2  ;;  %v10280_v44 = vld [vmem:[#allocation2 + $0xc8] ss:$12 sps:$4 sm:$0xff]   ;;  %v4347_v1 = vsel %vm3460_vm1, %v4344_v55, %v4346_v34  ;;  %9837 = vmatpush3.bf16.msra.mxu0 %v10357_v8 }
 0x249   : > { %v4462_v5 = vmul.f32 %v4343_v14, %v4029_v60  ;;  %v3981_v47 = vadd.f32 %v12087_v12, %v3925_v29  ;;  %v3081_v27 = vpop.f32.mrf.mxu0  ;;  %5413 = vst [vmem:[#allocation2 + $0xec] sm:$0xf] %v9609_v51  ;;  %5116 = vst [vmem:[#allocation2 + $0x10c] sm:$0xf] %v9609_v51  ;;  %6820 = vmatmul.mubr.bf16.gmra.mxu0 %v10280_v44  ;;  %v12165_v41 = vpop.f32.mrf.mxu1  ;;  %v13054_v60 = vld [vmem:[#allocation6_spill] sm:$0xff] }
 0x24a   : > { %4819 = vst [vmem:[#allocation2 + $0x12c] sm:$0xf] %v9609_v51  ;;  %v3807_v57 = vsel %vm3752_vm2, %v3804_v7, %v3806_v24  ;;  %v3082_v26 = vadd.f32 %v3081_v27, %v12074_v32  ;;  %v4867_v16 = vld [vmem:[#allocation4 + $0xd0] sm:$0xff]  ;;  %6547 = vmatmul.mubr.bf16.gmra.mxu1 %v10277_v45  ;;  %6829 = vmatprep.mubr.bf16.mxu0 %v13035_v35 }
 0x24b   : > { %4511 = vst [vmem:[#allocation4 + $0xe1] sm:$0xff] %v4462_v5  ;;  %v4030_v20 = vmax.f32 %v3981_v47, 0.0  ;;  %v3926_v30 = vadd.f32 %v3807_v57, %v11567_v3  ;;  %v9781_v11 = vpop.f32.mrf.mxu0  ;;  %v9563_v2 = vpack.c.bf16 %v4867_v16, %v4867_v16  ;;  %v2874_v18 = vpop.f32.mrf.mxu1 }
 0x24c   : > { %v3808_v6 = vrot.slane %v3082_v26, 2  ;;  %v10284_v63 = vld [vmem:[#allocation2 + $0xf4] ss:$12 sps:$4 sm:$0xff]   ;;  %v12170_v3 = vpop.permute.xlu0 %4215 }
 0x24d   : > { %v4463_v32 = vmul.f32 %v4345_v43, %v4030_v20  ;;  %v3982_v56 = vadd.f32 %v12087_v12, %v3926_v30  ;;  %v3086_v36 = vpop.f32.mrf.mxu0  ;;  %5117 = vst [vmem:[#allocation2 + $0x118] sm:$0xf] %v9563_v2  ;;  %5414 = vst [vmem:[#allocation2 + $0xf8] sm:$0xf] %v9563_v2  ;;  %6556 = vmatprep.mubr.bf16.mxu1 %v10284_v63  ;;  %v4348_v31 = vrot.slane %v12170_v3, 1  ;;  %v12176_v17 = vpop.f32.mrf.mxu1 }
 0x24e   : > { %4820 = vst [vmem:[#allocation2 + $0x138] sm:$0xf] %v9563_v2  ;;  %v3809_v15 = vsel %vm3752_vm2, %v3806_v24, %v3808_v6  ;;  %v3087_v38 = vadd.f32 %v3086_v36, %v12100_v53  ;;  %v5165_v39 = vld [vmem:[#allocation4 + $0xd8] sm:$0xff]  ;;  %v4350_v24 = vrot.slane %v12180_v10, 1 }
 0x24f   : > { %4512 = vst [vmem:[#allocation4 + $0xe9] sm:$0xff] %v4463_v32  ;;  %v4031_v40 = vmax.f32 %v3982_v56, 0.0  ;;  %v3927_v13 = vadd.f32 %v3809_v15, %v13053_v58  ;;  %v9784_v48 = vpop.f32.mrf.mxu0  ;;  %v9611_v23 = vpack.c.bf16 %v5165_v39, %v5165_v39  ;;  %v2879_v25 = vpop.f32.mrf.mxu1  ;;  %v4349_v44 = vsel %vm3460_vm1, %v4346_v34, %v4348_v31  ;;  %v13055_v2 = vld [vmem:[#allocation7_spill] sm:$0xff]  ;;  %v10287_v15 = vld [vmem:[#allocation2 + $0x108] ss:$12 sps:$4 sm:$0xff]  }
 0x250   : > { %v3810_v7 = vrot.slane %v3087_v38, 2  ;;  %v10285_v49 = vld [vmem:[#allocation2 + $0xe0] ss:$12 sps:$4 sm:$0xff]   ;;  %v4224_v57 = vpop.permute.xlu0 %4223  ;;  %v4351_v32 = vsel %vm3460_vm1, %v4348_v31, %v4350_v24  ;;  %v12201_v39 = vpop.permute.xlu1 %4227 }
 0x251   : > { %v4464_v9 = vmul.f32 %v4347_v1, %v4031_v40  ;;  %v3983_v28 = vadd.f32 %v12087_v12, %v3927_v13  ;;  %v3089_v53 = vpop.f32.mrf.mxu0  ;;  %5415 = vst [vmem:[#allocation2 + $0x104] sm:$0xf] %v9611_v23  ;;  %5118 = vst [vmem:[#allocation2 + $0x124] sm:$0xf] %v9611_v23  ;;  %6830 = vmatmul.mubr.bf16.gmra.mxu0 %v10285_v49  ;;  %v12186_v51 = vpop.f32.mrf.mxu1  ;;  %v4352_v30 = vrot.slane %v4224_v57, 1  ;;  %v13056_v48 = vld [vmem:[#allocation8_spill] sm:$0xff] }
 0x252   : > { %4821 = vst [vmem:[#allocation2 + $0x144] sm:$0xf] %v9611_v23  ;;  %v3811_v33 = vsel %vm3752_vm2, %v3808_v6, %v3810_v7  ;;  %v3090_v54 = vadd.f32 %v3089_v53, %v12119_v4  ;;  %v4869_v62 = vld [vmem:[#allocation4 + $0xe0] sm:$0xff]  ;;  %6557 = vmatmul.mubr.bf16.gmra.mxu1 %v10282_v52  ;;  %6839 = vmatprep.mubr.bf16.mxu0 %v13035_v35 }
 0x253   : > { %4513 = vst [vmem:[#allocation4 + $0xf1] sm:$0xff] %v4464_v9  ;;  %v4032_v55 = vmax.f32 %v3983_v28, 0.0  ;;  %v3928_v29 = vadd.f32 %v3811_v33, %v13054_v60  ;;  %v9785_v46 = vpop.f32.mrf.mxu0  ;;  %v9565_v14 = vpack.c.bf16 %v4869_v62, %v4869_v62  ;;  %v2882_v21 = vpop.f32.mrf.mxu1  ;;  %v4354_v9 = vrot.slane %v12201_v39, 1 }
 0x254   : > { %v3812_v5 = vrot.slane %v3090_v54, 2  ;;  %v10289_v47 = vld [vmem:[#allocation2 + $0x10c] ss:$12 sps:$4 sm:$0xff]   ;;  %v4353_v28 = vsel %vm3460_vm1, %v4350_v24, %v4352_v30  ;;  %v4232_v54 = vpop.permute.xlu0 %4231 }
 0x255   : > { %v4465_v4 = vmul.f32 %v4349_v44, %v4032_v55  ;;  %v3984_v27 = vadd.f32 %v12087_v12, %v3928_v29  ;;  %v3094_v45 = vpop.f32.mrf.mxu0  ;;  %5119 = vst [vmem:[#allocation2 + $0x130] sm:$0xf] %v9565_v14  ;;  %5416 = vst [vmem:[#allocation2 + $0x110] sm:$0xf] %v9565_v14  ;;  %6566 = vmatprep.mubr.bf16.mxu1 %v10289_v47  ;;  %v12197_v6 = vpop.f32.mrf.mxu1  ;;  %v4356_v29 = vrot.slane %v4232_v54, 1 }
 0x256   : > { %4822 = vst [vmem:[#allocation2 + $0x150] sm:$0xf] %v9565_v14  ;;  %v3813_v26 = vsel %vm3752_vm2, %v3810_v7, %v3812_v5  ;;  %v3095_v16 = vadd.f32 %v3094_v45, %v12133_v22  ;;  %v5167_v20 = vld [vmem:[#allocation4 + $0xe8] sm:$0xff] }
 0x257   : > { %4514 = vst [vmem:[#allocation4 + $0xf9] sm:$0xff] %v4465_v4  ;;  %v4033_v11 = vmax.f32 %v3984_v27, 0.0  ;;  %v3929_v34 = vadd.f32 %v3813_v26, %v13055_v2  ;;  %v9788_v43 = vpop.f32.mrf.mxu0  ;;  %v9613_v63 = vpack.c.bf16 %v5167_v20, %v5167_v20  ;;  %v2887_v38 = vpop.f32.mrf.mxu1  ;;  %v13057_v14 = vld [vmem:[#allocation9_spill] sm:$0xff]  ;;  %v4355_v4 = vsel %vm3460_vm1, %v4352_v30, %v4354_v9 }
 0x258   : > { %v3814_v56 = vrot.slane %v3095_v16, 2  ;;  %v10291_v36 = vld [vmem:[#allocation2 + $0xf8] ss:$12 sps:$4 sm:$0xff]   ;;  %v12219_v16 = vpop.permute.xlu1 %4235 }
 0x259   : > { %v4466_v18 = vmul.f32 %v4351_v32, %v4033_v11  ;;  %v3985_v3 = vadd.f32 %v12087_v12, %v3929_v34  ;;  %v3097_v22 = vpop.f32.mrf.mxu0  ;;  %5417 = vst [vmem:[#allocation2 + $0x11c] sm:$0xf] %v9613_v63  ;;  %5120 = vst [vmem:[#allocation2 + $0x13c] sm:$0xf] %v9613_v63  ;;  %6840 = vmatmul.mubr.bf16.gmra.mxu0 %v10291_v36  ;;  %v12207_v7 = vpop.f32.mrf.mxu1  ;;  %v13058_v34 = vld [vmem:[#allocation10_spill] sm:$0xff]  ;;  %v4358_v36 = vrot.slane %v12219_v16, 1 }
 0x25a   : > { %4823 = vst [vmem:[#allocation2 + $0x15c] sm:$0xf] %v9613_v63  ;;  %v3815_v40 = vsel %vm3752_vm2, %v3812_v5, %v3814_v56  ;;  %v3098_v58 = vadd.f32 %v3097_v22, %v12143_v61  ;;  %v4871_v13 = vld [vmem:[#allocation4 + $0xf0] sm:$0xff]  ;;  %6567 = vmatmul.mubr.bf16.gmra.mxu1 %v10287_v15  ;;  %6849 = vmatprep.mubr.bf16.mxu0 %v13035_v35 }
 0x25b   : > { %4515 = vst [vmem:[#allocation4 + $0x101] sm:$0xff] %v4466_v18  ;;  %v4034_v31 = vmax.f32 %v3985_v3, 0.0  ;;  %v3930_v23 = vadd.f32 %v3815_v40, %v13056_v48  ;;  %v9789_v1 = vpop.f32.mrf.mxu0  ;;  %v9567_v49 = vpack.c.bf16 %v4871_v13, %v4871_v13  ;;  %v2890_v33 = vpop.f32.mrf.mxu1  ;;  %v4357_v18 = vsel %vm3460_vm1, %v4354_v9, %v4356_v29 }
 0x25c   : > { %v3816_v53 = vrot.slane %v3098_v58, 2  ;;  %v10294_v52 = vld [vmem:[#allocation2 + $0x124] ss:$12 sps:$4 sm:$0xff]   ;;  %v4240_v40 = vpop.permute.xlu0 %4239 }
 0x25d   : > { %v4467_v61 = vmul.f32 %v4353_v28, %v4034_v31  ;;  %v3986_v25 = vadd.f32 %v12087_v12, %v3930_v23  ;;  %v3102_v10 = vpop.f32.mrf.mxu0  ;;  %5121 = vst [vmem:[#allocation2 + $0x148] sm:$0xf] %v9567_v49  ;;  %5418 = vst [vmem:[#allocation2 + $0x128] sm:$0xf] %v9567_v49  ;;  %6576 = vmatprep.mubr.bf16.mxu1 %v10294_v52  ;;  %v12215_v5 = vpop.f32.mrf.mxu1  ;;  %v4360_v48 = vrot.slane %v4240_v40, 1  ;;  %v13059_v1 = vld [vmem:[#allocation11_spill] sm:$0xff] }
 0x25e   : > { %4824 = vst [vmem:[#allocation2 + $0x168] sm:$0xf] %v9567_v49  ;;  %v3817_v62 = vsel %vm3752_vm2, %v3814_v56, %v3816_v53  ;;  %v3103_v55 = vadd.f32 %v3102_v10, %v12155_v19  ;;  %v5169_v60 = vld [vmem:[#allocation4 + $0xf8] sm:$0xff]  ;;  %v4359_v52 = vsel %vm3460_vm1, %v4356_v29, %v4358_v36 }
 0x25f   : > { %4516 = vst [vmem:[#allocation4 + $0x109] sm:$0xff] %v4467_v61  ;;  %v4035_v46 = vmax.f32 %v3986_v25, 0.0  ;;  %v3931_v24 = vadd.f32 %v3817_v62, %v13057_v14  ;;  %v9792_v44 = vpop.f32.mrf.mxu0  ;;  %v9615_v47 = vpack.c.bf16 %v5169_v60, %v5169_v60  ;;  %v10292_v19 = vld [vmem:[#allocation2 + $0x120] ss:$12 sps:$4 sm:$0xff]   ;;  %v2895_v26 = vpop.f32.mrf.mxu1 }
 0x260   : > { %v3818_v27 = vrot.slane %v3103_v55, 2  ;;  %v10295_v45 = vld [vmem:[#allocation2 + $0x110] ss:$12 sps:$4 sm:$0xff]   ;;  %v12237_v55 = vpop.permute.xlu1 %4243 }
 0x261   : > { %v4468_v21 = vmul.f32 %v4355_v4, %v4035_v46  ;;  %v3987_v8 = vadd.f32 %v12087_v12, %v3931_v24  ;;  %v3105_v57 = vpop.f32.mrf.mxu0  ;;  %5419 = vst [vmem:[#allocation2 + $0x134] sm:$0xf] %v9615_v47  ;;  %5122 = vst [vmem:[#allocation2 + $0x154] sm:$0xf] %v9615_v47  ;;  %6850 = vmatmul.mubr.bf16.gmra.mxu0 %v10295_v45  ;;  %v12225_v32 = vpop.f32.mrf.mxu1  ;;  %v13060_v24 = vld [vmem:[#allocation12_spill] sm:$0xff]  ;;  %v4362_v45 = vrot.slane %v12237_v55, 1 }
 0x262   : > { %4825 = vst [vmem:[#allocation2 + $0x174] sm:$0xf] %v9615_v47  ;;  %v3819_v20 = vsel %vm3752_vm2, %v3816_v53, %v3818_v27  ;;  %v3106_v11 = vadd.f32 %v3105_v57, %v12165_v41  ;;  %v4873_v2 = vld [vmem:[#allocation4 + $0x100] sm:$0xff]  ;;  %6577 = vmatmul.mubr.bf16.gmra.mxu1 %v10292_v19  ;;  %6859 = vmatprep.mubr.bf16.mxu0 %v13035_v35 }
 0x263   : > { %4517 = vst [vmem:[#allocation4 + $0x111] sm:$0xff] %v4468_v21  ;;  %v4036_v30 = vmax.f32 %v3987_v8, 0.0  ;;  %v3932_v43 = vadd.f32 %v3819_v20, %v13058_v34  ;;  %v9793_v63 = vpop.f32.mrf.mxu0  ;;  %v9569_v56 = vpack.c.bf16 %v4873_v2, %v4873_v2  ;;  %v2898_v39 = vpop.f32.mrf.mxu1  ;;  %v4361_v21 = vsel %vm3460_vm1, %v4358_v36, %v4360_v48 }
 0x264   : > { %v3820_v3 = vrot.slane %v3106_v11, 2  ;;  %v10299_v22 = vld [vmem:[#allocation2 + $0x13c] ss:$12 sps:$4 sm:$0xff]   ;;  %v4248_v20 = vpop.permute.xlu0 %4247  ;;  %v13061_v63 = vld [vmem:[#allocation13_spill] sm:$0xff] }
 0x265   : > { %v4469_v41 = vmul.f32 %v4357_v18, %v4036_v30  ;;  %v3988_v15 = vadd.f32 %v12087_v12, %v3932_v43  ;;  %v3110_v38 = vpop.f32.mrf.mxu0  ;;  %5123 = vst [vmem:[#allocation2 + $0x160] sm:$0xf] %v9569_v56  ;;  %5420 = vst [vmem:[#allocation2 + $0x140] sm:$0xf] %v9569_v56  ;;  %6586 = vmatprep.mubr.bf16.mxu1 %v10299_v22  ;;  %v12233_v28 = vpop.f32.mrf.mxu1  ;;  %v4364_v34 = vrot.slane %v4248_v20, 1 }
 0x266   : > { %4826 = vst [vmem:[#allocation2 + $0x180] sm:$0xf] %v9569_v56  ;;  %v3821_v58 = vsel %vm3752_vm2, %v3818_v27, %v3820_v3  ;;  %v3111_v13 = vadd.f32 %v3110_v38, %v12176_v17  ;;  %v5171_v31 = vld [vmem:[#allocation4 + $0x108] sm:$0xff]  ;;  %v10297_v17 = vld [vmem:[#allocation2 + $0x138] ss:$12 sps:$4 sm:$0xff]   ;;  %v4363_v22 = vsel %vm3460_vm1, %v4360_v48, %v4362_v45 }
 0x267   : > { %4518 = vst [vmem:[#allocation4 + $0x119] sm:$0xff] %v4469_v41  ;;  %v4037_v23 = vmax.f32 %v3988_v15, 0.0  ;;  %v3933_v49 = vadd.f32 %v3821_v58, %v13059_v1  ;;  %v9796_v9 = vpop.f32.mrf.mxu0  ;;  %v9617_v53 = vpack.c.bf16 %v5171_v31, %v5171_v31  ;;  %v2903_v62 = vpop.f32.mrf.mxu1 }
 0x268   : > { %v3822_v61 = vrot.slane %v3111_v13, 2  ;;  %v10300_v25 = vld [vmem:[#allocation2 + $0x128] ss:$12 sps:$4 sm:$0xff]   ;;  %v12255_v13 = vpop.permute.xlu1 %4251 }
 0x269   : > { %v4470_v10 = vmul.f32 %v4359_v52, %v4037_v23  ;;  %v3989_v33 = vadd.f32 %v12087_v12, %v3933_v49  ;;  %v3113_v54 = vpop.f32.mrf.mxu0  ;;  %5421 = vst [vmem:[#allocation2 + $0x14c] sm:$0xf] %v9617_v53  ;;  %5124 = vst [vmem:[#allocation2 + $0x16c] sm:$0xf] %v9617_v53  ;;  %6860 = vmatmul.mubr.bf16.gmra.mxu0 %v10300_v25  ;;  %v12243_v4 = vpop.f32.mrf.mxu1  ;;  %v13062_v49 = vld [vmem:[#allocation14_spill] sm:$0xff]  ;;  %v4366_v25 = vrot.slane %v12255_v13, 1 }
 0x26a   : > { %4827 = vst [vmem:[#allocation2 + $0x18c] sm:$0xf] %v9617_v53  ;;  %v3823_v60 = vsel %vm3752_vm2, %v3820_v3, %v3822_v61  ;;  %v3114_v46 = vadd.f32 %v3113_v54, %v12186_v51  ;;  %v4875_v14 = vld [vmem:[#allocation4 + $0x110] sm:$0xff]  ;;  %6587 = vmatmul.mubr.bf16.gmra.mxu1 %v10297_v17  ;;  %6869 = vmatprep.mubr.bf16.mxu0 %v13035_v35 }
 0x26b   : > { %4519 = vst [vmem:[#allocation4 + $0x121] sm:$0xff] %v4470_v10  ;;  %v4038_v29 = vmax.f32 %v3989_v33, 0.0  ;;  %v3934_v44 = vadd.f32 %v3823_v60, %v13060_v24  ;;  %v9797_v47 = vpop.f32.mrf.mxu0  ;;  %v9571_v27 = vpack.c.bf16 %v4875_v14, %v4875_v14  ;;  %v2906_v16 = vpop.f32.mrf.mxu1  ;;  %v4365_v10 = vsel %vm3460_vm1, %v4362_v45, %v4364_v34 }
 0x26c   : > { %v3824_v8 = vrot.slane %v3114_v46, 2  ;;  %v10304_v57 = vld [vmem:[#allocation2 + $0x154] ss:$12 sps:$4 sm:$0xff]   ;;  %v4256_v60 = vpop.permute.xlu0 %4255 }
 0x26d   : > { %v4471_v51 = vmul.f32 %v4361_v21, %v4038_v29  ;;  %v3990_v19 = vadd.f32 %v12087_v12, %v3934_v44  ;;  %v3118_v26 = vpop.f32.mrf.mxu0  ;;  %5125 = vst [vmem:[#allocation2 + $0x178] sm:$0xf] %v9571_v27  ;;  %5422 = vst [vmem:[#allocation2 + $0x158] sm:$0xf] %v9571_v27  ;;  %6596 = vmatprep.mubr.bf16.mxu1 %v10304_v57  ;;  %v12251_v18 = vpop.f32.mrf.mxu1  ;;  %v4368_v24 = vrot.slane %v4256_v60, 1  ;;  %v13063_v47 = vld [vmem:[#allocation15_spill] sm:$0xff] }
 0x26e   : > { %4828 = vst [vmem:[#allocation2 + $0x198] sm:$0xf] %v9571_v27  ;;  %v3825_v11 = vsel %vm3752_vm2, %v3822_v61, %v3824_v8  ;;  %v3119_v2 = vadd.f32 %v3118_v26, %v12197_v6  ;;  %v5173_v30 = vld [vmem:[#allocation4 + $0x118] sm:$0xff]  ;;  %v10302_v6 = vld [vmem:[#allocation2 + $0x150] ss:$12 sps:$4 sm:$0xff]   ;;  %v4367_v57 = vsel %vm3460_vm1, %v4364_v34, %v4366_v25 }
 0x26f   : > { %4520 = vst [vmem:[#allocation4 + $0x129] sm:$0xff] %v4471_v51  ;;  %v4039_v43 = vmax.f32 %v3990_v19, 0.0  ;;  %v3935_v56 = vadd.f32 %v3825_v11, %v13061_v63  ;;  %v9800_v36 = vpop.f32.mrf.mxu0  ;;  %v9619_v3 = vpack.c.bf16 %v5173_v30, %v5173_v30  ;;  %v2911_v58 = vpop.f32.mrf.mxu1 }
 0x270   : > { %v3826_v41 = vrot.slane %v3119_v2, 2  ;;  %v10306_v15 = vld [vmem:[#allocation2 + $0x140] ss:$12 sps:$4 sm:$0xff]   ;;  %v12273_v2 = vpop.permute.xlu1 %4259 }
 0x271   : > { %v4472_v38 = vmul.f32 %v4363_v22, %v4039_v43  ;;  %v3991_v39 = vadd.f32 %v12087_v12, %v3935_v56  ;;  %v3121_v40 = vpop.f32.mrf.mxu0  ;;  %5423 = vst [vmem:[#allocation2 + $0x164] sm:$0xf] %v9619_v3  ;;  %5126 = vst [vmem:[#allocation2 + $0x184] sm:$0xf] %v9619_v3  ;;  %6870 = vmatmul.mubr.bf16.gmra.mxu0 %v10306_v15  ;;  %v12261_v52 = vpop.f32.mrf.mxu1  ;;  %v13064_v56 = vld [vmem:[#allocation16_spill] sm:$0xff]  ;;  %v4370_v15 = vrot.slane %v12273_v2, 1 }
 0x272   : > { %4829 = vst [vmem:[#allocation2 + $0x1a4] sm:$0xf] %v9619_v3  ;;  %v3827_v31 = vsel %vm3752_vm2, %v3824_v8, %v3826_v41  ;;  %v3122_v23 = vadd.f32 %v3121_v40, %v12207_v7  ;;  %v4877_v1 = vld [vmem:[#allocation4 + $0x120] sm:$0xff]  ;;  %6597 = vmatmul.mubr.bf16.gmra.mxu1 %v10302_v6  ;;  %6879 = vmatprep.mubr.bf16.mxu0 %v13035_v35 }
 0x273   : > { %4521 = vst [vmem:[#allocation4 + $0x131] sm:$0xff] %v4472_v38  ;;  %v4040_v48 = vmax.f32 %v3991_v39, 0.0  ;;  %v3936_v9 = vadd.f32 %v3827_v31, %v13062_v49  ;;  %v9801_v53 = vpop.f32.mrf.mxu0  ;;  %v9573_v61 = vpack.c.bf16 %v4877_v1, %v4877_v1  ;;  %v2914_v55 = vpop.f32.mrf.mxu1  ;;  %v4369_v38 = vsel %vm3460_vm1, %v4366_v25, %v4368_v24 }
 0x274   : > { %v3828_v33 = vrot.slane %v3122_v23, 2  ;;  %v10309_v54 = vld [vmem:[#allocation2 + $0x16c] ss:$12 sps:$4 sm:$0xff]   ;;  %v4264_v31 = vpop.permute.xlu0 %4263 }
 0x275   : > { %v4473_v7 = vmul.f32 %v4365_v10, %v4040_v48  ;;  %v3992_v17 = vadd.f32 %v12087_v12, %v3936_v9  ;;  %v3126_v62 = vpop.f32.mrf.mxu0  ;;  %5127 = vst [vmem:[#allocation2 + $0x190] sm:$0xf] %v9573_v61  ;;  %5424 = vst [vmem:[#allocation2 + $0x170] sm:$0xf] %v9573_v61  ;;  %6606 = vmatprep.mubr.bf16.mxu1 %v10309_v54  ;;  %v12269_v21 = vpop.f32.mrf.mxu1  ;;  %v4372_v49 = vrot.slane %v4264_v31, 1 }
 0x276   : > { %4830 = vst [vmem:[#allocation2 + $0x1b0] sm:$0xf] %v9573_v61  ;;  %v3829_v46 = vsel %vm3752_vm2, %v3826_v41, %v3828_v33  ;;  %v3127_v14 = vadd.f32 %v3126_v62, %v12215_v5  ;;  %v5175_v29 = vld [vmem:[#allocation4 + $0x128] sm:$0xff] }
 0x277   : > { %4522 = vst [vmem:[#allocation4 + $0x139] sm:$0xff] %v4473_v7  ;;  %v4041_v44 = vmax.f32 %v3992_v17, 0.0  ;;  %v3937_v27 = vadd.f32 %v3829_v46, %v13063_v47  ;;  %v9804_v45 = vpop.f32.mrf.mxu0  ;;  %v9621_v8 = vpack.c.bf16 %v5175_v29, %v5175_v29  ;;  %v10307_v5 = vld [vmem:[#allocation2 + $0x168] ss:$12 sps:$4 sm:$0xff]   ;;  %v2919_v11 = vpop.f32.mrf.mxu1 }
 0x278   : > { %v3830_v51 = vrot.slane %v3127_v14, 2  ;;  %v10310_v19 = vld [vmem:[#allocation2 + $0x158] ss:$12 sps:$4 sm:$0xff]   ;;  %v4268_v46 = vpop.permute.xlu1 %4267 }
 0x279   : > { %v4474_v26 = vmul.f32 %v4367_v57, %v4041_v44  ;;  %v3993_v16 = vadd.f32 %v12087_v12, %v3937_v27  ;;  %v3129_v20 = vpop.f32.mrf.mxu0  ;;  %5425 = vst [vmem:[#allocation2 + $0x17c] sm:$0xf] %v9621_v8  ;;  %5128 = vst [vmem:[#allocation2 + $0x19c] sm:$0xf] %v9621_v8  ;;  %6880 = vmatmul.mubr.bf16.gmra.mxu0 %v10310_v19  ;;  %v12279_v22 = vpop.f32.mrf.mxu1  ;;  %v4374_v45 = vrot.slane %v4268_v46, 1 }
 0x27a   : > { %4831 = vst [vmem:[#allocation2 + $0x1bc] sm:$0xf] %v9621_v8  ;;  %v3831_v30 = vsel %vm3752_vm2, %v3828_v33, %v3830_v51  ;;  %v3130_v43 = vadd.f32 %v3129_v20, %v12225_v32  ;;  %v4879_v63 = vld [vmem:[#allocation4 + $0x130] sm:$0xff]  ;;  %6607 = vmatmul.mubr.bf16.gmra.mxu1 %v10307_v5  ;;  %6889 = vmatprep.mubr.bf16.mxu0 %v13035_v35  ;;  %v4272_v20 = vpop.permute.xlu0 %4271 }
 0x27b   : > { %4523 = vst [vmem:[#allocation4 + $0x141] sm:$0xff] %v4474_v26  ;;  %v4042_v34 = vmax.f32 %v3993_v16, 0.0  ;;  %v3938_v36 = vadd.f32 %v3831_v30, %v13064_v56  ;;  %v9805_v3 = vpop.f32.mrf.mxu0  ;;  %v9575_v41 = vpack.c.bf16 %v4879_v63, %v4879_v63  ;;  %v2922_v13 = vpop.f32.mrf.mxu1  ;;  %v4371_v33 = vsel %vm3460_vm1, %v4368_v24, %v4370_v15 }
 0x27c   : > { %v3832_v39 = vrot.slane %v3130_v43, 2  ;;  %v10314_v40 = vld [vmem:[#allocation2 + $0x184] ss:$12 sps:$4 sm:$0xff]   ;;  %v4373_v8 = vsel %vm3460_vm1, %v4370_v15, %v4372_v49  ;;  %v4376_v30 = vrot.slane %v4272_v20, 1 }
 0x27d   : > { %v4475_v32 = vmul.f32 %v4369_v38, %v4042_v34  ;;  %v3994_v6 = vadd.f32 %v12087_v12, %v3938_v36  ;;  %v3134_v58 = vpop.f32.mrf.mxu0  ;;  %5129 = vst [vmem:[#allocation2 + $0x1a8] sm:$0xf] %v9575_v41  ;;  %5426 = vst [vmem:[#allocation2 + $0x188] sm:$0xf] %v9575_v41  ;;  %6616 = vmatprep.mubr.bf16.mxu1 %v10314_v40  ;;  %v12287_v25 = vpop.f32.mrf.mxu1  ;;  %v4375_v36 = vsel %vm3460_vm1, %v4372_v49, %v4374_v45  ;;  %v10317_v40 = vld [vmem:[#allocation2 + $0x198] ss:$12 sps:$4 sm:$0xff]  }
 0x27e   : > { %4832 = vst [vmem:[#allocation2 + $0x1c8] sm:$0xf] %v9575_v41  ;;  %v3833_v23 = vsel %vm3752_vm2, %v3830_v51, %v3832_v39  ;;  %v3135_v1 = vadd.f32 %v3134_v58, %v12233_v28  ;;  %v5177_v48 = vld [vmem:[#allocation4 + $0x138] sm:$0xff] }
 0x27f   : > { %4524 = vst [vmem:[#allocation4 + $0x149] sm:$0xff] %v4475_v32  ;;  %v4043_v9 = vmax.f32 %v3994_v6, 0.0  ;;  %v3939_v53 = vadd.f32 %v3833_v23, %v11707_v50  ;;  %v9808_v61 = vpop.f32.mrf.mxu0  ;;  %v9623_v10 = vpack.c.bf16 %v5177_v48, %v5177_v48  ;;  %v10312_v28 = vld [vmem:[#allocation2 + $0x180] ss:$12 sps:$4 sm:$0xff]   ;;  %v2927_v60 = vpop.f32.mrf.mxu1  ;;  %v4377_v48 = vsel %vm3460_vm1, %v4374_v45, %v4376_v30 }
 0x280   : > { %v3834_v54 = vrot.slane %v3135_v1, 2  ;;  %v10315_v7 = vld [vmem:[#allocation2 + $0x170] ss:$12 sps:$4 sm:$0xff]   ;;  %v4276_v6 = vpop.permute.xlu1 %4275 }
 0x281   : > { %v4476_v17 = vmul.f32 %v4371_v33, %v4043_v9  ;;  %v3995_v62 = vadd.f32 %v12087_v12, %v3939_v53  ;;  %v3137_v55 = vpop.f32.mrf.mxu0  ;;  %5427 = vst [vmem:[#allocation2 + $0x194] sm:$0xf] %v9623_v10  ;;  %5130 = vst [vmem:[#allocation2 + $0x1b4] sm:$0xf] %v9623_v10  ;;  %6890 = vmatmul.mubr.bf16.gmra.mxu0 %v10315_v7  ;;  %v12295_v12 = vpop.f32.mrf.mxu1  ;;  %v4378_v1 = vrot.slane %v4276_v6, 1 }
 0x282   : > { %4833 = vst [vmem:[#allocation2 + $0x1d4] sm:$0xf] %v9623_v10  ;;  %v3835_v50 = vsel %vm3752_vm2, %v3832_v39, %v3834_v54  ;;  %v3138_v14 = vadd.f32 %v3137_v55, %v12243_v4  ;;  %v4881_v29 = vld [vmem:[#allocation4 + $0x140] sm:$0xff]  ;;  %6617 = vmatmul.mubr.bf16.gmra.mxu1 %v10312_v28  ;;  %6899 = vmatprep.mubr.bf16.mxu0 %v13035_v35  ;;  %v12301_v4 = vld [vmem:[%s13023_s3] ss:$0 sm:$0xff]  ;;  %v4280_v10 = vpop.permute.xlu0 %4279 }
 0x283   : > { %4525 = vst [vmem:[#allocation4 + $0x151] sm:$0xff] %v4476_v17  ;;  %v4044_v24 = vmax.f32 %v3995_v62, 0.0  ;;  %v3940_v44 = vadd.f32 %v3835_v50, %v11712_v59  ;;  %v9809_v47 = vpop.f32.mrf.mxu0  ;;  %v9577_v27 = vpack.c.bf16 %v4881_v29, %v4881_v29  ;;  %v2930_v16 = vpop.f32.mrf.mxu1  ;;  %v4380_v7 = vrot.slane %v4280_v10, 1 }
 0x284   : > { %v3836_v57 = vrot.slane %v3138_v14, 2  ;;  %v10319_v51 = vld [vmem:[#allocation2 + $0x19c] ss:$12 sps:$4 sm:$0xff]   ;;  %v4379_v60 = vsel %vm3460_vm1, %v4376_v30, %v4378_v1 }
 0x285   : > { %v4477_v19 = vmul.f32 %v4373_v8, %v4044_v24  ;;  %v3996_v59 = vadd.f32 %v12301_v4, %v3940_v44  ;;  %v3142_v26 = vpop.f32.mrf.mxu0  ;;  %5131 = vst [vmem:[#allocation2 + $0x1c0] sm:$0xf] %v9577_v27  ;;  %5428 = vst [vmem:[#allocation2 + $0x1a0] sm:$0xf] %v9577_v27  ;;  %6626 = vmatprep.mubr.bf16.mxu1 %v10319_v51  ;;  %v10322_v44 = vld [vmem:[#allocation2 + $0x1b0] ss:$12 sps:$4 sm:$0xff]  }
 0x286   : > { %4834 = vst [vmem:[#allocation2 + $0x1e0] sm:$0xf] %v9577_v27  ;;  %v3837_v5 = vsel %vm3752_vm2, %v3834_v54, %v3836_v57  ;;  %v3143_v11 = vadd.f32 %v3142_v26, %v12251_v18  ;;  %v5179_v2 = vld [vmem:[#allocation4 + $0x148] sm:$0xff]  ;;  %v4284_v27 = vpop.permute.xlu1 %4283  ;;  %v4381_v26 = vsel %vm3460_vm1, %v4378_v1, %v4380_v7  ;;  %v4288_v16 = vpop.permute.xlu0 %4287  ;;  %v13067_v1 = vld [vmem:[#allocation20_spill] sm:$0xff] }
 0x287   : > { %4526 = vst [vmem:[#allocation4 + $0x159] sm:$0xff] %v4477_v19  ;;  %v4045_v43 = vmax.f32 %v3996_v59, 0.0  ;;  %v3941_v63 = vadd.f32 %v3837_v5, %v11722_v37  ;;  %v9812_v34 = vpop.f32.mrf.mxu0  ;;  %v9625_v56 = vpack.c.bf16 %v5179_v2, %v5179_v2  ;;  %v13065_v8 = vld [vmem:[#allocation17_spill] sm:$0xff]  ;;  %v4382_v59 = vrot.slane %v4284_v27, 1 }
 0x288   : > { %v3838_v3 = vrot.slane %v3143_v11, 2  ;;  %v10320_v41 = vld [vmem:[#allocation2 + $0x188] ss:$12 sps:$4 sm:$0xff]   ;;  %v4384_v34 = vrot.slane %v4288_v16, 1 }
 0x289   : > { %v4478_v15 = vmul.f32 %v4375_v36, %v4045_v43  ;;  %v3997_v38 = vadd.f32 %v12301_v4, %v3941_v63  ;;  %v3145_v39 = vpop.f32.mrf.mxu0  ;;  %5429 = vst [vmem:[#allocation2 + $0x1ac] sm:$0xf] %v9625_v56  ;;  %5132 = vst [vmem:[#allocation2 + $0x1cc] sm:$0xf] %v9625_v56  ;;  %6900 = vmatmul.mubr.bf16.gmra.mxu0 %v10320_v41  ;;  %v13066_v36 = vld [vmem:[#allocation19_spill] sm:$0xff] }
 0x28a   : > { %4835 = vst [vmem:[#allocation2 + $0x1ec] sm:$0xf] %v9625_v56  ;;  %v3839_v18 = vsel %vm3752_vm2, %v3836_v57, %v3838_v3  ;;  %v3146_v32 = vadd.f32 %v3145_v39, %v12261_v52  ;;  %v4883_v37 = vld [vmem:[#allocation4 + $0x150] sm:$0xff]  ;;  %6627 = vmatmul.mubr.bf16.gmra.mxu1 %v10317_v40  ;;  %6909 = vmatprep.mubr.bf16.mxu0 %v13035_v35  ;;  %v10326_v6 = vld [vmem:[#allocation2 + $0x1c8] ss:$12 sps:$4 sm:$0xff]  }
 0x28b   : > { %4527 = vst [vmem:[#allocation4 + $0x161] sm:$0xff] %v4478_v15  ;;  %v4046_v58 = vmax.f32 %v3997_v38, 0.0  ;;  %v3942_v13 = vadd.f32 %v3839_v18, %v11727_v42  ;;  %v9813_v31 = vpop.f32.mrf.mxu0  ;;  %v9579_v23 = vpack.c.bf16 %v4883_v37, %v4883_v37  ;;  %v4383_v38 = vsel %vm3460_vm1, %v4380_v7, %v4382_v59  ;;  %v12333_v18 = vpop.permute.xlu1 %4291 }
 0x28c   : > { %v3840_v49 = vrot.slane %v3146_v32, 2  ;;  %v10324_v9 = vld [vmem:[#allocation2 + $0x1b4] ss:$12 sps:$4 sm:$0xff]  }
 0x28d   : > { %v4479_v53 = vmul.f32 %v4377_v48, %v4046_v58  ;;  %v3998_v52 = vadd.f32 %v12301_v4, %v3942_v13  ;;  %v3150_v61 = vpop.f32.mrf.mxu0  ;;  %5133 = vst [vmem:[#allocation2 + $0x1d8] sm:$0xf] %v9579_v23  ;;  %5430 = vst [vmem:[#allocation2 + $0x1b8] sm:$0xf] %v9579_v23  ;;  %6636 = vmatprep.mubr.bf16.mxu1 %v10324_v9 }
 0x28e   : > { %4836 = vst [vmem:[#allocation2 + $0x1f8] sm:$0xf] %v9579_v23  ;;  %v3841_v42 = vsel %vm3752_vm2, %v3838_v3, %v3840_v49  ;;  %v3151_v33 = vadd.f32 %v3150_v61, %v12269_v21  ;;  %v5181_v54 = vld [vmem:[#allocation4 + $0x158] sm:$0xff] }
 0x28f   : > { %4528 = vst [vmem:[#allocation4 + $0x169] sm:$0xff] %v4479_v53  ;;  %v4047_v17 = vmax.f32 %v3998_v52, 0.0  ;;  %v3943_v62 = vadd.f32 %v3841_v42, %v11734_v0  ;;  %v9816_v55 = vpop.f32.mrf.mxu0  ;;  %v9627_v28 = vpack.c.bf16 %v5181_v54, %v5181_v54  ;;  %v4386_v53 = vrot.slane %v12333_v18, 1  ;;  %v10419_v18 = vld [vmem:[#allocation2] ss:$12 sps:$4 sm:$0xff]  }
 0x290   : > { %v3842_v46 = vrot.slane %v3151_v33, 2  ;;  %v10325_v50 = vld [vmem:[#allocation2 + $0x1a0] ss:$12 sps:$4 sm:$0xff]   ;;  %v4385_v52 = vsel %vm3460_vm1, %v4382_v59, %v4384_v34 }
 0x291   : > { %v4480_v14 = vmul.f32 %v4379_v60, %v4047_v17  ;;  %v3999_v29 = vadd.f32 %v12301_v4, %v3943_v62  ;;  %v3153_v24 = vpop.f32.mrf.mxu0  ;;  %5431 = vst [vmem:[#allocation2 + $0x1c4] sm:$0xf] %v9627_v28  ;;  %5134 = vst [vmem:[#allocation2 + $0x1e4] sm:$0xf] %v9627_v28  ;;  %6910 = vmatmul.mubr.bf16.gmra.mxu0 %v10325_v50  ;;  %v4387_v7 = vsel %vm3460_vm1, %v4384_v34, %v4386_v53  ;;  %v10332_v55 = vld [vmem:[#allocation2 + $0x1e0] ss:$12 sps:$4 sm:$0xff]  }
 0x292   : > { %4837 = vst [vmem:[#allocation2 + $0x204] sm:$0xf] %v9627_v28  ;;  %v3843_v21 = vsel %vm3752_vm2, %v3840_v49, %v3842_v46  ;;  %v3154_v47 = vadd.f32 %v3153_v24, %v12279_v22  ;;  %v4885_v0 = vld [vmem:[#allocation4 + $0x160] sm:$0xff]  ;;  %6637 = vmatmul.mubr.bf16.gmra.mxu1 %v10322_v44  ;;  %6919 = vmatprep.mubr.bf16.mxu0 %v13035_v35  ;;  %v3363_v28 = vld [vmem:[#allocation3 + $0x380] sm:$0x7f] }
 0x293   : > { %4529 = vst [vmem:[#allocation4 + $0x171] sm:$0xff] %v4480_v14  ;;  %v4048_v45 = vmax.f32 %v3999_v29, 0.0  ;;  %v3944_v57 = vadd.f32 %v3843_v21, %v13065_v8  ;;  %v9817_v51 = vpop.f32.mrf.mxu0  ;;  %v9581_v19 = vpack.c.bf16 %v4885_v0, %v4885_v0  ;;  %v13068_v24 = vld [vmem:[#allocation18_spill] sm:$0xff] }
 0x294   : > { %v3844_v20 = vrot.slane %v3154_v47, 2  ;;  %v10328_v5 = vld [vmem:[#allocation2 + $0x1cc] ss:$12 sps:$4 sm:$0xff]   ;;  %v13069_v44 = vrot.slane %v13068_v24, 1 }
 0x295   : > { %v4481_v11 = vmul.f32 %v4381_v26, %v4048_v45  ;;  %v4000_v22 = vadd.f32 %v12301_v4, %v3944_v57  ;;  %v3158_v2 = vpop.f32.mrf.mxu0  ;;  %5135 = vst [vmem:[#allocation2 + $0x1f0] sm:$0xf] %v9581_v19  ;;  %5432 = vst [vmem:[#allocation2 + $0x1d0] sm:$0xf] %v9581_v19  ;;  %6646 = vmatprep.mubr.bf16.mxu1 %v10328_v5 }
 0x296   : > { %4838 = vst [vmem:[#allocation2 + $0x210] sm:$0xf] %v9581_v19  ;;  %v3845_v30 = vsel %vm3752_vm2, %v3842_v46, %v3844_v20  ;;  %v12328_v43 = vadd.f32 %v3158_v2, %v12287_v25  ;;  %v5183_v63 = vld [vmem:[#allocation4 + $0x168] sm:$0xff]  ;;  %v3653_v21 = vadd.f32 %v13069_v44, %v3363_v28 }
 0x297   : > { %4530 = vst [vmem:[#allocation4 + $0x179] sm:$0xff] %v4481_v11  ;;  %v4049_v56 = vmax.f32 %v4000_v22, 0.0  ;;  %v3945_v3 = vadd.f32 %v3845_v30, %v13066_v36  ;;  %v9820_v41 = vpop.f32.mrf.mxu0  ;;  %v9629_v15 = vpack.c.bf16 %v5183_v63, %v5183_v63  ;;  %v10418_v36 = vld [vmem:[#allocation2 + $0x4] ss:$12 sps:$4 sm:$0xff]   ;;  %v10427_v44 = vld [vmem:[%s13024_s4 + $0x1e8] ss:$12 sps:$4 sm:$0xff]  }
 0x298   : > { %v3846_v39 = vrot.slane %v12328_v43, 2  ;;  %v10330_v40 = vld [vmem:[#allocation2 + $0x1b8] ss:$12 sps:$4 sm:$0xff]   ;;  %v10355_v41 = vld [vmem:[#allocation2 + $0x230] ss:$12 sps:$4 sm:$0xff]  }
 0x299   : > { %v4482_v32 = vmul.f32 %v4383_v38, %v4049_v56  ;;  %v4001_v25 = vadd.f32 %v12301_v4, %v3945_v3  ;;  %v3161_v37 = vpop.f32.mrf.mxu0  ;;  %5433 = vst [vmem:[#allocation2 + $0x1dc] sm:$0xf] %v9629_v15  ;;  %5136 = vst [vmem:[#allocation2 + $0x1fc] sm:$0xf] %v9629_v15  ;;  %6920 = vmatmul.mubr.bf16.gmra.mxu0 %v10330_v40  ;;  %v10337_v51 = vld [vmem:[#allocation2 + $0x1f8] ss:$12 sps:$4 sm:$0xff]  }
 0x29a   : > { %4839 = vst [vmem:[#allocation2 + $0x21c] sm:$0xf] %v9629_v15  ;;  %v3847_v58 = vsel %vm3752_vm2, %v3844_v20, %v3846_v39  ;;  %v3162_v13 = vadd.f32 %v3161_v37, %v12295_v12  ;;  %v4887_v31 = vld [vmem:[#allocation4 + $0x170] sm:$0xff]  ;;  %6647 = vmatmul.mubr.bf16.gmra.mxu1 %v10326_v6  ;;  %6929 = vmatprep.mubr.bf16.mxu0 %v13035_v35 }
 0x29b   : > { %4531 = vst [vmem:[#allocation4 + $0x181] sm:$0xff] %v4482_v32  ;;  %v4050_v23 = vmax.f32 %v4001_v25, 0.0  ;;  %v3946_v48 = vadd.f32 %v3847_v58, %v13067_v1  ;;  %v9821_v49 = vpop.f32.mrf.mxu0  ;;  %v9583_v9 = vpack.c.bf16 %v4887_v31, %v4887_v31  ;;  %v10420_v25 = vld [vmem:[#allocation2 + $0x1c] ss:$12 sps:$4 sm:$0xff]  }
 0x29c   : > { %3314 = vst [vmem:[#allocation3 + $0x258] sm:$0xff] %v3162_v13  ;;  %v10334_v61 = vld [vmem:[#allocation2 + $0x1e4] ss:$12 sps:$4 sm:$0xff]   ;;  %v12356_v13 = vld [vmem:[#allocation4] sm:$0xff] }
 0x29d   : > { %v4483_v10 = vmul.f32 %v4385_v52, %v4050_v23  ;;  %v4002_v12 = vadd.f32 %v12301_v4, %v3946_v48  ;;  %5137 = vst [vmem:[#allocation2 + $0x208] sm:$0xf] %v9583_v9  ;;  %5434 = vst [vmem:[#allocation2 + $0x1e8] sm:$0xf] %v9583_v9  ;;  %6656 = vmatprep.mubr.bf16.mxu1 %v10334_v61  ;;  %v10421_v37 = vld [vmem:[%s13024_s4 + $0x230] ss:$12 sps:$4 sm:$0xff]  }
 0x29e   : > { %4840 = vst [vmem:[#allocation2 + $0x228] sm:$0xf] %v9583_v9  ;;  %v5185_v42 = vld [vmem:[#allocation4 + $0x178] sm:$0xff]  ;;  %v10356_v23 = vld [vmem:[#allocation2 + $0x248] ss:$12 sps:$4 sm:$0xff]  }
 0x29f   : > { %4532 = vst [vmem:[#allocation4 + $0x189] sm:$0xff] %v4483_v10  ;;  %v4051_v33 = vmax.f32 %v4002_v12, 0.0  ;;  %v9631_v54 = vpack.c.bf16 %v5185_v42, %v5185_v42  ;;  %v10423_v9 = vld [vmem:[%s13024_s4 + $0x218] ss:$12 sps:$4 sm:$0xff]   ;;  %v10425_v42 = vld [vmem:[#allocation2 + $0x34] ss:$12 sps:$4 sm:$0xff]  }
 0x2a0   : > { %v10335_v17 = vld [vmem:[#allocation2 + $0x1d0] ss:$12 sps:$4 sm:$0xff]   ;;  %v10424_v10 = vld [vmem:[#allocation2 + $0x18] ss:$12 sps:$4 sm:$0xff]  }
 0x2a1   : > { %v4484_v62 = vmul.f32 %v4387_v7, %v4051_v33  ;;  %5435 = vst [vmem:[#allocation2 + $0x1f4] sm:$0xf] %v9631_v54  ;;  %5138 = vst [vmem:[#allocation2 + $0x214] sm:$0xf] %v9631_v54  ;;  %6930 = vmatmul.mubr.bf16.gmra.mxu0 %v10335_v17  ;;  %v10341_v11 = vld [vmem:[#allocation2 + $0x210] ss:$12 sps:$4 sm:$0xff]  }
 0x2a2   : > { %4841 = vst [vmem:[#allocation2 + $0x234] sm:$0xf] %v9631_v54  ;;  %v4889_v60 = vld [vmem:[#allocation4 + $0x180] sm:$0xff]  ;;  %6657 = vmatmul.mubr.bf16.gmra.mxu1 %v10332_v55  ;;  %6939 = vmatprep.mubr.bf16.mxu0 %v13035_v35 }
 0x2a3   : > { %4533 = vst [vmem:[#allocation4 + $0x191] sm:$0xff] %v4484_v62  ;;  %v3702_v46 = vld [vmem:[#allocation3 + $0x258] sm:$0x1]  ;;  %v9585_v50 = vpack.c.bf16 %v4889_v60, %v4889_v60  ;;  %v10426_v17 = vld [vmem:[%s13024_s4 + $0x200] ss:$12 sps:$4 sm:$0xff]  }
 0x2a4   : > { %v3848_v14 = vrot.slane %v3702_v46, 2  ;;  %v10339_v29 = vld [vmem:[#allocation2 + $0x1fc] ss:$12 sps:$4 sm:$0xff]  }
 0x2a5   : > { %5139 = vst [vmem:[#allocation2 + $0x220] sm:$0xf] %v9585_v50  ;;  %5436 = vst [vmem:[#allocation2 + $0x200] sm:$0xf] %v9585_v50  ;;  %6666 = vmatprep.mubr.bf16.mxu1 %v10339_v29 }
 0x2a6   : > { %4842 = vst [vmem:[#allocation2 + $0x240] sm:$0xf] %v9585_v50  ;;  %v3849_v47 = vsel %vm3752_vm2, %v3846_v39, %v3848_v14  ;;  %v5187_v0 = vld [vmem:[#allocation4 + $0x188] sm:$0xff] }
 0x2a7   : > { %v3947_v27 = vadd.f32 %v3849_v47, %v3653_v21  ;;  %v9633_v45 = vpack.c.bf16 %v5187_v0, %v5187_v0  ;;  %v10428_v0 = vld [vmem:[#allocation2 + $0x8] ss:$12 sps:$4 sm:$0xff]  }
 0x2a8   : > { %v10340_v8 = vld [vmem:[#allocation2 + $0x1e8] ss:$12 sps:$4 sm:$0xff]  }
 0x2a9   : > { %v4003_v57 = vadd.f32 %v12301_v4, %v3947_v27  ;;  %5437 = vst [vmem:[#allocation2 + $0x20c] sm:$0xf] %v9633_v45  ;;  %5140 = vst [vmem:[#allocation2 + $0x22c] sm:$0xf] %v9633_v45  ;;  %6940 = vmatmul.mubr.bf16.gmra.mxu0 %v10340_v8  ;;  %v10346_v30 = vld [vmem:[#allocation2 + $0x228] ss:$12 sps:$4 sm:$0xff]  }
 0x2aa   : > { %4843 = vst [vmem:[#allocation2 + $0x24c] sm:$0xf] %v9633_v45  ;;  %v4891_v19 = vld [vmem:[#allocation4 + $0x190] sm:$0xff]  ;;  %6667 = vmatmul.mubr.bf16.gmra.mxu1 %v10337_v51  ;;  %6949 = vmatprep.mubr.bf16.mxu0 %v13035_v35 }
 0x2ab   : > { %v4052_v59 = vmax.f32 %v4003_v57, 0.0  ;;  %v9587_v26 = vpack.c.bf16 %v4891_v19, %v4891_v19  ;;  %v10429_v45 = vld [vmem:[#allocation2 + $0x30] ss:$12 sps:$4 sm:$0xff]   ;;  %v10430_v51 = vld [vmem:[#allocation2 + $0x4c] ss:$12 sps:$4 sm:$0xff]  }
 0x2ac   : > { %v10343_v16 = vld [vmem:[#allocation2 + $0x214] ss:$12 sps:$4 sm:$0xff]  }
 0x2ad   : > { %v4485_v20 = vmul.f32 %v4386_v53, %v4052_v59  ;;  %5141 = vst [vmem:[#allocation2 + $0x238] sm:$0xf] %v9587_v26  ;;  %5438 = vst [vmem:[#allocation2 + $0x218] sm:$0xf] %v9587_v26  ;;  %6676 = vmatprep.mubr.bf16.mxu1 %v10343_v16 }
 0x2af   : > { %4534 = vst [vmem:[#allocation4 + $0x199] sm:$0x7f] %v4485_v20  ;;  %v10431_v20 = vld [vmem:[%s13024_s4 + $0x1d0] ss:$12 sps:$4 sm:$0xff]  }
 0x2b0   : > { %v10345_v5 = vld [vmem:[#allocation2 + $0x200] ss:$12 sps:$4 sm:$0xff]  }
 0x2b1   : > { %6950 = vmatmul.mubr.bf16.gmra.mxu0 %v10345_v5  ;;  %v10350_v43 = vld [vmem:[#allocation2 + $0x240] ss:$12 sps:$4 sm:$0xff]  }
 0x2b2   : > { %6677 = vmatmul.mubr.bf16.gmra.mxu1 %v10341_v11  ;;  %6959 = vmatprep.mubr.bf16.mxu0 %v13035_v35 }
 0x2b4   : > { %v10348_v4 = vld [vmem:[#allocation2 + $0x22c] ss:$12 sps:$4 sm:$0xff]  }
 0x2b5   : > { %6686 = vmatprep.mubr.bf16.mxu1 %v10348_v4 }
 0x2b6   : > { %v4892_v22 = vld [vmem:[#allocation4 + $0x198] sm:$0xff] }
 0x2b7   : > { %v9588_v2 = vpack.c.bf16 %v4892_v22, %v4892_v22 }
 0x2b9   : > { %5142 = vst [vmem:[#allocation2 + $0x244] sm:$0xf] %v9588_v2  ;;  %5439 = vst [vmem:[#allocation2 + $0x224] sm:$0xf] %v9588_v2 }
 0x2ba   : > { %6687 = vmatmul.mubr.bf16.gmra.mxu1 %v10346_v30 }
 0x2c0   : > { %v10352_v63 = vld [vmem:[#allocation2 + $0x244] ss:$12 sps:$4 sm:$0xff]  }
 0x2c1   : > { %v10353_v34 = vld [vmem:[#allocation2 + $0x218] ss:$12 sps:$4 sm:$0xff]   ;;  %6696 = vmatprep.mubr.bf16.mxu1 %v10352_v63 }
 0x2c2   : > { %6960 = vmatmul.mubr.bf16.gmra.mxu0 %v10353_v34  ;;  %v6458_v56 = vpop.f32.mrf.mxu1  ;;  %6697 = vmatmul.mubr.bf16.gmra.mxu1 %v10350_v43 }
 0x2c3   : > { %7022 = vmatprep.mubr.bf16.mxu1 %v10418_v36  ;;  %6969 = vmatprep.mubr.bf16.mxu0 %v13035_v35 }
 0x2c4   : > { %v6460_v3 = vpop.f32.mrf.mxu1 }
 0x2c6   : > { %v6462_v15 = vpop.f32.mrf.mxu1 }
 0x2c8   : > { %v6464_v38 = vpop.f32.mrf.mxu1 }
 0x2c9   : > { %v6741_v39 = vpop.f32.mrf.mxu0 }
 0x2ca   : > { %6970 = vmatmul.mubr.bf16.gmra.mxu0 %v10355_v41  ;;  %v6468_v40 = vpop.f32.mrf.mxu1  ;;  %7023 = vmatmul.mubr.bf16.vlgmr.msra.gmra.mxu1 %v10419_v18  ;;  %v6742_v32 = vadd.f32 %v6741_v39, %v6458_v56  ;;  %v10432_v56 = vld [vmem:[%s13024_s4 + $0x1b8] ss:$12 sps:$4 sm:$0xff]   ;;  %v10433_v41 = vld [vmem:[#allocation2 + $0x20] ss:$12 sps:$4 sm:$0xff]  }
 0x2cb   : > { %7030 = vmatprep.mubr.bf16.mxu1 %v10420_v25  ;;  %9946 = vmatpush3.bf16.msra.mxu1 %v10421_v37  ;;  %v6743_v6 = vpop.f32.mrf.mxu0  ;;  %v10435_v18 = vld [vmem:[#allocation2 + $0x64] ss:$12 sps:$4 sm:$0xff]  }
 0x2cc   : > { %v6470_v58 = vpop.f32.mrf.mxu1  ;;  %6979 = vmatprep.mubr.bf16.mxu0 %v13035_v35  ;;  %7456 = vst [vmem:[#allocation3 + $0x2b0] sm:$0xff] %v6742_v32  ;;  %9939 = vmatprep.subr.bf16.mxu1 %v12356_v13 }
 0x2cd   : > { %v6745_v31 = vpop.f32.mrf.mxu0 }
 0x2ce   : > { %v6472_v1 = vpop.f32.mrf.mxu1  ;;  %v6746_v48 = vadd.f32 %v6745_v31, %v6462_v15 }
 0x2cf   : > { %v6747_v49 = vpop.f32.mrf.mxu0  ;;  %9947 = vmatpush3.bf16.msra.mxu1 %v10423_v9 }
 0x2d0   : > { %v6474_v53 = vpop.f32.mrf.mxu1  ;;  %v12362_v52 = vadd.f32 %v6747_v49, %v6464_v38  ;;  %9940 = vmatprep.subr.bf16.mxu1 %v12356_v13  ;;  %v10434_v38 = vld [vmem:[#allocation2 + $0x48] ss:$12 sps:$4 sm:$0xff]  }
 0x2d1   : > { %v6751_v35 = vpop.f32.mrf.mxu0 }
 0x2d2   : > { %6980 = vmatmul.mubr.bf16.gmra.mxu0 %v10356_v23  ;;  %v6478_v61 = vpop.f32.mrf.mxu1  ;;  %7031 = vmatmul.mubr.bf16.gmra.mxu1 %v10424_v10  ;;  %v6752_v12 = vadd.f32 %v6751_v35, %v6468_v40  ;;  %v13032_v55 = vrot.slane %v12362_v52, 1  ;;  %v10437_v10 = vld [vmem:[%s13024_s4 + $0x188] ss:$12 sps:$4 sm:$0xff]  }
 0x2d3   : > { %7038 = vmatprep.mubr.bf16.mxu1 %v10425_v42  ;;  %9838 = vmatprep.mubr.msk.bf16.mxu0 %vm10515_vm0, %v12356_v13  ;;  %v6753_v33 = vpop.f32.mrf.mxu0 }
 0x2d4   : > { %v6480_v54 = vpop.f32.mrf.mxu1  ;;  %v6754_v7 = vadd.f32 %v6753_v33, %v6470_v58  ;;  %9948 = vmatpush3.bf16.msra.mxu1 %v10426_v17  ;;  %v10436_v58 = vld [vmem:[%s13024_s4 + $0x1a0] ss:$12 sps:$4 sm:$0xff]   ;;  %v10438_v33 = vld [vmem:[#allocation2 + $0x38] ss:$12 sps:$4 sm:$0xff]  }
 0x2d5   : > { %v6755_v62 = vpop.f32.mrf.mxu0  ;;  %9941 = vmatprep.subr.bf16.mxu1 %v12356_v13 }
 0x2d6   : > { %v6482_v28 = vpop.f32.mrf.mxu1  ;;  %v7752_v60 = vrot.slane %v6754_v7, 1  ;;  %v6756_v46 = vadd.f32 %v6755_v62, %v6472_v1  ;;  %v10439_v7 = vld [vmem:[#allocation2 + $0x60] ss:$12 sps:$4 sm:$0xff]  }
 0x2d7   : > { %v6757_v50 = vpop.f32.mrf.mxu0 }
 0x2d8   : > { %v7753_v14 = vsel %vm3460_vm1, %v13032_v55, %v7752_v60  ;;  %v6484_v29 = vpop.f32.mrf.mxu1  ;;  %v6758_v24 = vadd.f32 %v6757_v50, %v6474_v53  ;;  %9949 = vmatpush3.bf16.msra.mxu1 %v10427_v44  ;;  %v10490_v55 = vld [vmem:[#allocation2 + $0x1d0] ss:$12 sps:$4 sm:$0xff]  }
 0x2d9   : > { %v12378_v21 = vadd.f32 %v7753_v14, %v6746_v48  ;;  %v6761_v47 = vpop.f32.mrf.mxu0  ;;  %9942 = vmatprep.subr.bf16.mxu1 %v12356_v13 }
 0x2da   : > { %9839 = vmatmul.mubr.bf16.vlgmr.msra.gmra.mxu0 %v10428_v0  ;;  %v6488_v27 = vpop.f32.mrf.mxu1  ;;  %7039 = vmatmul.mubr.bf16.gmra.mxu1 %v10429_v45  ;;  %v7754_v8 = vrot.slane %v6758_v24, 1  ;;  %v6762_v57 = vadd.f32 %v6761_v47, %v6478_v61 }
 0x2db   : > { %7046 = vmatprep.mubr.bf16.mxu1 %v10430_v51  ;;  %9842 = vmatprep.mubr.msk.bf16.mxu0 %vm10515_vm0, %v12356_v13  ;;  %v6763_v19 = vpop.f32.mrf.mxu0 }
 0x2dc   : > { %v7755_v59 = vsel %vm3460_vm1, %v7752_v60, %v7754_v8  ;;  %v6490_v26 = vpop.f32.mrf.mxu1  ;;  %v6764_v16 = vadd.f32 %v6763_v19, %v6480_v54  ;;  %9950 = vmatpush3.bf16.msra.mxu1 %v10431_v20 }
 0x2dd   : > { %v12387_v5 = vadd.f32 %v7755_v59, %v6752_v12  ;;  %v6765_v11 = vpop.f32.mrf.mxu0  ;;  %9943 = vmatprep.subr.bf16.mxu1 %v12356_v13  ;;  %v10441_v59 = vld [vmem:[#allocation2 + $0x50] ss:$12 sps:$4 sm:$0xff]  }
 0x2de   : > { %v6492_v4 = vpop.f32.mrf.mxu1  ;;  %v7756_v22 = vrot.slane %v6764_v16, 1  ;;  %v6766_v2 = vadd.f32 %v6765_v11, %v6482_v28  ;;  %v10440_v28 = vld [vmem:[#allocation2 + $0x7c] ss:$12 sps:$4 sm:$0xff]   ;;  %v10442_v16 = vld [vmem:[#allocation2 + $0x78] ss:$12 sps:$4 sm:$0xff]  }
 0x2df   : > { %v6767_v30 = vpop.f32.mrf.mxu0 }
 0x2e0   : > { %v7757_v43 = vsel %vm3460_vm1, %v7754_v8, %v7756_v22  ;;  %v6494_v63 = vpop.f32.mrf.mxu1  ;;  %v6768_v34 = vadd.f32 %v6767_v30, %v6484_v29  ;;  %9951 = vmatpush3.bf16.msra.mxu1 %v10432_v56 }
 0x2e1   : > { %v12394_v36 = vadd.f32 %v7757_v43, %v6756_v46  ;;  %v6771_v3 = vpop.f32.mrf.mxu0  ;;  %9944 = vmatprep.subr.bf16.mxu1 %v12356_v13 }
 0x2e2   : > { %9843 = vmatmul.mubr.bf16.gmra.mxu0 %v10433_v41  ;;  %v6498_v15 = vpop.f32.mrf.mxu1  ;;  %7047 = vmatmul.mubr.bf16.gmra.mxu1 %v10434_v38  ;;  %v7758_v39 = vrot.slane %v6768_v34, 1  ;;  %v6772_v40 = vadd.f32 %v6771_v3, %v6488_v27 }
 0x2e3   : > { %7054 = vmatprep.mubr.bf16.mxu1 %v10435_v18  ;;  %9846 = vmatprep.mubr.msk.bf16.mxu0 %vm10515_vm0, %v12356_v13  ;;  %v6773_v32 = vpop.f32.mrf.mxu0 }
 0x2e4   : > { %v7759_v25 = vsel %vm3460_vm1, %v7756_v22, %v7758_v39  ;;  %v6500_v37 = vpop.f32.mrf.mxu1  ;;  %v6774_v6 = vadd.f32 %v6773_v32, %v6490_v26  ;;  %9952 = vmatpush3.bf16.msra.mxu1 %v10436_v58 }
 0x2e5   : > { %v12403_v31 = vadd.f32 %v7759_v25, %v6762_v57  ;;  %v6775_v23 = vpop.f32.mrf.mxu0  ;;  %9945 = vmatprep.subr.bf16.mxu1 %v12356_v13  ;;  %v10444_v25 = vld [vmem:[#allocation2 + $0x68] ss:$12 sps:$4 sm:$0xff]  }
 0x2e6   : > { %v6502_v1 = vpop.f32.mrf.mxu1  ;;  %v7760_v48 = vrot.slane %v6774_v6, 1  ;;  %v6776_v49 = vadd.f32 %v6775_v23, %v6492_v4  ;;  %v10443_v4 = vld [vmem:[#allocation2 + $0x94] ss:$12 sps:$4 sm:$0xff]   ;;  %v10445_v6 = vld [vmem:[#allocation2 + $0x90] ss:$12 sps:$4 sm:$0xff]  }
 0x2e7   : > { %v6777_v9 = vpop.f32.mrf.mxu0 }
 0x2e8   : > { %v7761_v53 = vsel %vm3460_vm1, %v7758_v39, %v7760_v48  ;;  %v6504_v35 = vpop.f32.mrf.mxu1  ;;  %v6778_v61 = vadd.f32 %v6777_v9, %v6494_v63  ;;  %9953 = vmatpush3.bf16.msra.mxu1 %v10437_v10 }
 0x2e9   : > { %v12410_v12 = vadd.f32 %v7761_v53, %v6766_v2  ;;  %v6781_v42 = vpop.f32.mrf.mxu0 }
 0x2ea   : > { %9847 = vmatmul.mubr.bf16.gmra.mxu0 %v10438_v33  ;;  %v6508_v54 = vpop.f32.mrf.mxu1  ;;  %7055 = vmatmul.mubr.bf16.gmra.mxu1 %v10439_v7  ;;  %v7762_v17 = vrot.slane %v6778_v61, 1  ;;  %v6782_v62 = vadd.f32 %v6781_v42, %v6498_v15 }
 0x2eb   : > { %7062 = vmatprep.mubr.bf16.mxu1 %v10440_v28  ;;  %9850 = vmatprep.mubr.msk.bf16.mxu0 %vm10515_vm0, %v12356_v13  ;;  %v6783_v60 = vpop.f32.mrf.mxu0 }
 0x2ec   : > { %v7763_v46 = vsel %vm3460_vm1, %v7760_v48, %v7762_v17  ;;  %v6510_v50 = vpop.f32.mrf.mxu1  ;;  %v6784_v14 = vadd.f32 %v6783_v60, %v6500_v37 }
 0x2ed   : > { %v12415_v29 = vadd.f32 %v7763_v46, %v6772_v40  ;;  %v6785_v24 = vpop.f32.mrf.mxu0  ;;  %v10447_v46 = vld [vmem:[#allocation2 + $0x80] ss:$12 sps:$4 sm:$0xff]  }
 0x2ee   : > { %v6512_v44 = vpop.f32.mrf.mxu1  ;;  %v7764_v47 = vrot.slane %v6784_v14, 1  ;;  %v6786_v0 = vadd.f32 %v6785_v24, %v6502_v1  ;;  %v10446_v1 = vld [vmem:[#allocation2 + $0xac] ss:$12 sps:$4 sm:$0xff]   ;;  %v10448_v14 = vld [vmem:[#allocation2 + $0xa8] ss:$12 sps:$4 sm:$0xff]  }
 0x2ef   : > { %v6787_v27 = vpop.f32.mrf.mxu0 }
 0x2f0   : > { %v7765_v45 = vsel %vm3460_vm1, %v7762_v17, %v7764_v47  ;;  %v6514_v8 = vpop.f32.mrf.mxu1  ;;  %v6788_v57 = vadd.f32 %v6787_v27, %v6504_v35 }
 0x2f1   : > { %v12418_v51 = vadd.f32 %v7765_v45, %v6776_v49  ;;  %v6791_v19 = vpop.f32.mrf.mxu0 }
 0x2f2   : > { %9851 = vmatmul.mubr.bf16.gmra.mxu0 %v10441_v59  ;;  %v6518_v26 = vpop.f32.mrf.mxu1  ;;  %7063 = vmatmul.mubr.bf16.gmra.mxu1 %v10442_v16  ;;  %v7766_v20 = vrot.slane %v6788_v57, 1  ;;  %v6792_v11 = vadd.f32 %v6791_v19, %v6508_v54 }
 0x2f3   : > { %7070 = vmatprep.mubr.bf16.mxu1 %v10443_v4  ;;  %9854 = vmatprep.mubr.msk.bf16.mxu0 %vm10515_vm0, %v12356_v13  ;;  %v6793_v22 = vpop.f32.mrf.mxu0 }
 0x2f4   : > { %v7767_v2 = vsel %vm3460_vm1, %v7764_v47, %v7766_v20  ;;  %v6520_v30 = vpop.f32.mrf.mxu1  ;;  %v6794_v43 = vadd.f32 %v6793_v22, %v6510_v50  ;;  %v10449_v47 = vld [vmem:[#allocation2 + $0xc4] ss:$12 sps:$4 sm:$0xff]  }
 0x2f5   : > { %v12423_v63 = vadd.f32 %v7767_v2, %v6782_v62  ;;  %v6795_v34 = vpop.f32.mrf.mxu0 }
 0x2f6   : > { %v6522_v56 = vpop.f32.mrf.mxu1  ;;  %v7768_v3 = vrot.slane %v6794_v43, 1  ;;  %v6796_v41 = vadd.f32 %v6795_v34, %v6512_v44  ;;  %v10450_v43 = vld [vmem:[#allocation2 + $0x98] ss:$12 sps:$4 sm:$0xff]  }
 0x2f7   : > { %v6797_v15 = vpop.f32.mrf.mxu0 }
 0x2f8   : > { %v7769_v38 = vsel %vm3460_vm1, %v7766_v20, %v7768_v3  ;;  %v6524_v39 = vpop.f32.mrf.mxu1  ;;  %v6798_v40 = vadd.f32 %v6797_v15, %v6514_v8  ;;  %v10452_v15 = vld [vmem:[#allocation2 + $0xdc] ss:$12 sps:$4 sm:$0xff]  }
 0x2f9   : > { %v12426_v18 = vadd.f32 %v7769_v38, %v6786_v0  ;;  %v6801_v32 = vpop.f32.mrf.mxu0 }
 0x2fa   : > { %9855 = vmatmul.mubr.bf16.gmra.mxu0 %v10444_v25  ;;  %v6528_v37 = vpop.f32.mrf.mxu1  ;;  %7071 = vmatmul.mubr.bf16.gmra.mxu1 %v10445_v6  ;;  %v7770_v58 = vrot.slane %v6798_v40, 1  ;;  %v6802_v23 = vadd.f32 %v6801_v32, %v6518_v26 }
 0x2fb   : > { %7078 = vmatprep.mubr.bf16.mxu1 %v10446_v1  ;;  %9858 = vmatprep.mubr.msk.bf16.mxu0 %vm10515_vm0, %v12356_v13  ;;  %v6803_v48 = vpop.f32.mrf.mxu0 }
 0x2fc   : > { %v7771_v49 = vsel %vm3460_vm1, %v7768_v3, %v7770_v58  ;;  %v6530_v9 = vpop.f32.mrf.mxu1  ;;  %v6804_v53 = vadd.f32 %v6803_v48, %v6520_v30 }
 0x2fd   : > { %v12431_v35 = vadd.f32 %v7771_v49, %v6792_v11  ;;  %v6805_v61 = vpop.f32.mrf.mxu0 }
 0x2fe   : > { %v6532_v10 = vpop.f32.mrf.mxu1  ;;  %v7772_v42 = vrot.slane %v6804_v53, 1  ;;  %v6806_v33 = vadd.f32 %v6805_v61, %v6522_v56  ;;  %v10451_v56 = vld [vmem:[#allocation2 + $0xc0] ss:$12 sps:$4 sm:$0xff]  }
 0x2ff   : > { %v6807_v54 = vpop.f32.mrf.mxu0 }
 0x300   : > { %v7773_v7 = vsel %vm3460_vm1, %v7770_v58, %v7772_v42  ;;  %v6534_v17 = vpop.f32.mrf.mxu1  ;;  %v6808_v62 = vadd.f32 %v6807_v54, %v6524_v39 }
 0x301   : > { %v12434_v28 = vadd.f32 %v7773_v7, %v6796_v41  ;;  %v6811_v60 = vpop.f32.mrf.mxu0 }
 0x302   : > { %9859 = vmatmul.mubr.bf16.gmra.mxu0 %v10447_v46  ;;  %v6538_v50 = vpop.f32.mrf.mxu1  ;;  %7079 = vmatmul.mubr.bf16.gmra.mxu1 %v10448_v14  ;;  %v7774_v24 = vrot.slane %v6808_v62, 1  ;;  %v6812_v44 = vadd.f32 %v6811_v60, %v6528_v37 }
 0x303   : > { %7086 = vmatprep.mubr.bf16.mxu1 %v10449_v47  ;;  %9862 = vmatprep.mubr.msk.bf16.mxu0 %vm10515_vm0, %v12356_v13  ;;  %v6813_v0 = vpop.f32.mrf.mxu0 }
 0x304   : > { %v7775_v27 = vsel %vm3460_vm1, %v7772_v42, %v7774_v24  ;;  %v6540_v45 = vpop.f32.mrf.mxu1  ;;  %v6814_v8 = vadd.f32 %v6813_v0, %v6530_v9 }
 0x305   : > { %v12439_v57 = vadd.f32 %v7775_v27, %v6802_v23  ;;  %v6815_v19 = vpop.f32.mrf.mxu0 }
 0x306   : > { %v6542_v59 = vpop.f32.mrf.mxu1  ;;  %v7776_v26 = vrot.slane %v6814_v8, 1  ;;  %v6816_v16 = vadd.f32 %v6815_v19, %v6532_v10  ;;  %v10453_v10 = vld [vmem:[#allocation2 + $0xb0] ss:$12 sps:$4 sm:$0xff]  }
 0x307   : > { %v6817_v20 = vpop.f32.mrf.mxu0 }
 0x308   : > { %v7777_v11 = vsel %vm3460_vm1, %v7774_v24, %v7776_v26  ;;  %v6544_v4 = vpop.f32.mrf.mxu1  ;;  %v6818_v22 = vadd.f32 %v6817_v20, %v6534_v17  ;;  %v10455_v17 = vld [vmem:[#allocation2 + $0xf4] ss:$12 sps:$4 sm:$0xff]  }
 0x309   : > { %v12442_v2 = vadd.f32 %v7777_v11, %v6806_v33  ;;  %v6821_v30 = vpop.f32.mrf.mxu0  ;;  %v10454_v33 = vld [vmem:[#allocation2 + $0xd8] ss:$12 sps:$4 sm:$0xff]   ;;  %v10457_v11 = vld [vmem:[#allocation2 + $0xf0] ss:$12 sps:$4 sm:$0xff]  }
 0x30a   : > { %9863 = vmatmul.mubr.bf16.gmra.mxu0 %v10450_v43  ;;  %v6548_v34 = vpop.f32.mrf.mxu1  ;;  %7087 = vmatmul.mubr.bf16.gmra.mxu1 %v10451_v56  ;;  %v7778_v3 = vrot.slane %v6818_v22, 1  ;;  %v6822_v41 = vadd.f32 %v6821_v30, %v6538_v50  ;;  %v10458_v30 = vld [vmem:[#allocation2 + $0x10c] ss:$12 sps:$4 sm:$0xff]  }
 0x30b   : > { %7094 = vmatprep.mubr.bf16.mxu1 %v10452_v15  ;;  %9866 = vmatprep.mubr.msk.bf16.mxu0 %vm10515_vm0, %v12356_v13  ;;  %v6823_v38 = vpop.f32.mrf.mxu0 }
 0x30c   : > { %v7779_v39 = vsel %vm3460_vm1, %v7776_v26, %v7778_v3  ;;  %v6550_v40 = vpop.f32.mrf.mxu1  ;;  %v6824_v32 = vadd.f32 %v6823_v38, %v6540_v45 }
 0x30d   : > { %v12447_v25 = vadd.f32 %v7779_v39, %v6812_v44  ;;  %v6825_v37 = vpop.f32.mrf.mxu0 }
 0x30e   : > { %v6552_v6 = vpop.f32.mrf.mxu1  ;;  %v7780_v58 = vrot.slane %v6824_v32, 1  ;;  %v6826_v23 = vadd.f32 %v6825_v37, %v6542_v59 }
 0x30f   : > { %v6827_v1 = vpop.f32.mrf.mxu0 }
 0x310   : > { %v7781_v48 = vsel %vm3460_vm1, %v7778_v3, %v7780_v58  ;;  %v6554_v49 = vpop.f32.mrf.mxu1  ;;  %v6828_v9 = vadd.f32 %v6827_v1, %v6544_v4 }
 0x311   : > { %v12450_v53 = vadd.f32 %v7781_v48, %v6816_v16  ;;  %v6831_v61 = vpop.f32.mrf.mxu0  ;;  %v10456_v16 = vld [vmem:[#allocation2 + $0xc8] ss:$12 sps:$4 sm:$0xff]   ;;  %v10459_v48 = vld [vmem:[#allocation2 + $0xe0] ss:$12 sps:$4 sm:$0xff]  }
 0x312   : > { %9867 = vmatmul.mubr.bf16.gmra.mxu0 %v10453_v10  ;;  %v6558_v42 = vpop.f32.mrf.mxu1  ;;  %7095 = vmatmul.mubr.bf16.gmra.mxu1 %v10454_v33  ;;  %v7782_v54 = vrot.slane %v6828_v9, 1  ;;  %v6832_v7 = vadd.f32 %v6831_v61, %v6548_v34  ;;  %v10460_v9 = vld [vmem:[#allocation2 + $0x108] ss:$12 sps:$4 sm:$0xff]  }
 0x313   : > { %7102 = vmatprep.mubr.bf16.mxu1 %v10455_v17  ;;  %9870 = vmatprep.mubr.msk.bf16.mxu0 %vm10515_vm0, %v12356_v13  ;;  %v6833_v62 = vpop.f32.mrf.mxu0 }
 0x314   : > { %v7783_v60 = vsel %vm3460_vm1, %v7780_v58, %v7782_v54  ;;  %v6560_v46 = vpop.f32.mrf.mxu1  ;;  %v6834_v50 = vadd.f32 %v6833_v62, %v6550_v40 }
 0x315   : > { %v12455_v14 = vadd.f32 %v7783_v60, %v6822_v41  ;;  %v6835_v24 = vpop.f32.mrf.mxu0 }
 0x316   : > { %v6562_v44 = vpop.f32.mrf.mxu1  ;;  %v7784_v47 = vrot.slane %v6834_v50, 1  ;;  %v6836_v0 = vadd.f32 %v6835_v24, %v6552_v6 }
 0x317   : > { %v6837_v27 = vpop.f32.mrf.mxu0 }
 0x318   : > { %v7785_v45 = vsel %vm3460_vm1, %v7782_v54, %v7784_v47  ;;  %v6564_v8 = vpop.f32.mrf.mxu1  ;;  %v6838_v19 = vadd.f32 %v6837_v27, %v6554_v49 }
 0x319   : > { %v12458_v59 = vadd.f32 %v7785_v45, %v6826_v23  ;;  %v6841_v26 = vpop.f32.mrf.mxu0 }
 0x31a   : > { %9871 = vmatmul.mubr.bf16.gmra.mxu0 %v10456_v16  ;;  %v6568_v20 = vpop.f32.mrf.mxu1  ;;  %7103 = vmatmul.mubr.bf16.gmra.mxu1 %v10457_v11  ;;  %v7786_v4 = vrot.slane %v6838_v19, 1  ;;  %v6842_v22 = vadd.f32 %v6841_v26, %v6558_v42  ;;  %v10461_v42 = vld [vmem:[#allocation2 + $0x124] ss:$12 sps:$4 sm:$0xff]   ;;  %v10463_v16 = vld [vmem:[#allocation2 + $0x120] ss:$12 sps:$4 sm:$0xff]  }
 0x31b   : > { %7110 = vmatprep.mubr.bf16.mxu1 %v10458_v30  ;;  %9874 = vmatprep.mubr.msk.bf16.mxu0 %vm10515_vm0, %v12356_v13  ;;  %v6843_v43 = vpop.f32.mrf.mxu0  ;;  %v10462_v19 = vld [vmem:[#allocation2 + $0xf8] ss:$12 sps:$4 sm:$0xff]  }
 0x31c   : > { %v7787_v34 = vsel %vm3460_vm1, %v7784_v47, %v7786_v4  ;;  %v6570_v56 = vpop.f32.mrf.mxu1  ;;  %v6844_v3 = vadd.f32 %v6843_v43, %v6560_v46 }
 0x31d   : > { %v12463_v41 = vadd.f32 %v7787_v34, %v6832_v7  ;;  %v6845_v15 = vpop.f32.mrf.mxu0 }
 0x31e   : > { %v6572_v38 = vpop.f32.mrf.mxu1  ;;  %v7788_v39 = vrot.slane %v6844_v3, 1  ;;  %v6846_v40 = vadd.f32 %v6845_v15, %v6562_v44 }
 0x31f   : > { %v6847_v32 = vpop.f32.mrf.mxu0 }
 0x320   : > { %v7789_v37 = vsel %vm3460_vm1, %v7786_v4, %v7788_v39  ;;  %v6574_v6 = vpop.f32.mrf.mxu1  ;;  %v6848_v58 = vadd.f32 %v6847_v32, %v6564_v8  ;;  %v10464_v4 = vld [vmem:[#allocation2 + $0x13c] ss:$12 sps:$4 sm:$0xff]  }
 0x321   : > { %v12466_v23 = vadd.f32 %v7789_v37, %v6836_v0  ;;  %v6851_v1 = vpop.f32.mrf.mxu0 }
 0x322   : > { %9875 = vmatmul.mubr.bf16.gmra.mxu0 %v10459_v48  ;;  %v6578_v49 = vpop.f32.mrf.mxu1  ;;  %7111 = vmatmul.mubr.bf16.gmra.mxu1 %v10460_v9  ;;  %v7790_v61 = vrot.slane %v6848_v58, 1  ;;  %v6852_v10 = vadd.f32 %v6851_v1, %v6568_v20  ;;  %v10465_v48 = vld [vmem:[#allocation2 + $0x110] ss:$12 sps:$4 sm:$0xff]   ;;  %v10466_v9 = vld [vmem:[#allocation2 + $0x138] ss:$12 sps:$4 sm:$0xff]  }
 0x323   : > { %7118 = vmatprep.mubr.bf16.mxu1 %v10461_v42  ;;  %9878 = vmatprep.mubr.msk.bf16.mxu0 %vm10515_vm0, %v12356_v13  ;;  %v6853_v33 = vpop.f32.mrf.mxu0  ;;  %v10467_v42 = vld [vmem:[#allocation2 + $0x154] ss:$12 sps:$4 sm:$0xff]  }
 0x324   : > { %v7791_v54 = vsel %vm3460_vm1, %v7788_v39, %v7790_v61  ;;  %v6580_v7 = vpop.f32.mrf.mxu1  ;;  %v6854_v17 = vadd.f32 %v6853_v33, %v6570_v56 }
 0x325   : > { %v12471_v62 = vadd.f32 %v7791_v54, %v6842_v22  ;;  %v6855_v60 = vpop.f32.mrf.mxu0 }
 0x326   : > { %v6582_v46 = vpop.f32.mrf.mxu1  ;;  %v7792_v50 = vrot.slane %v6854_v17, 1  ;;  %v6856_v24 = vadd.f32 %v6855_v60, %v6572_v38 }
 0x327   : > { %v6857_v44 = vpop.f32.mrf.mxu0 }
 0x328   : > { %v7793_v47 = vsel %vm3460_vm1, %v7790_v61, %v7792_v50  ;;  %v6584_v0 = vpop.f32.mrf.mxu1  ;;  %v6858_v27 = vadd.f32 %v6857_v44, %v6574_v6 }
 0x329   : > { %v12474_v45 = vadd.f32 %v7793_v47, %v6846_v40  ;;  %v6861_v8 = vpop.f32.mrf.mxu0 }
 0x32a   : > { %9879 = vmatmul.mubr.bf16.gmra.mxu0 %v10462_v19  ;;  %v6588_v26 = vpop.f32.mrf.mxu1  ;;  %7119 = vmatmul.mubr.bf16.gmra.mxu1 %v10463_v16  ;;  %v7794_v20 = vrot.slane %v6858_v27, 1  ;;  %v6862_v11 = vadd.f32 %v6861_v8, %v6578_v49  ;;  %v10468_v16 = vld [vmem:[#allocation2 + $0x128] ss:$12 sps:$4 sm:$0xff]  }
 0x32b   : > { %7126 = vmatprep.mubr.bf16.mxu1 %v10464_v4  ;;  %9882 = vmatprep.mubr.msk.bf16.mxu0 %vm10515_vm0, %v12356_v13  ;;  %v6863_v22 = vpop.f32.mrf.mxu0  ;;  %v10469_v4 = vld [vmem:[#allocation2 + $0x150] ss:$12 sps:$4 sm:$0xff]  }
 0x32c   : > { %v7795_v30 = vsel %vm3460_vm1, %v7792_v50, %v7794_v20  ;;  %v6590_v43 = vpop.f32.mrf.mxu1  ;;  %v6864_v34 = vadd.f32 %v6863_v22, %v6580_v7 }
 0x32d   : > { %v12479_v56 = vadd.f32 %v7795_v30, %v6852_v10  ;;  %v6865_v3 = vpop.f32.mrf.mxu0  ;;  %v10470_v30 = vld [vmem:[#allocation2 + $0x16c] ss:$12 sps:$4 sm:$0xff]  }
 0x32e   : > { %v6592_v15 = vpop.f32.mrf.mxu1  ;;  %v7796_v38 = vrot.slane %v6864_v34, 1  ;;  %v6866_v39 = vadd.f32 %v6865_v3, %v6582_v46 }
 0x32f   : > { %v6867_v40 = vpop.f32.mrf.mxu0 }
 0x330   : > { %v7797_v32 = vsel %vm3460_vm1, %v7794_v20, %v7796_v38  ;;  %v6594_v37 = vpop.f32.mrf.mxu1  ;;  %v6868_v6 = vadd.f32 %v6867_v40, %v6584_v0 }
 0x331   : > { %v12482_v58 = vadd.f32 %v7797_v32, %v6856_v24  ;;  %v6871_v1 = vpop.f32.mrf.mxu0 }
 0x332   : > { %9883 = vmatmul.mubr.bf16.gmra.mxu0 %v10465_v48  ;;  %v6598_v49 = vpop.f32.mrf.mxu1  ;;  %7127 = vmatmul.mubr.bf16.gmra.mxu1 %v10466_v9  ;;  %v7798_v61 = vrot.slane %v6868_v6, 1  ;;  %v6872_v10 = vadd.f32 %v6871_v1, %v6588_v26 }
 0x333   : > { %7134 = vmatprep.mubr.bf16.mxu1 %v10467_v42  ;;  %9886 = vmatprep.mubr.msk.bf16.mxu0 %vm10515_vm0, %v12356_v13  ;;  %v6873_v33 = vpop.f32.mrf.mxu0  ;;  %v10471_v42 = vld [vmem:[#allocation2 + $0x140] ss:$12 sps:$4 sm:$0xff]  }
 0x334   : > { %v7799_v54 = vsel %vm3460_vm1, %v7796_v38, %v7798_v61  ;;  %v6600_v7 = vpop.f32.mrf.mxu1  ;;  %v6874_v17 = vadd.f32 %v6873_v33, %v6590_v43 }
 0x335   : > { %v12487_v60 = vadd.f32 %v7799_v54, %v6862_v11  ;;  %v6875_v46 = vpop.f32.mrf.mxu0  ;;  %v10472_v54 = vld [vmem:[#allocation2 + $0x168] ss:$12 sps:$4 sm:$0xff]  }
 0x336   : > { %v6602_v50 = vpop.f32.mrf.mxu1  ;;  %v7800_v24 = vrot.slane %v6874_v17, 1  ;;  %v6876_v44 = vadd.f32 %v6875_v46, %v6592_v15  ;;  %v10473_v17 = vld [vmem:[#allocation2 + $0x184] ss:$12 sps:$4 sm:$0xff]  }
 0x337   : > { %v6877_v47 = vpop.f32.mrf.mxu0 }
 0x338   : > { %v7801_v0 = vsel %vm3460_vm1, %v7798_v61, %v7800_v24  ;;  %v6604_v27 = vpop.f32.mrf.mxu1  ;;  %v6878_v8 = vadd.f32 %v6877_v47, %v6594_v37 }
 0x339   : > { %v12490_v19 = vadd.f32 %v7801_v0, %v6866_v39  ;;  %v6881_v26 = vpop.f32.mrf.mxu0 }
 0x33a   : > { %9887 = vmatmul.mubr.bf16.gmra.mxu0 %v10468_v16  ;;  %v6608_v20 = vpop.f32.mrf.mxu1  ;;  %7135 = vmatmul.mubr.bf16.gmra.mxu1 %v10469_v4  ;;  %v7802_v22 = vrot.slane %v6878_v8, 1  ;;  %v6882_v11 = vadd.f32 %v6881_v26, %v6598_v49 }
 0x33b   : > { %7142 = vmatprep.mubr.bf16.mxu1 %v10470_v30  ;;  %9890 = vmatprep.mubr.msk.bf16.mxu0 %vm10515_vm0, %v12356_v13  ;;  %v6883_v43 = vpop.f32.mrf.mxu0 }
 0x33c   : > { %v7803_v34 = vsel %vm3460_vm1, %v7800_v24, %v7802_v22  ;;  %v6610_v3 = vpop.f32.mrf.mxu1  ;;  %v6884_v15 = vadd.f32 %v6883_v43, %v6600_v7 }
 0x33d   : > { %v12495_v38 = vadd.f32 %v7803_v34, %v6872_v10  ;;  %v6885_v39 = vpop.f32.mrf.mxu0  ;;  %v10474_v34 = vld [vmem:[#allocation2 + $0x158] ss:$12 sps:$4 sm:$0xff]  }
 0x33e   : > { %v6612_v40 = vpop.f32.mrf.mxu1  ;;  %v7804_v32 = vrot.slane %v6884_v15, 1  ;;  %v6886_v37 = vadd.f32 %v6885_v39, %v6602_v50  ;;  %v10475_v39 = vld [vmem:[#allocation2 + $0x180] ss:$12 sps:$4 sm:$0xff]  }
 0x33f   : > { %v6887_v6 = vpop.f32.mrf.mxu0 }
 0x340   : > { %v7805_v1 = vsel %vm3460_vm1, %v7802_v22, %v7804_v32  ;;  %v6614_v48 = vpop.f32.mrf.mxu1  ;;  %v6888_v49 = vadd.f32 %v6887_v6, %v6604_v27 }
 0x341   : > { %v12498_v9 = vadd.f32 %v7805_v1, %v6876_v44  ;;  %v6891_v61 = vpop.f32.mrf.mxu0 }
 0x342   : > { %9891 = vmatmul.mubr.bf16.gmra.mxu0 %v10471_v42  ;;  %v6618_v33 = vpop.f32.mrf.mxu1  ;;  %7143 = vmatmul.mubr.bf16.gmra.mxu1 %v10472_v54  ;;  %v7806_v7 = vrot.slane %v6888_v49, 1  ;;  %v6892_v10 = vadd.f32 %v6891_v61, %v6608_v20 }
 0x343   : > { %7150 = vmatprep.mubr.bf16.mxu1 %v10473_v17  ;;  %9894 = vmatprep.mubr.msk.bf16.mxu0 %vm10515_vm0, %v12356_v13  ;;  %v6893_v46 = vpop.f32.mrf.mxu0 }
 0x344   : > { %v7807_v50 = vsel %vm3460_vm1, %v7804_v32, %v7806_v7  ;;  %v6620_v24 = vpop.f32.mrf.mxu1  ;;  %v6894_v47 = vadd.f32 %v6893_v46, %v6610_v3  ;;  %v10476_v32 = vld [vmem:[#allocation2 + $0x19c] ss:$12 sps:$4 sm:$0xff]  }
 0x345   : > { %v12503_v44 = vadd.f32 %v7807_v50, %v6882_v11  ;;  %v6895_v0 = vpop.f32.mrf.mxu0 }
 0x346   : > { %v6622_v27 = vpop.f32.mrf.mxu1  ;;  %v7808_v8 = vrot.slane %v6894_v47, 1  ;;  %v6896_v26 = vadd.f32 %v6895_v0, %v6612_v40  ;;  %v10477_v0 = vld [vmem:[#allocation2 + $0x170] ss:$12 sps:$4 sm:$0xff]  }
 0x347   : > { %v6897_v16 = vpop.f32.mrf.mxu0 }
 0x348   : > { %v7809_v4 = vsel %vm3460_vm1, %v7806_v7, %v7808_v8  ;;  %v6624_v20 = vpop.f32.mrf.mxu1  ;;  %v6898_v22 = vadd.f32 %v6897_v16, %v6614_v48 }
 0x349   : > { %v12506_v30 = vadd.f32 %v7809_v4, %v6886_v37  ;;  %v6901_v43 = vpop.f32.mrf.mxu0  ;;  %v10479_v4 = vld [vmem:[#allocation2 + $0x1b4] ss:$12 sps:$4 sm:$0xff]  }
 0x34a   : > { %9895 = vmatmul.mubr.bf16.gmra.mxu0 %v10474_v34  ;;  %v6628_v15 = vpop.f32.mrf.mxu1  ;;  %7151 = vmatmul.mubr.bf16.gmra.mxu1 %v10475_v39  ;;  %v7810_v3 = vrot.slane %v6898_v22, 1  ;;  %v6902_v11 = vadd.f32 %v6901_v43, %v6618_v33 }
 0x34b   : > { %7158 = vmatprep.mubr.bf16.mxu1 %v10476_v32  ;;  %9898 = vmatprep.mubr.msk.bf16.mxu0 %vm10515_vm0, %v12356_v13  ;;  %v6903_v40 = vpop.f32.mrf.mxu0 }
 0x34c   : > { %v7811_v6 = vsel %vm3460_vm1, %v7808_v8, %v7810_v3  ;;  %v6630_v1 = vpop.f32.mrf.mxu1  ;;  %v6904_v48 = vadd.f32 %v6903_v40, %v6620_v24  ;;  %v10478_v8 = vld [vmem:[#allocation2 + $0x198] ss:$12 sps:$4 sm:$0xff]  }
 0x34d   : > { %v12511_v37 = vadd.f32 %v7811_v6, %v6892_v10  ;;  %v6905_v49 = vpop.f32.mrf.mxu0 }
 0x34e   : > { %v6632_v61 = vpop.f32.mrf.mxu1  ;;  %v7812_v42 = vrot.slane %v6904_v48, 1  ;;  %v6906_v54 = vadd.f32 %v6905_v49, %v6622_v27 }
 0x34f   : > { %v6907_v7 = vpop.f32.mrf.mxu0 }
 0x350   : > { %v7813_v17 = vsel %vm3460_vm1, %v7810_v3, %v7812_v42  ;;  %v6634_v33 = vpop.f32.mrf.mxu1  ;;  %v6908_v46 = vadd.f32 %v6907_v7, %v6624_v20 }
 0x351   : > { %v12514_v50 = vadd.f32 %v7813_v17, %v6896_v26  ;;  %v6911_v47 = vpop.f32.mrf.mxu0  ;;  %v10480_v17 = vld [vmem:[#allocation2 + $0x188] ss:$12 sps:$4 sm:$0xff]  }
 0x352   : > { %9899 = vmatmul.mubr.bf16.gmra.mxu0 %v10477_v0  ;;  %v6638_v16 = vpop.f32.mrf.mxu1  ;;  %7159 = vmatmul.mubr.bf16.gmra.mxu1 %v10478_v8  ;;  %v7814_v24 = vrot.slane %v6908_v46, 1  ;;  %v6912_v10 = vadd.f32 %v6911_v47, %v6628_v15  ;;  %v10482_v47 = vld [vmem:[#allocation2 + $0x1cc] ss:$12 sps:$4 sm:$0xff]  }
 0x353   : > { %7166 = vmatprep.mubr.bf16.mxu1 %v10479_v4  ;;  %9902 = vmatprep.mubr.msk.bf16.mxu0 %vm10515_vm0, %v12356_v13  ;;  %v6913_v27 = vpop.f32.mrf.mxu0 }
 0x354   : > { %v7815_v22 = vsel %vm3460_vm1, %v7812_v42, %v7814_v24  ;;  %v6640_v43 = vpop.f32.mrf.mxu1  ;;  %v6914_v20 = vadd.f32 %v6913_v27, %v6630_v1  ;;  %v10481_v42 = vld [vmem:[#allocation2 + $0x1b0] ss:$12 sps:$4 sm:$0xff]  }
 0x355   : > { %v12519_v26 = vadd.f32 %v7815_v22, %v6902_v11  ;;  %v6915_v34 = vpop.f32.mrf.mxu0 }
 0x356   : > { %v6642_v39 = vpop.f32.mrf.mxu1  ;;  %v7816_v3 = vrot.slane %v6914_v20, 1  ;;  %v6916_v32 = vadd.f32 %v6915_v34, %v6632_v61 }
 0x357   : > { %v6917_v40 = vpop.f32.mrf.mxu0 }
 0x358   : > { %v7817_v6 = vsel %vm3460_vm1, %v7814_v24, %v7816_v3  ;;  %v6644_v15 = vpop.f32.mrf.mxu1  ;;  %v6918_v48 = vadd.f32 %v6917_v40, %v6634_v33 }
 0x359   : > { %v12522_v49 = vadd.f32 %v7817_v6, %v6906_v54  ;;  %v6921_v7 = vpop.f32.mrf.mxu0 }
 0x35a   : > { %9903 = vmatmul.mubr.bf16.gmra.mxu0 %v10480_v17  ;;  %v6648_v46 = vpop.f32.mrf.mxu1  ;;  %7167 = vmatmul.mubr.bf16.gmra.mxu1 %v10481_v42  ;;  %v7818_v1 = vrot.slane %v6918_v48, 1  ;;  %v6922_v11 = vadd.f32 %v6921_v7, %v6638_v16  ;;  %v10483_v7 = vld [vmem:[#allocation2 + $0x1a0] ss:$12 sps:$4 sm:$0xff]   ;;  %v10485_v42 = vld [vmem:[#allocation2 + $0x1e4] ss:$12 sps:$4 sm:$0xff]  }
 0x35b   : > { %7174 = vmatprep.mubr.bf16.mxu1 %v10482_v47  ;;  %9906 = vmatprep.mubr.msk.bf16.mxu0 %vm10515_vm0, %v12356_v13  ;;  %v6923_v61 = vpop.f32.mrf.mxu0 }
 0x35c   : > { %v7819_v0 = vsel %vm3460_vm1, %v7816_v3, %v7818_v1  ;;  %v6650_v8 = vpop.f32.mrf.mxu1  ;;  %v6924_v33 = vadd.f32 %v6923_v61, %v6640_v43  ;;  %v10484_v3 = vld [vmem:[#allocation2 + $0x1c8] ss:$12 sps:$4 sm:$0xff]  }
 0x35d   : > { %v12527_v54 = vadd.f32 %v7819_v0, %v6912_v10  ;;  %v6925_v24 = vpop.f32.mrf.mxu0 }
 0x35e   : > { %v6652_v4 = vpop.f32.mrf.mxu1  ;;  %v7820_v27 = vrot.slane %v6924_v33, 1  ;;  %v6926_v22 = vadd.f32 %v6925_v24, %v6642_v39 }
 0x35f   : > { %13070 = vst [vmem:[#allocation5_spill] sm:$0xff] %v12527_v54  ;;  %v6927_v20 = vpop.f32.mrf.mxu0 }
 0x360   : > { %v7821_v34 = vsel %vm3460_vm1, %v7818_v1, %v7820_v27  ;;  %v6654_v16 = vpop.f32.mrf.mxu1  ;;  %v6928_v40 = vadd.f32 %v6927_v20, %v6644_v15 }
 0x361   : > { %v12530_v6 = vadd.f32 %v7821_v34, %v6916_v32  ;;  %v6931_v48 = vpop.f32.mrf.mxu0 }
 0x362   : > { %9907 = vmatmul.mubr.bf16.gmra.mxu0 %v10483_v7  ;;  %v6658_v17 = vpop.f32.mrf.mxu1  ;;  %7175 = vmatmul.mubr.bf16.gmra.mxu1 %v10484_v3  ;;  %v7822_v43 = vrot.slane %v6928_v40, 1  ;;  %v6932_v10 = vadd.f32 %v6931_v48, %v6648_v46 }
 0x363   : > { %13071 = vst [vmem:[#allocation6_spill] sm:$0xff] %v12530_v6  ;;  %7182 = vmatprep.mubr.bf16.mxu1 %v10485_v42  ;;  %9910 = vmatprep.mubr.msk.bf16.mxu0 %vm10515_vm0, %v12356_v13  ;;  %v6933_v39 = vpop.f32.mrf.mxu0  ;;  %v10486_v13 = vld [vmem:[#allocation2 + $0x1b8] ss:$12 sps:$4 sm:$0xff]   ;;  %v10488_v42 = vld [vmem:[#allocation2 + $0x1fc] ss:$12 sps:$4 sm:$0xff]  }
 0x364   : > { %v7823_v1 = vsel %vm3460_vm1, %v7820_v27, %v7822_v43  ;;  %v6660_v47 = vpop.f32.mrf.mxu1  ;;  %v6934_v15 = vadd.f32 %v6933_v39, %v6650_v8  ;;  %v10487_v27 = vld [vmem:[#allocation2 + $0x1e0] ss:$12 sps:$4 sm:$0xff]  }
 0x365   : > { %v12535_v32 = vadd.f32 %v7823_v1, %v6922_v11  ;;  %v6935_v61 = vpop.f32.mrf.mxu0  ;;  %v12540_v39 = vld [vmem:[#allocation4] sm:$0xff] }
 0x366   : > { %v6662_v0 = vpop.f32.mrf.mxu1  ;;  %v7824_v33 = vrot.slane %v6934_v15, 1  ;;  %v6936_v24 = vadd.f32 %v6935_v61, %v6652_v4 }
 0x367   : > { %13072 = vst [vmem:[#allocation7_spill] sm:$0xff] %v12535_v32  ;;  %v6937_v20 = vpop.f32.mrf.mxu0 }
 0x368   : > { %v7825_v34 = vsel %vm3460_vm1, %v7822_v43, %v7824_v33  ;;  %v6664_v46 = vpop.f32.mrf.mxu1  ;;  %v6938_v40 = vadd.f32 %v6937_v20, %v6654_v16 }
 0x369   : > { %v12538_v48 = vadd.f32 %v7825_v34, %v6926_v22  ;;  %v6941_v7 = vpop.f32.mrf.mxu0 }
 0x36a   : > { %9911 = vmatmul.mubr.bf16.gmra.mxu0 %v10486_v13  ;;  %v6668_v3 = vpop.f32.mrf.mxu1  ;;  %7183 = vmatmul.mubr.bf16.gmra.mxu1 %v10487_v27  ;;  %v7826_v8 = vrot.slane %v6938_v40, 1  ;;  %v6942_v11 = vadd.f32 %v6941_v7, %v6658_v17 }
 0x36b   : > { %13073 = vst [vmem:[#allocation8_spill] sm:$0xff] %v12538_v48  ;;  %7190 = vmatprep.mubr.bf16.mxu1 %v10488_v42  ;;  %9914 = vmatprep.mubr.msk.bf16.mxu0 %vm10515_vm0, %v12540_v39  ;;  %v6943_v4 = vpop.f32.mrf.mxu0 }
 0x36c   : > { %v7827_v16 = vsel %vm3460_vm1, %v7824_v33, %v7826_v8  ;;  %v6670_v22 = vpop.f32.mrf.mxu1  ;;  %v6944_v43 = vadd.f32 %v6943_v4, %v6660_v47  ;;  %v10491_v33 = vld [vmem:[#allocation2 + $0x1f8] ss:$12 sps:$4 sm:$0xff]   ;;  %v10492_v4 = vld [vmem:[#allocation2 + $0x214] ss:$12 sps:$4 sm:$0xff]  }
 0x36d   : > { %v12545_v1 = vadd.f32 %v7827_v16, %v6932_v10  ;;  %v6945_v15 = vpop.f32.mrf.mxu0 }
 0x36e   : > { %v6672_v61 = vpop.f32.mrf.mxu1  ;;  %v7828_v20 = vrot.slane %v6944_v43, 1  ;;  %v6946_v34 = vadd.f32 %v6945_v15, %v6662_v0 }
 0x36f   : > { %13074 = vst [vmem:[#allocation9_spill] sm:$0xff] %v12545_v1  ;;  %v6947_v40 = vpop.f32.mrf.mxu0  ;;  %v10494_v1 = vld [vmem:[#allocation2 + $0x210] ss:$12 sps:$4 sm:$0xff]  }
 0x370   : > { %v7829_v17 = vsel %vm3460_vm1, %v7826_v8, %v7828_v20  ;;  %v6674_v7 = vpop.f32.mrf.mxu1  ;;  %v6948_v13 = vadd.f32 %v6947_v40, %v6664_v46 }
 0x371   : > { %v12548_v27 = vadd.f32 %v7829_v17, %v6936_v24  ;;  %v6951_v42 = vpop.f32.mrf.mxu0 }
 0x372   : > { %9915 = vmatmul.mubr.bf16.gmra.mxu0 %v10490_v55  ;;  %v6678_v48 = vpop.f32.mrf.mxu1  ;;  %7191 = vmatmul.mubr.bf16.gmra.mxu1 %v10491_v33  ;;  %v7830_v47 = vrot.slane %v6948_v13, 1  ;;  %v6952_v10 = vadd.f32 %v6951_v42, %v6668_v3 }
 0x373   : > { %13075 = vst [vmem:[#allocation10_spill] sm:$0xff] %v12548_v27  ;;  %7198 = vmatprep.mubr.bf16.mxu1 %v10492_v4  ;;  %9918 = vmatprep.mubr.msk.bf16.mxu0 %vm10515_vm0, %v12540_v39  ;;  %v6953_v0 = vpop.f32.mrf.mxu0  ;;  %v10493_v4 = vld [vmem:[#allocation2 + $0x1e8] ss:$12 sps:$4 sm:$0xff]  }
 0x374   : > { %v7831_v8 = vsel %vm3460_vm1, %v7828_v20, %v7830_v47  ;;  %v6680_v16 = vpop.f32.mrf.mxu1  ;;  %v6954_v46 = vadd.f32 %v6953_v0, %v6670_v22  ;;  %v10495_v22 = vld [vmem:[#allocation2 + $0x22c] ss:$12 sps:$4 sm:$0xff]  }
 0x375   : > { %v12553_v24 = vadd.f32 %v7831_v8, %v6942_v11  ;;  %v6955_v43 = vpop.f32.mrf.mxu0  ;;  %v10496_v8 = vld [vmem:[#allocation2 + $0x200] ss:$12 sps:$4 sm:$0xff]  }
 0x376   : > { %v6682_v15 = vpop.f32.mrf.mxu1  ;;  %v7832_v55 = vrot.slane %v6954_v46, 1  ;;  %v6956_v40 = vadd.f32 %v6955_v43, %v6672_v61  ;;  %v10497_v43 = vld [vmem:[#allocation2 + $0x228] ss:$12 sps:$4 sm:$0xff]  }
 0x377   : > { %13076 = vst [vmem:[#allocation11_spill] sm:$0xff] %v12553_v24  ;;  %v6957_v17 = vpop.f32.mrf.mxu0 }
 0x378   : > { %v7833_v13 = vsel %vm3460_vm1, %v7830_v47, %v7832_v55  ;;  %v6684_v3 = vpop.f32.mrf.mxu1  ;;  %v6958_v42 = vadd.f32 %v6957_v17, %v6674_v7  ;;  %v10498_v17 = vld [vmem:[#allocation2 + $0x244] ss:$12 sps:$4 sm:$0xff]  }
 0x379   : > { %v12556_v33 = vadd.f32 %v7833_v13, %v6946_v34 }
 0x37a   : > { %9919 = vmatmul.mubr.bf16.gmra.mxu0 %v10493_v4  ;;  %v6688_v27 = vpop.f32.mrf.mxu1  ;;  %7199 = vmatmul.mubr.bf16.gmra.mxu1 %v10494_v1  ;;  %v7834_v20 = vrot.slane %v6958_v42, 1 }
 0x37b   : > { %13077 = vst [vmem:[#allocation12_spill] sm:$0xff] %v12556_v33  ;;  %7206 = vmatprep.mubr.bf16.mxu1 %v10495_v22  ;;  %9922 = vmatprep.mubr.msk.bf16.mxu0 %vm10515_vm0, %v12540_v39 }
 0x37c   : > { %v7835_v11 = vsel %vm3460_vm1, %v7832_v55, %v7834_v20  ;;  %v6690_v61 = vpop.f32.mrf.mxu1 }
 0x37d   : > { %v12561_v0 = vadd.f32 %v7835_v11, %v6952_v10 }
 0x37e   : > { %v6692_v47 = vpop.f32.mrf.mxu1 }
 0x37f   : > { %13078 = vst [vmem:[#allocation13_spill] sm:$0xff] %v12561_v0 }
 0x380   : > { %v6694_v7 = vpop.f32.mrf.mxu1 }
 0x382   : > { %v6961_v34 = vpop.f32.mrf.mxu0  ;;  %9923 = vmatmul.mubr.bf16.gmra.mxu0 %v10496_v8  ;;  %v6698_v46 = vpop.f32.mrf.mxu1  ;;  %7207 = vmatmul.mubr.bf16.gmra.mxu1 %v10497_v43 }
 0x383   : > { %v6962_v1 = vadd.f32 %v6961_v34, %v6678_v48  ;;  %7214 = vmatprep.mubr.bf16.mxu1 %v10498_v17  ;;  %9926 = vmatprep.mubr.msk.bf16.mxu0 %vm10515_vm0, %v12540_v39  ;;  %v10499_v34 = vld [vmem:[#allocation2 + $0x218] ss:$12 sps:$4 sm:$0xff]   ;;  %v10500_v17 = vld [vmem:[#allocation2 + $0x240] ss:$12 sps:$4 sm:$0xff]  }
 0x384   : > { %v6963_v13 = vpop.f32.mrf.mxu0  ;;  %v6700_v42 = vpop.f32.mrf.mxu1 }
 0x385   : > { %v6964_v55 = vadd.f32 %v6963_v13, %v6680_v16 }
 0x386   : > { %v6965_v4 = vpop.f32.mrf.mxu0  ;;  %v6702_v10 = vpop.f32.mrf.mxu1 }
 0x387   : > { %v7836_v22 = vrot.slane %v6964_v55, 1  ;;  %v6966_v11 = vadd.f32 %v6965_v4, %v6682_v15 }
 0x388   : > { %v6967_v0 = vpop.f32.mrf.mxu0  ;;  %v6704_v33 = vpop.f32.mrf.mxu1 }
 0x389   : > { %v7837_v8 = vsel %vm3460_vm1, %v7834_v20, %v7836_v22  ;;  %v6968_v24 = vadd.f32 %v6967_v0, %v6684_v3 }
 0x38a   : > { %v12566_v32 = vadd.f32 %v7837_v8, %v6956_v40  ;;  %v6971_v48 = vpop.f32.mrf.mxu0  ;;  %9927 = vmatmul.mubr.bf16.gmra.mxu0 %v10499_v34  ;;  %v7024_v43 = vpop.f32.mrf.mxu1  ;;  %7215 = vmatmul.mubr.bf16.gmra.mxu1 %v10500_v17 }
 0x38b   : > { %v7838_v6 = vrot.slane %v6968_v24, 1  ;;  %v6972_v54 = vadd.f32 %v6971_v48, %v6688_v27  ;;  %9930 = vmatprep.mubr.msk.bf16.mxu1 %vm10515_vm0, %v12540_v39  ;;  %v10501_v43 = vld [vmem:[#allocation2 + $0x230] ss:$12 sps:$4 sm:$0xff]  }
 0x38c   : > { %v6973_v16 = vpop.f32.mrf.mxu0  ;;  %v7026_v15 = vpop.f32.mrf.mxu1 }
 0x38d   : > { %v7839_v33 = vsel %vm3460_vm1, %v7836_v22, %v7838_v6  ;;  %v6974_v13 = vadd.f32 %v6973_v16, %v6690_v61 }
 0x38e   : > { %v12571_v20 = vadd.f32 %v7839_v33, %v6962_v1  ;;  %v6975_v40 = vpop.f32.mrf.mxu0  ;;  %v7027_v3 = vpop.f32.mrf.mxu1 }
 0x38f   : > { %v7840_v0 = vrot.slane %v6974_v13, 1  ;;  %v6976_v55 = vadd.f32 %v6975_v40, %v6692_v47 }
 0x390   : > { %v6977_v4 = vpop.f32.mrf.mxu0  ;;  %v7029_v10 = vpop.f32.mrf.mxu1 }
 0x391   : > { %v7841_v8 = vsel %vm3460_vm1, %v7838_v6, %v7840_v0  ;;  %v6978_v24 = vadd.f32 %v6977_v4, %v6694_v7 }
 0x392   : > { %v12574_v27 = vadd.f32 %v7841_v8, %v6966_v11  ;;  %v6981_v48 = vpop.f32.mrf.mxu0  ;;  %v7032_v34 = vpop.f32.mrf.mxu1  ;;  %9931 = vmatmul.mubr.bf16.vlgmr.msra.gmra.mxu1 %v10501_v43 }
 0x393   : > { %v7842_v17 = vrot.slane %v6978_v24, 1  ;;  %v6982_v22 = vadd.f32 %v6981_v48, %v6698_v46  ;;  %9934 = vmatprep.mubr.msk.bf16.mxu1 %vm10515_vm0, %v12540_v39 }
 0x394   : > { %13079 = vst [vmem:[#allocation14_spill] sm:$0xff] %v12574_v27  ;;  %v6983_v61 = vpop.f32.mrf.mxu0  ;;  %v7034_v1 = vpop.f32.mrf.mxu1 }
 0x395   : > { %v7843_v47 = vsel %vm3460_vm1, %v7840_v0, %v7842_v17  ;;  %7600 = vst [vmem:[#allocation3 + $0x380] sm:$0xff] %v6982_v22  ;;  %v12579_v16 = vadd.f32 %v6983_v61, %v6700_v42  ;;  %v10502_v0 = vld [vmem:[#allocation2 + $0x248] ss:$12 sps:$4 sm:$0xff]  }
 0x396   : > { %v12581_v6 = vadd.f32 %v7843_v47, %v6972_v54  ;;  %v6985_v7 = vpop.f32.mrf.mxu0  ;;  %v7035_v11 = vpop.f32.mrf.mxu1  ;;  %v7606_v47 = vld [vmem:[#allocation3 + $0x2b0] sm:$0x80] }
 0x397   : > { %13080 = vst [vmem:[#allocation15_spill] sm:$0xff] %v12579_v16  ;;  %v13033_v15 = vrot.slane %v12579_v16, 1  ;;  %v8237_v7 = vld [vmem:[%s10654_s12 + $0x20] sm:$0xff] }
 0x398   : > { %13081 = vst [vmem:[#allocation16_spill] sm:$0xff] %v12581_v6  ;;  %v6987_v33 = vpop.f32.mrf.mxu0  ;;  %v7037_v13 = vpop.f32.mrf.mxu1 }
 0x399   : > { %v7845_v46 = vsel %vm3460_vm1, %v7842_v17, %v13033_v15  ;;  %v8238_v33 = vld [vmem:[%s10654_s12 + $0x28] sm:$0xff]  ;;  %v12601_v15 = vld [vmem:[%s13025_s5] ss:$0 sm:$0xff] }
 0x39a   : > { %v12587_v39 = vadd.f32 %v7845_v46, %v6976_v55  ;;  %v7257_v40 = vpop.f32.mrf.mxu0  ;;  %v7040_v4 = vpop.f32.mrf.mxu1  ;;  %9935 = vmatmul.mubr.bf16.gmra.mxu1 %v10502_v0  ;;  %v8239_v46 = vld [vmem:[%s10654_s12 + $0x30] sm:$0xff] }
 0x39c   : > { %13082 = vst [vmem:[#allocation17_spill] sm:$0xff] %v12587_v39  ;;  %v9840_v54 = vpop.f32.mrf.mxu0  ;;  %v7042_v42 = vpop.f32.mrf.mxu1 }
 0x39e   : > { %v7260_v10 = vpop.f32.mrf.mxu0  ;;  %v7043_v8 = vpop.f32.mrf.mxu1 }
 0x39f   : > { %v7261_v24 = vadd.f32 %v7260_v10, %v7027_v3  ;;  %v13083_v3 = vrot.slane %v12362_v52, 1  ;;  %v8389_v10 = vrot.slane %v8237_v7, 1 }
 0x3a0   : > { %v9841_v48 = vpop.f32.mrf.mxu0  ;;  %v7045_v43 = vpop.f32.mrf.mxu1 }
 0x3a1   : > { %7461 = vst [vmem:[#allocation3 + $0x438] sm:$0xff] %v7261_v24  ;;  %v7895_v54 = vadd.f32 %v13083_v3, %v7606_v47  ;;  %v8390_v24 = vrot.slane %v8238_v33, 1 }
 0x3a2   : > { %v7265_v22 = vpop.f32.mrf.mxu0  ;;  %v12589_v61 = vpop.f32.mrf.mxu1 }
 0x3a3   : > { %v7266_v55 = vadd.f32 %v7265_v22, %v7032_v34 }
 0x3a4   : > { %v9844_v17 = vpop.f32.mrf.mxu0  ;;  %v7050_v1 = vpop.f32.mrf.mxu1 }
 0x3a5   : > { %v8043_v22 = vrot.slane %v7266_v55, 2  ;;  %v8392_v1 = vrot.slane %v8239_v46, 1  ;;  %v8391_v46 = vsel %vm3460_vm1, %v8389_v10, %v8390_v24 }
 0x3a6   : > { %v7268_v13 = vpop.f32.mrf.mxu0  ;;  %v12594_v40 = vpop.f32.mrf.mxu1 }
 0x3a7   : > { %v7269_v0 = vadd.f32 %v7268_v13, %v7035_v11  ;;  %v8240_v11 = vld [vmem:[%s10654_s12 + $0x38] sm:$0xff] }
 0x3a8   : > { %v7944_v42 = vld [vmem:[#allocation3 + $0x438] sm:$0xfe]  ;;  %v9845_v48 = vpop.f32.mrf.mxu0  ;;  %v7053_v34 = vpop.f32.mrf.mxu1  ;;  %v8394_v39 = vrot.slane %v8240_v11, 1 }
 0x3a9   : > { %v8042_v43 = vrot.slane %v7944_v42, 2  ;;  %v8045_v17 = vrot.slane %v7269_v0, 2  ;;  %v8393_v34 = vsel %vm3460_vm1, %v8390_v24, %v8392_v1 }
 0x3aa   : > { %v7273_v16 = vpop.f32.mrf.mxu0  ;;  %v12604_v13 = vpop.f32.mrf.mxu1 }
 0x3ab   : > { %v8188_v52 = vadd.f32 %v8042_v43, %v7895_v54  ;;  %v8044_v47 = vsel %vm3752_vm2, %v8042_v43, %v8043_v22  ;;  %v8046_v7 = vsel %vm3752_vm2, %v8043_v22, %v8045_v17  ;;  %v7274_v33 = vadd.f32 %v7273_v16, %v7040_v4  ;;  %v8241_v4 = vld [vmem:[%s10654_s12 + $0x40] sm:$0xff] }
 0x3ac   : > { %v8189_v55 = vadd.f32 %v8044_v47, %v12378_v21  ;;  %v8190_v0 = vadd.f32 %v8046_v7, %v12387_v5  ;;  %v9848_v3 = vpop.f32.mrf.mxu0  ;;  %v7058_v42 = vpop.f32.mrf.mxu1 }
 0x3ad   : > { %v8292_v48 = vadd.f32 %v12601_v15, %v8188_v52  ;;  %v8047_v54 = vrot.slane %v7274_v33, 2 }
 0x3ae   : > { %v8293_v43 = vadd.f32 %v12601_v15, %v8189_v55  ;;  %v8294_v22 = vadd.f32 %v12601_v15, %v8190_v0  ;;  %v7276_v16 = vpop.f32.mrf.mxu0  ;;  %v12617_v6 = vpop.f32.mrf.mxu1  ;;  %v8396_v0 = vrot.slane %v8241_v4, 1 }
 0x3af   : > { %v8533_v21 = vadd.f32 %v8389_v10, %v8292_v48  ;;  %v8048_v47 = vsel %vm3752_vm2, %v8045_v17, %v8047_v54  ;;  %v7277_v5 = vadd.f32 %v7276_v16, %v7043_v8  ;;  %v8395_v10 = vsel %vm3460_vm1, %v8392_v1, %v8394_v39  ;;  %v8242_v16 = vld [vmem:[%s10654_s12 + $0x48] sm:$0xff] }
 0x3b0   : > { %v8534_v24 = vadd.f32 %v8391_v46, %v8293_v43  ;;  %v8535_v11 = vadd.f32 %v8393_v34, %v8294_v22  ;;  %v8191_v52 = vadd.f32 %v8048_v47, %v12394_v36  ;;  %v9849_v7 = vpop.f32.mrf.mxu0  ;;  %v7061_v33 = vpop.f32.mrf.mxu1  ;;  %v8397_v4 = vsel %vm3460_vm1, %v8394_v39, %v8396_v0 }
 0x3b1   : > { %v8582_v55 = vmax.f32 %v8533_v21, 0.0  ;;  %v8049_v17 = vrot.slane %v7277_v5, 2  ;;  %v8398_v47 = vrot.slane %v8242_v16, 1 }
 0x3b2   : > { %v8583_v8 = vmax.f32 %v8534_v24, 0.0  ;;  %v8584_v3 = vmax.f32 %v8535_v11, 0.0  ;;  %v8295_v42 = vadd.f32 %v12601_v15, %v8191_v52  ;;  %v7281_v48 = vpop.f32.mrf.mxu0  ;;  %v12629_v27 = vpop.f32.mrf.mxu1 }
 0x3b3   : > { %8631 = vst [vmem:[%s12623_s11 - $0x7] sm:$0x80] %v8582_v55  ;;  %v8050_v36 = vsel %vm3752_vm2, %v8047_v54, %v8049_v17  ;;  %v7282_v46 = vadd.f32 %v7281_v48, %v12589_v61  ;;  %v8243_v54 = vld [vmem:[%s10654_s12 + $0x50] sm:$0xff] }
 0x3b4   : > { %8632 = vst [vmem:[%s12623_s11 + $0x1] sm:$0xff] %v8583_v8  ;;  %8633 = vst [vmem:[%s12623_s11 + $0x9] sm:$0xff] %v8584_v3  ;;  %v8536_v1 = vadd.f32 %v8395_v10, %v8295_v42  ;;  %v8192_v34 = vadd.f32 %v8050_v36, %v12403_v31  ;;  %v9852_v43 = vpop.f32.mrf.mxu0  ;;  %v7066_v22 = vpop.f32.mrf.mxu1  ;;  %v8399_v10 = vsel %vm3460_vm1, %v8396_v0, %v8398_v47  ;;  %v8400_v3 = vrot.slane %v8243_v54, 1  ;;  %v8244_v36 = vld [vmem:[%s10654_s12 + $0x58] sm:$0xff]  ;;  %v8245_v54 = vld [vmem:[%s10654_s12 + $0x60] sm:$0xff] }
 0x3b5   : > { %v8051_v21 = vrot.slane %v7282_v46, 2 }
 0x3b6   : > { %v8585_v5 = vmax.f32 %v8536_v1, 0.0  ;;  %v8296_v24 = vadd.f32 %v12601_v15, %v8192_v34  ;;  %v7284_v11 = vpop.f32.mrf.mxu0  ;;  %v12640_v52 = vpop.f32.mrf.mxu1  ;;  %v8401_v43 = vsel %vm3460_vm1, %v8398_v47, %v8400_v3 }
 0x3b7   : > { %v8052_v61 = vsel %vm3752_vm2, %v8049_v17, %v8051_v21  ;;  %v7285_v7 = vadd.f32 %v7284_v11, %v12594_v40 }
 0x3b8   : > { %8634 = vst [vmem:[%s12623_s11 + $0x11] sm:$0xff] %v8585_v5  ;;  %v8537_v31 = vadd.f32 %v8397_v4, %v8296_v24  ;;  %v8193_v33 = vadd.f32 %v8052_v61, %v12410_v12  ;;  %v9853_v39 = vpop.f32.mrf.mxu0  ;;  %v7069_v55 = vpop.f32.mrf.mxu1  ;;  %v8402_v4 = vrot.slane %v8244_v36, 1 }
 0x3b9   : > { %v8053_v8 = vrot.slane %v7285_v7, 2  ;;  %v8404_v55 = vrot.slane %v8245_v54, 1 }
 0x3ba   : > { %v8586_v42 = vmax.f32 %v8537_v31, 0.0  ;;  %v8297_v48 = vadd.f32 %v12601_v15, %v8193_v33  ;;  %v7289_v16 = vpop.f32.mrf.mxu0  ;;  %v12649_v17 = vpop.f32.mrf.mxu1  ;;  %v8403_v33 = vsel %vm3460_vm1, %v8400_v3, %v8402_v4 }
 0x3bb   : > { %v8054_v40 = vsel %vm3752_vm2, %v8051_v21, %v8053_v8  ;;  %v7290_v46 = vadd.f32 %v7289_v16, %v12604_v13  ;;  %v8246_v16 = vld [vmem:[%s10654_s12 + $0x68] sm:$0xff] }
 0x3bc   : > { %8635 = vst [vmem:[%s12623_s11 + $0x19] sm:$0xff] %v8586_v42  ;;  %v8538_v12 = vadd.f32 %v8399_v10, %v8297_v48  ;;  %v8194_v1 = vadd.f32 %v8054_v40, %v12415_v29  ;;  %v9856_v0 = vpop.f32.mrf.mxu0  ;;  %v7074_v34 = vpop.f32.mrf.mxu1 }
 0x3bd   : > { %v8055_v22 = vrot.slane %v7290_v46, 2  ;;  %v8406_v0 = vrot.slane %v8246_v16, 1 }
 0x3be   : > { %v8587_v5 = vmax.f32 %v8538_v12, 0.0  ;;  %v8298_v24 = vadd.f32 %v12601_v15, %v8194_v1  ;;  %v7292_v11 = vpop.f32.mrf.mxu0  ;;  %v12658_v21 = vpop.f32.mrf.mxu1  ;;  %v8405_v12 = vsel %vm3460_vm1, %v8402_v4, %v8404_v55 }
 0x3bf   : > { %v8056_v13 = vsel %vm3752_vm2, %v8053_v8, %v8055_v22  ;;  %v7293_v61 = vadd.f32 %v7292_v11, %v12617_v6 }
 0x3c0   : > { %8636 = vst [vmem:[%s12623_s11 + $0x21] sm:$0xff] %v8587_v5  ;;  %v8539_v29 = vadd.f32 %v8401_v43, %v8298_v24  ;;  %v8195_v7 = vadd.f32 %v8056_v13, %v12418_v51  ;;  %v9857_v47 = vpop.f32.mrf.mxu0  ;;  %v7077_v31 = vpop.f32.mrf.mxu1  ;;  %v8247_v24 = vld [vmem:[%s10654_s12 + $0x70] sm:$0xff] }
 0x3c1   : > { %v8057_v39 = vrot.slane %v7293_v61, 2  ;;  %v8407_v61 = vsel %vm3460_vm1, %v8404_v55, %v8406_v0 }
 0x3c2   : > { %v8588_v10 = vmax.f32 %v8539_v29, 0.0  ;;  %v8299_v42 = vadd.f32 %v12601_v15, %v8195_v7  ;;  %v7297_v48 = vpop.f32.mrf.mxu0  ;;  %v12667_v8 = vpop.f32.mrf.mxu1  ;;  %v8408_v7 = vrot.slane %v8247_v24, 1 }
 0x3c3   : > { %v8058_v6 = vsel %vm3752_vm2, %v8055_v22, %v8057_v39  ;;  %v7298_v36 = vadd.f32 %v7297_v48, %v12629_v27 }
 0x3c4   : > { %8637 = vst [vmem:[%s12623_s11 + $0x29] sm:$0xff] %v8588_v10  ;;  %v8540_v51 = vadd.f32 %v8403_v33, %v8299_v42  ;;  %v8196_v40 = vadd.f32 %v8058_v6, %v12423_v63  ;;  %v9860_v3 = vpop.f32.mrf.mxu0  ;;  %v7082_v46 = vpop.f32.mrf.mxu1  ;;  %v8248_v10 = vld [vmem:[%s10654_s12 + $0x78] sm:$0xff]  ;;  %v8409_v6 = vsel %vm3460_vm1, %v8406_v0, %v8408_v7 }
 0x3c5   : > { %v8059_v1 = vrot.slane %v7298_v36, 2 }
 0x3c6   : > { %v8589_v34 = vmax.f32 %v8540_v51, 0.0  ;;  %v8300_v43 = vadd.f32 %v12601_v15, %v8196_v40  ;;  %v7300_v5 = vpop.f32.mrf.mxu0  ;;  %v12676_v22 = vpop.f32.mrf.mxu1  ;;  %v8410_v51 = vrot.slane %v8248_v10, 1 }
 0x3c7   : > { %v8060_v27 = vsel %vm3752_vm2, %v8057_v39, %v8059_v1  ;;  %v7301_v11 = vadd.f32 %v7300_v5, %v12640_v52 }
 0x3c8   : > { %8638 = vst [vmem:[%s12623_s11 + $0x31] sm:$0xff] %v8589_v34  ;;  %v8541_v63 = vadd.f32 %v8405_v12, %v8300_v43  ;;  %v8197_v54 = vadd.f32 %v8060_v27, %v12426_v18  ;;  %v9861_v4 = vpop.f32.mrf.mxu0  ;;  %v7085_v13 = vpop.f32.mrf.mxu1  ;;  %v8249_v12 = vld [vmem:[%s10654_s12 + $0x80] sm:$0xff]  ;;  %v8411_v24 = vsel %vm3460_vm1, %v8408_v7, %v8410_v51 }
 0x3c9   : > { %v8061_v29 = vrot.slane %v7301_v11, 2  ;;  %v8412_v11 = vrot.slane %v8249_v12, 1  ;;  %v8250_v13 = vld [vmem:[%s10654_s12 + $0x88] sm:$0xff] }
 0x3ca   : > { %v8590_v47 = vmax.f32 %v8541_v63, 0.0  ;;  %v8301_v31 = vadd.f32 %v12601_v15, %v8197_v54  ;;  %v7305_v33 = vpop.f32.mrf.mxu0  ;;  %v12685_v39 = vpop.f32.mrf.mxu1 }
 0x3cb   : > { %v8062_v52 = vsel %vm3752_vm2, %v8059_v1, %v8061_v29  ;;  %v7306_v42 = vadd.f32 %v7305_v33, %v12649_v17  ;;  %v8413_v33 = vsel %vm3460_vm1, %v8410_v51, %v8412_v11 }
 0x3cc   : > { %8639 = vst [vmem:[%s12623_s11 + $0x39] sm:$0xff] %v8590_v47  ;;  %v8542_v18 = vadd.f32 %v8407_v61, %v8301_v31  ;;  %v8198_v48 = vadd.f32 %v8062_v52, %v12431_v35  ;;  %v9864_v55 = vpop.f32.mrf.mxu0  ;;  %v7090_v16 = vpop.f32.mrf.mxu1  ;;  %v8414_v52 = vrot.slane %v8250_v13, 1 }
 0x3cd   : > { %v8063_v36 = vrot.slane %v7306_v42, 2  ;;  %v8251_v55 = vld [vmem:[%s10654_s12 + $0x90] sm:$0xff] }
 0x3ce   : > { %v8591_v40 = vmax.f32 %v8542_v18, 0.0  ;;  %v8302_v3 = vadd.f32 %v12601_v15, %v8198_v48  ;;  %v7308_v46 = vpop.f32.mrf.mxu0  ;;  %v12694_v1 = vpop.f32.mrf.mxu1  ;;  %v8416_v12 = vrot.slane %v8251_v55, 1 }
 0x3cf   : > { %v8064_v17 = vsel %vm3752_vm2, %v8061_v29, %v8063_v36  ;;  %v7309_v34 = vadd.f32 %v7308_v46, %v12658_v21 }
 0x3d0   : > { %8640 = vst [vmem:[%s12623_s11 + $0x41] sm:$0xff] %v8591_v40  ;;  %v8543_v35 = vadd.f32 %v8409_v6, %v8302_v3  ;;  %v8199_v43 = vadd.f32 %v8064_v17, %v12434_v28  ;;  %v9865_v0 = vpop.f32.mrf.mxu0  ;;  %v7093_v5 = vpop.f32.mrf.mxu1  ;;  %v8415_v3 = vsel %vm3460_vm1, %v8412_v11, %v8414_v52 }
 0x3d1   : > { %v8065_v27 = vrot.slane %v7309_v34, 2 }
 0x3d2   : > { %v8592_v63 = vmax.f32 %v8543_v35, 0.0  ;;  %v8303_v54 = vadd.f32 %v12601_v15, %v8199_v43  ;;  %v7313_v4 = vpop.f32.mrf.mxu0  ;;  %v12703_v61 = vpop.f32.mrf.mxu1  ;;  %v8252_v43 = vld [vmem:[%s10654_s12 + $0x98] sm:$0xff] }
 0x3d3   : > { %v8066_v21 = vsel %vm3752_vm2, %v8063_v36, %v8065_v27  ;;  %v7314_v29 = vadd.f32 %v7313_v4, %v12667_v8  ;;  %v8418_v4 = vrot.slane %v8252_v43, 1 }
 0x3d4   : > { %8641 = vst [vmem:[%s12623_s11 + $0x49] sm:$0xff] %v8592_v63  ;;  %v8544_v28 = vadd.f32 %v8411_v24, %v8303_v54  ;;  %v8200_v47 = vadd.f32 %v8066_v21, %v12439_v57  ;;  %v9868_v7 = vpop.f32.mrf.mxu0  ;;  %v7098_v31 = vpop.f32.mrf.mxu1  ;;  %v8417_v63 = vsel %vm3460_vm1, %v8414_v52, %v8416_v12 }
 0x3d5   : > { %v8067_v10 = vrot.slane %v7314_v29, 2  ;;  %v8419_v52 = vsel %vm3460_vm1, %v8416_v12, %v8418_v4 }
 0x3d6   : > { %v8593_v42 = vmax.f32 %v8544_v28, 0.0  ;;  %v8304_v18 = vadd.f32 %v12601_v15, %v8200_v47  ;;  %v7316_v48 = vpop.f32.mrf.mxu0  ;;  %v12712_v16 = vpop.f32.mrf.mxu1  ;;  %v8253_v28 = vld [vmem:[%s10654_s12 + $0xa0] sm:$0xff] }
 0x3d7   : > { %v8068_v8 = vsel %vm3752_vm2, %v8065_v27, %v8067_v10  ;;  %v7317_v6 = vadd.f32 %v7316_v48, %v12676_v22 }
 0x3d8   : > { %8642 = vst [vmem:[%s12623_s11 + $0x51] sm:$0xff] %v8593_v42  ;;  %v8545_v57 = vadd.f32 %v8413_v33, %v8304_v18  ;;  %v8201_v36 = vadd.f32 %v8068_v8, %v12442_v2  ;;  %v9869_v51 = vpop.f32.mrf.mxu0  ;;  %v7101_v40 = vpop.f32.mrf.mxu1  ;;  %v8420_v18 = vrot.slane %v8253_v28, 1  ;;  %v8256_v28 = vld [vmem:[%s10654_s12 + $0xb8] sm:$0xff] }
 0x3d9   : > { %v8069_v46 = vrot.slane %v7317_v6, 2  ;;  %v8254_v6 = vld [vmem:[%s10654_s12 + $0xa8] sm:$0xff] }
 0x3da   : > { %v8594_v17 = vmax.f32 %v8545_v57, 0.0  ;;  %v8305_v34 = vadd.f32 %v12601_v15, %v8201_v36  ;;  %v7321_v35 = vpop.f32.mrf.mxu0  ;;  %v12721_v0 = vpop.f32.mrf.mxu1 }
 0x3db   : > { %v8070_v22 = vsel %vm3752_vm2, %v8067_v10, %v8069_v46  ;;  %v7322_v5 = vadd.f32 %v7321_v35, %v12685_v39 }
 0x3dc   : > { %8643 = vst [vmem:[%s12623_s11 + $0x59] sm:$0xff] %v8594_v17  ;;  %v8546_v2 = vadd.f32 %v8415_v3, %v8305_v34  ;;  %v8202_v24 = vadd.f32 %v8070_v22, %v12447_v25  ;;  %v9872_v27 = vpop.f32.mrf.mxu0  ;;  %v7106_v11 = vpop.f32.mrf.mxu1  ;;  %v8422_v17 = vrot.slane %v8254_v6, 1  ;;  %v8255_v22 = vld [vmem:[%s10654_s12 + $0xb0] sm:$0xff] }
 0x3dd   : > { %v8071_v54 = vrot.slane %v7322_v5, 2 }
 0x3de   : > { %v8595_v13 = vmax.f32 %v8546_v2, 0.0  ;;  %v8306_v21 = vadd.f32 %v12601_v15, %v8202_v24  ;;  %v7324_v29 = vpop.f32.mrf.mxu0  ;;  %v12730_v47 = vpop.f32.mrf.mxu1 }
 0x3df   : > { %v8072_v39 = vsel %vm3752_vm2, %v8069_v46, %v8071_v54  ;;  %v7325_v7 = vadd.f32 %v7324_v29, %v12694_v1  ;;  %v8421_v46 = vsel %vm3460_vm1, %v8418_v4, %v8420_v18  ;;  %v8424_v4 = vrot.slane %v8255_v22, 1 }
 0x3e0   : > { %8644 = vst [vmem:[%s12623_s11 + $0x61] sm:$0xff] %v8595_v13  ;;  %v8547_v25 = vadd.f32 %v8417_v63, %v8306_v21  ;;  %v8203_v31 = vadd.f32 %v8072_v39, %v12450_v53  ;;  %v9873_v33 = vpop.f32.mrf.mxu0  ;;  %v7109_v10 = vpop.f32.mrf.mxu1  ;;  %v8423_v63 = vsel %vm3460_vm1, %v8420_v18, %v8422_v17 }
 0x3e1   : > { %v8073_v42 = vrot.slane %v7325_v7, 2  ;;  %v8425_v10 = vsel %vm3460_vm1, %v8422_v17, %v8424_v4 }
 0x3e2   : > { %v8596_v48 = vmax.f32 %v8547_v25, 0.0  ;;  %v8307_v55 = vadd.f32 %v12601_v15, %v8203_v31  ;;  %v7329_v8 = vpop.f32.mrf.mxu0  ;;  %v12739_v57 = vpop.f32.mrf.mxu1 }
 0x3e3   : > { %v8074_v1 = vsel %vm3752_vm2, %v8071_v54, %v8073_v42  ;;  %v7330_v36 = vadd.f32 %v7329_v8, %v12703_v61  ;;  %v8257_v8 = vld [vmem:[%s10654_s12 + $0xc0] sm:$0xff] }
 0x3e4   : > { %8645 = vst [vmem:[%s12623_s11 + $0x69] sm:$0xff] %v8596_v48  ;;  %v8548_v53 = vadd.f32 %v8419_v52, %v8307_v55  ;;  %v8204_v51 = vadd.f32 %v8074_v1, %v12455_v14  ;;  %v9876_v40 = vpop.f32.mrf.mxu0  ;;  %v7114_v3 = vpop.f32.mrf.mxu1 }
 0x3e5   : > { %v8075_v12 = vrot.slane %v7330_v36, 2 }
 0x3e6   : > { %v8597_v34 = vmax.f32 %v8548_v53, 0.0  ;;  %v8308_v35 = vadd.f32 %v12601_v15, %v8204_v51  ;;  %v7332_v43 = vpop.f32.mrf.mxu0  ;;  %v12748_v5 = vpop.f32.mrf.mxu1 }
 0x3e7   : > { %v8076_v61 = vsel %vm3752_vm2, %v8073_v42, %v8075_v12  ;;  %v7333_v2 = vadd.f32 %v7332_v43, %v12712_v16  ;;  %v8426_v42 = vrot.slane %v8256_v28, 1 }
 0x3e8   : > { %8646 = vst [vmem:[%s12623_s11 + $0x71] sm:$0xff] %v8597_v34  ;;  %v8549_v14 = vadd.f32 %v8421_v46, %v8308_v35  ;;  %v8205_v24 = vadd.f32 %v8076_v61, %v12458_v59  ;;  %v9877_v27 = vpop.f32.mrf.mxu0  ;;  %v7117_v11 = vpop.f32.mrf.mxu1  ;;  %v8428_v46 = vrot.slane %v8257_v8, 1  ;;  %v8258_v35 = vld [vmem:[%s10654_s12 + $0xc8] sm:$0xff] }
 0x3e9   : > { %v8077_v54 = vrot.slane %v7333_v2, 2  ;;  %v8427_v40 = vsel %vm3460_vm1, %v8424_v4, %v8426_v42  ;;  %v8430_v11 = vrot.slane %v8258_v35, 1 }
 0x3ea   : > { %v8598_v13 = vmax.f32 %v8549_v14, 0.0  ;;  %v8309_v21 = vadd.f32 %v12601_v15, %v8205_v24  ;;  %v7337_v29 = vpop.f32.mrf.mxu0  ;;  %v12757_v39 = vpop.f32.mrf.mxu1  ;;  %v8429_v24 = vsel %vm3460_vm1, %v8426_v42, %v8428_v46  ;;  %v8260_v42 = vld [vmem:[%s10654_s12 + $0xd8] sm:$0xff] }
 0x3eb   : > { %v8078_v16 = vsel %vm3752_vm2, %v8075_v12, %v8077_v54  ;;  %v7338_v7 = vadd.f32 %v7337_v29, %v12721_v0 }
 0x3ec   : > { %8647 = vst [vmem:[%s12623_s11 + $0x79] sm:$0xff] %v8598_v13  ;;  %v8550_v59 = vadd.f32 %v8423_v63, %v8309_v21  ;;  %v8206_v25 = vadd.f32 %v8078_v16, %v12463_v41  ;;  %v9880_v31 = vpop.f32.mrf.mxu0  ;;  %v7122_v33 = vpop.f32.mrf.mxu1  ;;  %v8259_v13 = vld [vmem:[%s10654_s12 + $0xd0] sm:$0xff] }
 0x3ed   : > { %v8079_v52 = vrot.slane %v7338_v7, 2  ;;  %v8432_v31 = vrot.slane %v8259_v13, 1 }
 0x3ee   : > { %v8599_v18 = vmax.f32 %v8550_v59, 0.0  ;;  %v8310_v48 = vadd.f32 %v12601_v15, %v8206_v25  ;;  %v7340_v55 = vpop.f32.mrf.mxu0  ;;  %v12766_v6 = vpop.f32.mrf.mxu1  ;;  %v8431_v59 = vsel %vm3460_vm1, %v8428_v46, %v8430_v11 }
 0x3ef   : > { %v8080_v0 = vsel %vm3752_vm2, %v8077_v54, %v8079_v52  ;;  %v7341_v1 = vadd.f32 %v7340_v55, %v12730_v47 }
 0x3f0   : > { %8648 = vst [vmem:[%s12623_s11 + $0x81] sm:$0xff] %v8599_v18  ;;  %v8551_v41 = vadd.f32 %v8425_v10, %v8310_v48  ;;  %v8207_v36 = vadd.f32 %v8080_v0, %v12466_v23  ;;  %v9881_v53 = vpop.f32.mrf.mxu0  ;;  %v7125_v51 = vpop.f32.mrf.mxu1 }
 0x3f1   : > { %v8081_v3 = vrot.slane %v7341_v1, 2  ;;  %v8433_v1 = vsel %vm3460_vm1, %v8430_v11, %v8432_v31 }
 0x3f2   : > { %v8600_v12 = vmax.f32 %v8551_v41, 0.0  ;;  %v8311_v17 = vadd.f32 %v12601_v15, %v8207_v36  ;;  %v7345_v34 = vpop.f32.mrf.mxu0  ;;  %v12775_v43 = vpop.f32.mrf.mxu1  ;;  %v8434_v36 = vrot.slane %v8260_v42, 1 }
 0x3f3   : > { %v8082_v47 = vsel %vm3752_vm2, %v8079_v52, %v8081_v3  ;;  %v7346_v22 = vadd.f32 %v7345_v34, %v12739_v57 }
 0x3f4   : > { %8649 = vst [vmem:[%s12623_s11 + $0x89] sm:$0xff] %v8600_v12  ;;  %v8552_v23 = vadd.f32 %v8427_v40, %v8311_v17  ;;  %v8208_v61 = vadd.f32 %v8082_v47, %v12471_v62  ;;  %v9884_v2 = vpop.f32.mrf.mxu0  ;;  %v7130_v14 = vpop.f32.mrf.mxu1  ;;  %v8435_v47 = vsel %vm3460_vm1, %v8432_v31, %v8434_v36 }
 0x3f5   : > { %v8083_v27 = vrot.slane %v7346_v22, 2 }
 0x3f6   : > { %v8601_v63 = vmax.f32 %v8552_v23, 0.0  ;;  %v8312_v54 = vadd.f32 %v12601_v15, %v8208_v61  ;;  %v7348_v4 = vpop.f32.mrf.mxu0  ;;  %v12784_v21 = vpop.f32.mrf.mxu1 }
 0x3f7   : > { %v8084_v57 = vsel %vm3752_vm2, %v8081_v3, %v8083_v27  ;;  %v7349_v29 = vadd.f32 %v7348_v4, %v12748_v5  ;;  %v8261_v3 = vld [vmem:[%s10654_s12 + $0xe0] sm:$0xff] }
 0x3f8   : > { %8650 = vst [vmem:[%s12623_s11 + $0x91] sm:$0xff] %v8601_v63  ;;  %v8553_v62 = vadd.f32 %v8429_v24, %v8312_v54  ;;  %v8209_v28 = vadd.f32 %v8084_v57, %v12474_v45  ;;  %v9885_v16 = vpop.f32.mrf.mxu0  ;;  %v7133_v7 = vpop.f32.mrf.mxu1  ;;  %v8436_v23 = vrot.slane %v8261_v3, 1  ;;  %v8262_v24 = vld [vmem:[%s10654_s12 + $0xe8] sm:$0xff] }
 0x3f9   : > { %v8085_v25 = vrot.slane %v7349_v29, 2  ;;  %v8438_v29 = vrot.slane %v8262_v24, 1  ;;  %v8263_v7 = vld [vmem:[%s10654_s12 + $0xf0] sm:$0xff] }
 0x3fa   : > { %v8602_v33 = vmax.f32 %v8553_v62, 0.0  ;;  %v8313_v10 = vadd.f32 %v12601_v15, %v8209_v28  ;;  %v7353_v52 = vpop.f32.mrf.mxu0  ;;  %v12793_v18 = vpop.f32.mrf.mxu1  ;;  %v8437_v13 = vsel %vm3460_vm1, %v8434_v36, %v8436_v23 }
 0x3fb   : > { %v8086_v5 = vsel %vm3752_vm2, %v8083_v27, %v8085_v25  ;;  %v7354_v48 = vadd.f32 %v7353_v52, %v12757_v39  ;;  %v8439_v52 = vsel %vm3460_vm1, %v8436_v23, %v8438_v29 }
 0x3fc   : > { %8651 = vst [vmem:[%s12623_s11 + $0x99] sm:$0xff] %v8602_v33  ;;  %v8554_v45 = vadd.f32 %v8431_v59, %v8313_v10  ;;  %v8210_v55 = vadd.f32 %v8086_v5, %v12479_v56  ;;  %v9888_v8 = vpop.f32.mrf.mxu0  ;;  %v7138_v0 = vpop.f32.mrf.mxu1  ;;  %v8440_v5 = vrot.slane %v8263_v7, 1 }
 0x3fd   : > { %v8087_v41 = vrot.slane %v7354_v48, 2  ;;  %v8264_v8 = vld [vmem:[%s10654_s12 + $0xf8] sm:$0xff] }
 0x3fe   : > { %v8603_v53 = vmax.f32 %v8554_v45, 0.0  ;;  %v8314_v51 = vadd.f32 %v12601_v15, %v8210_v55  ;;  %v7356_v40 = vpop.f32.mrf.mxu0  ;;  %v12802_v46 = vpop.f32.mrf.mxu1  ;;  %v8442_v3 = vrot.slane %v8264_v8, 1 }
 0x3ff   : > { %v8088_v39 = vsel %vm3752_vm2, %v8085_v25, %v8087_v41  ;;  %v7357_v12 = vadd.f32 %v7356_v40, %v12766_v6 }
 0x400   : > { %8652 = vst [vmem:[%s12623_s11 + $0xa1] sm:$0xff] %v8603_v53  ;;  %v8555_v56 = vadd.f32 %v8433_v1, %v8314_v51  ;;  %v8211_v17 = vadd.f32 %v8088_v39, %v12482_v58  ;;  %v9889_v34 = vpop.f32.mrf.mxu0  ;;  %v7141_v35 = vpop.f32.mrf.mxu1  ;;  %v8441_v51 = vsel %vm3460_vm1, %v8438_v29, %v8440_v5 }
 0x401   : > { %v8089_v22 = vrot.slane %v7357_v12, 2 }
 0x402   : > { %v8604_v61 = vmax.f32 %v8555_v56, 0.0  ;;  %v8315_v2 = vadd.f32 %v12601_v15, %v8211_v17  ;;  %v7361_v14 = vpop.f32.mrf.mxu0  ;;  %v12811_v27 = vpop.f32.mrf.mxu1  ;;  %v8265_v17 = vld [vmem:[%s10654_s12 + $0x100] sm:$0xff] }
 0x403   : > { %v8090_v6 = vsel %vm3752_vm2, %v8087_v41, %v8089_v22  ;;  %v7362_v11 = vadd.f32 %v7361_v14, %v12775_v43  ;;  %v8444_v14 = vrot.slane %v8265_v17, 1  ;;  %v8269_v17 = vld [vmem:[%s10654_s12 + $0x120] sm:$0xff] }
 0x404   : > { %8653 = vst [vmem:[%s12623_s11 + $0xa9] sm:$0xff] %v8604_v61  ;;  %v8556_v58 = vadd.f32 %v8435_v47, %v8315_v2  ;;  %v8212_v63 = vadd.f32 %v8090_v6, %v12487_v60  ;;  %v9892_v54 = vpop.f32.mrf.mxu0  ;;  %v7146_v4 = vpop.f32.mrf.mxu1  ;;  %v8443_v61 = vsel %vm3460_vm1, %v8440_v5, %v8442_v3 }
 0x405   : > { %v8091_v57 = vrot.slane %v7362_v11, 2  ;;  %v8445_v29 = vsel %vm3460_vm1, %v8442_v3, %v8444_v14 }
 0x406   : > { %v8605_v62 = vmax.f32 %v8556_v58, 0.0  ;;  %v8316_v28 = vadd.f32 %v12601_v15, %v8212_v63  ;;  %v7364_v16 = vpop.f32.mrf.mxu0  ;;  %v12820_v59 = vpop.f32.mrf.mxu1  ;;  %v8266_v58 = vld [vmem:[%s10654_s12 + $0x108] sm:$0xff] }
 0x407   : > { %v8092_v43 = vsel %vm3752_vm2, %v8089_v22, %v8091_v57  ;;  %v7365_v25 = vadd.f32 %v7364_v16, %v12784_v21 }
 0x408   : > { %8654 = vst [vmem:[%s12623_s11 + $0xb1] sm:$0xff] %v8605_v62  ;;  %v8557_v60 = vadd.f32 %v8437_v13, %v8316_v28  ;;  %v8213_v31 = vadd.f32 %v8092_v43, %v12490_v19  ;;  %v9893_v33 = vpop.f32.mrf.mxu0  ;;  %v7149_v10 = vpop.f32.mrf.mxu1  ;;  %v8446_v28 = vrot.slane %v8266_v58, 1 }
 0x409   : > { %v8093_v42 = vrot.slane %v7365_v25, 2  ;;  %v8267_v25 = vld [vmem:[%s10654_s12 + $0x110] sm:$0xff] }
 0x40a   : > { %v8606_v48 = vmax.f32 %v8557_v60, 0.0  ;;  %v8317_v45 = vadd.f32 %v12601_v15, %v8213_v31  ;;  %v7369_v55 = vpop.f32.mrf.mxu0  ;;  %v12829_v0 = vpop.f32.mrf.mxu1 }
 0x40b   : > { %v8094_v21 = vsel %vm3752_vm2, %v8091_v57, %v8093_v42  ;;  %v7370_v1 = vadd.f32 %v7369_v55, %v12793_v18 }
 0x40c   : > { %8655 = vst [vmem:[%s12623_s11 + $0xb9] sm:$0xff] %v8606_v48  ;;  %v8558_v19 = vadd.f32 %v8439_v52, %v8317_v45  ;;  %v8214_v41 = vadd.f32 %v8094_v21, %v12495_v38  ;;  %v9896_v36 = vpop.f32.mrf.mxu0  ;;  %v7154_v53 = vpop.f32.mrf.mxu1  ;;  %v8448_v48 = vrot.slane %v8267_v25, 1  ;;  %v8268_v21 = vld [vmem:[%s10654_s12 + $0x118] sm:$0xff] }
 0x40d   : > { %v8095_v40 = vrot.slane %v7370_v1, 2  ;;  %v8450_v3 = vrot.slane %v8268_v21, 1  ;;  %v13084_v21 = vld [vmem:[#allocation5_spill] sm:$0xff] }
 0x40e   : > { %v8607_v39 = vmax.f32 %v8558_v19, 0.0  ;;  %v8318_v12 = vadd.f32 %v12601_v15, %v8214_v41  ;;  %v7372_v56 = vpop.f32.mrf.mxu0  ;;  %v12838_v34 = vpop.f32.mrf.mxu1 }
 0x40f   : > { %v8096_v18 = vsel %vm3752_vm2, %v8093_v42, %v8095_v40  ;;  %v7373_v35 = vadd.f32 %v7372_v56, %v12802_v46  ;;  %v8447_v42 = vsel %vm3460_vm1, %v8444_v14, %v8446_v28 }
 0x410   : > { %8656 = vst [vmem:[%s12623_s11 + $0xc1] sm:$0xff] %v8607_v39  ;;  %v8559_v38 = vadd.f32 %v8441_v51, %v8318_v12  ;;  %v8215_v47 = vadd.f32 %v8096_v18, %v12498_v9  ;;  %v9897_v22 = vpop.f32.mrf.mxu0  ;;  %v7157_v23 = vpop.f32.mrf.mxu1  ;;  %v8449_v51 = vsel %vm3460_vm1, %v8446_v28, %v8448_v48 }
 0x411   : > { %v8097_v2 = vrot.slane %v7373_v35, 2  ;;  %v8451_v23 = vsel %vm3460_vm1, %v8448_v48, %v8450_v3  ;;  %v8272_v48 = vld [vmem:[%s10654_s12 + $0x138] sm:$0xff] }
 0x412   : > { %v8608_v24 = vmax.f32 %v8559_v38, 0.0  ;;  %v8319_v6 = vadd.f32 %v12601_v15, %v8215_v47  ;;  %v7377_v11 = vpop.f32.mrf.mxu0  ;;  %v12847_v63 = vpop.f32.mrf.mxu1 }
 0x413   : > { %v8098_v46 = vsel %vm3752_vm2, %v8095_v40, %v8097_v2  ;;  %v7378_v54 = vadd.f32 %v7377_v11, %v12811_v27  ;;  %v8270_v11 = vld [vmem:[%s10654_s12 + $0x128] sm:$0xff] }
 0x414   : > { %8657 = vst [vmem:[%s12623_s11 + $0xc9] sm:$0xff] %v8608_v24  ;;  %v8560_v9 = vadd.f32 %v8443_v61, %v8319_v6  ;;  %v8216_v4 = vadd.f32 %v8098_v46, %v12503_v44  ;;  %v9900_v13 = vpop.f32.mrf.mxu0  ;;  %v7162_v57 = vpop.f32.mrf.mxu1 }
 0x415   : > { %v8099_v62 = vrot.slane %v7378_v54, 2 }
 0x416   : > { %v8609_v16 = vmax.f32 %v8560_v9, 0.0  ;;  %v8320_v7 = vadd.f32 %v12601_v15, %v8216_v4  ;;  %v7380_v43 = vpop.f32.mrf.mxu0  ;;  %v12856_v60 = vpop.f32.mrf.mxu1 }
 0x417   : > { %v8100_v27 = vsel %vm3752_vm2, %v8097_v2, %v8099_v62  ;;  %v7381_v31 = vadd.f32 %v7380_v43, %v12820_v59  ;;  %v8452_v2 = vrot.slane %v8269_v17, 1 }
 0x418   : > { %8658 = vst [vmem:[%s12623_s11 + $0xd1] sm:$0xff] %v8609_v16  ;;  %v8561_v44 = vadd.f32 %v8445_v29, %v8320_v7  ;;  %v8217_v33 = vadd.f32 %v8100_v27, %v12506_v30  ;;  %v9901_v10 = vpop.f32.mrf.mxu0  ;;  %v7165_v52 = vpop.f32.mrf.mxu1  ;;  %v8454_v29 = vrot.slane %v8270_v11, 1  ;;  %v8271_v7 = vld [vmem:[%s10654_s12 + $0x130] sm:$0xff] }
 0x419   : > { %v8101_v5 = vrot.slane %v7381_v31, 2  ;;  %v8453_v13 = vsel %vm3460_vm1, %v8450_v3, %v8452_v2 }
 0x41a   : > { %v8610_v45 = vmax.f32 %v8561_v44, 0.0  ;;  %v8321_v55 = vadd.f32 %v12601_v15, %v8217_v33  ;;  %v7385_v8 = vpop.f32.mrf.mxu0  ;;  %v12865_v1 = vpop.f32.mrf.mxu1  ;;  %v8455_v33 = vsel %vm3460_vm1, %v8452_v2, %v8454_v29 }
 0x41b   : > { %v8102_v59 = vsel %vm3752_vm2, %v8099_v62, %v8101_v5  ;;  %v7386_v19 = vadd.f32 %v7385_v8, %v12829_v0 }
 0x41c   : > { %8659 = vst [vmem:[%s12623_s11 + $0xd9] sm:$0xff] %v8610_v45  ;;  %v8562_v30 = vadd.f32 %v8447_v42, %v8321_v55  ;;  %v8218_v41 = vadd.f32 %v8102_v59, %v12511_v37  ;;  %v9904_v36 = vpop.f32.mrf.mxu0  ;;  %v7170_v53 = vpop.f32.mrf.mxu1  ;;  %v12902_v42 = vld [vmem:[%s13025_s5] ss:$0 sm:$0xff] }
 0x41d   : > { %v8103_v40 = vrot.slane %v7386_v19, 2  ;;  %v8458_v53 = vrot.slane %v8272_v48, 1  ;;  %v8276_v48 = vld [vmem:[%s10654_s12 + $0x158] sm:$0xff] }
 0x41e   : > { %v8611_v39 = vmax.f32 %v8562_v30, 0.0  ;;  %v8322_v12 = vadd.f32 %v12601_v15, %v8218_v41  ;;  %v7388_v56 = vpop.f32.mrf.mxu0  ;;  %v12874_v18 = vpop.f32.mrf.mxu1 }
 0x41f   : > { %v8104_v0 = vsel %vm3752_vm2, %v8101_v5, %v8103_v40  ;;  %v7389_v35 = vadd.f32 %v7388_v56, %v12838_v34 }
 0x420   : > { %8660 = vst [vmem:[%s12623_s11 + $0xe1] sm:$0xff] %v8611_v39  ;;  %v8563_v37 = vadd.f32 %v8449_v51, %v8322_v12  ;;  %v8219_v38 = vadd.f32 %v8104_v0, %v12514_v50  ;;  %v9905_v47 = vpop.f32.mrf.mxu0  ;;  %v7173_v22 = vpop.f32.mrf.mxu1  ;;  %v8273_v39 = vld [vmem:[%s10654_s12 + $0x140] sm:$0xff]  ;;  %v13085_v0 = vld [vmem:[#allocation6_spill] sm:$0xff] }
 0x421   : > { %v8105_v61 = vrot.slane %v7389_v35, 2 }
 0x422   : > { %v8612_v14 = vmax.f32 %v8563_v37, 0.0  ;;  %v8323_v24 = vadd.f32 %v12601_v15, %v8219_v38  ;;  %v7393_v6 = vpop.f32.mrf.mxu0  ;;  %v12883_v58 = vpop.f32.mrf.mxu1 }
 0x423   : > { %v8106_v34 = vsel %vm3752_vm2, %v8103_v40, %v8105_v61  ;;  %v7394_v46 = vadd.f32 %v7393_v6, %v12847_v63 }
 0x424   : > { %8661 = vst [vmem:[%s12623_s11 + $0xe9] sm:$0xff] %v8612_v14  ;;  %v8564_v50 = vadd.f32 %v8451_v23, %v8323_v24  ;;  %v8220_v54 = vadd.f32 %v8106_v34, %v12519_v26  ;;  %v9908_v9 = vpop.f32.mrf.mxu0  ;;  %v7178_v4 = vpop.f32.mrf.mxu1  ;;  %v8460_v23 = vrot.slane %v8273_v39, 1  ;;  %v8274_v24 = vld [vmem:[%s10654_s12 + $0x148] sm:$0xff]  ;;  %v8277_v39 = vld [vmem:[%s10654_s12 + $0x160] sm:$0xff] }
 0x425   : > { %v8107_v57 = vrot.slane %v7394_v46, 2  ;;  %v13086_v46 = vld [vmem:[#allocation7_spill] sm:$0xff] }
 0x426   : > { %v8613_v62 = vmax.f32 %v8564_v50, 0.0  ;;  %v8324_v28 = vadd.f32 %v12601_v15, %v8220_v54  ;;  %v7396_v16 = vpop.f32.mrf.mxu0  ;;  %v12892_v43 = vpop.f32.mrf.mxu1  ;;  %v8456_v15 = vrot.slane %v8271_v7, 1  ;;  %v8461_v4 = vsel %vm3460_vm1, %v8458_v53, %v8460_v23 }
 0x427   : > { %v8108_v63 = vsel %vm3752_vm2, %v8105_v61, %v8107_v57  ;;  %v7397_v25 = vadd.f32 %v7396_v16, %v12856_v60  ;;  %v8275_v16 = vld [vmem:[%s10654_s12 + $0x150] sm:$0xff] }
 0x428   : > { %8662 = vst [vmem:[%s12623_s11 + $0xf1] sm:$0xff] %v8613_v62  ;;  %v8565_v26 = vadd.f32 %v8453_v13, %v8324_v28  ;;  %v8221_v27 = vadd.f32 %v8108_v63, %v12522_v49  ;;  %v9909_v31 = vpop.f32.mrf.mxu0  ;;  %v7181_v44 = vpop.f32.mrf.mxu1  ;;  %v8457_v41 = vsel %vm3460_vm1, %v8454_v29, %v8456_v15  ;;  %v8459_v47 = vsel %vm3460_vm1, %v8456_v15, %v8458_v53 }
 0x429   : > { %v8109_v10 = vrot.slane %v7397_v25, 2  ;;  %v8464_v15 = vrot.slane %v8275_v16, 1  ;;  %v8466_v53 = vrot.slane %v8276_v48, 1  ;;  %v8279_v16 = vld [vmem:[%s10654_s12 + $0x170] sm:$0xff]  ;;  %v8280_v48 = vld [vmem:[%s10654_s12 + $0x178] sm:$0xff] }
 0x42a   : > { %v8614_v52 = vmax.f32 %v8565_v26, 0.0  ;;  %v8325_v5 = vadd.f32 %v12902_v42, %v8221_v27  ;;  %v7401_v60 = vpop.f32.mrf.mxu0  ;;  %v12906_v45 = vpop.f32.mrf.mxu1  ;;  %v13087_v26 = vld [vmem:[#allocation8_spill] sm:$0xff] }
 0x42b   : > { %v8110_v49 = vsel %vm3752_vm2, %v8107_v57, %v8109_v10  ;;  %v7402_v55 = vadd.f32 %v7401_v60, %v12865_v1  ;;  %v8462_v57 = vrot.slane %v8274_v24, 1  ;;  %v8278_v24 = vld [vmem:[%s10654_s12 + $0x168] sm:$0xff] }
 0x42c   : > { %8663 = vst [vmem:[%s12623_s11 + $0xf9] sm:$0xff] %v8614_v52  ;;  %v8566_v8 = vadd.f32 %v8455_v33, %v8325_v5  ;;  %v8222_v59 = vadd.f32 %v8110_v49, %v13084_v21  ;;  %v9912_v19 = vpop.f32.mrf.mxu0  ;;  %v7186_v30 = vpop.f32.mrf.mxu1  ;;  %v13088_v21 = vld [vmem:[#allocation9_spill] sm:$0xff] }
 0x42d   : > { %v8111_v36 = vrot.slane %v7402_v55, 2  ;;  %v8463_v33 = vsel %vm3460_vm1, %v8460_v23, %v8462_v57  ;;  %v8468_v23 = vrot.slane %v8277_v39, 1  ;;  %v8281_v39 = vld [vmem:[%s10654_s12 + $0x180] sm:$0xff] }
 0x42e   : > { %v8615_v51 = vmax.f32 %v8566_v8, 0.0  ;;  %v8326_v40 = vadd.f32 %v12902_v42, %v8222_v59  ;;  %v7404_v3 = vpop.f32.mrf.mxu0  ;;  %v12915_v12 = vpop.f32.mrf.mxu1 }
 0x42f   : > { %v8112_v1 = vsel %vm3752_vm2, %v8109_v10, %v8111_v36  ;;  %v7405_v56 = vadd.f32 %v7404_v3, %v12874_v18 }
 0x430   : > { %8664 = vst [vmem:[%s12623_s11 + $0x101] sm:$0xff] %v8615_v51  ;;  %v8567_v17 = vadd.f32 %v8457_v41, %v8326_v40  ;;  %v8223_v35 = vadd.f32 %v8112_v1, %v13085_v0  ;;  %v9913_v37 = vpop.f32.mrf.mxu0  ;;  %v7189_v38 = vpop.f32.mrf.mxu1  ;;  %v8465_v41 = vsel %vm3460_vm1, %v8462_v57, %v8464_v15  ;;  %v13089_v0 = vld [vmem:[#allocation10_spill] sm:$0xff]  ;;  %v8470_v57 = vrot.slane %v8278_v24, 1 }
 0x431   : > { %v8113_v22 = vrot.slane %v7405_v56, 2 }
 0x432   : > { %v8616_v61 = vmax.f32 %v8567_v17, 0.0  ;;  %v8327_v2 = vadd.f32 %v12902_v42, %v8223_v35  ;;  %v7409_v14 = vpop.f32.mrf.mxu0  ;;  %v12924_v6 = vpop.f32.mrf.mxu1 }
 0x433   : > { %v8114_v18 = vsel %vm3752_vm2, %v8111_v36, %v8113_v22  ;;  %v7410_v11 = vadd.f32 %v7409_v14, %v12883_v58 }
 0x434   : > { %8665 = vst [vmem:[%s12623_s11 + $0x109] sm:$0xff] %v8616_v61  ;;  %v8568_v34 = vadd.f32 %v8459_v47, %v8327_v2  ;;  %v8224_v50 = vadd.f32 %v8114_v18, %v13086_v46  ;;  %v9916_v54 = vpop.f32.mrf.mxu0  ;;  %v7194_v9 = vpop.f32.mrf.mxu1  ;;  %v8467_v47 = vsel %vm3460_vm1, %v8464_v15, %v8466_v53  ;;  %v13090_v46 = vld [vmem:[#allocation11_spill] sm:$0xff]  ;;  %v8472_v15 = vrot.slane %v8279_v16, 1 }
 0x435   : > { %v8115_v13 = vrot.slane %v7410_v11, 2 }
 0x436   : > { %v8617_v29 = vmax.f32 %v8568_v34, 0.0  ;;  %v8328_v62 = vadd.f32 %v12902_v42, %v8224_v50  ;;  %v7412_v28 = vpop.f32.mrf.mxu0  ;;  %v12933_v7 = vpop.f32.mrf.mxu1 }
 0x437   : > { %v8116_v58 = vsel %vm3752_vm2, %v8113_v22, %v8115_v13  ;;  %v7413_v63 = vadd.f32 %v7412_v28, %v12892_v43 }
 0x438   : > { %8666 = vst [vmem:[%s12623_s11 + $0x111] sm:$0xff] %v8617_v29  ;;  %v8569_v25 = vadd.f32 %v8461_v4, %v8328_v62  ;;  %v8225_v27 = vadd.f32 %v8116_v58, %v13087_v26  ;;  %v9917_v31 = vpop.f32.mrf.mxu0  ;;  %v7197_v44 = vpop.f32.mrf.mxu1  ;;  %v8469_v4 = vsel %vm3460_vm1, %v8466_v53, %v8468_v23  ;;  %v13091_v26 = vld [vmem:[#allocation12_spill] sm:$0xff]  ;;  %v8474_v53 = vrot.slane %v8280_v48, 1 }
 0x439   : > { %v8117_v10 = vrot.slane %v7413_v63, 2 }
 0x43a   : > { %v8618_v52 = vmax.f32 %v8569_v25, 0.0  ;;  %v8329_v5 = vadd.f32 %v12902_v42, %v8225_v27  ;;  %v7417_v60 = vpop.f32.mrf.mxu0  ;;  %v12942_v49 = vpop.f32.mrf.mxu1 }
 0x43b   : > { %v8118_v43 = vsel %vm3752_vm2, %v8115_v13, %v8117_v10  ;;  %v7418_v55 = vadd.f32 %v7417_v60, %v12906_v45 }
 0x43c   : > { %8667 = vst [vmem:[%s12623_s11 + $0x119] sm:$0xff] %v8618_v52  ;;  %v8570_v8 = vadd.f32 %v8463_v33, %v8329_v5  ;;  %v8226_v59 = vadd.f32 %v8118_v43, %v13088_v21  ;;  %v9920_v19 = vpop.f32.mrf.mxu0  ;;  %v7202_v30 = vpop.f32.mrf.mxu1  ;;  %v8471_v33 = vsel %vm3460_vm1, %v8468_v23, %v8470_v57  ;;  %v13092_v21 = vld [vmem:[#allocation13_spill] sm:$0xff] }
 0x43d   : > { %v8119_v36 = vrot.slane %v7418_v55, 2 }
 0x43e   : > { %v8619_v51 = vmax.f32 %v8570_v8, 0.0  ;;  %v8330_v40 = vadd.f32 %v12902_v42, %v8226_v59  ;;  %v7420_v3 = vpop.f32.mrf.mxu0  ;;  %v12951_v1 = vpop.f32.mrf.mxu1 }
 0x43f   : > { %v8120_v45 = vsel %vm3752_vm2, %v8117_v10, %v8119_v36  ;;  %v7421_v56 = vadd.f32 %v7420_v3, %v12915_v12 }
 0x440   : > { %8668 = vst [vmem:[%s12623_s11 + $0x121] sm:$0xff] %v8619_v51  ;;  %v8571_v17 = vadd.f32 %v8465_v41, %v8330_v40  ;;  %v8227_v35 = vadd.f32 %v8120_v45, %v13089_v0  ;;  %v9921_v37 = vpop.f32.mrf.mxu0  ;;  %v7205_v38 = vpop.f32.mrf.mxu1  ;;  %v8473_v41 = vsel %vm3460_vm1, %v8470_v57, %v8472_v15 }
 0x441   : > { %v8121_v22 = vrot.slane %v7421_v56, 2  ;;  %v8475_v38 = vsel %vm3460_vm1, %v8472_v15, %v8474_v53 }
 0x442   : > { %v8620_v61 = vmax.f32 %v8571_v17, 0.0  ;;  %v8331_v2 = vadd.f32 %v12902_v42, %v8227_v35  ;;  %v7425_v14 = vpop.f32.mrf.mxu0  ;;  %v7208_v18 = vpop.f32.mrf.mxu1 }
 0x443   : > { %v8122_v12 = vsel %vm3752_vm2, %v8119_v36, %v8121_v22  ;;  %v7426_v11 = vadd.f32 %v7425_v14, %v12924_v6  ;;  %v8282_v14 = vld [vmem:[%s10654_s12 + $0x188] sm:$0xff] }
 0x444   : > { %8669 = vst [vmem:[%s12623_s11 + $0x129] sm:$0xff] %v8620_v61  ;;  %v8572_v34 = vadd.f32 %v8467_v47, %v8331_v2  ;;  %v8228_v50 = vadd.f32 %v8122_v12, %v13090_v46  ;;  %v9924_v54 = vpop.f32.mrf.mxu0  ;;  %v7210_v9 = vpop.f32.mrf.mxu1 }
 0x445   : > { %v8123_v13 = vrot.slane %v7426_v11, 2 }
 0x446   : > { %v8621_v29 = vmax.f32 %v8572_v34, 0.0  ;;  %v8332_v62 = vadd.f32 %v12902_v42, %v8228_v50  ;;  %v7428_v28 = vpop.f32.mrf.mxu0  ;;  %v7211_v58 = vpop.f32.mrf.mxu1  ;;  %v8478_v50 = vrot.slane %v8282_v14, 1 }
 0x447   : > { %v8124_v6 = vsel %vm3752_vm2, %v8121_v22, %v8123_v13  ;;  %v7429_v63 = vadd.f32 %v7428_v28, %v12933_v7  ;;  %v8476_v22 = vrot.slane %v8281_v39, 1  ;;  %v7654_v39 = vld [vmem:[#allocation3 + $0x380] sm:$0x7f] }
 0x448   : > { %8670 = vst [vmem:[%s12623_s11 + $0x131] sm:$0xff] %v8621_v29  ;;  %v8573_v25 = vadd.f32 %v8469_v4, %v8332_v62  ;;  %v8229_v27 = vadd.f32 %v8124_v6, %v13091_v26  ;;  %v9925_v31 = vpop.f32.mrf.mxu0  ;;  %v7213_v44 = vpop.f32.mrf.mxu1  ;;  %v13093_v62 = vld [vmem:[#allocation14_spill] sm:$0xff] }
 0x449   : > { %v8125_v10 = vrot.slane %v7429_v63, 2  ;;  %v8477_v34 = vsel %vm3460_vm1, %v8474_v53, %v8476_v22  ;;  %v8479_v16 = vsel %vm3460_vm1, %v8476_v22, %v8478_v50  ;;  %v8284_v31 = vld [vmem:[%s10654_s12 + $0x198] sm:$0xff] }
 0x44a   : > { %v8622_v52 = vmax.f32 %v8573_v25, 0.0  ;;  %v8333_v5 = vadd.f32 %v12902_v42, %v8229_v27  ;;  %v7433_v60 = vpop.f32.mrf.mxu0  ;;  %v7216_v43 = vpop.f32.mrf.mxu1  ;;  %v8482_v48 = vrot.slane %v8284_v31, 1 }
 0x44b   : > { %v8126_v7 = vsel %vm3752_vm2, %v8123_v13, %v8125_v10  ;;  %v7434_v55 = vadd.f32 %v7433_v60, %v12942_v49  ;;  %v8283_v13 = vld [vmem:[%s10654_s12 + $0x190] sm:$0xff] }
 0x44c   : > { %8671 = vst [vmem:[%s12623_s11 + $0x139] sm:$0xff] %v8622_v52  ;;  %v8574_v8 = vadd.f32 %v8471_v33, %v8333_v5  ;;  %v8230_v59 = vadd.f32 %v8126_v7, %v13092_v21  ;;  %v9928_v19 = vpop.f32.mrf.mxu0  ;;  %v7218_v30 = vpop.f32.mrf.mxu1  ;;  %v8480_v63 = vrot.slane %v8283_v13, 1 }
 0x44d   : > { %v8127_v36 = vrot.slane %v7434_v55, 2  ;;  %v13095_v19 = vld [vmem:[#allocation17_spill] sm:$0xff] }
 0x44e   : > { %v8623_v51 = vmax.f32 %v8574_v8, 0.0  ;;  %v8334_v40 = vadd.f32 %v12902_v42, %v8230_v59  ;;  %v7436_v3 = vpop.f32.mrf.mxu0  ;;  %v7219_v45 = vpop.f32.mrf.mxu1  ;;  %v8481_v5 = vsel %vm3460_vm1, %v8478_v50, %v8480_v63 }
 0x44f   : > { %v8128_v49 = vsel %vm3752_vm2, %v8125_v10, %v8127_v36  ;;  %v7437_v56 = vadd.f32 %v7436_v3, %v12951_v1  ;;  %v13094_v10 = vld [vmem:[#allocation16_spill] sm:$0xff] }
 0x450   : > { %8672 = vst [vmem:[%s12623_s11 + $0x141] sm:$0xff] %v8623_v51  ;;  %v8575_v17 = vadd.f32 %v8473_v41, %v8334_v40  ;;  %v8231_v0 = vadd.f32 %v8128_v49, %v12566_v32  ;;  %v9929_v35 = vpop.f32.mrf.mxu0  ;;  %v7221_v37 = vpop.f32.mrf.mxu1 }
 0x451   : > { %v8129_v47 = vrot.slane %v7437_v56, 2 }
 0x452   : > { %v8624_v23 = vmax.f32 %v8575_v17, 0.0  ;;  %v8335_v61 = vadd.f32 %v12902_v42, %v8231_v0  ;;  %v7441_v2 = vpop.f32.mrf.mxu1 }
 0x453   : > { %v8130_v24 = vsel %vm3752_vm2, %v8127_v36, %v8129_v47  ;;  %v7442_v1 = vadd.f32 %v7441_v2, %v7208_v18  ;;  %v8483_v36 = vsel %vm3460_vm1, %v8480_v63, %v8482_v48 }
 0x454   : > { %8673 = vst [vmem:[%s12623_s11 + $0x149] sm:$0xff] %v8624_v23  ;;  %v8576_v12 = vadd.f32 %v8475_v38, %v8335_v61  ;;  %v8232_v32 = vadd.f32 %v8130_v24, %v12571_v20  ;;  %v9932_v11 = vpop.f32.mrf.mxu1 }
 0x455   : > { %v8131_v46 = vrot.slane %v7442_v1, 2 }
 0x456   : > { %v8625_v54 = vmax.f32 %v8576_v12, 0.0  ;;  %v8336_v9 = vadd.f32 %v12902_v42, %v8232_v32  ;;  %v7444_v4 = vpop.f32.mrf.mxu1 }
 0x457   : > { %v8132_v57 = vsel %vm3752_vm2, %v8129_v47, %v8131_v46  ;;  %v7445_v29 = vadd.f32 %v7444_v4, %v7211_v58 }
 0x458   : > { %8674 = vst [vmem:[%s12623_s11 + $0x151] sm:$0xff] %v8625_v54  ;;  %v8577_v18 = vadd.f32 %v8477_v34, %v8336_v9  ;;  %v8233_v28 = vadd.f32 %v8132_v57, %v13093_v62  ;;  %v9933_v20 = vpop.f32.mrf.mxu1 }
 0x459   : > { %v8133_v6 = vrot.slane %v7445_v29, 2 }
 0x45a   : > { %v8626_v25 = vmax.f32 %v8577_v18, 0.0  ;;  %v8337_v26 = vadd.f32 %v12902_v42, %v8233_v28  ;;  %v7449_v27 = vpop.f32.mrf.mxu1 }
 0x45b   : > { %v8134_v44 = vsel %vm3752_vm2, %v8131_v46, %v8133_v6  ;;  %v7450_v33 = vadd.f32 %v7449_v27, %v7216_v43 }
 0x45c   : > { %8675 = vst [vmem:[%s12623_s11 + $0x159] sm:$0xff] %v8626_v25  ;;  %v8578_v58 = vadd.f32 %v8479_v16, %v8337_v26  ;;  %v8234_v15 = vadd.f32 %v8134_v44, %v13094_v10  ;;  %v9936_v52 = vpop.f32.mrf.mxu1 }
 0x45d   : > { %v8135_v60 = vrot.slane %v7450_v33, 2 }
 0x45e   : > { %v8627_v7 = vmax.f32 %v8578_v58, 0.0  ;;  %v8338_v55 = vadd.f32 %v12902_v42, %v8234_v15  ;;  %v7452_v8 = vpop.f32.mrf.mxu1 }
 0x45f   : > { %v8136_v21 = vsel %vm3752_vm2, %v8133_v6, %v8135_v60  ;;  %v7453_v59 = vadd.f32 %v7452_v8, %v7219_v45  ;;  %v13096_v45 = vld [vmem:[#allocation15_spill] sm:$0xff] }
 0x460   : > { %8676 = vst [vmem:[%s12623_s11 + $0x161] sm:$0xff] %v8627_v7  ;;  %v8579_v43 = vadd.f32 %v8481_v5, %v8338_v55  ;;  %v8235_v30 = vadd.f32 %v8136_v21, %v13095_v19  ;;  %v9937_v41 = vpop.f32.mrf.mxu1  ;;  %v13097_v17 = vrot.slane %v13096_v45, 1 }
 0x461   : > { %7605 = vst [vmem:[#allocation3 + $0x258] sm:$0xff] %v7453_v59 }
 0x462   : > { %v8628_v53 = vmax.f32 %v8579_v43, 0.0  ;;  %v8339_v51 = vadd.f32 %v12902_v42, %v8235_v30  ;;  %v7943_v0 = vadd.f32 %v13097_v17, %v7654_v39 }
 0x464   : > { %8677 = vst [vmem:[%s12623_s11 + $0x169] sm:$0xff] %v8628_v53  ;;  %v8580_v40 = vadd.f32 %v8483_v36, %v8339_v51 }
 0x466   : > { %v8629_v3 = vmax.f32 %v8580_v40, 0.0 }
 0x468   : > { %8678 = vst [vmem:[%s12623_s11 + $0x171] sm:$0xff] %v8629_v3  ;;  %v7992_v49 = vld [vmem:[#allocation3 + $0x258] sm:$0x1] }
 0x469   : > { %v8137_v56 = vrot.slane %v7992_v49, 2 }
 0x46b   : > { %v8138_v35 = vsel %vm3752_vm2, %v8135_v60, %v8137_v56 }
 0x46c   : > { %v8236_v37 = vadd.f32 %v8138_v35, %v7943_v0 }
 0x46e   : > { %v8340_v38 = vadd.f32 %v12902_v42, %v8236_v37 }
 0x470   : > { %v8581_v47 = vadd.f32 %v8482_v48, %v8340_v38 }
 0x472   : > { %v8630_v22 = vmax.f32 %v8581_v47, 0.0 }
 0x474   : > { %8679 = vst [vmem:[%s12623_s11 + $0x179] sm:$0x7f] %v8630_v22 }
 0x475 PF: > { %s16_s21 = sadd.s32 1, %s10510_s21  }
 0x476   : > { %p13_p4 = scmp.ge.s32.totalorder %s16_s21, 4  }
 0x478   :  { %15 = sbr.rel (!%p13_p4) target bundleno = 1 (0x1), region = 74 }

</bundles_post_ra>
